<compile_context>
chip_gen: v7x
topology: tpu7x:2x2x1
jax: 0.10.0
libtpu: 0.0.40
codegen_flags: <defaults>
</compile_context>

<pallas_src>
import jax
import jax.numpy as jnp
import numpy as np
from jax import lax
from jax.experimental import pallas as pl
from jax.experimental.pallas import tpu as pltpu


# ----------------------------- config ---------------------------------------


def _make_divisible(v, divisor, min_value=None):
    if min_value is None:
        min_value = divisor
    new_v = max(min_value, int(v + divisor / 2) // divisor * divisor)
    if new_v < 0.9 * v:
        new_v += divisor
    return new_v


N = 2
H = 16
W = 16
C_IN = 16
C_EXP = 64
C_OUT = 16
C_SQ = _make_divisible(C_EXP // 4, 8)  # 16
BN_EPS = 1e-5

# Main path (expand / depthwise / project) keeps HIGHEST so the 1e-3 check against the
# HIGHEST reference is guaranteed; the SE gate matmuls are relaxed to DEFAULT (review:
# safe -- gate-only path).
MAIN_MATMUL_PRECISION = lax.Precision.HIGHEST
SE_MATMUL_PRECISION = lax.Precision.DEFAULT

# Packed-operand row layout (all offsets are multiples of 8 -> sublane aligned).
_OFF_W_EXP = 0                       # rows [  0,  16): (C_IN, C_EXP) expand, BN1 folded
_OFF_W_DW = _OFF_W_EXP + C_IN        # rows [ 16,  32): (9->16, C_EXP) dw 3x3, BN2 folded
_OFF_W_FC1 = _OFF_W_DW + 16          # rows [ 32,  96): (C_EXP, C_EXP) SE fc1, cols>=C_SQ zero
_OFF_W_FC2 = _OFF_W_FC1 + C_EXP      # rows [ 96, 160): (C_EXP, C_EXP) SE fc2, rows>=C_SQ zero
_OFF_W_PROJ = _OFF_W_FC2 + C_EXP     # rows [160, 224): (C_EXP, C_EXP) project, cols>=C_OUT zero
_OFF_BIAS = _OFF_W_PROJ + C_EXP      # rows [224, 232): b1 | b2 | b_fc1 | b_fc2 | b3 | 0 | 0 | 0
WPACK_ROWS = _OFF_BIAS + 8           # 232


# ----------------------------- kernel ---------------------------------------


def _hardswish(x):
    # PyTorch nn.Hardswish: x * relu6(x + 3) / 6
    return x * jnp.clip(x + 3.0, 0.0, 6.0) * (1.0 / 6.0)


def _hardsigmoid(x):
    # PyTorch nn.Hardsigmoid: relu6(x + 3) / 6
    return jnp.clip(x + 3.0, 0.0, 6.0) * (1.0 / 6.0)


def inverted_residual_kernel(
    x_ref,       # (nb, H, W, C_IN)   nb = full batch (no-grid path) or 1 (v7x grid path)
    wpack_ref,   # (WPACK_ROWS, C_EXP) all weights + biases, see layout above
    o_ref,       # (nb, H, W, C_OUT)
):
    nb, hh, ww, c_in = x_ref.shape
    c_exp = wpack_ref.shape[1]
    c_out = o_ref.shape[3]
    rows = nb * hh * ww
    rows_pad = nb * (hh + 2) * ww

    # ---- unpack the single packed operand (static, sublane-aligned slices) ----
    w_exp = wpack_ref[_OFF_W_EXP:_OFF_W_EXP + c_in, :]          # (16, 64)
    w_dw = wpack_ref[_OFF_W_DW:_OFF_W_DW + 16, :]               # (16, 64), rows 0..8 used
    w_fc1 = wpack_ref[_OFF_W_FC1:_OFF_W_FC1 + c_exp, :]         # (64, 64), cols>=C_SQ zero
    w_fc2 = wpack_ref[_OFF_W_FC2:_OFF_W_FC2 + c_exp, :]         # (64, 64), rows>=C_SQ zero
    w_proj = wpack_ref[_OFF_W_PROJ:_OFF_W_PROJ + c_exp, :][:, :c_out]   # (64, 16)
    b_blk = wpack_ref[_OFF_BIAS:_OFF_BIAS + 8, :]               # (8, 64)
    b1 = b_blk[0]                                               # (64,)
    b2 = b_blk[1]                                               # (64,)
    b_fc1 = b_blk[2]                                            # (64,), cols>=C_SQ zero
    b_fc2 = b_blk[3]                                            # (64,)
    b3 = b_blk[4, :c_out]                                       # (16,)

    # ---- 1x1 expand conv (BN1 scale folded into weight) + bias + hardswish ----
    x2 = x_ref[...].astype(jnp.float32).reshape(rows, c_in)     # (rows, 16)
    h2 = jnp.dot(x2, w_exp, preferred_element_type=jnp.float32,
                 precision=MAIN_MATMUL_PRECISION) + b1          # (rows, 64)
    h2 = _hardswish(h2)

    # ---- 3x3 depthwise conv (stride 1, pad 1) + BN2 bias + hardswish ----------
    # Zero-pad along H only (sublane-aligned concat); the +-1 W-shifts are static
    # sublane row-shifts (jnp.roll) masked at the W boundary (single compare).
    h3 = h2.reshape(nb, hh * ww, c_exp)                          # (nb, 256, 64)
    zrow = jnp.zeros((nb, ww, c_exp), jnp.float32)
    hp = jnp.concatenate([zrow, h3, zrow], axis=1)               # (nb, (H+2)*W, 64)
    hp_flat = hp.reshape(rows_pad, c_exp)
    w_idx = lax.broadcasted_iota(jnp.int32, (rows_pad, c_exp), 0) % ww

    h_dw = None
    for kx in range(3):
        dx = kx - 1
        if dx == 0:
            sh = hp
        else:
            # shifted[s] = hp_flat[s + dx]; every wrapped / cross-row source sits at a
            # masked W-boundary column (see fragility note at top of file).
            rolled = jnp.roll(hp_flat, shift=-dx, axis=0)
            keep = (w_idx != 0) if dx == -1 else (w_idx != ww - 1)
            sh = jnp.where(keep, rolled, 0.0).reshape(nb, (hh + 2) * ww, c_exp)
        for ky in range(3):
            off = ky * ww
            tap = sh[:, off:off + hh * ww, :] * w_dw[ky * 3 + kx]    # (nb, 256, 64)
            h_dw = tap if h_dw is None else h_dw + tap
    h_dw = _hardswish(h_dw + b2)                                 # (nb, 256, 64)

    # ---- Squeeze-Excitation: avgpool -> fc1 -> relu -> fc2 -> hardsigmoid -----
    # fc1/fc2 are zero-padded to (64,64) so no lane sub-slicing is needed; the padded
    # columns/rows stay exactly zero through the bias add and relu.
    pooled = jnp.mean(h_dw, axis=1)                              # (nb, 64)
    se = jnp.dot(pooled, w_fc1, preferred_element_type=jnp.float32,
                 precision=SE_MATMUL_PRECISION) + b_fc1          # (nb, 64)
    se = jnp.maximum(se, 0.0)
    se = jnp.dot(se, w_fc2, preferred_element_type=jnp.float32,
                 precision=SE_MATMUL_PRECISION) + b_fc2          # (nb, 64)
    se = _hardsigmoid(se)
    h_g = (h_dw * se[:, None, :]).reshape(rows, c_exp)           # (rows, 64)

    # ---- 1x1 project conv (BN3 scale folded) + bias + residual ---------------
    out = jnp.dot(h_g, w_proj, preferred_element_type=jnp.float32,
                  precision=MAIN_MATMUL_PRECISION) + b3          # (rows, 16)
    out = out + x_ref[...].astype(jnp.float32).reshape(rows, c_in)   # residual (C_IN==C_OUT)
    o_ref[...] = out.reshape(nb, hh, ww, c_out).astype(o_ref.dtype)


# ----------------------------- wrapper ---------------------------------------


def _multi_tensorcore():
    """True on chips with 2 TensorCores per device (v7x): shard the batch across them."""
    try:
        kind = jax.devices()[0].device_kind.lower()
    except Exception:
        return False
    return ("v7" in kind) or ("7x" in kind)


def inverted_residual(x_nhwc, wpack):
    n, h, w, _ = x_nhwc.shape
    out_shape = jax.ShapeDtypeStruct((n, h, w, C_OUT), x_nhwc.dtype)

    if _multi_tensorcore():
        # v7x: batch elements are fully independent (SE pooling is per-sample), so split
        # the grid over N and let the two TensorCores each take one sample.
        return pl.pallas_call(
            inverted_residual_kernel,
            out_shape=out_shape,
            grid_spec=pltpu.PrefetchScalarGridSpec(
                num_scalar_prefetch=0,
                grid=(n,),
                in_specs=[
                    pl.BlockSpec((1, h, w, C_IN), lambda i: (i, 0, 0, 0)),
                    pl.BlockSpec((WPACK_ROWS, C_EXP), lambda i: (0, 0)),
                ],
                out_specs=pl.BlockSpec((1, h, w, C_OUT), lambda i: (i, 0, 0, 0)),
            ),
            compiler_params=pltpu.CompilerParams(
                dimension_semantics=("parallel",)),
        )(x_nhwc, wpack)

    # v5e / v6e (single TensorCore): one grid-less invocation with default whole-array
    # VMEM specs -- no pipeline prologue/epilogue, no default double-buffering.
    return pl.pallas_call(inverted_residual_kernel, out_shape=out_shape)(x_nhwc, wpack)


# ----------------------------- params ---------------------------------------


def _fold_bn(gamma, beta, mean, var, eps=BN_EPS):
    scale = gamma / jnp.sqrt(var + eps)
    bias = beta - mean * scale
    return scale.reshape(1, -1), bias.reshape(1, -1)


def make_params(key):
    ks = jax.random.split(key, 20)
    f32 = jnp.float32

    def bn(k, c):
        k1, k2, k3, k4 = jax.random.split(k, 4)
        gamma = jax.random.uniform(k1, (c,), f32, 0.5, 1.5)
        beta = 0.1 * jax.random.normal(k2, (c,), f32)
        mean = 0.1 * jax.random.normal(k3, (c,), f32)
        var = jax.random.uniform(k4, (c,), f32, 0.5, 1.5)
        return _fold_bn(gamma, beta, mean, var)

    s1, b1 = bn(ks[0], C_EXP)
    s2, b2 = bn(ks[1], C_EXP)
    s3, b3 = bn(ks[2], C_OUT)
    return dict(
        w_exp=0.1 * jax.random.normal(ks[3], (C_IN, C_EXP), f32),
        s1=s1, b1=b1,
        w_dw=0.1 * jax.random.normal(ks[4], (3, 3, C_EXP), f32),
        s2=s2, b2=b2,
        w_fc1=0.1 * jax.random.normal(ks[5], (C_EXP, C_SQ), f32),
        b_fc1=(0.1 * jax.random.normal(ks[6], (C_SQ,), f32)).reshape(1, -1),
        w_fc2=0.1 * jax.random.normal(ks[7], (C_SQ, C_EXP), f32),
        b_fc2=(0.1 * jax.random.normal(ks[8], (C_EXP,), f32)).reshape(1, -1),
        w_proj=0.1 * jax.random.normal(ks[9], (C_EXP, C_OUT), f32),
        s3=s3, b3=b3,
    )


def prepare_kernel_params(p):
    """Fold BN scales into conv weights and pack everything into one (232, 64) array."""
    f32 = jnp.float32
    w_exp = p["w_exp"] * p["s1"][0][None, :]                       # (16, 64), BN1 folded
    w_dw = (p["w_dw"] * p["s2"][0][None, None, :]).reshape(9, C_EXP)
    w_dw = jnp.concatenate([w_dw, jnp.zeros((16 - 9, C_EXP), f32)], axis=0)   # (16, 64)
    w_fc1 = jnp.zeros((C_EXP, C_EXP), f32).at[:, :C_SQ].set(p["w_fc1"])       # (64, 64)
    w_fc2 = jnp.zeros((C_EXP, C_EXP), f32).at[:C_SQ, :].set(p["w_fc2"])       # (64, 64)
    w_proj = jnp.zeros((C_EXP, C_EXP), f32).at[:, :C_OUT].set(
        p["w_proj"] * p["s3"][0][None, :])                                    # (64, 64)
    b_fc1 = jnp.zeros((C_EXP,), f32).at[:C_SQ].set(p["b_fc1"][0])
    b3 = jnp.zeros((C_EXP,), f32).at[:C_OUT].set(p["b3"][0])
    biases = jnp.stack([p["b1"][0], p["b2"][0], b_fc1, p["b_fc2"][0], b3])    # (5, 64)
    biases = jnp.concatenate([biases, jnp.zeros((3, C_EXP), f32)], axis=0)    # (8, 64)
    wpack = jnp.concatenate([w_exp, w_dw, w_fc1, w_fc2, w_proj, biases], axis=0)
    assert wpack.shape == (WPACK_ROWS, C_EXP), wpack.shape
    return wpack


# ----------------------------- reference -------------------------------------


def ref_forward(x_nhwc, p):
    prec = lax.Precision.HIGHEST
    dn = ("NHWC", "HWIO", "NHWC")
    # expand 1x1 + BN + hardswish
    h = lax.conv_general_dilated(x_nhwc, p["w_exp"].reshape(1, 1, C_IN, C_EXP),
                                 (1, 1), "VALID", dimension_numbers=dn, precision=prec)
    h = h * p["s1"][0] + p["b1"][0]
    h = h * jnp.clip(h + 3.0, 0.0, 6.0) / 6.0
    # depthwise 3x3 + BN + hardswish
    h = lax.conv_general_dilated(h, p["w_dw"].reshape(3, 3, 1, C_EXP),
                                 (1, 1), "SAME", feature_group_count=C_EXP,
                                 dimension_numbers=dn, precision=prec)
    h = h * p["s2"][0] + p["b2"][0]
    h = h * jnp.clip(h + 3.0, 0.0, 6.0) / 6.0
    # squeeze-excitation
    pooled = jnp.mean(h, axis=(1, 2))                                   # (N, Cexp)
    s = jnp.maximum(pooled @ p["w_fc1"] + p["b_fc1"][0], 0.0)
    s = s @ p["w_fc2"] + p["b_fc2"][0]
    s = jnp.clip(s + 3.0, 0.0, 6.0) / 6.0
    h = h * s[:, None, None, :]
    # project 1x1 + BN
    out = jnp.einsum("nhwc,cd->nhwd", h, p["w_proj"], precision=prec)
    out = out * p["s3"][0] + p["b3"][0]
    return out + x_nhwc


# ----------------------------- main ------------------------------------------


if __name__ == "__main__":
    key = jax.random.PRNGKey(0)
    k_x, k_p = jax.random.split(key)

    # PyTorch-style NCHW input, transposed to the kernel's NHWC layout.
    x_nchw = jax.random.normal(k_x, (N, C_IN, H, W), jnp.float32)
    x_nhwc = jnp.transpose(x_nchw, (0, 2, 3, 1))

    params = make_params(k_p)
    wpack = prepare_kernel_params(params)

    out_nhwc = jax.block_until_ready(inverted_residual(x_nhwc, wpack))
    out_nchw = jnp.transpose(out_nhwc, (0, 3, 1, 2))  # back to PyTorch layout

    ref_nhwc = jax.block_until_ready(ref_forward(x_nhwc, params))
    np.testing.assert_allclose(np.asarray(out_nhwc), np.asarray(ref_nhwc),
                               rtol=1e-3, atol=1e-3)

    print("KERNEL_OK")
</pallas_src>

<mosaic_0001>
module attributes {stable_mosaic.version = 11 : i64} {
  func.func @inverted_residual_kernel(%arg0: memref<2x16x16x16xf32, #tpu.memory_space<vmem>>, %arg1: memref<232x64xf32, #tpu.memory_space<vmem>>, %arg2: memref<2x16x16x16xf32, #tpu.memory_space<vmem>>) attributes {dimension_semantics = [], scalar_prefetch = 0 : i64, scratch_operands = 0 : i64, tpu.core_type = #tpu.core_type<tc>} {
    %c0 = arith.constant 0 : index
    %c0_0 = arith.constant 0 : index
    %0 = vector.load %arg1[%c0, %c0_0] : memref<232x64xf32, #tpu.memory_space<vmem>>, vector<16x64xf32>
    %c16 = arith.constant 16 : index
    %c0_1 = arith.constant 0 : index
    %1 = vector.load %arg1[%c16, %c0_1] : memref<232x64xf32, #tpu.memory_space<vmem>>, vector<16x64xf32>
    %c32 = arith.constant 32 : index
    %c0_2 = arith.constant 0 : index
    %2 = vector.load %arg1[%c32, %c0_2] : memref<232x64xf32, #tpu.memory_space<vmem>>, vector<64x64xf32>
    %c96 = arith.constant 96 : index
    %c0_3 = arith.constant 0 : index
    %3 = vector.load %arg1[%c96, %c0_3] : memref<232x64xf32, #tpu.memory_space<vmem>>, vector<64x64xf32>
    %c160 = arith.constant 160 : index
    %c0_4 = arith.constant 0 : index
    %4 = vector.load %arg1[%c160, %c0_4] : memref<232x64xf32, #tpu.memory_space<vmem>>, vector<64x64xf32>
    %5 = vector.extract_strided_slice %4 {offsets = [0, 0], sizes = [64, 16], strides = [1, 1]} : vector<64x64xf32> to vector<64x16xf32>
    %c224 = arith.constant 224 : index
    %c0_5 = arith.constant 0 : index
    %6 = vector.load %arg1[%c224, %c0_5] : memref<232x64xf32, #tpu.memory_space<vmem>>, vector<8x64xf32>
    %7 = vector.extract_strided_slice %6 {offsets = [0, 0], sizes = [1, 64], strides = [1, 1]} : vector<8x64xf32> to vector<1x64xf32>
    %8 = vector.shape_cast %7 : vector<1x64xf32> to vector<64xf32>
    %9 = vector.extract_strided_slice %6 {offsets = [1, 0], sizes = [1, 64], strides = [1, 1]} : vector<8x64xf32> to vector<1x64xf32>
    %10 = vector.shape_cast %9 : vector<1x64xf32> to vector<64xf32>
    %11 = vector.extract_strided_slice %6 {offsets = [2, 0], sizes = [1, 64], strides = [1, 1]} : vector<8x64xf32> to vector<1x64xf32>
    %12 = vector.shape_cast %11 : vector<1x64xf32> to vector<64xf32>
    %13 = vector.extract_strided_slice %6 {offsets = [3, 0], sizes = [1, 64], strides = [1, 1]} : vector<8x64xf32> to vector<1x64xf32>
    %14 = vector.shape_cast %13 : vector<1x64xf32> to vector<64xf32>
    %15 = vector.extract_strided_slice %6 {offsets = [4, 0], sizes = [1, 16], strides = [1, 1]} : vector<8x64xf32> to vector<1x16xf32>
    %16 = vector.shape_cast %15 : vector<1x16xf32> to vector<16xf32>
    %c0_6 = arith.constant 0 : index
    %c0_7 = arith.constant 0 : index
    %c0_8 = arith.constant 0 : index
    %c0_9 = arith.constant 0 : index
    %17 = vector.load %arg0[%c0_6, %c0_7, %c0_8, %c0_9] : memref<2x16x16x16xf32, #tpu.memory_space<vmem>>, vector<2x16x16x16xf32>
    %18 = vector.shape_cast %17 : vector<2x16x16x16xf32> to vector<512x16xf32>
    %cst = arith.constant dense<0.000000e+00> : vector<512x64xf32>
    %19 = tpu.matmul %18, %0, %cst {dimension_numbers = #tpu.dot_dimension_numbers<[1], [0], [0], [1], [0, 0, 1, 1], [], []>, precision = #tpu.contract_precision<fp32>} : vector<512x16xf32>, vector<16x64xf32>, vector<512x64xf32> -> vector<512x64xf32>
    %20 = vector.shape_cast %8 : vector<64xf32> to vector<1x64xf32>
    %21 = vector.broadcast %20 : vector<1x64xf32> to vector<512x64xf32>
    %22 = arith.addf %19, %21 : vector<512x64xf32>
    %cst_10 = arith.constant 3.000000e+00 : f32
    %23 = vector.broadcast %cst_10 : f32 to vector<512x64xf32>
    %24 = arith.addf %22, %23 : vector<512x64xf32>
    %cst_11 = arith.constant 0.000000e+00 : f32
    %cst_12 = arith.constant 6.000000e+00 : f32
    %25 = vector.broadcast %cst_11 : f32 to vector<512x64xf32>
    %26 = arith.maximumf %25, %24 : vector<512x64xf32>
    %27 = vector.broadcast %cst_12 : f32 to vector<512x64xf32>
    %28 = arith.minimumf %27, %26 : vector<512x64xf32>
    %29 = arith.mulf %22, %28 : vector<512x64xf32>
    %cst_13 = arith.constant 0.166666672 : f32
    %30 = vector.broadcast %cst_13 : f32 to vector<512x64xf32>
    %31 = arith.mulf %29, %30 : vector<512x64xf32>
    %32 = vector.shape_cast %31 : vector<512x64xf32> to vector<2x256x64xf32>
    %cst_14 = arith.constant 0.000000e+00 : f32
    %33 = vector.broadcast %cst_14 : f32 to vector<2x16x64xf32>
    %34 = tpu.concatenate %33, %32, %33 in 1 : vector<2x16x64xf32>, vector<2x256x64xf32>, vector<2x16x64xf32> -> vector<2x288x64xf32>
    %35 = vector.shape_cast %34 : vector<2x288x64xf32> to vector<576x64xf32>
    %36 = tpu.iota {dimensions = array<i32: 0>} : vector<576x64xi32>
    %c16_i32 = arith.constant 16 : i32
    %c0_i32 = arith.constant 0 : i32
    %37 = arith.cmpi eq, %c16_i32, %c0_i32 : i32
    %c1_i32 = arith.constant 1 : i32
    %38 = arith.select %37, %c1_i32, %c16_i32 : i32
    %39 = vector.broadcast %38 : i32 to vector<576x64xi32>
    %40 = arith.remsi %36, %39 : vector<576x64xi32>
    %c0_i32_15 = arith.constant 0 : i32
    %41 = vector.broadcast %c0_i32_15 : i32 to vector<576x64xi32>
    %42 = arith.cmpi ne, %40, %41 : vector<576x64xi32>
    %c0_i32_16 = arith.constant 0 : i32
    %43 = vector.broadcast %c0_i32_16 : i32 to vector<576x64xi32>
    %44 = arith.cmpi slt, %40, %43 : vector<576x64xi32>
    %c0_i32_17 = arith.constant 0 : i32
    %45 = arith.cmpi slt, %38, %c0_i32_17 : i32
    %46 = vector.broadcast %45 : i1 to vector<576x64xi1>
    %47 = vector.broadcast %46 : vector<576x64xi1> to vector<576x64xi1>
    %48 = arith.xori %44, %47 : vector<576x64xi1>
    %49 = arith.andi %48, %42 : vector<576x64xi1>
    %50 = vector.broadcast %38 : i32 to vector<576x64xi32>
    %51 = arith.addi %40, %50 : vector<576x64xi32>
    %52 = arith.select %49, %51, %40 : vector<576x64xi1>, vector<576x64xi32>
    %53 = vector.extract_strided_slice %35 {offsets = [575, 0], sizes = [1, 64], strides = [1, 1]} : vector<576x64xf32> to vector<1x64xf32>
    %54 = vector.extract_strided_slice %35 {offsets = [0, 0], sizes = [575, 64], strides = [1, 1]} : vector<576x64xf32> to vector<575x64xf32>
    %55 = tpu.concatenate %53, %54 in 0 : vector<1x64xf32>, vector<575x64xf32> -> vector<576x64xf32>
    %c0_i32_18 = arith.constant 0 : i32
    %56 = vector.broadcast %c0_i32_18 : i32 to vector<576x64xi32>
    %57 = arith.cmpi ne, %52, %56 : vector<576x64xi32>
    %cst_19 = arith.constant 0.000000e+00 : f32
    %58 = vector.broadcast %cst_19 : f32 to vector<576x64xf32>
    %59 = arith.select %57, %55, %58 : vector<576x64xi1>, vector<576x64xf32>
    %60 = vector.shape_cast %59 : vector<576x64xf32> to vector<2x288x64xf32>
    %61 = vector.extract_strided_slice %60 {offsets = [0, 0, 0], sizes = [2, 256, 64], strides = [1, 1, 1]} : vector<2x288x64xf32> to vector<2x256x64xf32>
    %62 = vector.extract_strided_slice %1 {offsets = [0, 0], sizes = [1, 64], strides = [1, 1]} : vector<16x64xf32> to vector<1x64xf32>
    %63 = vector.shape_cast %62 : vector<1x64xf32> to vector<64xf32>
    %64 = vector.shape_cast %63 : vector<64xf32> to vector<1x1x64xf32>
    %65 = vector.broadcast %64 : vector<1x1x64xf32> to vector<2x256x64xf32>
    %66 = arith.mulf %61, %65 : vector<2x256x64xf32>
    %67 = vector.extract_strided_slice %60 {offsets = [0, 16, 0], sizes = [2, 256, 64], strides = [1, 1, 1]} : vector<2x288x64xf32> to vector<2x256x64xf32>
    %68 = vector.extract_strided_slice %1 {offsets = [3, 0], sizes = [1, 64], strides = [1, 1]} : vector<16x64xf32> to vector<1x64xf32>
    %69 = vector.shape_cast %68 : vector<1x64xf32> to vector<64xf32>
    %70 = vector.shape_cast %69 : vector<64xf32> to vector<1x1x64xf32>
    %71 = vector.broadcast %70 : vector<1x1x64xf32> to vector<2x256x64xf32>
    %72 = arith.mulf %67, %71 : vector<2x256x64xf32>
    %73 = arith.addf %66, %72 : vector<2x256x64xf32>
    %74 = vector.extract_strided_slice %60 {offsets = [0, 32, 0], sizes = [2, 256, 64], strides = [1, 1, 1]} : vector<2x288x64xf32> to vector<2x256x64xf32>
    %75 = vector.extract_strided_slice %1 {offsets = [6, 0], sizes = [1, 64], strides = [1, 1]} : vector<16x64xf32> to vector<1x64xf32>
    %76 = vector.shape_cast %75 : vector<1x64xf32> to vector<64xf32>
    %77 = vector.shape_cast %76 : vector<64xf32> to vector<1x1x64xf32>
    %78 = vector.broadcast %77 : vector<1x1x64xf32> to vector<2x256x64xf32>
    %79 = arith.mulf %74, %78 : vector<2x256x64xf32>
    %80 = arith.addf %73, %79 : vector<2x256x64xf32>
    %81 = vector.extract_strided_slice %34 {offsets = [0, 0, 0], sizes = [2, 256, 64], strides = [1, 1, 1]} : vector<2x288x64xf32> to vector<2x256x64xf32>
    %82 = vector.extract_strided_slice %1 {offsets = [1, 0], sizes = [1, 64], strides = [1, 1]} : vector<16x64xf32> to vector<1x64xf32>
    %83 = vector.shape_cast %82 : vector<1x64xf32> to vector<64xf32>
    %84 = vector.shape_cast %83 : vector<64xf32> to vector<1x1x64xf32>
    %85 = vector.broadcast %84 : vector<1x1x64xf32> to vector<2x256x64xf32>
    %86 = arith.mulf %81, %85 : vector<2x256x64xf32>
    %87 = arith.addf %80, %86 : vector<2x256x64xf32>
    %88 = vector.extract_strided_slice %34 {offsets = [0, 16, 0], sizes = [2, 256, 64], strides = [1, 1, 1]} : vector<2x288x64xf32> to vector<2x256x64xf32>
    %89 = vector.extract_strided_slice %1 {offsets = [4, 0], sizes = [1, 64], strides = [1, 1]} : vector<16x64xf32> to vector<1x64xf32>
    %90 = vector.shape_cast %89 : vector<1x64xf32> to vector<64xf32>
    %91 = vector.shape_cast %90 : vector<64xf32> to vector<1x1x64xf32>
    %92 = vector.broadcast %91 : vector<1x1x64xf32> to vector<2x256x64xf32>
    %93 = arith.mulf %88, %92 : vector<2x256x64xf32>
    %94 = arith.addf %87, %93 : vector<2x256x64xf32>
    %95 = vector.extract_strided_slice %34 {offsets = [0, 32, 0], sizes = [2, 256, 64], strides = [1, 1, 1]} : vector<2x288x64xf32> to vector<2x256x64xf32>
    %96 = vector.extract_strided_slice %1 {offsets = [7, 0], sizes = [1, 64], strides = [1, 1]} : vector<16x64xf32> to vector<1x64xf32>
    %97 = vector.shape_cast %96 : vector<1x64xf32> to vector<64xf32>
    %98 = vector.shape_cast %97 : vector<64xf32> to vector<1x1x64xf32>
    %99 = vector.broadcast %98 : vector<1x1x64xf32> to vector<2x256x64xf32>
    %100 = arith.mulf %95, %99 : vector<2x256x64xf32>
    %101 = arith.addf %94, %100 : vector<2x256x64xf32>
    %102 = vector.extract_strided_slice %35 {offsets = [1, 0], sizes = [575, 64], strides = [1, 1]} : vector<576x64xf32> to vector<575x64xf32>
    %103 = vector.extract_strided_slice %35 {offsets = [0, 0], sizes = [1, 64], strides = [1, 1]} : vector<576x64xf32> to vector<1x64xf32>
    %104 = tpu.concatenate %102, %103 in 0 : vector<575x64xf32>, vector<1x64xf32> -> vector<576x64xf32>
    %c15_i32 = arith.constant 15 : i32
    %105 = vector.broadcast %c15_i32 : i32 to vector<576x64xi32>
    %106 = arith.cmpi ne, %52, %105 : vector<576x64xi32>
    %cst_20 = arith.constant 0.000000e+00 : f32
    %107 = vector.broadcast %cst_20 : f32 to vector<576x64xf32>
    %108 = arith.select %106, %104, %107 : vector<576x64xi1>, vector<576x64xf32>
    %109 = vector.shape_cast %108 : vector<576x64xf32> to vector<2x288x64xf32>
    %110 = vector.extract_strided_slice %109 {offsets = [0, 0, 0], sizes = [2, 256, 64], strides = [1, 1, 1]} : vector<2x288x64xf32> to vector<2x256x64xf32>
    %111 = vector.extract_strided_slice %1 {offsets = [2, 0], sizes = [1, 64], strides = [1, 1]} : vector<16x64xf32> to vector<1x64xf32>
    %112 = vector.shape_cast %111 : vector<1x64xf32> to vector<64xf32>
    %113 = vector.shape_cast %112 : vector<64xf32> to vector<1x1x64xf32>
    %114 = vector.broadcast %113 : vector<1x1x64xf32> to vector<2x256x64xf32>
    %115 = arith.mulf %110, %114 : vector<2x256x64xf32>
    %116 = arith.addf %101, %115 : vector<2x256x64xf32>
    %117 = vector.extract_strided_slice %109 {offsets = [0, 16, 0], sizes = [2, 256, 64], strides = [1, 1, 1]} : vector<2x288x64xf32> to vector<2x256x64xf32>
    %118 = vector.extract_strided_slice %1 {offsets = [5, 0], sizes = [1, 64], strides = [1, 1]} : vector<16x64xf32> to vector<1x64xf32>
    %119 = vector.shape_cast %118 : vector<1x64xf32> to vector<64xf32>
    %120 = vector.shape_cast %119 : vector<64xf32> to vector<1x1x64xf32>
    %121 = vector.broadcast %120 : vector<1x1x64xf32> to vector<2x256x64xf32>
    %122 = arith.mulf %117, %121 : vector<2x256x64xf32>
    %123 = arith.addf %116, %122 : vector<2x256x64xf32>
    %124 = vector.extract_strided_slice %109 {offsets = [0, 32, 0], sizes = [2, 256, 64], strides = [1, 1, 1]} : vector<2x288x64xf32> to vector<2x256x64xf32>
    %125 = vector.extract_strided_slice %1 {offsets = [8, 0], sizes = [1, 64], strides = [1, 1]} : vector<16x64xf32> to vector<1x64xf32>
    %126 = vector.shape_cast %125 : vector<1x64xf32> to vector<64xf32>
    %127 = vector.shape_cast %126 : vector<64xf32> to vector<1x1x64xf32>
    %128 = vector.broadcast %127 : vector<1x1x64xf32> to vector<2x256x64xf32>
    %129 = arith.mulf %124, %128 : vector<2x256x64xf32>
    %130 = arith.addf %123, %129 : vector<2x256x64xf32>
    %131 = vector.shape_cast %10 : vector<64xf32> to vector<1x1x64xf32>
    %132 = vector.broadcast %131 : vector<1x1x64xf32> to vector<2x256x64xf32>
    %133 = arith.addf %130, %132 : vector<2x256x64xf32>
    %cst_21 = arith.constant 3.000000e+00 : f32
    %134 = vector.broadcast %cst_21 : f32 to vector<2x256x64xf32>
    %135 = arith.addf %133, %134 : vector<2x256x64xf32>
    %cst_22 = arith.constant 0.000000e+00 : f32
    %cst_23 = arith.constant 6.000000e+00 : f32
    %136 = vector.broadcast %cst_22 : f32 to vector<2x256x64xf32>
    %137 = arith.maximumf %136, %135 : vector<2x256x64xf32>
    %138 = vector.broadcast %cst_23 : f32 to vector<2x256x64xf32>
    %139 = arith.minimumf %138, %137 : vector<2x256x64xf32>
    %140 = arith.mulf %133, %139 : vector<2x256x64xf32>
    %cst_24 = arith.constant 0.166666672 : f32
    %141 = vector.broadcast %cst_24 : f32 to vector<2x256x64xf32>
    %142 = arith.mulf %140, %141 : vector<2x256x64xf32>
    %cst_25 = arith.constant dense<0.000000e+00> : vector<2x64xf32>
    %143 = vector.multi_reduction <add>, %142, %cst_25 [1] : vector<2x256x64xf32> to vector<2x64xf32>
    %cst_26 = arith.constant 2.560000e+02 : f32
    %144 = vector.broadcast %cst_26 : f32 to vector<2x64xf32>
    %145 = arith.divf %143, %144 : vector<2x64xf32>
    %cst_27 = arith.constant dense<0.000000e+00> : vector<2x64xf32>
    %146 = tpu.matmul %145, %2, %cst_27 {dimension_numbers = #tpu.dot_dimension_numbers<[1], [0], [0], [1], [0, 0, 1, 1], [], []>} : vector<2x64xf32>, vector<64x64xf32>, vector<2x64xf32> -> vector<2x64xf32>
    %147 = vector.shape_cast %12 : vector<64xf32> to vector<1x64xf32>
    %148 = vector.broadcast %147 : vector<1x64xf32> to vector<2x64xf32>
    %149 = arith.addf %146, %148 : vector<2x64xf32>
    %cst_28 = arith.constant 0.000000e+00 : f32
    %150 = vector.broadcast %cst_28 : f32 to vector<2x64xf32>
    %151 = arith.maximumf %149, %150 : vector<2x64xf32>
    %cst_29 = arith.constant dense<0.000000e+00> : vector<2x64xf32>
    %152 = tpu.matmul %151, %3, %cst_29 {dimension_numbers = #tpu.dot_dimension_numbers<[1], [0], [0], [1], [0, 0, 1, 1], [], []>} : vector<2x64xf32>, vector<64x64xf32>, vector<2x64xf32> -> vector<2x64xf32>
    %153 = vector.shape_cast %14 : vector<64xf32> to vector<1x64xf32>
    %154 = vector.broadcast %153 : vector<1x64xf32> to vector<2x64xf32>
    %155 = arith.addf %152, %154 : vector<2x64xf32>
    %cst_30 = arith.constant 3.000000e+00 : f32
    %156 = vector.broadcast %cst_30 : f32 to vector<2x64xf32>
    %157 = arith.addf %155, %156 : vector<2x64xf32>
    %cst_31 = arith.constant 0.000000e+00 : f32
    %cst_32 = arith.constant 6.000000e+00 : f32
    %158 = vector.broadcast %cst_31 : f32 to vector<2x64xf32>
    %159 = arith.maximumf %158, %157 : vector<2x64xf32>
    %160 = vector.broadcast %cst_32 : f32 to vector<2x64xf32>
    %161 = arith.minimumf %160, %159 : vector<2x64xf32>
    %cst_33 = arith.constant 0.166666672 : f32
    %162 = vector.broadcast %cst_33 : f32 to vector<2x64xf32>
    %163 = arith.mulf %161, %162 : vector<2x64xf32>
    %164 = vector.shape_cast %163 : vector<2x64xf32> to vector<2x1x64xf32>
    %165 = vector.broadcast %164 : vector<2x1x64xf32> to vector<2x256x64xf32>
    %166 = arith.mulf %142, %165 : vector<2x256x64xf32>
    %167 = vector.shape_cast %166 : vector<2x256x64xf32> to vector<512x64xf32>
    %cst_34 = arith.constant dense<0.000000e+00> : vector<512x16xf32>
    %168 = tpu.matmul %167, %5, %cst_34 {dimension_numbers = #tpu.dot_dimension_numbers<[1], [0], [0], [1], [0, 0, 1, 1], [], []>, precision = #tpu.contract_precision<fp32>} : vector<512x64xf32>, vector<64x16xf32>, vector<512x16xf32> -> vector<512x16xf32>
    %169 = vector.shape_cast %16 : vector<16xf32> to vector<1x16xf32>
    %170 = vector.broadcast %169 : vector<1x16xf32> to vector<512x16xf32>
    %171 = arith.addf %168, %170 : vector<512x16xf32>
    %c0_35 = arith.constant 0 : index
    %c0_36 = arith.constant 0 : index
    %c0_37 = arith.constant 0 : index
    %c0_38 = arith.constant 0 : index
    %172 = vector.load %arg0[%c0_35, %c0_36, %c0_37, %c0_38] : memref<2x16x16x16xf32, #tpu.memory_space<vmem>>, vector<2x16x16x16xf32>
    %173 = vector.shape_cast %172 : vector<2x16x16x16xf32> to vector<512x16xf32>
    %174 = arith.addf %171, %173 : vector<512x16xf32>
    %175 = vector.shape_cast %174 : vector<512x16xf32> to vector<2x16x16x16xf32>
    %c0_39 = arith.constant 0 : index
    %c0_40 = arith.constant 0 : index
    %c0_41 = arith.constant 0 : index
    %c0_42 = arith.constant 0 : index
    %176 = vector.load %arg2[%c0_39, %c0_40, %c0_41, %c0_42] : memref<2x16x16x16xf32, #tpu.memory_space<vmem>>, vector<2x16x16x16xf32>
    tpu.vector_store %arg2[%c0_39, %c0_40, %c0_41, %c0_42], %175 {strides = array<i32>} : memref<2x16x16x16xf32, #tpu.memory_space<vmem>>, vector<2x16x16x16xf32>,
    return
  }
}

</mosaic_0001>

<bundles_post_ra>
// kernel: tpu_custom_call.1
= control target key start
LH: loop header
LB: loop body
LE: loop exit
PB: predicated region body
PF: predicated region fallthrough
CT: control target
= control target key end

     0   :  { %7 = vsyncpa [#allocation3], 0  ;;  %s20529_s0 = inlined_call_operand.hbm [shape: f32[2,16,16,16], index: 0, kind: input, shape index: {}]   ;;  %s20530_s1 = inlined_call_operand.vmem [shape: f32[232,64], index: 1, kind: input, shape index: {}]   ;;  %s20531_s2 = inlined_call_operand.hbm [shape: f32[2,16,16,16], index: 2, kind: output, shape index: {}]  }
   0x1   :  { %8 = vsyncpa [#allocation4], 0  ;;  %s14193_s9 = smov [#allocation2]   ;;  %s14145_s13 = scalar_lea.hbm %s20529_s0, 8192 }
   0x2   :  { %s14_s10 = sshll.u32 %s14193_s9, 4  ;;  %p14146_p0 = scmp.ne.s32.totalorder %s20529_s0, %s14145_s13  ;;  %s15_s10 = int_to_ptr.vmem [resolvable:$true] %s14_s10 }
   0x3   :  { %p14149_p1 = scmp.lt.u32.totalorder %s14145_s13, %s20529_s0 }
   0x5   :  { %p14151_p2 = pnand %p14149_p1, %p14146_p0 }
   0x7   :  { %14154 = shalt.err (!%p14151_p2)
}
   0x8   :  { %s14155_s18 = scalar_lea.vmem %s15_s10, 8192  ;;  %p14160_p4 = scmp.lt.s32.totalorder %s15_s10, %s15_s10 }
   0x9   :  { %p14156_p3 = scmp.ne.s32.totalorder %s15_s10, %s14155_s18  ;;  %p14161_p5 = scmp.lt.s32.totalorder %s14155_s18, %s14155_s18 }
   0xb   :  { %p14162_p6 = por %p14161_p5, %p14160_p4 }
   0xd   :  { %p14163_p7 = pnand %p14162_p6, %p14156_p3 }
   0xf   :  { %14166 = shalt.err (!%p14163_p7)
}
  0x10   :  { %s14194_s19 = smov 128   ;;  %s14195_s20 = smov 8  }
  0x11   :  { %20 = dma.hbm_to_vmem [thread:$0]  %s20529_s0, 8192, %s15_s10, [#allocation3], %s14194_s19, %s14194_s19, %s14195_s20  }
  0x12   :  { %14189 = dma.done.wait [#allocation3], 8192  }
  0x13   :  { %14190 = vsyncadd [#allocation3], 4294959104  ;;  %vm123_vm0 = vcmask 130048   ;;  %v26_v0 = vld [vmem:[%s20530_s1] sm:$0xff]  ;;  %v27_v1 = vld [vmem:[%s20530_s1 + $0x8] sm:$0xff]  ;;  %vm4808_vm1 = vcmask 1040384  }
  0x14   :  { %v55_v2 = vld [vmem:[#allocation2] sm:$0xff]  ;;  %v317_v3 = vand.u32 4294901760, %v26_v0  ;;  %v320_v4 = vand.u32 4294901760, %v27_v1  ;;  %v56_v6 = vld [vmem:[#allocation2 + $0x8] sm:$0xff]  ;;  %v57_v7 = vld [vmem:[#allocation2 + $0x10] sm:$0xff]  ;;  %vm5874_vm2 = vcmask 1046528  }
  0x15   :  { %v125_v5 = vsel %vm123_vm0, %v55_v2, 0  ;;  %v58_v8 = vld [vmem:[#allocation2 + $0x18] sm:$0xff]  ;;  %v128_v10 = vsel %vm123_vm0, %v56_v6, 0  ;;  %v131_v11 = vsel %vm123_vm0, %v57_v7, 0  ;;  %v59_v13 = vld [vmem:[#allocation2 + $0x20] sm:$0xff]  ;;  %v60_v18 = vld [vmem:[#allocation2 + $0x28] sm:$0xff] }
  0x16   :  { %v14238_v9 = vand.u32 4294901760, %v125_v5  ;;  %v134_v12 = vsel %vm123_vm0, %v58_v8, 0  ;;  %v14243_v14 = vpack.c.bf16 %v320_v4, %v317_v3  ;;  %v14245_v15 = vand.u32 4294901760, %v128_v10  ;;  %v61_v39 = vld [vmem:[#allocation2 + $0x30] sm:$0xff]  ;;  %v62_v48 = vld [vmem:[#allocation2 + $0x38] sm:$0xff]  ;;  %v63_v49 = vld [vmem:[#allocation2 + $0x40] sm:$0xff] }
  0x17   :  { %v14247_v16 = vsub.f32 %v26_v0, %v317_v3  ;;  %v14249_v17 = vsub.f32 %v27_v1, %v320_v4  ;;  %v14254_v20 = vand.u32 4294901760, %v131_v11  ;;  %v14256_v21 = vand.u32 4294901760, %v134_v12  ;;  %v64_v50 = vld [vmem:[#allocation2 + $0x48] sm:$0xff]  ;;  %v65_v55 = vld [vmem:[#allocation2 + $0x50] sm:$0xff]  ;;  %v66_v60 = vld [vmem:[#allocation2 + $0x58] sm:$0xff] }
  0x18   :  { %21262 = vst [vmem:[#allocation8_spill] sm:$0xff] %v14238_v9  ;;  %21263 = vst [vmem:[#allocation9_spill] sm:$0xff] %v14245_v15  ;;  %v14252_v19 = vsub.f32 %v125_v5, %v14238_v9  ;;  %v137_v22 = vsel %vm123_vm0, %v59_v13, 0  ;;  %13151 = vmatprep.subr.bf16.mxu0 %v14243_v14  ;;  %v14261_v23 = vsub.f32 %v128_v10, %v14245_v15  ;;  %v140_v30 = vsel %vm123_vm0, %v60_v18, 0  ;;  %v67_v61 = vld [vmem:[#allocation2 + $0x60] sm:$0xff] }
  0x19   :  { %21264 = vst [vmem:[#allocation10_spill] sm:$0xff] %v14247_v16  ;;  %21265 = vst [vmem:[#allocation11_spill] sm:$0xff] %v14249_v17  ;;  %v20549_v24 = vand.u32 4294901760, %v14247_v16  ;;  %v20548_v25 = vand.u32 4294901760, %v14249_v17  ;;  %v14265_v26 = vand.u32 4294901760, %v137_v22  ;;  %13153 = vmatpush3.bf16.msra.mxu0 %v14243_v14  ;;  %v14270_v28 = vsub.f32 %v131_v11, %v14254_v20  ;;  %v68_v11 = vld [vmem:[#allocation2 + $0x68] sm:$0xff] }
  0x1a   :  { %21266 = vst [vmem:[#allocation12_spill] sm:$0xff] %v14252_v19  ;;  %21267 = vst [vmem:[#allocation13_spill] sm:$0xff] %v14254_v20  ;;  %v20546_v27 = vand.u32 4294901760, %v14252_v19  ;;  %v14273_v29 = vsub.f32 %v134_v12, %v14256_v21  ;;  %v20545_v31 = vand.u32 4294901760, %v14261_v23  ;;  %v14291_v38 = vand.u32 4294901760, %v140_v30 }
  0x1b   :  { %21268 = vst [vmem:[#allocation14_spill] sm:$0xff] %v14256_v21  ;;  %21269 = vst [vmem:[#allocation15_spill] sm:$0xff] %v14261_v23  ;;  %v1027_v32 = vsub.f32 %v14247_v16, %v20549_v24  ;;  %v1034_v33 = vsub.f32 %v14249_v17, %v20548_v25  ;;  %v14284_v34 = vsub.f32 %v137_v22, %v14265_v26  ;;  %v20544_v36 = vand.u32 4294901760, %v14270_v28  ;;  %v80_v24 = vld [vmem:[#allocation2 + $0xc8] sm:$0xff] }
  0x1c   :  { %21270 = vst [vmem:[#allocation16_spill] sm:$0xff] %v14265_v26  ;;  %21271 = vst [vmem:[#allocation17_spill] sm:$0xff] %v14270_v28  ;;  %v386_v35 = vsub.f32 %v14252_v19, %v20546_v27  ;;  %v20542_v37 = vand.u32 4294901760, %v14273_v29  ;;  %v396_v40 = vsub.f32 %v14261_v23, %v20545_v31  ;;  %v14304_v47 = vsub.f32 %v140_v30, %v14291_v38  ;;  %v78_v31 = vld [vmem:[#allocation2 + $0xb8] sm:$0xff]  ;;  %v79_v27 = vld [vmem:[#allocation2 + $0xc0] sm:$0xff] }
  0x1d   :  { %21272 = vst [vmem:[#allocation18_spill] sm:$0xff] %v14273_v29  ;;  %21273 = vst [vmem:[#allocation19_spill] sm:$0xff] %v14284_v34  ;;  %v1028_v41 = vand.u32 4294901760, %v1027_v32  ;;  %v1035_v42 = vand.u32 4294901760, %v1034_v33  ;;  %v20541_v43 = vand.u32 4294901760, %v14284_v34  ;;  %v406_v45 = vsub.f32 %v14270_v28, %v20544_v36 }
  0x1e   :  { %21274 = vst [vmem:[#allocation20_spill] sm:$0xff] %v14291_v38  ;;  %v387_v44 = vand.u32 4294901760, %v386_v35  ;;  %v416_v46 = vsub.f32 %v14273_v29, %v20542_v37  ;;  %21275 = vst [vmem:[#allocation21_spill] sm:$0xff] %v14304_v47  ;;  %v397_v51 = vand.u32 4294901760, %v396_v40  ;;  %v143_v54 = vsel %vm123_vm0, %v61_v39, 0  ;;  %v77_v37 = vld [vmem:[#allocation2 + $0xb0] sm:$0xff] }
  0x1f   :  { %v13154_v52 = vpack.c.bf16 %v1035_v42, %v1028_v41  ;;  %v426_v53 = vsub.f32 %v14284_v34, %v20541_v43  ;;  %v407_v56 = vand.u32 4294901760, %v406_v45  ;;  %v20540_v58 = vand.u32 4294901760, %v14304_v47  ;;  %v92_v29 = vld [vmem:[#allocation2 + $0x128] sm:$0xff] }
  0x20   :  { %11844 = vmatprep.mubr.f32.mxu0 %v387_v44  ;;  %v417_v57 = vand.u32 4294901760, %v416_v46  ;;  %v14311_v59 = vand.u32 4294901760, %v143_v54  ;;  %v146_v63 = vsel %vm123_vm0, %v62_v48, 0  ;;  %v149_v0 = vsel %vm123_vm0, %v63_v49, 0  ;;  %v69_v49 = vld [vmem:[#allocation2 + $0x70] sm:$0xff] }
  0x21   :  { %11845 = vmatmul.mubr.f32.vlgmr.msra.gmra.mrb[0].mxu0 %v397_v51  ;;  %13155 = vmatprep.subr.bf16.mxu0 %v13154_v52  ;;  %v427_v62 = vand.u32 4294901760, %v426_v53  ;;  %v152_v1 = vsel %vm123_vm0, %v64_v50, 0  ;;  %v436_v2 = vsub.f32 %v14304_v47, %v20540_v58  ;;  %v14322_v4 = vand.u32 4294901760, %v146_v63 }
  0x22   :  { %21276 = vst [vmem:[#allocation22_spill] sm:$0xff] %v14311_v59  ;;  %13157 = vmatpush3.bf16.msra.mxu0 %v13154_v52  ;;  %11847 = vmatprep.mubr.f32.mxu0 %v407_v56  ;;  %v14320_v3 = vsub.f32 %v143_v54, %v14311_v59  ;;  %v14324_v5 = vand.u32 4294901760, %v149_v0  ;;  %v14326_v6 = vand.u32 4294901760, %v152_v1  ;;  %v155_v7 = vsel %vm123_vm0, %v65_v55, 0 }
  0x23   :  { %21278 = vst [vmem:[#allocation24_spill] sm:$0xff] %v14322_v4  ;;  %v158_v8 = vsel %vm123_vm0, %v66_v60, 0  ;;  %v161_v10 = vsel %vm123_vm0, %v67_v61, 0  ;;  %v437_v12 = vand.u32 4294901760, %v436_v2  ;;  %v14333_v18 = vsub.f32 %v146_v63, %v14322_v4  ;;  %v70_v60 = vld [vmem:[#allocation2 + $0x78] sm:$0xff]  ;;  %v71_v61 = vld [vmem:[#allocation2 + $0x80] sm:$0xff] }
  0x24   :  { %21277 = vst [vmem:[#allocation23_spill] sm:$0xff] %v14320_v3  ;;  %21279 = vst [vmem:[#allocation25_spill] sm:$0xff] %v14324_v5  ;;  %v20538_v13 = vand.u32 4294901760, %v14320_v3  ;;  %v14336_v22 = vsub.f32 %v149_v0, %v14324_v5  ;;  %v14339_v30 = vsub.f32 %v152_v1, %v14326_v6  ;;  %v14341_v32 = vand.u32 4294901760, %v155_v7 }
  0x25   :  { %21280 = vst [vmem:[#allocation26_spill] sm:$0xff] %v14326_v6  ;;  %21281 = vst [vmem:[#allocation27_spill] sm:$0xff] %v14333_v18  ;;  %11848 = vmatmul.mubr.f32.gmra.mrb[2].mxu0 %v417_v57  ;;  %v14343_v33 = vand.u32 4294901760, %v158_v8  ;;  %v14345_v35 = vand.u32 4294901760, %v161_v10  ;;  %v20537_v40 = vand.u32 4294901760, %v14333_v18  ;;  %v164_v42 = vsel %vm123_vm0, %v68_v11, 0 }
  0x26   :  { %21282 = vst [vmem:[#allocation28_spill] sm:$0xff] %v14336_v22  ;;  %21283 = vst [vmem:[#allocation29_spill] sm:$0xff] %v14339_v30  ;;  %11850 = vmatprep.mubr.f32.mxu0 %v427_v62  ;;  %v446_v39 = vsub.f32 %v14320_v3, %v20538_v13  ;;  %v20536_v41 = vand.u32 4294901760, %v14336_v22  ;;  %v20534_v44 = vand.u32 4294901760, %v14339_v30  ;;  %v14355_v45 = vsub.f32 %v155_v7, %v14341_v32 }
  0x27   :  { %21284 = vst [vmem:[#allocation30_spill] sm:$0xff] %v14341_v32  ;;  %21285 = vst [vmem:[#allocation31_spill] sm:$0xff] %v14343_v33  ;;  %v14358_v46 = vsub.f32 %v158_v8, %v14343_v33  ;;  %v14361_v48 = vsub.f32 %v161_v10, %v14345_v35  ;;  %v456_v51 = vsub.f32 %v14333_v18, %v20537_v40  ;;  %v14369_v53 = vand.u32 4294901760, %v164_v42  ;;  %v72_v10 = vld [vmem:[#allocation2 + $0x88] sm:$0xff] }
  0x28   :  { %21286 = vst [vmem:[#allocation32_spill] sm:$0xff] %v14345_v35  ;;  %21287 = vst [vmem:[#allocation33_spill] sm:$0xff] %v14355_v45  ;;  %v447_v50 = vand.u32 4294901760, %v446_v39  ;;  %v466_v52 = vsub.f32 %v14336_v22, %v20536_v41  ;;  %v476_v54 = vsub.f32 %v14339_v30, %v20534_v44  ;;  %v20532_v55 = vand.u32 4294901760, %v14355_v45 }
  0x29   :  { %21288 = vst [vmem:[#allocation34_spill] sm:$0xff] %v14358_v46  ;;  %21289 = vst [vmem:[#allocation35_spill] sm:$0xff] %v14361_v48  ;;  %11851 = vmatmul.mubr.f32.gmra.mrb[4].mxu0 %v437_v12  ;;  %v20533_v56 = vand.u32 4294901760, %v14358_v46  ;;  %v20535_v57 = vand.u32 4294901760, %v14361_v48  ;;  %v457_v62 = vand.u32 4294901760, %v456_v51  ;;  %v14378_v0 = vsub.f32 %v164_v42, %v14369_v53 }
  0x2a   :  { %21290 = vst [vmem:[#allocation36_spill] sm:$0xff] %v14369_v53  ;;  %11853 = vmatprep.mubr.f32.mxu0 %v447_v50  ;;  %v467_v63 = vand.u32 4294901760, %v466_v52  ;;  %v167_v1 = vsel %vm123_vm0, %v69_v49, 0  ;;  %v486_v2 = vsub.f32 %v14355_v45, %v20532_v55  ;;  %v170_v39 = vsel %vm123_vm0, %v70_v60, 0  ;;  %v73_v49 = vld [vmem:[#allocation2 + $0x90] sm:$0xff]  ;;  %v74_v50 = vld [vmem:[#allocation2 + $0x98] sm:$0xff] }
  0x2b   :  { %21291 = vst [vmem:[#allocation37_spill] sm:$0xff] %v14378_v0  ;;  %v496_v7 = vsub.f32 %v14358_v46, %v20533_v56  ;;  %v506_v8 = vsub.f32 %v14361_v48, %v20535_v57  ;;  %v20539_v11 = vand.u32 4294901760, %v14378_v0  ;;  %v14391_v12 = vand.u32 4294901760, %v167_v1  ;;  %v75_v60 = vld [vmem:[#allocation2 + $0xa0] sm:$0xff]  ;;  %v86_v46 = vld [vmem:[#allocation2 + $0xf8] sm:$0xff] }
  0x2c   :  { %v173_v42 = vsel %vm123_vm0, %v71_v61, 0  ;;  %v477_v51 = vand.u32 4294901760, %v476_v54  ;;  %v487_v52 = vand.u32 4294901760, %v486_v2  ;;  %v14395_v56 = vand.u32 4294901760, %v170_v39 }
  0x2d   :  { %21292 = vst [vmem:[#allocation38_spill] sm:$0xff] %v14391_v12  ;;  %11854 = vmatmul.mubr.f32.gmra.mrb[6].mxu0 %v457_v62  ;;  %v497_v55 = vand.u32 4294901760, %v496_v7  ;;  %v507_v44 = vand.u32 4294901760, %v506_v8  ;;  %v14398_v57 = vsub.f32 %v167_v1, %v14391_v12  ;;  %v14400_v41 = vand.u32 4294901760, %v173_v42  ;;  %v76_v8 = vld [vmem:[#allocation2 + $0xa8] sm:$0xff] }
  0x2e   :  { %21293 = vst [vmem:[#allocation39_spill] sm:$0xff] %v14395_v56  ;;  %11856 = vmatprep.mubr.f32.mxu0 %v467_v63  ;;  %v176_v40 = vsel %vm123_vm0, %v72_v10, 0  ;;  %v14404_v61 = vsub.f32 %v170_v39, %v14395_v56  ;;  %v179_v54 = vsel %vm123_vm0, %v73_v49, 0  ;;  %v182_v62 = vsel %vm123_vm0, %v74_v50, 0 }
  0x2f   :  { %21294 = vst [vmem:[#allocation40_spill] sm:$0xff] %v14398_v57  ;;  %21295 = vst [vmem:[#allocation41_spill] sm:$0xff] %v14400_v41  ;;  %v14406_v13 = vand.u32 4294901760, %v176_v40  ;;  %v516_v63 = vsub.f32 %v14378_v0, %v20539_v11  ;;  %v20543_v1 = vand.u32 4294901760, %v14398_v57  ;;  %v14415_v2 = vsub.f32 %v173_v42, %v14400_v41 }
  0x30   :  { %21296 = vst [vmem:[#allocation42_spill] sm:$0xff] %v14404_v61  ;;  %v14417_v7 = vand.u32 4294901760, %v179_v54  ;;  %v20547_v10 = vand.u32 4294901760, %v14404_v61  ;;  %v14423_v49 = vand.u32 4294901760, %v182_v62  ;;  %v185_v50 = vsel %vm123_vm0, %v75_v60, 0 }
  0x31   :  { %21297 = vst [vmem:[#allocation43_spill] sm:$0xff] %v14406_v13  ;;  %21298 = vst [vmem:[#allocation44_spill] sm:$0xff] %v14415_v2  ;;  %11857 = vmatmul.mubr.f32.gmra.mrb[8].mxu0 %v477_v51  ;;  %v14421_v39 = vsub.f32 %v176_v40, %v14406_v13  ;;  %v526_v11 = vsub.f32 %v14398_v57, %v20543_v1  ;;  %v20550_v42 = vand.u32 4294901760, %v14415_v2  ;;  %v14433_v51 = vand.u32 4294901760, %v185_v50 }
  0x32   :  { %21299 = vst [vmem:[#allocation45_spill] sm:$0xff] %v14417_v7  ;;  %21301 = vst [vmem:[#allocation47_spill] sm:$0xff] %v14423_v49  ;;  %11859 = vmatprep.mubr.f32.mxu0 %v487_v52  ;;  %v14431_v58 = vsub.f32 %v179_v54, %v14417_v7  ;;  %v536_v40 = vsub.f32 %v14404_v61, %v20547_v10  ;;  %v188_v43 = vsel %vm123_vm0, %v76_v8, 0  ;;  %v517_v60 = vand.u32 4294901760, %v516_v63 }
  0x33   :  { %21300 = vst [vmem:[#allocation46_spill] sm:$0xff] %v14421_v39  ;;  %21303 = vst [vmem:[#allocation49_spill] sm:$0xff] %v14433_v51  ;;  %v14440_v52 = vsub.f32 %v182_v62, %v14423_v49  ;;  %v546_v1 = vsub.f32 %v14415_v2, %v20550_v42  ;;  %v14446_v36 = vand.u32 4294901760, %v188_v43  ;;  %v527_v10 = vand.u32 4294901760, %v526_v11  ;;  %v81_v11 = vld [vmem:[#allocation2 + $0xd0] sm:$0xff]  ;;  %v82_v42 = vld [vmem:[#allocation2 + $0xd8] sm:$0xff] }
  0x34   :  { %21302 = vst [vmem:[#allocation48_spill] sm:$0xff] %v14431_v58  ;;  %v14450_v25 = vsub.f32 %v185_v50, %v14433_v51  ;;  %v537_v62 = vand.u32 4294901760, %v536_v40  ;;  %v194_v2 = vsel %vm123_vm0, %v78_v31, 0  ;;  %v21309_v50 = vand.u32 4294901760, %v14421_v39 }
  0x35   :  { %21304 = vst [vmem:[#allocation50_spill] sm:$0xff] %v14440_v52  ;;  %11860 = vmatmul.mubr.f32.gmra.mrb[10].mxu0 %v497_v55  ;;  %21305 = vst [vmem:[#allocation51_spill] sm:$0xff] %v14446_v36  ;;  %v191_v55 = vsel %vm123_vm0, %v77_v37, 0  ;;  %v14457_v54 = vsub.f32 %v188_v43, %v14446_v36  ;;  %v547_v8 = vand.u32 4294901760, %v546_v1  ;;  %v14467_v61 = vand.u32 4294901760, %v194_v2 }
  0x36   :  { %11862 = vmatprep.mubr.f32.mxu0 %v507_v44  ;;  %21306 = vst [vmem:[#allocation52_spill] sm:$0xff] %v14450_v25  ;;  %v14453_v63 = vand.u32 4294901760, %v191_v55  ;;  %v197_v44 = vsel %vm123_vm0, %v79_v27, 0  ;;  %v556_v37 = vsub.f32 %v14421_v39, %v21309_v50  ;;  %v21312_v43 = vand.u32 4294901760, %v14431_v58 }
  0x37   :  { %21308 = vst [vmem:[#allocation54_spill] sm:$0xff] %v14457_v54  ;;  %21311 = vst [vmem:[#allocation56_spill] sm:$0xff] %v14467_v61  ;;  %v14473_v57 = vand.u32 4294901760, %v197_v44  ;;  %v200_v1 = vsel %vm123_vm0, %v80_v24, 0  ;;  %v21314_v50 = vand.u32 4294901760, %v14440_v52  ;;  %v206_v0 = vsel %vm123_vm0, %v82_v42, 0 }
  0x38   :  { %21307 = vst [vmem:[#allocation53_spill] sm:$0xff] %v14453_v63  ;;  %v14465_v40 = vsub.f32 %v191_v55, %v14453_v63  ;;  %v566_v31 = vsub.f32 %v14431_v58, %v21312_v43  ;;  %v83_v43 = vld [vmem:[#allocation2 + $0xe0] sm:$0xff]  ;;  %v557_v27 = vand.u32 4294901760, %v556_v37  ;;  %v14496_v42 = vand.u32 4294901760, %v206_v0 }
  0x39   :  { %11863 = vmatmul.mubr.f32.gmra.mrb[12].mxu0 %v517_v60  ;;  %21313 = vst [vmem:[#allocation57_spill] sm:$0xff] %v14473_v57  ;;  %v203_v60 = vsel %vm123_vm0, %v81_v11, 0  ;;  %v576_v55 = vsub.f32 %v14440_v52, %v21314_v50  ;;  %v14487_v24 = vsub.f32 %v197_v44, %v14473_v57  ;;  %v14489_v11 = vand.u32 4294901760, %v200_v1  ;;  %v84_v52 = vld [vmem:[#allocation2 + $0xe8] sm:$0xff] }
  0x3a   :  { %21310 = vst [vmem:[#allocation55_spill] sm:$0xff] %v14465_v40  ;;  %11865 = vmatprep.mubr.f32.mxu0 %v527_v10  ;;  %v14482_v10 = vsub.f32 %v194_v2, %v14467_v61  ;;  %v567_v48 = vand.u32 4294901760, %v566_v31  ;;  %v21318_v50 = vand.u32 4294901760, %v14450_v25  ;;  %v14494_v2 = vand.u32 4294901760, %v203_v60  ;;  %21320 = vst [vmem:[#allocation62_spill] sm:$0xff] %v14496_v42 }
  0x3b   :  { %21316 = vst [vmem:[#allocation59_spill] sm:$0xff] %v14487_v24  ;;  %21317 = vst [vmem:[#allocation60_spill] sm:$0xff] %v14489_v11  ;;  %v577_v37 = vand.u32 4294901760, %v576_v55  ;;  %v21321_v58 = vand.u32 4294901760, %v14457_v54  ;;  %v21322_v31 = vand.u32 4294901760, %v14465_v40  ;;  %v14508_v45 = vsub.f32 %v200_v1, %v14489_v11 }
  0x3c   :  { %21315 = vst [vmem:[#allocation58_spill] sm:$0xff] %v14482_v10  ;;  %v586_v39 = vsub.f32 %v14450_v25, %v21318_v50  ;;  %21319 = vst [vmem:[#allocation61_spill] sm:$0xff] %v14494_v2  ;;  %v14512_v30 = vsub.f32 %v203_v60, %v14494_v2  ;;  %v21327_v1 = vand.u32 4294901760, %v14482_v10 }
  0x3d   :  { %11866 = vmatmul.mubr.f32.gmra.mrb[14].mxu0 %v537_v62  ;;  %v209_v62 = vsel %vm123_vm0, %v83_v43, 0  ;;  %v596_v44 = vsub.f32 %v14457_v54, %v21321_v58  ;;  %v606_v50 = vsub.f32 %v14465_v40, %v21322_v31  ;;  %21323 = vst [vmem:[#allocation63_spill] sm:$0xff] %v14508_v45  ;;  %v212_v43 = vsel %vm123_vm0, %v84_v52, 0  ;;  %v87_v40 = vld [vmem:[#allocation2 + $0x100] sm:$0xff] }
  0x3e   :  { %11868 = vmatprep.mubr.f32.mxu0 %v547_v8  ;;  %v85_v8 = vld [vmem:[#allocation2 + $0xf0] sm:$0xff]  ;;  %v587_v55 = vand.u32 4294901760, %v586_v39  ;;  %21324 = vst [vmem:[#allocation64_spill] sm:$0xff] %v14512_v30  ;;  %v14514_v58 = vand.u32 4294901760, %v209_v62  ;;  %v616_v54 = vsub.f32 %v14482_v10, %v21327_v1  ;;  %v14523_v52 = vand.u32 4294901760, %v212_v43 }
  0x3f   :  { %v215_v31 = vsel %vm123_vm0, %v85_v8, 0  ;;  %v597_v25 = vand.u32 4294901760, %v596_v44  ;;  %v21329_v39 = vand.u32 4294901760, %v14487_v24  ;;  %v221_v1 = vsel %vm123_vm0, %v87_v40, 0  ;;  %v89_v10 = vld [vmem:[#allocation2 + $0x110] sm:$0xff] }
  0x40   :  { %21325 = vst [vmem:[#allocation65_spill] sm:$0xff] %v14514_v58  ;;  %21328 = vst [vmem:[#allocation67_spill] sm:$0xff] %v14523_v52  ;;  %v14532_v44 = vsub.f32 %v209_v62, %v14514_v58  ;;  %v14534_v18 = vand.u32 4294901760, %v215_v31  ;;  %v617_v3 = vand.u32 4294901760, %v616_v54  ;;  %v14546_v8 = vand.u32 4294901760, %v221_v1 }
  0x41   :  { %11869 = vmatmul.mubr.f32.gmra.mrb[16].mxu0 %v557_v27  ;;  %v14517_v27 = vsub.f32 %v206_v0, %v14496_v42  ;;  %v626_v60 = vsub.f32 %v14487_v24, %v21329_v39  ;;  %v218_v0 = vsel %vm123_vm0, %v86_v46, 0  ;;  %v14539_v39 = vsub.f32 %v212_v43, %v14523_v52 }
  0x42   :  { %11871 = vmatprep.mubr.f32.mxu0 %v567_v48  ;;  %v607_v48 = vand.u32 4294901760, %v606_v50  ;;  %21330 = vst [vmem:[#allocation68_spill] sm:$0xff] %v14532_v44  ;;  %21331 = vst [vmem:[#allocation69_spill] sm:$0xff] %v14534_v18  ;;  %v14541_v22 = vand.u32 4294901760, %v218_v0  ;;  %v21336_v50 = vand.u32 4294901760, %v14512_v30  ;;  %v14554_v24 = vsub.f32 %v215_v31, %v14534_v18 }
  0x43   :  { %21326 = vst [vmem:[#allocation66_spill] sm:$0xff] %v14517_v27  ;;  %21332 = vst [vmem:[#allocation70_spill] sm:$0xff] %v14539_v39  ;;  %v627_v46 = vand.u32 4294901760, %v626_v60  ;;  %v90_v60 = vld [vmem:[#allocation2 + $0x118] sm:$0xff]  ;;  %v21338_v47 = vand.u32 4294901760, %v14517_v27  ;;  %v14567_v31 = vsub.f32 %v221_v1, %v14546_v8 }
  0x44   :  { %21333 = vst [vmem:[#allocation71_spill] sm:$0xff] %v14541_v22  ;;  %21335 = vst [vmem:[#allocation72_spill] sm:$0xff] %v14546_v8  ;;  %v646_v54 = vsub.f32 %v14512_v30, %v21336_v50  ;;  %v21349_v28 = vand.u32 4294901760, %v14554_v24 }
  0x45   :  { %11872 = vmatmul.mubr.f32.gmra.mrb[18].mxu0 %v577_v37  ;;  %v88_v37 = vld [vmem:[#allocation2 + $0x108] sm:$0xff]  ;;  %21337 = vst [vmem:[#allocation73_spill] sm:$0xff] %v14554_v24  ;;  %21341 = vst [vmem:[#allocation76_spill] sm:$0xff] %v14567_v31 }
  0x46   :  { %11874 = vmatprep.mubr.f32.mxu0 %v587_v55  ;;  %v21334_v55 = vand.u32 4294901760, %v14508_v45  ;;  %v224_v40 = vsel %vm123_vm0, %v88_v37, 0  ;;  %v647_v30 = vand.u32 4294901760, %v646_v54  ;;  %v93_v54 = vld [vmem:[#allocation2 + $0x130] sm:$0xff] }
  0x47   :  { %v14564_v34 = vand.u32 4294901760, %v224_v40 }
  0x48   :  { %v636_v62 = vsub.f32 %v14508_v45, %v21334_v55  ;;  %v656_v55 = vsub.f32 %v14517_v27, %v21338_v47  ;;  %v91_v45 = vld [vmem:[#allocation2 + $0x120] sm:$0xff]  ;;  %v21343_v47 = vand.u32 4294901760, %v14532_v44 }
  0x49   :  { %11875 = vmatmul.mubr.f32.gmra.mrb[20].mxu0 %v597_v25  ;;  %v227_v25 = vsel %vm123_vm0, %v89_v10, 0  ;;  %21340 = vst [vmem:[#allocation75_spill] sm:$0xff] %v14564_v34  ;;  %v230_v10 = vsel %vm123_vm0, %v90_v60, 0  ;;  %v233_v27 = vsel %vm123_vm0, %v91_v45, 0  ;;  %v14582_v60 = vsub.f32 %v224_v40, %v14564_v34 }
  0x4a   :  { %11877 = vmatprep.mubr.f32.mxu0 %v607_v48  ;;  %v14562_v48 = vsub.f32 %v218_v0, %v14541_v22  ;;  %v637_v50 = vand.u32 4294901760, %v636_v62  ;;  %v14569_v43 = vand.u32 4294901760, %v227_v25  ;;  %v666_v37 = vsub.f32 %v14532_v44, %v21343_v47  ;;  %v94_v44 = vld [vmem:[#allocation2 + $0x138] sm:$0xff] }
  0x4b   :  { %v21344_v62 = vand.u32 4294901760, %v14539_v39  ;;  %21345 = vst [vmem:[#allocation78_spill] sm:$0xff] %v14582_v60  ;;  %v14590_v45 = vand.u32 4294901760, %v233_v27  ;;  %v686_v40 = vsub.f32 %v14554_v24, %v21349_v28 }
  0x4c   :  { %21339 = vst [vmem:[#allocation74_spill] sm:$0xff] %v14562_v48  ;;  %21342 = vst [vmem:[#allocation77_spill] sm:$0xff] %v14569_v43  ;;  %v14588_v0 = vsub.f32 %v227_v25, %v14569_v43  ;;  %v21356_v43 = vand.u32 4294901760, %v14582_v60 }
  0x4d   :  { %11878 = vmatmul.mubr.f32.gmra.mrb[22].mxu0 %v617_v3  ;;  %v657_v3 = vand.u32 4294901760, %v656_v55  ;;  %v676_v1 = vsub.f32 %v14539_v39, %v21344_v62  ;;  %21348 = vst [vmem:[#allocation81_spill] sm:$0xff] %v14590_v45  ;;  %v236_v55 = vsel %vm123_vm0, %v92_v29, 0  ;;  %v667_v62 = vand.u32 4294901760, %v666_v37  ;;  %v95_v29 = vld [vmem:[#allocation2 + $0x140] sm:$0xff] }
  0x4e   :  { %11880 = vmatprep.mubr.f32.mxu0 %v627_v46  ;;  %v14584_v46 = vand.u32 4294901760, %v230_v10  ;;  %21347 = vst [vmem:[#allocation80_spill] sm:$0xff] %v14588_v0  ;;  %v239_v39 = vsel %vm123_vm0, %v93_v54, 0  ;;  %v14604_v19 = vand.u32 4294901760, %v236_v55  ;;  %v21353_v37 = vand.u32 4294901760, %v14567_v31 }
  0x4f   :  { %v14611_v24 = vsub.f32 %v233_v27, %v14590_v45  ;;  %v14613_v25 = vand.u32 4294901760, %v239_v39 }
  0x50   :  { %21346 = vst [vmem:[#allocation79_spill] sm:$0xff] %v14584_v46  ;;  %v14602_v23 = vsub.f32 %v230_v10, %v14584_v46  ;;  %21352 = vst [vmem:[#allocation83_spill] sm:$0xff] %v14604_v19  ;;  %v706_v28 = vsub.f32 %v14567_v31, %v21353_v37  ;;  %v242_v10 = vsel %vm123_vm0, %v94_v44, 0  ;;  %v96_v46 = vld [vmem:[#allocation2 + $0x148] sm:$0xff]  ;;  %v716_v37 = vsub.f32 %v14582_v60, %v21356_v43 }
  0x51   :  { %11881 = vmatmul.mubr.f32.gmra.mrb[24].mxu0 %v637_v50  ;;  %v21350_v50 = vand.u32 4294901760, %v14562_v48  ;;  %21354 = vst [vmem:[#allocation84_spill] sm:$0xff] %v14611_v24  ;;  %21355 = vst [vmem:[#allocation85_spill] sm:$0xff] %v14613_v25  ;;  %v14622_v27 = vsub.f32 %v236_v55, %v14604_v19  ;;  %v14628_v31 = vand.u32 4294901760, %v242_v10  ;;  %v248_v54 = vsel %vm123_vm0, %v96_v46, 0 }
  0x52   :  { %11883 = vmatprep.mubr.f32.mxu0 %v647_v30  ;;  %21351 = vst [vmem:[#allocation82_spill] sm:$0xff] %v14602_v23  ;;  %v677_v30 = vand.u32 4294901760, %v676_v1  ;;  %v21362_v60 = vand.u32 4294901760, %v14602_v23  ;;  %v21366_v19 = vand.u32 4294901760, %v14611_v24 }
  0x53   :  { %v696_v47 = vsub.f32 %v14562_v48, %v21350_v50  ;;  %v687_v50 = vand.u32 4294901760, %v686_v40  ;;  %v245_v48 = vsel %vm123_vm0, %v95_v29, 0  ;;  %21357 = vst [vmem:[#allocation86_spill] sm:$0xff] %v14622_v27  ;;  %v21358_v40 = vand.u32 4294901760, %v14588_v0  ;;  %21359 = vst [vmem:[#allocation87_spill] sm:$0xff] %v14628_v31 }
  0x54   :  { %v14633_v43 = vand.u32 4294901760, %v245_v48  ;;  %v21368_v45 = vand.u32 4294901760, %v14622_v27 }
  0x55   :  { %11884 = vmatmul.mubr.f32.gmra.mrb[26].mxu0 %v657_v3  ;;  %v97_v3 = vld [vmem:[#allocation2 + $0x150] sm:$0xff]  ;;  %v697_v1 = vand.u32 4294901760, %v696_v47  ;;  %v726_v44 = vsub.f32 %v14588_v0, %v21358_v40  ;;  %v14631_v47 = vsub.f32 %v239_v39, %v14613_v25  ;;  %v736_v40 = vsub.f32 %v14602_v23, %v21362_v60  ;;  %v99_v0 = vld [vmem:[#allocation2 + $0x160] sm:$0xff] }
  0x56   :  { %11886 = vmatprep.mubr.f32.mxu0 %v667_v62  ;;  %v707_v62 = vand.u32 4294901760, %v706_v28  ;;  %21361 = vst [vmem:[#allocation89_spill] sm:$0xff] %v14633_v43  ;;  %v251_v55 = vsel %vm123_vm0, %v97_v3, 0  ;;  %v717_v28 = vand.u32 4294901760, %v716_v37  ;;  %v14644_v39 = vand.u32 4294901760, %v248_v54  ;;  %v100_v3 = vld [vmem:[#allocation2 + $0x168] sm:$0xff] }
  0x57   :  { %21360 = vst [vmem:[#allocation88_spill] sm:$0xff] %v14631_v47  ;;  %v14646_v25 = vand.u32 4294901760, %v251_v55  ;;  %v727_v37 = vand.u32 4294901760, %v726_v44  ;;  %v746_v60 = vsub.f32 %v14611_v24, %v21366_v19  ;;  %v20641_v29 = vand.u32 4294901760, %v14631_v47 }
  0x58   :  { %21364 = vst [vmem:[#allocation91_spill] sm:$0xff] %v14644_v39  ;;  %v257_v23 = vsel %vm123_vm0, %v99_v0, 0  ;;  %v14665_v44 = vsub.f32 %v248_v54, %v14644_v39 }
  0x59   :  { %11887 = vmatmul.mubr.f32.gmra.mrb[28].mxu0 %v677_v30  ;;  %v98_v30 = vld [vmem:[#allocation2 + $0x158] sm:$0xff]  ;;  %21365 = vst [vmem:[#allocation92_spill] sm:$0xff] %v14646_v25 }
  0x5a   :  { %11889 = vmatprep.mubr.f32.mxu0 %v687_v50  ;;  %v14642_v50 = vsub.f32 %v242_v10, %v14628_v31  ;;  %v254_v46 = vsel %vm123_vm0, %v98_v30, 0  ;;  %v101_v10 = vld [vmem:[#allocation2 + $0x170] sm:$0xff]  ;;  %v737_v31 = vand.u32 4294901760, %v736_v40  ;;  %v756_v30 = vsub.f32 %v14622_v27, %v21368_v45  ;;  %21370 = vst [vmem:[#allocation95_spill] sm:$0xff] %v14665_v44 }
  0x5b   :  { %v14660_v34 = vand.u32 4294901760, %v254_v46  ;;  %v263_v0 = vsel %vm123_vm0, %v101_v10, 0  ;;  %v747_v40 = vand.u32 4294901760, %v746_v60  ;;  %v766_v45 = vsub.f32 %v14631_v47, %v20641_v29  ;;  %v103_v10 = vld [vmem:[#allocation2 + $0x180] sm:$0xff] }
  0x5c   :  { %21363 = vst [vmem:[#allocation90_spill] sm:$0xff] %v14642_v50  ;;  %v757_v54 = vand.u32 4294901760, %v756_v30 }
  0x5d   :  { %11890 = vmatmul.mubr.f32.gmra.mrb[30].mxu0 %v697_v1  ;;  %v14654_v1 = vsub.f32 %v245_v48, %v14633_v43  ;;  %21369 = vst [vmem:[#allocation94_spill] sm:$0xff] %v14660_v34  ;;  %v14668_v48 = vsub.f32 %v251_v55, %v14646_v25  ;;  %v14680_v24 = vsub.f32 %v254_v46, %v14660_v34  ;;  %v14682_v55 = vand.u32 4294901760, %v263_v0 }
  0x5e   :  { %11892 = vmatprep.mubr.f32.mxu0 %v707_v62  ;;  %v260_v62 = vsel %vm123_vm0, %v100_v3, 0  ;;  %v14675_v3 = vand.u32 4294901760, %v257_v23  ;;  %v767_v25 = vand.u32 4294901760, %v766_v45  ;;  %v105_v45 = vld [vmem:[#allocation2 + $0x190] sm:$0xff] }
  0x5f   :  { %21367 = vst [vmem:[#allocation93_spill] sm:$0xff] %v14654_v1  ;;  %21371 = vst [vmem:[#allocation96_spill] sm:$0xff] %v14668_v48  ;;  %v14677_v19 = vand.u32 4294901760, %v260_v62  ;;  %v21377_v30 = vand.u32 4294901760, %v14654_v1  ;;  %v14702_v27 = vsub.f32 %v263_v0, %v14682_v55 }
  0x60   :  { %21372 = vst [vmem:[#allocation97_spill] sm:$0xff] %v14675_v3  ;;  %21374 = vst [vmem:[#allocation99_spill] sm:$0xff] %v14680_v24  ;;  %v14694_v34 = vsub.f32 %v257_v23, %v14675_v3  ;;  %v21385_v3 = vand.u32 4294901760, %v14680_v24 }
  0x61   :  { %11893 = vmatmul.mubr.f32.gmra.mrb[32].mxu0 %v717_v28  ;;  %v102_v28 = vld [vmem:[#allocation2 + $0x178] sm:$0xff]  ;;  %21373 = vst [vmem:[#allocation98_spill] sm:$0xff] %v14677_v19  ;;  %21375 = vst [vmem:[#allocation100_spill] sm:$0xff] %v14682_v55  ;;  %v786_v46 = vsub.f32 %v14654_v1, %v21377_v30  ;;  %v21382_v30 = vand.u32 4294901760, %v14665_v44 }
  0x62   :  { %11895 = vmatprep.mubr.f32.mxu0 %v727_v37  ;;  %v21376_v37 = vand.u32 4294901760, %v14642_v50  ;;  %v266_v47 = vsel %vm123_vm0, %v102_v28, 0  ;;  %21378 = vst [vmem:[#allocation101_spill] sm:$0xff] %v14694_v34  ;;  %21380 = vst [vmem:[#allocation103_spill] sm:$0xff] %v14702_v27 }
  0x63   :  { %v796_v23 = vsub.f32 %v14665_v44, %v21382_v30  ;;  %v816_v30 = vsub.f32 %v14680_v24, %v21385_v3  ;;  %v109_v24 = vld [vmem:[#allocation2 + $0x1b0] sm:$0xff] }
  0x64   :  { %v776_v60 = vsub.f32 %v14642_v50, %v21376_v37  ;;  %v269_v37 = vsel %vm123_vm0, %v103_v10, 0  ;;  %v104_v50 = vld [vmem:[#allocation2 + $0x188] sm:$0xff]  ;;  %v787_v10 = vand.u32 4294901760, %v786_v46  ;;  %v107_v46 = vld [vmem:[#allocation2 + $0x1a0] sm:$0xff]  ;;  %v287_v39 = vsel %vm123_vm0, %v109_v24, 0 }
  0x65   :  { %11896 = vmatmul.mubr.f32.gmra.mrb[34].mxu0 %v737_v31  ;;  %v14697_v31 = vsub.f32 %v260_v62, %v14677_v19  ;;  %v21383_v62 = vand.u32 4294901760, %v14668_v48  ;;  %v14713_v19 = vand.u32 4294901760, %v269_v37  ;;  %v272_v0 = vsel %vm123_vm0, %v104_v50, 0 }
  0x66   :  { %11898 = vmatprep.mubr.f32.mxu0 %v747_v40  ;;  %v14704_v40 = vand.u32 4294901760, %v266_v47  ;;  %v777_v28 = vand.u32 4294901760, %v776_v60  ;;  %v106_v60 = vld [vmem:[#allocation2 + $0x198] sm:$0xff]  ;;  %v21388_v50 = vand.u32 4294901760, %v14694_v34  ;;  %v14766_v24 = vpack.c.bf16 %v14249_v17, %v14247_v16 }
  0x67   :  { %21379 = vst [vmem:[#allocation102_spill] sm:$0xff] %v14697_v31  ;;  %v806_v1 = vsub.f32 %v14668_v48, %v21383_v62  ;;  %21384 = vst [vmem:[#allocation105_spill] sm:$0xff] %v14713_v19  ;;  %v797_v62 = vand.u32 4294901760, %v796_v23  ;;  %v14725_v48 = vand.u32 4294901760, %v272_v0  ;;  %v14731_v55 = vsub.f32 %v269_v37, %v14713_v19  ;;  %v110_v37 = vld [vmem:[#allocation2 + $0x1b8] sm:$0xff] }
  0x68   :  { %21381 = vst [vmem:[#allocation104_spill] sm:$0xff] %v14704_v40  ;;  %v278_v44 = vsel %vm123_vm0, %v106_v60, 0  ;;  %v281_v23 = vsel %vm123_vm0, %v107_v46, 0  ;;  %13159 = vmatprep.subr.bf16.mxu0 %v14766_v24 }
  0x69   :  { %11899 = vmatmul.mubr.f32.gmra.mrb[36].mxu0 %v757_v54  ;;  %v275_v54 = vsel %vm123_vm0, %v105_v45, 0  ;;  %v807_v29 = vand.u32 4294901760, %v806_v1  ;;  %21387 = vst [vmem:[#allocation107_spill] sm:$0xff] %v14725_v48  ;;  %v826_v45 = vsub.f32 %v14694_v34, %v21388_v50  ;;  %21389 = vst [vmem:[#allocation108_spill] sm:$0xff] %v14731_v55  ;;  %v14745_v34 = vsub.f32 %v272_v0, %v14725_v48 }
  0x6a   :  { %11901 = vmatprep.mubr.f32.mxu0 %v767_v25  ;;  %v14723_v25 = vsub.f32 %v266_v47, %v14704_v40  ;;  %v14733_v3 = vand.u32 4294901760, %v275_v54  ;;  %v108_v47 = vld [vmem:[#allocation2 + $0x1a8] sm:$0xff]  ;;  %v21392_v40 = vand.u32 4294901760, %v14702_v27  ;;  %v14747_v60 = vand.u32 4294901760, %v278_v44 }
  0x6b   :  { %21393 = vst [vmem:[#allocation110_spill] sm:$0xff] %v14745_v34  ;;  %v284_v19 = vsel %vm123_vm0, %v108_v47, 0  ;;  %v14762_v47 = vand.u32 4294901760, %v287_v39 }
  0x6c   :  { %21386 = vst [vmem:[#allocation106_spill] sm:$0xff] %v14723_v25  ;;  %21390 = vst [vmem:[#allocation109_spill] sm:$0xff] %v14733_v3  ;;  %v846_v50 = vsub.f32 %v14702_v27, %v21392_v40  ;;  %v14753_v46 = vsub.f32 %v275_v54, %v14733_v3  ;;  %v14755_v40 = vand.u32 4294901760, %v281_v23  ;;  %v111_v27 = vld [vmem:[#allocation2 + $0x1c0] sm:$0xff]  ;;  %v21397_v0 = vand.u32 4294901760, %v14723_v25  ;;  %v113_v54 = vld [vmem:[#allocation2 + $0x1d0] sm:$0xff] }
  0x6d   :  { %11902 = vmatmul.mubr.f32.gmra.mrb[38].mxu0 %v777_v28  ;;  %v21391_v28 = vand.u32 4294901760, %v14697_v31  ;;  %21394 = vst [vmem:[#allocation111_spill] sm:$0xff] %v14747_v60  ;;  %v14760_v48 = vand.u32 4294901760, %v284_v19  ;;  %21399 = vst [vmem:[#allocation115_spill] sm:$0xff] %v14762_v47 }
  0x6e   :  { %11904 = vmatprep.mubr.f32.mxu0 %v787_v10  ;;  %v817_v10 = vand.u32 4294901760, %v816_v30  ;;  %v20682_v30 = vand.u32 4294901760, %v14731_v55  ;;  %21395 = vst [vmem:[#allocation112_spill] sm:$0xff] %v14753_v46  ;;  %21396 = vst [vmem:[#allocation113_spill] sm:$0xff] %v14755_v40  ;;  %v14778_v3 = vsub.f32 %v281_v23, %v14755_v40 }
  0x6f   :  { %v836_v1 = vsub.f32 %v14697_v31, %v21391_v28  ;;  %v827_v28 = vand.u32 4294901760, %v826_v45  ;;  %v856_v31 = vsub.f32 %v14723_v25, %v21397_v0  ;;  %21398 = vst [vmem:[#allocation114_spill] sm:$0xff] %v14760_v48  ;;  %v14770_v45 = vsub.f32 %v278_v44, %v14747_v60 }
  0x70   :  { %v866_v0 = vsub.f32 %v14731_v55, %v20682_v30  ;;  %21401 = vst [vmem:[#allocation117_spill] sm:$0xff] %v14778_v3  ;;  %v14783_v44 = vsub.f32 %v284_v19, %v14760_v48  ;;  %v21405_v25 = vand.u32 4294901760, %v14745_v34  ;;  %v21407_v19 = vand.u32 4294901760, %v14753_v46 }
  0x71   :  { %11905 = vmatmul.mubr.f32.gmra.mrb[40].mxu0 %v797_v62  ;;  %v837_v62 = vand.u32 4294901760, %v836_v1  ;;  %21400 = vst [vmem:[#allocation116_spill] sm:$0xff] %v14770_v45  ;;  %v290_v1 = vsel %vm123_vm0, %v110_v37, 0  ;;  %v14786_v37 = vsub.f32 %v287_v39, %v14762_v47  ;;  %v857_v30 = vand.u32 4294901760, %v856_v31 }
  0x72   :  { %11907 = vmatprep.mubr.f32.mxu0 %v807_v29  ;;  %v847_v29 = vand.u32 4294901760, %v846_v50  ;;  %v112_v50 = vld [vmem:[#allocation2 + $0x1c8] sm:$0xff]  ;;  %21402 = vst [vmem:[#allocation118_spill] sm:$0xff] %v14783_v44  ;;  %v876_v23 = vsub.f32 %v14745_v34, %v21405_v25  ;;  %v867_v17 = vand.u32 4294901760, %v866_v0  ;;  %v886_v39 = vsub.f32 %v14753_v46, %v21407_v19 }
  0x73   :  { %21403 = vst [vmem:[#allocation119_spill] sm:$0xff] %v14786_v37  ;;  %v296_v47 = vsel %vm123_vm0, %v112_v50, 0  ;;  %v299_v31 = vsel %vm123_vm0, %v113_v54, 0  ;;  %v21409_v34 = vand.u32 4294901760, %v14770_v45  ;;  %v21412_v48 = vand.u32 4294901760, %v14778_v3  ;;  %v116_v46 = vld [vmem:[#allocation2 + $0x1e8] sm:$0xff] }
  0x74   :  { %v877_v0 = vand.u32 4294901760, %v876_v23  ;;  %v14813_v50 = vand.u32 4294901760, %v296_v47  ;;  %v887_v54 = vand.u32 4294901760, %v886_v39 }
  0x75   :  { %11908 = vmatmul.mubr.f32.gmra.mrb[42].mxu0 %v817_v10  ;;  %v293_v10 = vsel %vm123_vm0, %v111_v27, 0  ;;  %v896_v19 = vsub.f32 %v14770_v45, %v21409_v34  ;;  %v906_v25 = vsub.f32 %v14778_v3, %v21412_v48  ;;  %v21414_v34 = vand.u32 4294901760, %v14783_v44 }
  0x76   :  { %11910 = vmatprep.mubr.f32.mxu0 %v827_v28  ;;  %v14788_v28 = vand.u32 4294901760, %v290_v1  ;;  %v14794_v55 = vand.u32 4294901760, %v293_v10  ;;  %21411 = vst [vmem:[#allocation124_spill] sm:$0xff] %v14813_v50  ;;  %v21415_v45 = vand.u32 4294901760, %v14786_v37 }
  0x77   :  { %v897_v48 = vand.u32 4294901760, %v896_v19 }
  0x78   :  { %21404 = vst [vmem:[#allocation120_spill] sm:$0xff] %v14788_v28  ;;  %21406 = vst [vmem:[#allocation121_spill] sm:$0xff] %v14794_v55  ;;  %v14805_v27 = vsub.f32 %v290_v1, %v14788_v28  ;;  %v14811_v16 = vsub.f32 %v293_v10, %v14794_v55  ;;  %v14818_v1 = vand.u32 4294901760, %v299_v31  ;;  %v916_v10 = vsub.f32 %v14783_v44, %v21414_v34  ;;  %v117_v55 = vld [vmem:[#allocation2 + $0x1f0] sm:$0xff] }
  0x79   :  { %11911 = vmatmul.mubr.f32.gmra.mrb[44].mxu0 %v837_v62  ;;  %v114_v62 = vld [vmem:[#allocation2 + $0x1d8] sm:$0xff]  ;;  %v907_v28 = vand.u32 4294901760, %v906_v25  ;;  %v311_v39 = vsel %vm123_vm0, %v117_v55, 0 }
  0x7a   :  { %11913 = vmatprep.mubr.f32.mxu0 %v847_v29  ;;  %21408 = vst [vmem:[#allocation122_spill] sm:$0xff] %v14805_v27  ;;  %v115_v29 = vld [vmem:[#allocation2 + $0x1e0] sm:$0xff]  ;;  %21410 = vst [vmem:[#allocation123_spill] sm:$0xff] %v14811_v16  ;;  %v14836_v34 = vsub.f32 %v299_v31, %v14818_v1  ;;  %v917_v19 = vand.u32 4294901760, %v916_v10  ;;  %v21419_v3 = vand.u32 4294901760, %v14805_v27 }
  0x7b   :  { %21413 = vst [vmem:[#allocation125_spill] sm:$0xff] %v14818_v1  ;;  %v305_v23 = vsel %vm123_vm0, %v115_v29, 0 }
  0x7c   :  { %21417 = vst [vmem:[#allocation127_spill] sm:$0xff] %v14836_v34  ;;  %v14838_v44 = vand.u32 4294901760, %v305_v23  ;;  %v20714_v55 = vand.u32 4294901760, %v14836_v34 }
  0x7d   :  { %11914 = vmatmul.mubr.f32.gmra.mrb[46].mxu0 %v857_v30  ;;  %v302_v30 = vsel %vm123_vm0, %v114_v62, 0  ;;  %v14831_v62 = vsub.f32 %v296_v47, %v14813_v50  ;;  %v936_v47 = vsub.f32 %v14805_v27, %v21419_v3 }
  0x7e   :  { %11916 = vmatprep.mubr.f32.mxu0 %v867_v17  ;;  %v926_v17 = vsub.f32 %v14786_v37, %v21415_v45  ;;  %v14833_v29 = vand.u32 4294901760, %v302_v30  ;;  %21418 = vst [vmem:[#allocation128_spill] sm:$0xff] %v14838_v44  ;;  %v308_v45 = vsel %vm123_vm0, %v116_v46, 0  ;;  %v14856_v10 = vsub.f32 %v305_v23, %v14838_v44 }
  0x7f   :  { %v20713_v31 = vand.u32 4294901760, %v14831_v62  ;;  %v14852_v46 = vand.u32 4294901760, %v308_v45  ;;  %v966_v27 = vsub.f32 %v14836_v34, %v20714_v55 }
  0x80   :  { %21416 = vst [vmem:[#allocation126_spill] sm:$0xff] %v14833_v29  ;;  %v927_v37 = vand.u32 4294901760, %v926_v17  ;;  %v14850_v1 = vsub.f32 %v302_v30, %v14833_v29  ;;  %21423 = vst [vmem:[#allocation131_spill] sm:$0xff] %v14856_v10  ;;  %v14858_v17 = vand.u32 4294901760, %v311_v39 }
  0x81   :  { %11917 = vmatmul.mubr.f32.gmra.mrb[48].mxu0 %v877_v0  ;;  %v118_v0 = vld [vmem:[#allocation2 + $0x1f8] sm:$0xff]  ;;  %21422 = vst [vmem:[#allocation130_spill] sm:$0xff] %v14852_v46 }
  0x82   :  { %11919 = vmatprep.mubr.f32.mxu0 %v887_v54  ;;  %v21420_v54 = vand.u32 4294901760, %v14811_v16  ;;  %21421 = vst [vmem:[#allocation129_spill] sm:$0xff] %v14850_v1  ;;  %21424 = vst [vmem:[#allocation132_spill] sm:$0xff] %v14858_v17  ;;  %v314_v3 = vsel %vm123_vm0, %v118_v0, 0  ;;  %v20715_v30 = vand.u32 4294901760, %v14850_v1  ;;  %v20721_v0 = vand.u32 4294901760, %v14856_v10 }
  0x84   :  { %v946_v25 = vsub.f32 %v14811_v16, %v21420_v54  ;;  %v956_v54 = vsub.f32 %v14831_v62, %v20713_v31  ;;  %v14866_v16 = vsub.f32 %v308_v45, %v14852_v46  ;;  %v976_v45 = vsub.f32 %v14850_v1, %v20715_v30 }
  0x85   :  { %11920 = vmatmul.mubr.f32.gmra.mrb[50].mxu0 %v897_v48  ;;  %v937_v48 = vand.u32 4294901760, %v936_v47  ;;  %v986_v55 = vsub.f32 %v14856_v10, %v20721_v0  ;;  %v21442_v0 = vld [vmem:[#allocation105_spill] sm:$0xff] }
  0x86   :  { %11922 = vmatprep.mubr.f32.mxu0 %v907_v28  ;;  %v14868_v28 = vand.u32 4294901760, %v314_v3  ;;  %v947_v23 = vand.u32 4294901760, %v946_v25  ;;  %v957_v47 = vand.u32 4294901760, %v956_v54  ;;  %v20720_v31 = vand.u32 4294901760, %v14866_v16 }
  0x87   :  { %v967_v25 = vand.u32 4294901760, %v966_v27  ;;  %v987_v1 = vand.u32 4294901760, %v986_v55  ;;  %v21430_v55 = vld [vmem:[#allocation79_spill] sm:$0xff] }
  0x88   :  { %21425 = vst [vmem:[#allocation133_spill] sm:$0xff] %v14868_v28  ;;  %v996_v54 = vsub.f32 %v14866_v16, %v20720_v31  ;;  %v21441_v31 = vld [vmem:[#allocation104_spill] sm:$0xff] }
  0x89   :  { %11923 = vmatmul.mubr.f32.gmra.mrb[52].mxu0 %v917_v19  ;;  %v14875_v19 = vsub.f32 %v311_v39, %v14858_v17 }
  0x8a   :  { %11925 = vmatprep.mubr.f32.mxu0 %v927_v37  ;;  %v14882_v37 = vsub.f32 %v314_v3, %v14868_v28  ;;  %v997_v3 = vand.u32 4294901760, %v996_v54  ;;  %v21433_v54 = vld [vmem:[#allocation85_spill] sm:$0xff] }
  0x8b   :  { %21426 = vst [vmem:[#allocation134_spill] sm:$0xff] %v14875_v19  ;;  %v20719_v39 = vand.u32 4294901760, %v14875_v19 }
  0x8c   :  { %21427 = vst [vmem:[#allocation135_spill] sm:$0xff] %v14882_v37  ;;  %v20718_v30 = vand.u32 4294901760, %v14882_v37 }
  0x8d   :  { %11926 = vmatmul.mubr.f32.gmra.mrb[54].mxu0 %v937_v48  ;;  %v977_v48 = vand.u32 4294901760, %v976_v45  ;;  %v1006_v27 = vsub.f32 %v14875_v19, %v20719_v39  ;;  %v21440_v39 = vld [vmem:[#allocation100_spill] sm:$0xff] }
  0x8e   :  { %11928 = vmatprep.mubr.f32.mxu0 %v947_v23  ;;  %v1016_v23 = vsub.f32 %v14882_v37, %v20718_v30  ;;  %v21439_v30 = vld [vmem:[#allocation98_spill] sm:$0xff] }
  0x90   :  { %v1017_v45 = vand.u32 4294901760, %v1016_v23  ;;  %v21436_v23 = vld [vmem:[#allocation92_spill] sm:$0xff] }
  0x91   :  { %11929 = vmatmul.mubr.f32.gmra.mrb[56].mxu0 %v957_v47  ;;  %v1007_v47 = vand.u32 4294901760, %v1006_v27  ;;  %v21434_v27 = vld [vmem:[#allocation87_spill] sm:$0xff] }
  0x92   :  { %11931 = vmatprep.mubr.f32.mxu0 %v967_v25  ;;  %v21431_v25 = vld [vmem:[#allocation81_spill] sm:$0xff] }
  0x95   :  { %11932 = vmatmul.mubr.f32.gmra.mrb[58].mxu0 %v977_v48  ;;  %v21432_v48 = vld [vmem:[#allocation83_spill] sm:$0xff] }
  0x96   :  { %11934 = vmatprep.mubr.f32.mxu0 %v987_v1  ;;  %v21429_v1 = vld [vmem:[#allocation77_spill] sm:$0xff] }
  0x99   :  { %11935 = vmatmul.mubr.f32.gmra.mrb[60].mxu0 %v997_v3  ;;  %v21435_v3 = vld [vmem:[#allocation91_spill] sm:$0xff] }
  0x9a   :  { %11937 = vmatprep.mubr.f32.mxu0 %v1007_v47  ;;  %v21437_v47 = vld [vmem:[#allocation94_spill] sm:$0xff] }
  0x9d   :  { %11938 = vmatmul.mubr.f32.gmra.mrb[62].mxu0 %v1017_v45  ;;  %v21438_v45 = vld [vmem:[#allocation97_spill] sm:$0xff] }
  0x9e   :  { %11944 = vmatprep.mubr.f32.mxu0 %v14238_v9  ;;  %v21509_v9 = vld [vmem:[#allocation122_spill] sm:$0xff] }
  0xa1   :  { %11945 = vmatmul.mubr.f32.vlgmr.msra.gmra.mrb[0].mxu0 %v14245_v15  ;;  %v21508_v15 = vld [vmem:[#allocation119_spill] sm:$0xff] }
  0xa2   :  { %13161 = vmatpush3.bf16.msra.mxu0 %v14766_v24  ;;  %11947 = vmatprep.mubr.f32.mxu0 %v14254_v20  ;;  %v21428_v24 = vld [vmem:[#allocation75_spill] sm:$0xff]  ;;  %v21507_v20 = vld [vmem:[#allocation118_spill] sm:$0xff] }
  0xa3   :  { %13163 = vmatprep.subr.bf16.mxu0 %v14243_v14 }
  0xa5   :  { %11948 = vmatmul.mubr.f32.gmra.mrb[2].mxu0 %v14256_v21  ;;  %v21506_v21 = vld [vmem:[#allocation117_spill] sm:$0xff] }
  0xa6   :  { %11950 = vmatprep.mubr.f32.mxu0 %v14265_v26  ;;  %v21505_v26 = vld [vmem:[#allocation116_spill] sm:$0xff] }
  0xa9   :  { %11951 = vmatmul.mubr.f32.gmra.mrb[4].mxu0 %v14291_v38  ;;  %v21504_v38 = vld [vmem:[#allocation112_spill] sm:$0xff] }
  0xaa   :  { %11953 = vmatprep.mubr.f32.mxu0 %v14311_v59  ;;  %v21503_v59 = vld [vmem:[#allocation110_spill] sm:$0xff] }
  0xad   :  { %11954 = vmatmul.mubr.f32.gmra.mrb[6].mxu0 %v14322_v4  ;;  %v21502_v4 = vld [vmem:[#allocation108_spill] sm:$0xff] }
  0xae   :  { %11956 = vmatprep.mubr.f32.mxu0 %v14324_v5  ;;  %v21501_v5 = vld [vmem:[#allocation106_spill] sm:$0xff] }
  0xb1   :  { %11957 = vmatmul.mubr.f32.gmra.mrb[8].mxu0 %v14326_v6  ;;  %v21500_v6 = vld [vmem:[#allocation103_spill] sm:$0xff] }
  0xb2   :  { %11959 = vmatprep.mubr.f32.mxu0 %v14341_v32  ;;  %v21499_v32 = vld [vmem:[#allocation102_spill] sm:$0xff] }
  0xb5   :  { %11960 = vmatmul.mubr.f32.gmra.mrb[10].mxu0 %v14343_v33  ;;  %v21498_v33 = vld [vmem:[#allocation101_spill] sm:$0xff] }
  0xb6   :  { %11962 = vmatprep.mubr.f32.mxu0 %v14345_v35  ;;  %v21497_v35 = vld [vmem:[#allocation99_spill] sm:$0xff] }
  0xb9   :  { %11963 = vmatmul.mubr.f32.gmra.mrb[12].mxu0 %v14369_v53  ;;  %v21496_v53 = vld [vmem:[#allocation96_spill] sm:$0xff] }
  0xba   :  { %11965 = vmatprep.mubr.f32.mxu0 %v14391_v12  ;;  %v21495_v12 = vld [vmem:[#allocation95_spill] sm:$0xff] }
  0xbd   :  { %11966 = vmatmul.mubr.f32.gmra.mrb[14].mxu0 %v14395_v56  ;;  %v21494_v56 = vld [vmem:[#allocation93_spill] sm:$0xff] }
  0xbe   :  { %11968 = vmatprep.mubr.f32.mxu0 %v14400_v41  ;;  %v21493_v41 = vld [vmem:[#allocation90_spill] sm:$0xff] }
  0xc1   :  { %11969 = vmatmul.mubr.f32.gmra.mrb[16].mxu0 %v14406_v13  ;;  %v21492_v13 = vld [vmem:[#allocation88_spill] sm:$0xff] }
  0xc2   :  { %11971 = vmatprep.mubr.f32.mxu0 %v14417_v7  ;;  %v21491_v7 = vld [vmem:[#allocation86_spill] sm:$0xff] }
  0xc5   :  { %11972 = vmatmul.mubr.f32.gmra.mrb[18].mxu0 %v14423_v49  ;;  %v21490_v49 = vld [vmem:[#allocation84_spill] sm:$0xff] }
  0xc6   :  { %11974 = vmatprep.mubr.f32.mxu0 %v14433_v51  ;;  %v21489_v51 = vld [vmem:[#allocation82_spill] sm:$0xff] }
  0xc9   :  { %11975 = vmatmul.mubr.f32.gmra.mrb[20].mxu0 %v14446_v36  ;;  %v21488_v36 = vld [vmem:[#allocation80_spill] sm:$0xff] }
  0xca   :  { %11977 = vmatprep.mubr.f32.mxu0 %v14453_v63  ;;  %v21487_v63 = vld [vmem:[#allocation78_spill] sm:$0xff] }
  0xcd   :  { %11978 = vmatmul.mubr.f32.gmra.mrb[22].mxu0 %v14467_v61  ;;  %v21486_v61 = vld [vmem:[#allocation76_spill] sm:$0xff] }
  0xce   :  { %11980 = vmatprep.mubr.f32.mxu0 %v14473_v57  ;;  %v21485_v57 = vld [vmem:[#allocation74_spill] sm:$0xff] }
  0xd1   :  { %11981 = vmatmul.mubr.f32.gmra.mrb[24].mxu0 %v14489_v11  ;;  %v21484_v11 = vld [vmem:[#allocation73_spill] sm:$0xff] }
  0xd2   :  { %11983 = vmatprep.mubr.f32.mxu0 %v14494_v2  ;;  %v21483_v2 = vld [vmem:[#allocation70_spill] sm:$0xff] }
  0xd5   :  { %11984 = vmatmul.mubr.f32.gmra.mrb[26].mxu0 %v14496_v42  ;;  %v21482_v42 = vld [vmem:[#allocation68_spill] sm:$0xff] }
  0xd6   :  { %11986 = vmatprep.mubr.f32.mxu0 %v14514_v58  ;;  %v21481_v58 = vld [vmem:[#allocation66_spill] sm:$0xff] }
  0xd9   :  { %11987 = vmatmul.mubr.f32.gmra.mrb[28].mxu0 %v14523_v52  ;;  %v21480_v52 = vld [vmem:[#allocation64_spill] sm:$0xff] }
  0xda   :  { %11989 = vmatprep.mubr.f32.mxu0 %v14534_v18  ;;  %v21479_v18 = vld [vmem:[#allocation63_spill] sm:$0xff] }
  0xdd   :  { %11990 = vmatmul.mubr.f32.gmra.mrb[30].mxu0 %v14541_v22  ;;  %v21478_v22 = vld [vmem:[#allocation59_spill] sm:$0xff] }
  0xde   :  { %11992 = vmatprep.mubr.f32.mxu0 %v14546_v8  ;;  %v21477_v8 = vld [vmem:[#allocation58_spill] sm:$0xff] }
  0xe1   :  { %11993 = vmatmul.mubr.f32.gmra.mrb[32].mxu0 %v21428_v24  ;;  %v21476_v24 = vld [vmem:[#allocation55_spill] sm:$0xff] }
  0xe2   :  { %11995 = vmatprep.mubr.f32.mxu0 %v21429_v1  ;;  %v21475_v1 = vld [vmem:[#allocation54_spill] sm:$0xff] }
  0xe5   :  { %11996 = vmatmul.mubr.f32.gmra.mrb[34].mxu0 %v21430_v55  ;;  %v21474_v55 = vld [vmem:[#allocation52_spill] sm:$0xff] }
  0xe6   :  { %11998 = vmatprep.mubr.f32.mxu0 %v21431_v25  ;;  %v21473_v25 = vld [vmem:[#allocation50_spill] sm:$0xff] }
  0xe9   :  { %11999 = vmatmul.mubr.f32.gmra.mrb[36].mxu0 %v21432_v48  ;;  %v21472_v48 = vld [vmem:[#allocation48_spill] sm:$0xff] }
  0xea   :  { %12001 = vmatprep.mubr.f32.mxu0 %v21433_v54  ;;  %v21443_v54 = vld [vmem:[#allocation107_spill] sm:$0xff] }
  0xed   :  { %12002 = vmatmul.mubr.f32.gmra.mrb[38].mxu0 %v21434_v27  ;;  %v21444_v27 = vld [vmem:[#allocation109_spill] sm:$0xff] }
  0xee   :  { %12004 = vmatprep.mubr.f32.mxu0 %v14633_v43  ;;  %v21471_v43 = vld [vmem:[#allocation46_spill] sm:$0xff] }
  0xf1   :  { %12005 = vmatmul.mubr.f32.gmra.mrb[40].mxu0 %v21435_v3  ;;  %v21470_v3 = vld [vmem:[#allocation44_spill] sm:$0xff] }
  0xf2   :  { %12007 = vmatprep.mubr.f32.mxu0 %v21436_v23  ;;  %v21445_v23 = vld [vmem:[#allocation114_spill] sm:$0xff] }
  0xf5   :  { %12008 = vmatmul.mubr.f32.gmra.mrb[42].mxu0 %v21437_v47  ;;  %v21446_v47 = vld [vmem:[#allocation115_spill] sm:$0xff] }
  0xf6   :  { %12010 = vmatprep.mubr.f32.mxu0 %v21438_v45  ;;  %v21447_v45 = vld [vmem:[#allocation120_spill] sm:$0xff] }
  0xf9   :  { %12011 = vmatmul.mubr.f32.gmra.mrb[44].mxu0 %v21439_v30  ;;  %v21448_v30 = vld [vmem:[#allocation121_spill] sm:$0xff] }
  0xfa   :  { %12013 = vmatprep.mubr.f32.mxu0 %v21440_v39  ;;  %v21469_v39 = vld [vmem:[#allocation42_spill] sm:$0xff] }
  0xfd   :  { %12014 = vmatmul.mubr.f32.gmra.mrb[46].mxu0 %v21441_v31  ;;  %v21449_v31 = vld [vmem:[#allocation125_spill] sm:$0xff] }
  0xfe   :  { %12016 = vmatprep.mubr.f32.mxu0 %v21442_v0  ;;  %v21468_v0 = vld [vmem:[#allocation40_spill] sm:$0xff] }
 0x101   :  { %12017 = vmatmul.mubr.f32.gmra.mrb[48].mxu0 %v21443_v54  ;;  %v21467_v54 = vld [vmem:[#allocation37_spill] sm:$0xff] }
 0x102   :  { %12019 = vmatprep.mubr.f32.mxu0 %v21444_v27  ;;  %v21466_v27 = vld [vmem:[#allocation35_spill] sm:$0xff] }
 0x105   :  { %12020 = vmatmul.mubr.f32.gmra.mrb[50].mxu0 %v14747_v60 }
 0x106   :  { %12022 = vmatprep.mubr.f32.mxu0 %v14755_v40  ;;  %v21454_v40 = vld [vmem:[#allocation11_spill] sm:$0xff] }
 0x109   :  { %12023 = vmatmul.mubr.f32.gmra.mrb[52].mxu0 %v21445_v23  ;;  %v21450_v23 = vld [vmem:[#allocation12_spill] sm:$0xff] }
 0x10a   :  { %12025 = vmatprep.mubr.f32.mxu0 %v21446_v47  ;;  %v21451_v47 = vld [vmem:[#allocation15_spill] sm:$0xff] }
 0x10d   :  { %12026 = vmatmul.mubr.f32.gmra.mrb[54].mxu0 %v21447_v45  ;;  %v21452_v45 = vld [vmem:[#allocation10_spill] sm:$0xff] }
 0x10e   :  { %12028 = vmatprep.mubr.f32.mxu0 %v21448_v30  ;;  %v21453_v30 = vand.u32 4294901760, %v21452_v45  ;;  %v21462_v45 = vld [vmem:[#allocation28_spill] sm:$0xff] }
 0x111   :  { %12029 = vmatmul.mubr.f32.gmra.mrb[56].mxu0 %v14813_v50  ;;  %v21455_v50 = vand.u32 4294901760, %v21454_v40  ;;  %v21463_v40 = vld [vmem:[#allocation29_spill] sm:$0xff] }
 0x112   :  { %12031 = vmatprep.mubr.f32.mxu0 %v21449_v31  ;;  %v21461_v31 = vld [vmem:[#allocation27_spill] sm:$0xff] }
 0x113   :  { %v14970_v60 = vpack.c.bf16 %v21455_v50, %v21453_v30  ;;  %v21464_v50 = vld [vmem:[#allocation33_spill] sm:$0xff]  ;;  %v21465_v30 = vld [vmem:[#allocation34_spill] sm:$0xff] }
 0x115   :  { %12032 = vmatmul.mubr.f32.gmra.mrb[58].mxu0 %v14833_v29  ;;  %v21456_v29 = vld [vmem:[#allocation17_spill] sm:$0xff] }
 0x116   :  { %12034 = vmatprep.mubr.f32.mxu0 %v14838_v44  ;;  %v21460_v44 = vld [vmem:[#allocation23_spill] sm:$0xff] }
 0x119   :  { %12035 = vmatmul.mubr.f32.gmra.mrb[60].mxu0 %v14852_v46  ;;  %v21457_v46 = vld [vmem:[#allocation18_spill] sm:$0xff] }
 0x11a   :  { %12037 = vmatprep.mubr.f32.mxu0 %v14858_v17  ;;  %v21458_v17 = vld [vmem:[#allocation19_spill] sm:$0xff] }
 0x11d   :  { %12038 = vmatmul.mubr.f32.gmra.mrb[62].mxu0 %v14868_v28  ;;  %v21459_v28 = vld [vmem:[#allocation21_spill] sm:$0xff] }
 0x11e   :  { %12044 = vmatprep.mubr.f32.mxu0 %v21450_v23 }
 0x121   :  { %12045 = vmatmul.mubr.f32.vlgmr.msra.gmra.mrb[0].mxu0 %v21451_v47 }
 0x122   :  { %13165 = vmatpush3.bf16.msra.mxu0 %v14243_v14  ;;  %12047 = vmatprep.mubr.f32.mxu0 %v21456_v29 }
 0x123   :  { %13167 = vmatprep.subr.bf16.mxu0 %v14970_v60 }
 0x125   :  { %12048 = vmatmul.mubr.f32.gmra.mrb[2].mxu0 %v21457_v46 }
 0x126   :  { %12050 = vmatprep.mubr.f32.mxu0 %v21458_v17 }
 0x129   :  { %12051 = vmatmul.mubr.f32.gmra.mrb[4].mxu0 %v21459_v28 }
 0x12a   :  { %12053 = vmatprep.mubr.f32.mxu0 %v21460_v44 }
 0x12d   :  { %12054 = vmatmul.mubr.f32.gmra.mrb[6].mxu0 %v21461_v31 }
 0x12e   :  { %12056 = vmatprep.mubr.f32.mxu0 %v21462_v45 }
 0x131   :  { %12057 = vmatmul.mubr.f32.gmra.mrb[8].mxu0 %v21463_v40 }
 0x132   :  { %12059 = vmatprep.mubr.f32.mxu0 %v21464_v50 }
 0x135   :  { %12060 = vmatmul.mubr.f32.gmra.mrb[10].mxu0 %v21465_v30 }
 0x136   :  { %12062 = vmatprep.mubr.f32.mxu0 %v21466_v27 }
 0x139   :  { %12063 = vmatmul.mubr.f32.gmra.mrb[12].mxu0 %v21467_v54 }
 0x13a   :  { %12065 = vmatprep.mubr.f32.mxu0 %v21468_v0 }
 0x13d   :  { %12066 = vmatmul.mubr.f32.gmra.mrb[14].mxu0 %v21469_v39 }
 0x13e   :  { %12068 = vmatprep.mubr.f32.mxu0 %v21470_v3 }
 0x141   :  { %12069 = vmatmul.mubr.f32.gmra.mrb[16].mxu0 %v21471_v43 }
 0x142   :  { %12071 = vmatprep.mubr.f32.mxu0 %v21472_v48 }
 0x145   :  { %12072 = vmatmul.mubr.f32.gmra.mrb[18].mxu0 %v21473_v25 }
 0x146   :  { %12074 = vmatprep.mubr.f32.mxu0 %v21474_v55 }
 0x149   :  { %12075 = vmatmul.mubr.f32.gmra.mrb[20].mxu0 %v21475_v1 }
 0x14a   :  { %12077 = vmatprep.mubr.f32.mxu0 %v21476_v24 }
 0x14d   :  { %12078 = vmatmul.mubr.f32.gmra.mrb[22].mxu0 %v21477_v8 }
 0x14e   :  { %12080 = vmatprep.mubr.f32.mxu0 %v21478_v22 }
 0x151   :  { %12081 = vmatmul.mubr.f32.gmra.mrb[24].mxu0 %v21479_v18 }
 0x152   :  { %12083 = vmatprep.mubr.f32.mxu0 %v21480_v52 }
 0x155   :  { %12084 = vmatmul.mubr.f32.gmra.mrb[26].mxu0 %v21481_v58 }
 0x156   :  { %12086 = vmatprep.mubr.f32.mxu0 %v21482_v42 }
 0x159   :  { %12087 = vmatmul.mubr.f32.gmra.mrb[28].mxu0 %v21483_v2 }
 0x15a   :  { %12089 = vmatprep.mubr.f32.mxu0 %v21484_v11 }
 0x15d   :  { %12090 = vmatmul.mubr.f32.gmra.mrb[30].mxu0 %v21485_v57 }
 0x15e   :  { %12092 = vmatprep.mubr.f32.mxu0 %v21486_v61 }
 0x161   :  { %12093 = vmatmul.mubr.f32.gmra.mrb[32].mxu0 %v21487_v63 }
 0x162   :  { %12095 = vmatprep.mubr.f32.mxu0 %v21488_v36 }
 0x165   :  { %12096 = vmatmul.mubr.f32.gmra.mrb[34].mxu0 %v21489_v51 }
 0x166   :  { %12098 = vmatprep.mubr.f32.mxu0 %v21490_v49 }
 0x169   :  { %12099 = vmatmul.mubr.f32.gmra.mrb[36].mxu0 %v21491_v7 }
 0x16a   :  { %12101 = vmatprep.mubr.f32.mxu0 %v21492_v13 }
 0x16d   :  { %12102 = vmatmul.mubr.f32.gmra.mrb[38].mxu0 %v21493_v41 }
 0x16e   :  { %12104 = vmatprep.mubr.f32.mxu0 %v21494_v56 }
 0x171   :  { %12105 = vmatmul.mubr.f32.gmra.mrb[40].mxu0 %v21495_v12 }
 0x172   :  { %12107 = vmatprep.mubr.f32.mxu0 %v21496_v53 }
 0x175   :  { %12108 = vmatmul.mubr.f32.gmra.mrb[42].mxu0 %v21497_v35 }
 0x176   :  { %12110 = vmatprep.mubr.f32.mxu0 %v21498_v33 }
 0x179   :  { %12111 = vmatmul.mubr.f32.gmra.mrb[44].mxu0 %v21499_v32  ;;  %v21510_v32 = vld [vmem:[#allocation123_spill] sm:$0xff] }
 0x17a   :  { %12113 = vmatprep.mubr.f32.mxu0 %v21500_v6 }
 0x17d   :  { %12114 = vmatmul.mubr.f32.gmra.mrb[46].mxu0 %v21501_v5 }
 0x17e   :  { %12116 = vmatprep.mubr.f32.mxu0 %v21502_v4  ;;  %v21511_v4 = vld [vmem:[#allocation129_spill] sm:$0xff] }
 0x181   :  { %12117 = vmatmul.mubr.f32.gmra.mrb[48].mxu0 %v21503_v59 }
 0x182   :  { %12119 = vmatprep.mubr.f32.mxu0 %v21504_v38 }
 0x185   :  { %12120 = vmatmul.mubr.f32.gmra.mrb[50].mxu0 %v21505_v26 }
 0x186   :  { %12122 = vmatprep.mubr.f32.mxu0 %v21506_v21 }
 0x189   :  { %12123 = vmatmul.mubr.f32.gmra.mrb[52].mxu0 %v21507_v20 }
 0x18a   :  { %12125 = vmatprep.mubr.f32.mxu0 %v21508_v15  ;;  %v21512_v15 = vand.u32 4294901760, %v21450_v23 }
 0x18d   :  { %12126 = vmatmul.mubr.f32.gmra.mrb[54].mxu0 %v21509_v9  ;;  %v21513_v9 = vand.u32 4294901760, %v21451_v47 }
 0x18e   :  { %12128 = vmatprep.mubr.f32.mxu0 %v21510_v32 }
 0x191   :  { %12129 = vmatmul.mubr.f32.gmra.mrb[56].mxu0 %v14831_v62 }
 0x192   :  { %12131 = vmatprep.mubr.f32.mxu0 %v14836_v34  ;;  %v21514_v34 = vand.u32 4294901760, %v21456_v29  ;;  %v21521_v29 = vand.u32 4294901760, %v21463_v40 }
 0x195   :  { %12132 = vmatmul.mubr.f32.gmra.mrb[58].mxu0 %v21511_v4 }
 0x196   :  { %12134 = vmatprep.mubr.f32.mxu0 %v14856_v10  ;;  %v21515_v10 = vand.u32 4294901760, %v21457_v46  ;;  %v21523_v46 = vand.u32 4294901760, %v21465_v30 }
 0x199   :  { %12135 = vmatmul.mubr.f32.gmra.mrb[60].mxu0 %v14866_v16 }
 0x19a   :  { %12137 = vmatprep.mubr.f32.mxu0 %v14875_v19  ;;  %v21516_v19 = vand.u32 4294901760, %v21458_v17  ;;  %v21527_v17 = vand.u32 4294901760, %v21469_v39  ;;  %v21534_v39 = vand.u32 4294901760, %v21476_v24  ;;  %v21541_v24 = vand.u32 4294901760, %v21483_v2 }
 0x19b   :  { %v21548_v2 = vand.u32 4294901760, %v21490_v49  ;;  %v21555_v49 = vand.u32 4294901760, %v21497_v35  ;;  %v21564_v35 = vand.u32 4294901760, %v21504_v38  ;;  %v21573_v38 = vand.u32 4294901760, %v14831_v62  ;;  %v21584_v62 = vld [vmem:[#allocation8_spill] sm:$0xff] }
 0x19d   :  { %12138 = vmatmul.mubr.f32.gmra.mrb[62].mxu0 %v14882_v37  ;;  %v21517_v37 = vand.u32 4294901760, %v21459_v28  ;;  %v21528_v28 = vand.u32 4294901760, %v21470_v3  ;;  %v21535_v3 = vand.u32 4294901760, %v21477_v8  ;;  %v21542_v8 = vand.u32 4294901760, %v21484_v11 }
 0x19e   :  { %12144 = vmatprep.mubr.f32.mxu0 %v21512_v15  ;;  %v21518_v15 = vand.u32 4294901760, %v21460_v44  ;;  %v21525_v44 = vand.u32 4294901760, %v21467_v54  ;;  %v21532_v54 = vand.u32 4294901760, %v21474_v55  ;;  %v21539_v55 = vand.u32 4294901760, %v21481_v58 }
 0x19f   :  { %v21546_v58 = vand.u32 4294901760, %v21488_v36  ;;  %v21549_v11 = vand.u32 4294901760, %v21491_v7  ;;  %v21553_v36 = vand.u32 4294901760, %v21495_v12  ;;  %v21556_v7 = vand.u32 4294901760, %v21498_v33  ;;  %v21561_v12 = vld [vmem:[#allocation108_spill] sm:$0xff] }
 0x1a0   :  { %v21562_v47 = vand.u32 4294901760, %v21561_v12  ;;  %v21565_v33 = vand.u32 4294901760, %v21505_v26  ;;  %v21574_v26 = vld [vmem:[#allocation127_spill] sm:$0xff] }
 0x1a1   :  { %12145 = vmatmul.mubr.f32.vlgmr.msra.gmra.mrb[0].mxu0 %v21513_v9  ;;  %v21519_v9 = vand.u32 4294901760, %v21461_v31  ;;  %v21526_v31 = vand.u32 4294901760, %v21468_v0  ;;  %v21533_v0 = vand.u32 4294901760, %v21475_v1  ;;  %v21540_v1 = vand.u32 4294901760, %v21482_v42  ;;  %v21625_v12 = vld [vmem:[#allocation91_spill] sm:$0xff] }
 0x1a2   :  { %13169 = vmatpush3.bf16.msra.mxu0 %v14970_v60  ;;  %12147 = vmatprep.mubr.f32.mxu0 %v21514_v34  ;;  %v21520_v60 = vand.u32 4294901760, %v21462_v45  ;;  %v21522_v34 = vand.u32 4294901760, %v21464_v50  ;;  %v21547_v42 = vand.u32 4294901760, %v21489_v51  ;;  %v21554_v51 = vand.u32 4294901760, %v21496_v53  ;;  %v21570_v50 = vld [vmem:[#allocation122_spill] sm:$0xff] }
 0x1a3   :  { %13171 = vmatprep.subr.bf16.mxu0 %v14243_v14  ;;  %v21563_v53 = vand.u32 4294901760, %v21503_v59  ;;  %v21566_v45 = vand.u32 4294901760, %v21506_v21  ;;  %v21571_v30 = vand.u32 4294901760, %v21570_v50  ;;  %v21572_v59 = vand.u32 4294901760, %v21510_v32  ;;  %v21582_v32 = vld [vmem:[#allocation135_spill] sm:$0xff]  ;;  %v21634_v50 = vld [vmem:[#allocation109_spill] sm:$0xff] }
 0x1a4   :  { %v21576_v21 = vand.u32 4294901760, %v21511_v4  ;;  %v21586_v4 = vld [vmem:[#allocation13_spill] sm:$0xff] }
 0x1a5   :  { %12148 = vmatmul.mubr.f32.gmra.mrb[2].mxu0 %v21515_v10  ;;  %v21524_v10 = vand.u32 4294901760, %v21466_v27  ;;  %v21531_v27 = vand.u32 4294901760, %v21473_v25  ;;  %v21538_v25 = vand.u32 4294901760, %v21480_v52  ;;  %v21545_v52 = vand.u32 4294901760, %v21487_v63 }
 0x1a6   :  { %12150 = vmatprep.mubr.f32.mxu0 %v21516_v19  ;;  %v21529_v19 = vand.u32 4294901760, %v21471_v43  ;;  %v21536_v43 = vand.u32 4294901760, %v21478_v22  ;;  %v21543_v22 = vand.u32 4294901760, %v21485_v57  ;;  %v21550_v57 = vand.u32 4294901760, %v21492_v13  ;;  %v21557_v13 = vld [vmem:[#allocation102_spill] sm:$0xff] }
 0x1a7   :  { %v21552_v63 = vand.u32 4294901760, %v21494_v56  ;;  %v21558_v23 = vand.u32 4294901760, %v21557_v13  ;;  %v21560_v56 = vand.u32 4294901760, %v21501_v5  ;;  %v21568_v5 = vld [vmem:[#allocation119_spill] sm:$0xff] }
 0x1a8   :  { %v21569_v40 = vand.u32 4294901760, %v21568_v5  ;;  %v21621_v13 = vld [vmem:[#allocation83_spill] sm:$0xff]  ;;  %v21632_v5 = vld [vmem:[#allocation105_spill] sm:$0xff] }
 0x1a9   :  { %12151 = vmatmul.mubr.f32.gmra.mrb[4].mxu0 %v21517_v37  ;;  %v21530_v37 = vand.u32 4294901760, %v21472_v48  ;;  %v21537_v48 = vand.u32 4294901760, %v21479_v18  ;;  %v21544_v18 = vand.u32 4294901760, %v21486_v61  ;;  %v21551_v61 = vand.u32 4294901760, %v21493_v41 }
 0x1aa   :  { %12153 = vmatprep.mubr.f32.mxu0 %v21518_v15  ;;  %v21559_v41 = vand.u32 4294901760, %v21500_v6  ;;  %v21567_v6 = vand.u32 4294901760, %v21507_v20  ;;  %v21575_v15 = vand.u32 4294901760, %v21574_v26  ;;  %v21577_v20 = vld [vmem:[#allocation131_spill] sm:$0xff] }
 0x1ab   :  { %v21638_v26 = vld [vmem:[#allocation115_spill] sm:$0xff] }
 0x1ad   :  { %12154 = vmatmul.mubr.f32.gmra.mrb[6].mxu0 %v21519_v9  ;;  %v21578_v9 = vand.u32 4294901760, %v21577_v20  ;;  %v21641_v20 = vld [vmem:[#allocation124_spill] sm:$0xff] }
 0x1ae   :  { %12156 = vmatprep.mubr.f32.mxu0 %v21520_v60  ;;  %v21579_v60 = vand.u32 4294901760, %v14866_v16  ;;  %v21589_v16 = vld [vmem:[#allocation20_spill] sm:$0xff] }
 0x1b1   :  { %12157 = vmatmul.mubr.f32.gmra.mrb[8].mxu0 %v21521_v29  ;;  %v21580_v29 = vld [vmem:[#allocation134_spill] sm:$0xff] }
 0x1b2   :  { %12159 = vmatprep.mubr.f32.mxu0 %v21522_v34  ;;  %v21581_v34 = vand.u32 4294901760, %v21580_v29  ;;  %v21644_v29 = vld [vmem:[#allocation128_spill] sm:$0xff] }
 0x1b5   :  { %12160 = vmatmul.mubr.f32.gmra.mrb[10].mxu0 %v21523_v46  ;;  %v21583_v46 = vand.u32 4294901760, %v21582_v32  ;;  %v21646_v32 = vld [vmem:[#allocation132_spill] sm:$0xff] }
 0x1b6   :  { %12162 = vmatprep.mubr.f32.mxu0 %v21524_v10  ;;  %v21585_v10 = vld [vmem:[#allocation9_spill] sm:$0xff] }
 0x1b9   :  { %12163 = vmatmul.mubr.f32.gmra.mrb[12].mxu0 %v21525_v44  ;;  %v21587_v44 = vld [vmem:[#allocation14_spill] sm:$0xff] }
 0x1ba   :  { %12165 = vmatprep.mubr.f32.mxu0 %v21526_v31  ;;  %v21588_v31 = vld [vmem:[#allocation16_spill] sm:$0xff] }
 0x1bd   :  { %12166 = vmatmul.mubr.f32.gmra.mrb[14].mxu0 %v21527_v17  ;;  %v21590_v17 = vld [vmem:[#allocation22_spill] sm:$0xff] }
 0x1be   :  { %12168 = vmatprep.mubr.f32.mxu0 %v21528_v28  ;;  %v21591_v28 = vld [vmem:[#allocation24_spill] sm:$0xff] }
 0x1c1   :  { %12169 = vmatmul.mubr.f32.gmra.mrb[16].mxu0 %v21529_v19  ;;  %v21592_v19 = vld [vmem:[#allocation25_spill] sm:$0xff] }
 0x1c2   :  { %12171 = vmatprep.mubr.f32.mxu0 %v21530_v37  ;;  %v21593_v37 = vld [vmem:[#allocation26_spill] sm:$0xff] }
 0x1c5   :  { %12172 = vmatmul.mubr.f32.gmra.mrb[18].mxu0 %v21531_v27  ;;  %v21594_v27 = vld [vmem:[#allocation30_spill] sm:$0xff] }
 0x1c6   :  { %12174 = vmatprep.mubr.f32.mxu0 %v21532_v54  ;;  %v21595_v54 = vld [vmem:[#allocation31_spill] sm:$0xff] }
 0x1c9   :  { %12175 = vmatmul.mubr.f32.gmra.mrb[20].mxu0 %v21533_v0  ;;  %v21597_v0 = vld [vmem:[#allocation36_spill] sm:$0xff] }
 0x1ca   :  { %12177 = vmatprep.mubr.f32.mxu0 %v21534_v39  ;;  %v21598_v39 = vld [vmem:[#allocation38_spill] sm:$0xff] }
 0x1cd   :  { %12178 = vmatmul.mubr.f32.gmra.mrb[22].mxu0 %v21535_v3  ;;  %v21599_v3 = vld [vmem:[#allocation39_spill] sm:$0xff] }
 0x1ce   :  { %12180 = vmatprep.mubr.f32.mxu0 %v21536_v43  ;;  %v21600_v43 = vld [vmem:[#allocation41_spill] sm:$0xff] }
 0x1d1   :  { %12181 = vmatmul.mubr.f32.gmra.mrb[24].mxu0 %v21537_v48  ;;  %v21601_v48 = vld [vmem:[#allocation43_spill] sm:$0xff] }
 0x1d2   :  { %12183 = vmatprep.mubr.f32.mxu0 %v21538_v25  ;;  %v21602_v25 = vld [vmem:[#allocation45_spill] sm:$0xff] }
 0x1d5   :  { %12184 = vmatmul.mubr.f32.gmra.mrb[26].mxu0 %v21539_v55  ;;  %v21603_v55 = vld [vmem:[#allocation47_spill] sm:$0xff] }
 0x1d6   :  { %12186 = vmatprep.mubr.f32.mxu0 %v21540_v1  ;;  %v21604_v1 = vld [vmem:[#allocation49_spill] sm:$0xff] }
 0x1d9   :  { %12187 = vmatmul.mubr.f32.gmra.mrb[28].mxu0 %v21541_v24  ;;  %v21605_v24 = vld [vmem:[#allocation51_spill] sm:$0xff] }
 0x1da   :  { %12189 = vmatprep.mubr.f32.mxu0 %v21542_v8  ;;  %v21606_v8 = vld [vmem:[#allocation53_spill] sm:$0xff] }
 0x1dd   :  { %12190 = vmatmul.mubr.f32.gmra.mrb[30].mxu0 %v21543_v22  ;;  %v21607_v22 = vld [vmem:[#allocation56_spill] sm:$0xff] }
 0x1de   :  { %12192 = vmatprep.mubr.f32.mxu0 %v21544_v18  ;;  %v21608_v18 = vld [vmem:[#allocation57_spill] sm:$0xff] }
 0x1e1   :  { %12193 = vmatmul.mubr.f32.gmra.mrb[32].mxu0 %v21545_v52  ;;  %v21609_v52 = vld [vmem:[#allocation60_spill] sm:$0xff] }
 0x1e2   :  { %12195 = vmatprep.mubr.f32.mxu0 %v21546_v58  ;;  %v21610_v58 = vld [vmem:[#allocation61_spill] sm:$0xff] }
 0x1e5   :  { %12196 = vmatmul.mubr.f32.gmra.mrb[34].mxu0 %v21547_v42  ;;  %v21611_v42 = vld [vmem:[#allocation62_spill] sm:$0xff] }
 0x1e6   :  { %12198 = vmatprep.mubr.f32.mxu0 %v21548_v2  ;;  %v21612_v2 = vld [vmem:[#allocation65_spill] sm:$0xff] }
 0x1e9   :  { %12199 = vmatmul.mubr.f32.gmra.mrb[36].mxu0 %v21549_v11  ;;  %v21613_v11 = vld [vmem:[#allocation67_spill] sm:$0xff] }
 0x1ea   :  { %12201 = vmatprep.mubr.f32.mxu0 %v21550_v57  ;;  %v21614_v57 = vld [vmem:[#allocation69_spill] sm:$0xff] }
 0x1ed   :  { %12202 = vmatmul.mubr.f32.gmra.mrb[38].mxu0 %v21551_v61  ;;  %v21615_v61 = vld [vmem:[#allocation71_spill] sm:$0xff] }
 0x1ee   :  { %12204 = vmatprep.mubr.f32.mxu0 %v21552_v63  ;;  %v21616_v63 = vld [vmem:[#allocation72_spill] sm:$0xff] }
 0x1f1   :  { %12205 = vmatmul.mubr.f32.gmra.mrb[40].mxu0 %v21553_v36  ;;  %v21617_v36 = vld [vmem:[#allocation75_spill] sm:$0xff] }
 0x1f2   :  { %12207 = vmatprep.mubr.f32.mxu0 %v21554_v51  ;;  %v21618_v51 = vld [vmem:[#allocation77_spill] sm:$0xff] }
 0x1f5   :  { %12208 = vmatmul.mubr.f32.gmra.mrb[42].mxu0 %v21555_v49  ;;  %v21619_v49 = vld [vmem:[#allocation79_spill] sm:$0xff] }
 0x1f6   :  { %12210 = vmatprep.mubr.f32.mxu0 %v21556_v7  ;;  %v21620_v7 = vld [vmem:[#allocation81_spill] sm:$0xff] }
 0x1f9   :  { %12211 = vmatmul.mubr.f32.gmra.mrb[44].mxu0 %v21558_v23  ;;  %v21622_v23 = vld [vmem:[#allocation85_spill] sm:$0xff] }
 0x1fa   :  { %12213 = vmatprep.mubr.f32.mxu0 %v21559_v41  ;;  %v21623_v41 = vld [vmem:[#allocation87_spill] sm:$0xff] }
 0x1fd   :  { %12214 = vmatmul.mubr.f32.gmra.mrb[46].mxu0 %v21560_v56  ;;  %v21624_v56 = vld [vmem:[#allocation89_spill] sm:$0xff] }
 0x1fe   :  { %12216 = vmatprep.mubr.f32.mxu0 %v21562_v47  ;;  %v21626_v47 = vld [vmem:[#allocation92_spill] sm:$0xff] }
 0x201   :  { %12217 = vmatmul.mubr.f32.gmra.mrb[48].mxu0 %v21563_v53  ;;  %v21627_v53 = vld [vmem:[#allocation94_spill] sm:$0xff] }
 0x202   :  { %12219 = vmatprep.mubr.f32.mxu0 %v21564_v35  ;;  %v21628_v35 = vld [vmem:[#allocation97_spill] sm:$0xff] }
 0x205   :  { %12220 = vmatmul.mubr.f32.gmra.mrb[50].mxu0 %v21565_v33  ;;  %v21629_v33 = vld [vmem:[#allocation98_spill] sm:$0xff] }
 0x206   :  { %12222 = vmatprep.mubr.f32.mxu0 %v21566_v45  ;;  %v21630_v45 = vld [vmem:[#allocation100_spill] sm:$0xff] }
 0x209   :  { %12223 = vmatmul.mubr.f32.gmra.mrb[52].mxu0 %v21567_v6  ;;  %v21631_v6 = vld [vmem:[#allocation104_spill] sm:$0xff] }
 0x20a   :  { %12225 = vmatprep.mubr.f32.mxu0 %v21569_v40  ;;  %v21633_v40 = vld [vmem:[#allocation107_spill] sm:$0xff] }
 0x20d   :  { %12226 = vmatmul.mubr.f32.gmra.mrb[54].mxu0 %v21571_v30  ;;  %v21635_v30 = vld [vmem:[#allocation111_spill] sm:$0xff] }
 0x20e   :  { %12228 = vmatprep.mubr.f32.mxu0 %v21572_v59  ;;  %v21636_v59 = vld [vmem:[#allocation113_spill] sm:$0xff] }
 0x211   :  { %12229 = vmatmul.mubr.f32.gmra.mrb[56].mxu0 %v21573_v38  ;;  %v21637_v38 = vld [vmem:[#allocation114_spill] sm:$0xff] }
 0x212   :  { %12231 = vmatprep.mubr.f32.mxu0 %v21575_v15  ;;  %v21639_v15 = vld [vmem:[#allocation120_spill] sm:$0xff] }
 0x215   :  { %12232 = vmatmul.mubr.f32.gmra.mrb[58].mxu0 %v21576_v21  ;;  %v21640_v21 = vld [vmem:[#allocation121_spill] sm:$0xff] }
 0x216   :  { %12234 = vmatprep.mubr.f32.mxu0 %v21578_v9  ;;  %v21642_v9 = vld [vmem:[#allocation125_spill] sm:$0xff] }
 0x219   :  { %12235 = vmatmul.mubr.f32.gmra.mrb[60].mxu0 %v21579_v60  ;;  %v21643_v60 = vld [vmem:[#allocation126_spill] sm:$0xff] }
 0x21a   :  { %12237 = vmatprep.mubr.f32.mxu0 %v21581_v34  ;;  %v21645_v34 = vld [vmem:[#allocation130_spill] sm:$0xff] }
 0x21d   :  { %12238 = vmatmul.mubr.f32.gmra.mrb[62].mxu0 %v21583_v46  ;;  %v21647_v46 = vld [vmem:[#allocation133_spill] sm:$0xff] }
 0x21e   :  { %12244 = vmatprep.mubr.f32.mxu0 %v21584_v62 }
 0x221   :  { %12245 = vmatmul.mubr.f32.vlgmr.msra.gmra.mrb[0].mxu0 %v21585_v10 }
 0x222   :  { %13173 = vmatpush3.bf16.msra.mxu0 %v14243_v14  ;;  %12247 = vmatprep.mubr.f32.mxu0 %v21586_v4  ;;  %v21596_v14 = vld [vmem:[#allocation32_spill] sm:$0xff] }
 0x225   :  { %12248 = vmatmul.mubr.f32.gmra.mrb[2].mxu0 %v21587_v44 }
 0x226   :  { %12250 = vmatprep.mubr.f32.mxu0 %v21588_v31 }
 0x229   :  { %12251 = vmatmul.mubr.f32.gmra.mrb[4].mxu0 %v21589_v16 }
 0x22a   :  { %12253 = vmatprep.mubr.f32.mxu0 %v21590_v17 }
 0x22d   :  { %12254 = vmatmul.mubr.f32.gmra.mrb[6].mxu0 %v21591_v28 }
 0x22e   :  { %12256 = vmatprep.mubr.f32.mxu0 %v21592_v19 }
 0x231   :  { %12257 = vmatmul.mubr.f32.gmra.mrb[8].mxu0 %v21593_v37 }
 0x232   :  { %12259 = vmatprep.mubr.f32.mxu0 %v21594_v27 }
 0x235   :  { %12260 = vmatmul.mubr.f32.gmra.mrb[10].mxu0 %v21595_v54 }
 0x236   :  { %12262 = vmatprep.mubr.f32.mxu0 %v21596_v14 }
 0x239   :  { %12263 = vmatmul.mubr.f32.gmra.mrb[12].mxu0 %v21597_v0 }
 0x23a   :  { %12265 = vmatprep.mubr.f32.mxu0 %v21598_v39 }
 0x23d   :  { %12266 = vmatmul.mubr.f32.gmra.mrb[14].mxu0 %v21599_v3 }
 0x23e   :  { %12268 = vmatprep.mubr.f32.mxu0 %v21600_v43 }
 0x241   :  { %12269 = vmatmul.mubr.f32.gmra.mrb[16].mxu0 %v21601_v48 }
 0x242   :  { %12271 = vmatprep.mubr.f32.mxu0 %v21602_v25 }
 0x245   :  { %12272 = vmatmul.mubr.f32.gmra.mrb[18].mxu0 %v21603_v55 }
 0x246   :  { %12274 = vmatprep.mubr.f32.mxu0 %v21604_v1 }
 0x249   :  { %12275 = vmatmul.mubr.f32.gmra.mrb[20].mxu0 %v21605_v24 }
 0x24a   :  { %12277 = vmatprep.mubr.f32.mxu0 %v21606_v8 }
 0x24d   :  { %12278 = vmatmul.mubr.f32.gmra.mrb[22].mxu0 %v21607_v22 }
 0x24e   :  { %12280 = vmatprep.mubr.f32.mxu0 %v21608_v18 }
 0x251   :  { %12281 = vmatmul.mubr.f32.gmra.mrb[24].mxu0 %v21609_v52 }
 0x252   :  { %12283 = vmatprep.mubr.f32.mxu0 %v21610_v58 }
 0x255   :  { %12284 = vmatmul.mubr.f32.gmra.mrb[26].mxu0 %v21611_v42 }
 0x256   :  { %12286 = vmatprep.mubr.f32.mxu0 %v21612_v2 }
 0x259   :  { %12287 = vmatmul.mubr.f32.gmra.mrb[28].mxu0 %v21613_v11 }
 0x25a   :  { %12289 = vmatprep.mubr.f32.mxu0 %v21614_v57 }
 0x25d   :  { %12290 = vmatmul.mubr.f32.gmra.mrb[30].mxu0 %v21615_v61 }
 0x25e   :  { %12292 = vmatprep.mubr.f32.mxu0 %v21616_v63 }
 0x261   :  { %12293 = vmatmul.mubr.f32.gmra.mrb[32].mxu0 %v21617_v36 }
 0x262   :  { %12295 = vmatprep.mubr.f32.mxu0 %v21618_v51 }
 0x265   :  { %12296 = vmatmul.mubr.f32.gmra.mrb[34].mxu0 %v21619_v49 }
 0x266   :  { %12298 = vmatprep.mubr.f32.mxu0 %v21620_v7 }
 0x269   :  { %12299 = vmatmul.mubr.f32.gmra.mrb[36].mxu0 %v21621_v13 }
 0x26a   :  { %12301 = vmatprep.mubr.f32.mxu0 %v21622_v23 }
 0x26d   :  { %12302 = vmatmul.mubr.f32.gmra.mrb[38].mxu0 %v21623_v41 }
 0x26e   :  { %12304 = vmatprep.mubr.f32.mxu0 %v21624_v56 }
 0x271   :  { %12305 = vmatmul.mubr.f32.gmra.mrb[40].mxu0 %v21625_v12 }
 0x272   :  { %12307 = vmatprep.mubr.f32.mxu0 %v21626_v47 }
 0x275   :  { %12308 = vmatmul.mubr.f32.gmra.mrb[42].mxu0 %v21627_v53 }
 0x276   :  { %12310 = vmatprep.mubr.f32.mxu0 %v21628_v35 }
 0x279   :  { %12311 = vmatmul.mubr.f32.gmra.mrb[44].mxu0 %v21629_v33 }
 0x27a   :  { %12313 = vmatprep.mubr.f32.mxu0 %v21630_v45 }
 0x27d   :  { %12314 = vmatmul.mubr.f32.gmra.mrb[46].mxu0 %v21631_v6 }
 0x27e   :  { %12316 = vmatprep.mubr.f32.mxu0 %v21632_v5 }
 0x281   :  { %12317 = vmatmul.mubr.f32.gmra.mrb[48].mxu0 %v21633_v40 }
 0x282   :  { %12319 = vmatprep.mubr.f32.mxu0 %v21634_v50 }
 0x285   :  { %12320 = vmatmul.mubr.f32.gmra.mrb[50].mxu0 %v21635_v30 }
 0x286   :  { %12322 = vmatprep.mubr.f32.mxu0 %v21636_v59 }
 0x289   :  { %12323 = vmatmul.mubr.f32.gmra.mrb[52].mxu0 %v21637_v38 }
 0x28a   :  { %12325 = vmatprep.mubr.f32.mxu0 %v21638_v26 }
 0x28d   :  { %12326 = vmatmul.mubr.f32.gmra.mrb[54].mxu0 %v21639_v15 }
 0x28e   :  { %12328 = vmatprep.mubr.f32.mxu0 %v21640_v21 }
 0x291   :  { %12329 = vmatmul.mubr.f32.gmra.mrb[56].mxu0 %v21641_v20 }
 0x292   :  { %12331 = vmatprep.mubr.f32.mxu0 %v21642_v9 }
 0x295   :  { %12332 = vmatmul.mubr.f32.gmra.mrb[58].mxu0 %v21643_v60 }
 0x296   :  { %12334 = vmatprep.mubr.f32.mxu0 %v21644_v29 }
 0x299   :  { %12335 = vmatmul.mubr.f32.gmra.mrb[60].mxu0 %v21645_v34 }
 0x29a   :  { %12337 = vmatprep.mubr.f32.mxu0 %v21646_v32 }
 0x29d   :  { %12338 = vmatmul.mubr.f32.gmra.mrb[62].mxu0 %v21647_v46 }
 0x29e   :  { %12344 = vmatprep.mubr.f32.mxu0 %v21584_v62  ;;  %v119_v62 = vlaneseq }
 0x2a1   :  { %12345 = vmatmul.mubr.f32.vlgmr.msra.gmra.mrb[0].mxu0 %v21585_v10  ;;  %v15295_v10 = vshrl.u32 %v119_v62, 7 }
 0x2a2   :  { %12347 = vmatprep.mubr.f32.mxu0 %v21586_v4 }
 0x2a3   :  { %21648 = vst [vmem:[#allocation12_spill] sm:$0xff] %v15295_v10  ;;  %v15298_v4 = vsub.s32 0, %v15295_v10 }
 0x2a5   :  { %12348 = vmatmul.mubr.f32.gmra.mrb[2].mxu0 %v21587_v44  ;;  %21649 = vst [vmem:[#allocation15_spill] sm:$0xff] %v15298_v4  ;;  %v54_v44 = vld [vmem:[%s20530_s1 + $0xe0] sm:$0xff] }
 0x2a6   :  { %12350 = vmatprep.mubr.f32.mxu0 %v21588_v31  ;;  %v15304_v31 = vrot.slane %v54_v44, %v15298_v4 }
 0x2a9   :  { %12351 = vmatmul.mubr.f32.gmra.mrb[4].mxu0 %v21589_v16 }
 0x2aa   :  { %12353 = vmatprep.mubr.f32.mxu0 %v21590_v17 }
 0x2ad   :  { %12354 = vmatmul.mubr.f32.gmra.mrb[6].mxu0 %v21591_v28 }
 0x2ae   :  { %12356 = vmatprep.mubr.f32.mxu0 %v21592_v19 }
 0x2b1   :  { %12357 = vmatmul.mubr.f32.gmra.mrb[8].mxu0 %v21593_v37 }
 0x2b2   :  { %12359 = vmatprep.mubr.f32.mxu0 %v21594_v27 }
 0x2b5   :  { %12360 = vmatmul.mubr.f32.gmra.mrb[10].mxu0 %v21595_v54 }
 0x2b6   :  { %12362 = vmatprep.mubr.f32.mxu0 %v21596_v14 }
 0x2b9   :  { %12363 = vmatmul.mubr.f32.gmra.mrb[12].mxu0 %v21597_v0 }
 0x2ba   :  { %12365 = vmatprep.mubr.f32.mxu0 %v21598_v39 }
 0x2bd   :  { %12366 = vmatmul.mubr.f32.gmra.mrb[14].mxu0 %v21599_v3 }
 0x2be   :  { %12368 = vmatprep.mubr.f32.mxu0 %v21600_v43 }
 0x2c1   :  { %12369 = vmatmul.mubr.f32.gmra.mrb[16].mxu0 %v21601_v48 }
 0x2c2   :  { %12371 = vmatprep.mubr.f32.mxu0 %v21602_v25 }
 0x2c5   :  { %12372 = vmatmul.mubr.f32.gmra.mrb[18].mxu0 %v21603_v55 }
 0x2c6   :  { %12374 = vmatprep.mubr.f32.mxu0 %v21604_v1 }
 0x2c9   :  { %12375 = vmatmul.mubr.f32.gmra.mrb[20].mxu0 %v21605_v24 }
 0x2ca   :  { %12377 = vmatprep.mubr.f32.mxu0 %v21606_v8 }
 0x2cd   :  { %12378 = vmatmul.mubr.f32.gmra.mrb[22].mxu0 %v21607_v22 }
 0x2ce   :  { %12380 = vmatprep.mubr.f32.mxu0 %v21608_v18 }
 0x2d1   :  { %12381 = vmatmul.mubr.f32.gmra.mrb[24].mxu0 %v21609_v52 }
 0x2d2   :  { %12383 = vmatprep.mubr.f32.mxu0 %v21610_v58  ;;  %v20815_v58 = vsub.s32 1, %v15295_v10 }
 0x2d5   :  { %12384 = vmatmul.mubr.f32.gmra.mrb[26].mxu0 %v21611_v42 }
 0x2d6   :  { %12386 = vmatprep.mubr.f32.mxu0 %v21612_v2 }
 0x2d9   :  { %12387 = vmatmul.mubr.f32.gmra.mrb[28].mxu0 %v21613_v11 }
 0x2da   :  { %12389 = vmatprep.mubr.f32.mxu0 %v21614_v57 }
 0x2dd   :  { %12390 = vmatmul.mubr.f32.gmra.mrb[30].mxu0 %v21615_v61  ;;  %v20810_v61 = vsub.s32 4, %v15295_v10 }
 0x2de   :  { %12392 = vmatprep.mubr.f32.mxu0 %v21616_v63 }
 0x2e1   :  { %12393 = vmatmul.mubr.f32.gmra.mrb[32].mxu0 %v21617_v36 }
 0x2e2   :  { %12395 = vmatprep.mubr.f32.mxu0 %v21618_v51 }
 0x2e5   :  { %12396 = vmatmul.mubr.f32.gmra.mrb[34].mxu0 %v21619_v49  ;;  %v20811_v49 = vsub.s32 3, %v15295_v10 }
 0x2e6   :  { %12398 = vmatprep.mubr.f32.mxu0 %v21620_v7 }
 0x2e9   :  { %12399 = vmatmul.mubr.f32.gmra.mrb[36].mxu0 %v21621_v13 }
 0x2ea   :  { %12401 = vmatprep.mubr.f32.mxu0 %v21622_v23  ;;  %v15324_v23 = vld [vmem:[%s20530_s1 + $0x10] sm:$0xff] }
 0x2ed   :  { %12402 = vmatmul.mubr.f32.gmra.mrb[38].mxu0 %v21623_v41 }
 0x2ee   :  { %12404 = vmatprep.mubr.f32.mxu0 %v21624_v56 }
 0x2f1   :  { %12405 = vmatmul.mubr.f32.gmra.mrb[40].mxu0 %v21625_v12 }
 0x2f2   :  { %12407 = vmatprep.mubr.f32.mxu0 %v21626_v47 }
 0x2f5   :  { %12408 = vmatmul.mubr.f32.gmra.mrb[42].mxu0 %v21627_v53 }
 0x2f6   :  { %12410 = vmatprep.mubr.f32.mxu0 %v21628_v35 }
 0x2f9   :  { %12411 = vmatmul.mubr.f32.gmra.mrb[44].mxu0 %v21629_v33  ;;  %v20812_v33 = vsub.s32 2, %v15295_v10 }
 0x2fa   :  { %12413 = vmatprep.mubr.f32.mxu0 %v21630_v45  ;;  %v6354_v45 = vsub.s32 5, %v15295_v10 }
 0x2fb   :  { %v15373_v62 = vrot.slane %v15324_v23, %v20812_v33 }
 0x2fc   :  { %v15376_v44 = vrot.slane %v15324_v23, %v6354_v45 }
 0x2fd   :  { %12414 = vmatmul.mubr.f32.gmra.mrb[46].mxu0 %v21631_v6 }
 0x2fe   :  { %12416 = vmatprep.mubr.f32.mxu0 %v21632_v5 }
 0x301   :  { %12417 = vmatmul.mubr.f32.gmra.mrb[48].mxu0 %v21633_v40 }
 0x302   :  { %12419 = vmatprep.mubr.f32.mxu0 %v21634_v50  ;;  %v15336_v50 = vrot.slane %v15324_v23, %v20815_v58 }
 0x304   :  { %21651 = vst [vmem:[#allocation11_spill] sm:$0xff] %v15336_v50 }
 0x305   :  { %12420 = vmatmul.mubr.f32.gmra.mrb[50].mxu0 %v21635_v30  ;;  %v15341_v30 = vrot.slane %v15324_v23, %v20810_v61 }
 0x306   :  { %12422 = vmatprep.mubr.f32.mxu0 %v21636_v59 }
 0x309   :  { %12423 = vmatmul.mubr.f32.gmra.mrb[52].mxu0 %v21637_v38 }
 0x30a   :  { %12425 = vmatprep.mubr.f32.mxu0 %v21638_v26 }
 0x30d   :  { %12426 = vmatmul.mubr.f32.gmra.mrb[54].mxu0 %v21639_v15  ;;  %v15355_v15 = vrot.slane %v15324_v23, %v15298_v4 }
 0x30e   :  { %12428 = vmatprep.mubr.f32.mxu0 %v21640_v21  ;;  %v15360_v21 = vrot.slane %v15324_v23, %v20811_v49 }
 0x311   :  { %12429 = vmatmul.mubr.f32.gmra.mrb[56].mxu0 %v21641_v20  ;;  %v3808_v20 = vadd.s32 24, %v15295_v10 }
 0x312   :  { %12431 = vmatprep.mubr.f32.mxu0 %v21642_v9 }
 0x315   :  { %12432 = vmatmul.mubr.f32.gmra.mrb[58].mxu0 %v21643_v60 }
 0x316   :  { %12434 = vmatprep.mubr.f32.mxu0 %v21644_v29 }
 0x319   :  { %12435 = vmatmul.mubr.f32.gmra.mrb[60].mxu0 %v21645_v34 }
 0x31a   :  { %12437 = vmatprep.mubr.f32.mxu0 %v21646_v32 }
 0x31d   :  { %12438 = vmatmul.mubr.f32.gmra.mrb[62].mxu0 %v21647_v46 }
 0x374   :  { %v12346_v16 = vpop.f32.mrb[0].mxu0 }
 0x375   :  { %v13302_v17 = vadd.f32 %v12346_v16, %v15304_v31  ;;  %v3102_v28 = vpop.f32.mrb[1].mxu0  ;;  %v3809_v16 = vadd.s32 32, %v15295_v10 }
 0x376   :  { %v13303_v19 = vadd.f32 %v3102_v28, %v15304_v31 }
 0x377   :  { %v3485_v37 = vadd.f32 3.0, %v13302_v17 }
 0x378   :  { %v3484_v27 = vadd.f32 3.0, %v13303_v19  ;;  %v12349_v54 = vpop.f32.mrb[2].mxu0 }
 0x379   :  { %v3549_v14 = vmax.f32 %v3485_v37, 0.0  ;;  %v13304_v0 = vadd.f32 %v12349_v54, %v15304_v31  ;;  %v3114_v39 = vpop.f32.mrb[3].mxu0  ;;  %v3810_v37 = vadd.s32 40, %v15295_v10 }
 0x37a   :  { %v3548_v3 = vmax.f32 %v3484_v27, 0.0  ;;  %v13305_v43 = vadd.f32 %v3114_v39, %v15304_v31  ;;  %v3811_v27 = vadd.s32 48, %v15295_v10  ;;  %v5354_v39 = vsub.s32 6, %v15295_v10 }
 0x37b   :  { %v3613_v48 = vmin.f32 %v3549_v14, 6.0  ;;  %v3487_v25 = vadd.f32 3.0, %v13304_v0  ;;  %v3902_v14 = vand.u32 15, %v3808_v20 }
 0x37c   :  { %v3612_v55 = vmin.f32 %v3548_v3, 6.0  ;;  %v3486_v1 = vadd.f32 3.0, %v13305_v43  ;;  %v12352_v24 = vpop.f32.mrb[4].mxu0 }
 0x37d   :  { %v3677_v8 = vmul.f32 %v13302_v17, %v3613_v48  ;;  %v3551_v22 = vmax.f32 %v3487_v25, 0.0  ;;  %v13306_v18 = vadd.f32 %v12352_v24, %v15304_v31  ;;  %v3126_v52 = vpop.f32.mrb[5].mxu0  ;;  %v3909_v24 = vand.u32 15, %v3809_v16 }
 0x37e   :  { %v3676_v42 = vmul.f32 %v13303_v19, %v3612_v55  ;;  %v3550_v2 = vmax.f32 %v3486_v1, 0.0  ;;  %v15313_v11 = vadd.f32 %v3126_v52, %v15304_v31  ;;  %v5747_v19 = vsub.s32 7, %v15295_v10 }
 0x37f   :  { %v15315_v57 = vmul.f32 0.16666667, %v3677_v8  ;;  %v3615_v63 = vmin.f32 %v3551_v22, 6.0  ;;  %v3489_v36 = vadd.f32 3.0, %v13306_v18  ;;  %vm15425_vm3 = vcmp.ne.s32.totalorder %v3909_v24, 0 }
 0x380   :  { %v15318_v51 = vmul.f32 0.16666667, %v3676_v42  ;;  %v3614_v7 = vmin.f32 %v3550_v2, 6.0  ;;  %v12355_v13 = vpop.f32.mrb[6].mxu0  ;;  %v3488_v12 = vadd.f32 3.0, %v15313_v11  ;;  %vm15432_vm4 = vcmp.ne.s32.totalorder %v3902_v14, 15 }
 0x381   :  { %v4812_v41 = vrot.slane %v15315_v57, 7  ;;  %v5879_v56 = vrot.slane %v15315_v57, 1  ;;  %v3138_v47 = vpop.f32.mrb[7].mxu0  ;;  %v3679_v6 = vmul.f32 %v13304_v0, %v3615_v63  ;;  %v3553_v40 = vmax.f32 %v3489_v36, 0.0 }
 0x382   :  { %21650 = vst [vmem:[#allocation10_spill] sm:$0xff] %v15318_v51  ;;  %v20814_v53 = vrot.slane %v15318_v51, 7  ;;  %v20813_v35 = vrot.slane %v15318_v51, 1  ;;  %v3678_v5 = vmul.f32 %v13305_v43, %v3614_v7  ;;  %v3552_v9 = vmax.f32 %v3488_v12, 0.0 }
 0x383   :  { %v15363_v29 = vmul.f32 0.16666667, %v3679_v6  ;;  %v3617_v32 = vmin.f32 %v3553_v40, 6.0  ;;  %v15368_v46 = vadd.f32 %v12355_v13, %v15304_v31  ;;  %v15380_v17 = vadd.f32 %v3138_v47, %v15304_v31 }
 0x384   :  { %v15346_v59 = vsel %vm4808_vm1, %v20814_v53, %v4812_v41  ;;  %v15351_v38 = vsel %vm5874_vm2, %v20813_v35, %v5879_v56  ;;  %v12358_v26 = vpop.f32.mrb[8].mxu0  ;;  %v15365_v34 = vmul.f32 0.16666667, %v3678_v5  ;;  %v3616_v3 = vmin.f32 %v3552_v9, 6.0 }
 0x385   :  { %21652 = vst [vmem:[#allocation17_spill] sm:$0xff] %v15351_v38  ;;  %v3150_v60 = vpop.f32.mrb[9].mxu0  ;;  %21653 = vst [vmem:[#allocation18_spill] sm:$0xff] %v15363_v29  ;;  %v4816_v28 = vrot.slane %v15363_v29, 7  ;;  %v5883_v48 = vrot.slane %v15363_v29, 1  ;;  %v3681_v55 = vmul.f32 %v13306_v18, %v3617_v32  ;;  %v3491_v1 = vadd.f32 3.0, %v15368_v46 }
 0x386   :  { %21654 = vst [vmem:[#allocation19_spill] sm:$0xff] %v15365_v34  ;;  %v4814_v0 = vrot.slane %v15365_v34, 7  ;;  %v5881_v25 = vrot.slane %v15365_v34, 1  ;;  %v3490_v52 = vadd.f32 3.0, %v15380_v17  ;;  %v5159_v42 = vmul.f32 %v15355_v15, %v15346_v59  ;;  %v29_v18 = vld [vmem:[%s20530_s1 + $0x18] sm:$0xff] }
 0x387   :  { %v3916_v63 = vand.u32 15, %v3810_v37  ;;  %v3923_v36 = vand.u32 15, %v3811_v27  ;;  %v3812_v12 = vadd.s32 56, %v15295_v10  ;;  %v3813_v47 = vadd.s32 64, %v15295_v10 }
 0x388   :  { %v15386_v54 = vpop.f32.mrb[10].mxu0  ;;  %v4815_v8 = vsel %vm4808_vm1, %v4812_v41, %v4814_v0  ;;  %v15397_v22 = vsel %vm4808_vm1, %v4814_v0, %v4816_v28  ;;  %v5882_v13 = vsel %vm5874_vm2, %v5879_v56, %v5881_v25  ;;  %v3680_v41 = vmul.f32 %v15313_v11, %v3616_v3 }
 0x389   :  { %v15390_v43 = vpop.f32.mrb[11].mxu0  ;;  %21655 = vst [vmem:[#allocation21_spill] sm:$0xff] %v15397_v22  ;;  %v5227_v2 = vmul.f32 %v15360_v21, %v15397_v22  ;;  %v15418_v5 = vsel %vm5874_vm2, %v5881_v25, %v5883_v48  ;;  %v15420_v40 = vmul.f32 0.16666667, %v3681_v55  ;;  %v3555_v20 = vmax.f32 %v3491_v1, 0.0 }
 0x38a   :  { %v15423_v9 = vrot.slane %v15324_v23, %v5747_v19  ;;  %v15430_v56 = vrot.slane %v15324_v23, %v5354_v39  ;;  %v3554_v32 = vmax.f32 %v3490_v52, 0.0  ;;  %v15437_v37 = vrot.slane %v29_v18, %v15298_v4 }
 0x38b   :  { %v5291_v6 = vadd.f32 %v5227_v2, %v5159_v42  ;;  %vm15439_vm5 = vcmp.ne.s32.totalorder %v3923_v36, 0  ;;  %v15444_v19 = vadd.f32 %v12358_v26, %v15304_v31  ;;  %v20816_v23 = vrot.slane %v15420_v40, 7 }
 0x38c   :  { %v15404_v7 = vpop.f32.mrb[12].mxu0  ;;  %v15449_v39 = vmul.f32 0.16666667, %v3680_v41  ;;  %v3937_v14 = vand.u32 15, %v3813_v47  ;;  %v15452_v3 = vadd.f32 %v3150_v60, %v15304_v31  ;;  %vm15456_vm6 = vcmp.ne.s32.totalorder %v3916_v63, 15 }
 0x38d   :  { %v15413_v45 = vpop.f32.mrb[13].mxu0  ;;  %v3619_v1 = vmin.f32 %v3555_v20, 6.0  ;;  %v3930_v24 = vand.u32 15, %v3812_v12  ;;  %v15461_v26 = vadd.s32 72, %v15295_v10  ;;  %v5490_v52 = vmul.f32 %v15336_v50, %v15315_v57 }
 0x38e   :  { %v4818_v42 = vrot.slane %v15449_v39, 7  ;;  %v3618_v2 = vmin.f32 %v3554_v32, 6.0  ;;  %v15467_v60 = vadd.s32 80, %v15295_v10  ;;  %v15471_v63 = vsel %vm15425_vm3, %v4815_v8, 0.0 }
 0x38f   :  { %21664 = vst [vmem:[#allocation23_spill] sm:$0xff] %v15471_v63  ;;  %v20823_v36 = vrot.slane %v15420_v40, 1  ;;  %v5885_v18 = vrot.slane %v15449_v39, 1  ;;  %v3493_v41 = vadd.f32 3.0, %v15444_v19  ;;  %v5161_v47 = vmul.f32 %v15355_v15, %v15397_v22 }
 0x390   :  { %v15446_v0 = vpop.f32.mrb[14].mxu0  ;;  %v4819_v20 = vsel %vm4808_vm1, %v4816_v28, %v4818_v42  ;;  %v4821_v32 = vsel %vm4808_vm1, %v4818_v42, %v20816_v23  ;;  %vm15484_vm7 = vcmp.ne.s32.totalorder %v3937_v14, 0  ;;  %v3492_v11 = vadd.f32 3.0, %v15452_v3 }
 0x391   :  { %v15454_v25 = vpop.f32.mrb[15].mxu0  ;;  %v15493_v49 = vsel %vm15439_vm5, %v4819_v20, 0.0  ;;  %v5229_v33 = vmul.f32 %v15360_v21, %v4821_v32  ;;  %v5359_v28 = vmul.f32 %v15430_v56, %v4821_v32  ;;  %v3683_v35 = vmul.f32 %v15368_v46, %v3619_v1 }
 0x392   :  { %21667 = vst [vmem:[#allocation27_spill] sm:$0xff] %v15493_v49  ;;  %v5160_v14 = vmul.f32 %v15355_v15, %v15471_v63  ;;  %v5228_v42 = vmul.f32 %v15360_v21, %v15493_v49  ;;  %v5886_v53 = vsel %vm5874_vm2, %v5883_v48, %v5885_v18  ;;  %v3682_v27 = vmul.f32 %v15380_v17, %v3618_v2 }
 0x393   :  { %v5293_v20 = vadd.f32 %v5229_v33, %v5161_v47  ;;  %v5423_v58 = vadd.f32 %v5359_v28, %v5291_v6  ;;  %v15509_v23 = vsel %vm5874_vm2, %v5885_v18, %v20823_v36  ;;  %v3557_v46 = vmax.f32 %v3493_v41, 0.0 }
 0x394   :  { %v15476_v12 = vpop.f32.mrb[16].mxu0  ;;  %21668 = vst [vmem:[#allocation28_spill] sm:$0xff] %v15509_v23  ;;  %v5292_v4 = vadd.f32 %v5228_v42, %v5160_v14  ;;  %vm15513_vm8 = vcmp.ne.s32.totalorder %v3930_v24, 15  ;;  %v3556_v22 = vmax.f32 %v3492_v11, 0.0  ;;  %v3944_v48 = vand.u32 15, %v15461_v26 }
 0x395   :  { %v15489_v61 = vpop.f32.mrb[17].mxu0  ;;  %v5620_v33 = vmul.f32 %v15341_v30, %v15363_v29  ;;  %v15524_v17 = vsel %vm15432_vm4, %v5882_v13, 0.0  ;;  %v5552_v6 = vadd.f32 %v5490_v52, %v5423_v58  ;;  %v15526_v2 = vmul.f32 0.16666667, %v3683_v35 }
 0x396   :  { %21671 = vst [vmem:[#allocation29_spill] sm:$0xff] %v15524_v17  ;;  %v5492_v24 = vmul.f32 %v15336_v50, %v15363_v29  ;;  %v5752_v18 = vmul.f32 %v15423_v9, %v15420_v40  ;;  %v15532_v41 = vmul.f32 0.16666667, %v3682_v27  ;;  %v3951_v26 = vand.u32 15, %v15467_v60 }
 0x397   :  { %v5684_v47 = vadd.f32 %v5620_v33, %v5552_v6  ;;  %v15537_v11 = vsel %vm15456_vm6, %v5886_v53, 0.0  ;;  %v20829_v13 = vrot.slane %v15526_v2, 7  ;;  %v3621_v58 = vmin.f32 %v3557_v46, 6.0 }
 0x398   :  { %v15511_v1 = vpop.f32.mrb[18].mxu0  ;;  %21672 = vst [vmem:[#allocation33_spill] sm:$0xff] %v15537_v11  ;;  %v5491_v16 = vmul.f32 %v15336_v50, %v15365_v34  ;;  %v6227_v52 = vmul.f32 %v15373_v62, %v15524_v17  ;;  %v4822_v28 = vrot.slane %v15532_v41, 7  ;;  %v3620_v14 = vmin.f32 %v3556_v22, 6.0 }
 0x399   :  { %v15518_v38 = vpop.f32.mrb[19].mxu0  ;;  %v5163_v55 = vmul.f32 %v15355_v15, %v4821_v32  ;;  %v5813_v53 = vadd.f32 %v5752_v18, %v5684_v47  ;;  %v5889_v27 = vrot.slane %v15532_v41, 1  ;;  %v5162_v46 = vmul.f32 %v15355_v15, %v15493_v49 }
 0x39a   :  { %v6359_v33 = vmul.f32 %v15376_v44, %v15537_v11  ;;  %v21675_v6 = vrot.slane %v15420_v40, 7  ;;  %v4825_v22 = vsel %vm4808_vm1, %v4822_v28, %v20829_v13  ;;  %v3685_v42 = vmul.f32 %v15444_v19, %v3621_v58 }
 0x39b   :  { %v6291_v32 = vadd.f32 %v6227_v52, %v5813_v53  ;;  %v5231_v47 = vmul.f32 %v15360_v21, %v4825_v22  ;;  %v3684_v34 = vmul.f32 %v15452_v3, %v3620_v14  ;;  %v21678_v19 = vrot.slane %v15526_v2, 1 }
 0x39c   :  { %v15540_v35 = vpop.f32.mrb[20].mxu0  ;;  %v4823_v36 = vsel %vm4808_vm1, %v21675_v6, %v4822_v28  ;;  %v5361_v6 = vmul.f32 %v15430_v56, %v4825_v22  ;;  %v5622_v3 = vmul.f32 %v15341_v30, %v15420_v40  ;;  %vm15590_vm9 = vcmp.ne.s32.totalorder %v3951_v26, 0 }
 0x39d   :  { %21673 = vst [vmem:[#allocation34_spill] sm:$0xff] %v15540_v35  ;;  %v15547_v60 = vpop.f32.mrb[21].mxu0  ;;  %v5088_v18 = vsel %vm15484_vm7, %v4823_v36, 0.0  ;;  %v6423_v52 = vadd.f32 %v6359_v33, %v6291_v32  ;;  %v5295_v28 = vadd.f32 %v5231_v47, %v5163_v55  ;;  %v21677_v36 = vrot.slane %v15420_v40, 1 }
 0x39e   :  { %21674 = vst [vmem:[#allocation35_spill] sm:$0xff] %v15547_v60  ;;  %v5230_v17 = vmul.f32 %v15360_v21, %v5088_v18  ;;  %v5360_v60 = vmul.f32 %v15430_v56, %v5088_v18  ;;  %v15580_v58 = vsel %vm5874_vm2, %v5889_v27, %v21678_v19  ;;  %v15608_v33 = vmul.f32 0.16666667, %v3684_v34 }
 0x39f   :  { %v5890_v8 = vsel %vm5874_vm2, %v21677_v36, %v5889_v27  ;;  %v15596_v27 = vadd.f32 %v15386_v54, %v15304_v31  ;;  %vm15610_vm10 = vcmp.ne.s32.totalorder %v3944_v48, 15  ;;  %v6228_v34 = vmul.f32 %v15373_v62, %v15418_v5 }
 0x3a0   :  { %v15566_v49 = vpop.f32.mrb[22].mxu0  ;;  %v5294_v53 = vadd.f32 %v5230_v17, %v5162_v46  ;;  %v5424_v13 = vadd.f32 %v5360_v60, %v5292_v4  ;;  %v15584_v35 = vsel %vm15513_vm8, %v5890_v8, 0.0  ;;  %v5621_v4 = vmul.f32 %v15341_v30, %v15449_v39 }
 0x3a1   :  { %21676 = vst [vmem:[#allocation37_spill] sm:$0xff] %v15566_v49  ;;  %v15572_v29 = vpop.f32.mrb[23].mxu0  ;;  %v5425_v49 = vadd.f32 %v5361_v6, %v5293_v20  ;;  %v6491_v14 = vmul.f32 %v15437_v37, %v15584_v35  ;;  %v15600_v17 = vmul.f32 0.16666667, %v3685_v42  ;;  %v5754_v46 = vmul.f32 %v15423_v9, %v15526_v2 }
 0x3a2   :  { %v5553_v63 = vadd.f32 %v5491_v16, %v5424_v13  ;;  %v5494_v13 = vmul.f32 %v15336_v50, %v15420_v40  ;;  %v6229_v16 = vmul.f32 %v15373_v62, %v15537_v11  ;;  %v3495_v48 = vadd.f32 3.0, %v15596_v27 }
 0x3a3   :  { %v5554_v20 = vadd.f32 %v5492_v24, %v5425_v49  ;;  %v15606_v26 = vadd.f32 %v6491_v14, %v6423_v52  ;;  %v5753_v49 = vmul.f32 %v15423_v9, %v15532_v41  ;;  %v20830_v24 = vrot.slane %v15600_v17, 7 }
 0x3a4   :  { %v15602_v60 = vpop.f32.mrb[24].mxu0  ;;  %v5685_v54 = vadd.f32 %v5621_v4, %v5553_v63  ;;  %v6360_v42 = vmul.f32 %v15376_v44, %v15509_v23  ;;  %v4826_v36 = vrot.slane %v15608_v33, 7  ;;  %v5165_v8 = vmul.f32 %v15355_v15, %v4825_v22 }
 0x3a5   :  { %21681 = vst [vmem:[#allocation40_spill] sm:$0xff] %v15602_v60  ;;  %v5686_v47 = vadd.f32 %v5622_v3, %v5554_v20  ;;  %v6361_v40 = vmul.f32 %v15376_v44, %v15584_v35  ;;  %v20831_v19 = vrot.slane %v15600_v17, 1  ;;  %v5893_v3 = vrot.slane %v15608_v33, 1 }
 0x3a6   :  { %v5814_v6 = vadd.f32 %v5753_v49, %v5685_v54  ;;  %v21684_v63 = vrot.slane %v15526_v2, 7  ;;  %v5164_v22 = vmul.f32 %v15355_v15, %v5088_v18  ;;  %v6492_v54 = vmul.f32 %v15437_v37, %v15580_v58 }
 0x3a7   :  { %v5815_v52 = vadd.f32 %v5754_v46, %v5686_v47  ;;  %v15638_v46 = vsel %vm4808_vm1, %v4826_v36, %v20830_v24  ;;  %v13313_v55 = vadd.f32 %v15390_v43, %v15304_v31 }
 0x3a8   :  { %v6292_v14 = vadd.f32 %v6228_v34, %v5814_v6  ;;  %v4827_v20 = vsel %vm4808_vm1, %v21684_v63, %v4826_v36  ;;  %v5233_v49 = vmul.f32 %v15360_v21, %v15638_v46  ;;  %v5363_v63 = vmul.f32 %v15430_v56, %v15638_v46 }
 0x3a9   :  { %v6293_v4 = vadd.f32 %v6229_v16, %v5815_v52  ;;  %v15645_v47 = vsel %vm15590_vm9, %v4827_v20, 0.0  ;;  %v3559_v52 = vmax.f32 %v3495_v48, 0.0  ;;  %v15669_v48 = vsel %vm5874_vm2, %v5893_v3, %v20831_v19 }
 0x3aa   :  { %v6424_v16 = vadd.f32 %v6360_v42, %v6292_v14  ;;  %v5232_v6 = vmul.f32 %v15360_v21, %v15645_v47  ;;  %v15651_v36 = vadd.f32 %v5233_v49, %v5165_v8  ;;  %v5362_v18 = vmul.f32 %v15430_v56, %v15645_v47 }
 0x3ab   :  { %v6425_v34 = vadd.f32 %v6361_v40, %v6293_v4  ;;  %v21685_v42 = vrot.slane %v15526_v2, 1  ;;  %v5493_v8 = vmul.f32 %v15336_v50, %v15449_v39  ;;  %v5427_v4 = vadd.f32 %v5363_v63, %v5295_v28 }
 0x3ac   :  { %v15659_v20 = vadd.f32 %v6492_v54, %v6424_v16  ;;  %v15661_v24 = vadd.f32 %v5232_v6, %v5164_v22  ;;  %v5426_v14 = vadd.f32 %v5362_v18, %v5294_v53  ;;  %v15677_v22 = vpop.f32.mrb[25].mxu0  ;;  %v5624_v54 = vmul.f32 %v15341_v30, %v15526_v2 }
 0x3ad   :  { %v5894_v40 = vsel %vm5874_vm2, %v21685_v42, %v5893_v3  ;;  %21686 = vst [vmem:[#allocation42_spill] sm:$0xff] %v15677_v22  ;;  %v5623_v49 = vmul.f32 %v15341_v30, %v15532_v41  ;;  %v5556_v3 = vadd.f32 %v5494_v13, %v5427_v4  ;;  %v5756_v28 = vmul.f32 %v15423_v9, %v15600_v17 }
 0x3ae   :  { %v15675_v43 = vsel %vm15610_vm10, %v5894_v40, 0.0  ;;  %v5555_v16 = vadd.f32 %v5493_v8, %v5426_v14  ;;  %v3623_v53 = vmin.f32 %v3559_v52, 6.0  ;;  %v3494_v32 = vadd.f32 3.0, %v13313_v55 }
 0x3af   :  { %v6493_v6 = vmul.f32 %v15437_v37, %v15675_v43  ;;  %v5688_v63 = vadd.f32 %v5624_v54, %v5556_v3  ;;  %v5755_v42 = vmul.f32 %v15423_v9, %v15608_v33  ;;  %v6230_v19 = vmul.f32 %v15373_v62, %v15509_v23 }
 0x3b0   :  { %v5687_v18 = vadd.f32 %v5623_v49, %v5555_v16  ;;  %v3687_v13 = vmul.f32 %v15596_v27, %v3623_v53  ;;  %v3558_v8 = vmax.f32 %v3494_v32, 0.0  ;;  %v3816_v14 = vadd.s32 88, %v15295_v10 }
 0x3b1   :  { %v15689_v40 = vadd.f32 %v6493_v6, %v6425_v34  ;;  %v6231_v4 = vmul.f32 %v15373_v62, %v15584_v35  ;;  %v5817_v11 = vadd.f32 %v5756_v28, %v5688_v63  ;;  %v13314_v54 = vadd.f32 %v15404_v7, %v15304_v31  ;;  %v15708_v28 = vpop.f32.mrb[26].mxu0 }
 0x3b2   :  { %v5816_v52 = vadd.f32 %v5755_v42, %v5687_v18  ;;  %v6362_v34 = vmul.f32 %v15376_v44, %v15580_v58  ;;  %v6363_v49 = vmul.f32 %v15376_v44, %v15675_v43  ;;  %v3622_v16 = vmin.f32 %v3558_v8, 6.0  ;;  %21687 = vst [vmem:[#allocation44_spill] sm:$0xff] %v15708_v28 }
 0x3b3   :  { %v3817_v27 = vadd.s32 96, %v15295_v10  ;;  %v6295_v6 = vadd.f32 %v6231_v4, %v5817_v11  ;;  %v3497_v53 = vadd.f32 3.0, %v13314_v54  ;;  %v13315_v35 = vadd.f32 %v15413_v45, %v15304_v31 }
 0x3b4   :  { %v6294_v3 = vadd.f32 %v6230_v19, %v5816_v52  ;;  %v15706_v32 = vmul.f32 0.16666667, %v3687_v13  ;;  %v6494_v63 = vmul.f32 %v15437_v37, %v15669_v48  ;;  %v3686_v42 = vmul.f32 %v13313_v55, %v3622_v16 }
 0x3b5   :  { %v6427_v18 = vadd.f32 %v6363_v49, %v6295_v6  ;;  %v3965_v23 = vand.u32 15, %v3817_v27  ;;  %v3561_v8 = vmax.f32 %v3497_v53, 0.0  ;;  %v3958_v19 = vand.u32 15, %v3816_v14 }
 0x3b6   :  { %v6426_v7 = vadd.f32 %v6362_v34, %v6294_v3  ;;  %v3496_v11 = vadd.f32 3.0, %v13315_v35  ;;  %v20834_v4 = vrot.slane %v15706_v32, 7  ;;  %v15715_v52 = vmul.f32 0.16666667, %v3686_v42 }
 0x3b7   :  { %vm5020_vm11 = vcmp.ne.s32.totalorder %v3965_v23, 0  ;;  %v3625_v13 = vmin.f32 %v3561_v8, 6.0  ;;  %v5899_v34 = vrot.slane %v15706_v32, 1  ;;  %vm15720_vm12 = vcmp.ne.s32.totalorder %v3958_v19, 15  ;;  %v15740_v8 = vpop.f32.mrb[27].mxu0 }
 0x3b8   :  { %v15712_v22 = vadd.f32 %v6494_v63, %v6426_v7  ;;  %v4830_v45 = vrot.slane %v15715_v52, 7  ;;  %v5897_v49 = vrot.slane %v15715_v52, 1  ;;  %v3560_v16 = vmax.f32 %v3496_v11, 0.0  ;;  %21692 = vst [vmem:[#allocation48_spill] sm:$0xff] %v15740_v8 }
 0x3b9   :  { %v21691_v14 = vrot.slane %v15600_v17, 7  ;;  %v3818_v23 = vadd.s32 104, %v15295_v10  ;;  %v3819_v6 = vadd.s32 112, %v15295_v10  ;;  %v5495_v53 = vmul.f32 %v15336_v50, %v15532_v41 }
 0x3ba   :  { %21688 = vst [vmem:[#allocation46_spill] sm:$0xff] %v15712_v22  ;;  %v15730_v3 = vsel %vm4808_vm1, %v4830_v45, %v20834_v4  ;;  %v5166_v7 = vmul.f32 %v15355_v15, %v15645_v47  ;;  %v5167_v63 = vmul.f32 %v15355_v15, %v15638_v46  ;;  %v21693_v4 = vrot.slane %v15600_v17, 1 }
 0x3bb   :  { %v4831_v27 = vsel %vm4808_vm1, %v21691_v14, %v4830_v45  ;;  %v5235_v11 = vmul.f32 %v15360_v21, %v15730_v3  ;;  %v3689_v14 = vmul.f32 %v13314_v54, %v3625_v13  ;;  %v5365_v41 = vmul.f32 %v15430_v56, %v15730_v3 }
 0x3bc   :  { %v5092_v42 = vsel %vm5020_vm11, %v4831_v27, 0.0  ;;  %v5898_v47 = vsel %vm5874_vm2, %v21693_v4, %v5897_v49  ;;  %v15754_v46 = vsel %vm5874_vm2, %v5897_v49, %v5899_v34  ;;  %v3624_v27 = vmin.f32 %v3560_v16, 6.0 }
 0x3bd   :  { %v5234_v19 = vmul.f32 %v15360_v21, %v5092_v42  ;;  %v5364_v45 = vmul.f32 %v15430_v56, %v5092_v42  ;;  %v15756_v28 = vadd.f32 %v5235_v11, %v5167_v63  ;;  %v15761_v54 = vsel %vm15720_vm12, %v5898_v47, 0.0 }
 0x3be   :  { %v5496_v13 = vmul.f32 %v15336_v50, %v15526_v2  ;;  %v5429_v4 = vadd.f32 %v5365_v41, %v15651_v36  ;;  %v13316_v22 = vadd.f32 %v15446_v0, %v15304_v31  ;;  %v5625_v49 = vmul.f32 %v15341_v30, %v15608_v33 }
 0x3bf   :  { %v5298_v8 = vadd.f32 %v5234_v19, %v5166_v7  ;;  %v5428_v60 = vadd.f32 %v5364_v45, %v15661_v24  ;;  %v6495_v7 = vmul.f32 %v15437_v37, %v15761_v54  ;;  %v3972_v24 = vand.u32 15, %v3818_v23  ;;  %v15782_v23 = vpop.f32.mrb[28].mxu0 }
 0x3c0   :  { %v5626_v55 = vmul.f32 %v15341_v30, %v15600_v17  ;;  %v5558_v63 = vadd.f32 %v5496_v13, %v5429_v4  ;;  %v15774_v19 = vmul.f32 0.16666667, %v3689_v14  ;;  %v3688_v2 = vmul.f32 %v13315_v35, %v3624_v27 }
 0x3c1   :  { %v5557_v16 = vadd.f32 %v5495_v53, %v5428_v60  ;;  %v5757_v36 = vmul.f32 %v15423_v9, %v15715_v52  ;;  %v15778_v0 = vadd.f32 %v6495_v7, %v6427_v18  ;;  %v3979_v45 = vand.u32 15, %v3819_v6 }
 0x3c2   :  { %v5758_v60 = vmul.f32 %v15423_v9, %v15706_v32  ;;  %v5690_v53 = vadd.f32 %v5626_v55, %v5558_v63  ;;  %v3499_v41 = vadd.f32 3.0, %v13316_v22  ;;  %v6232_v14 = vmul.f32 %v15373_v62, %v15580_v58 }
 0x3c3   :  { %v5689_v11 = vadd.f32 %v5625_v49, %v5557_v16  ;;  %v15788_v35 = vadd.f32 %v15454_v25, %v15304_v31  ;;  %v6233_v18 = vmul.f32 %v15373_v62, %v15675_v43  ;;  %v20835_v6 = vrot.slane %v15774_v19, 7 }
 0x3c4   :  { %v5819_v27 = vadd.f32 %v5758_v60, %v5690_v53  ;;  %v15793_v13 = vmul.f32 0.16666667, %v3688_v2  ;;  %v6364_v4 = vmul.f32 %v15376_v44, %v15669_v48  ;;  %vm15797_vm13 = vcmp.ne.s32.totalorder %v3979_v45, 0 }
 0x3c5   :  { %v5818_v47 = vadd.f32 %v5757_v36, %v5689_v11  ;;  %vm15801_vm14 = vcmp.ne.s32.totalorder %v3972_v24, 15  ;;  %v6365_v43 = vmul.f32 %v15376_v44, %v15761_v54  ;;  %v3563_v55 = vmax.f32 %v3499_v41, 0.0 }
 0x3c6   :  { %v6297_v25 = vadd.f32 %v6233_v18, %v5819_v27  ;;  %v4834_v7 = vrot.slane %v15793_v13, 7  ;;  %v6496_v2 = vmul.f32 %v15437_v37, %v15754_v46  ;;  %v5901_v11 = vrot.slane %v15793_v13, 1 }
 0x3c7   :  { %v6296_v49 = vadd.f32 %v6232_v14, %v5818_v47  ;;  %v3498_v36 = vadd.f32 3.0, %v15788_v35  ;;  %v5903_v24 = vrot.slane %v15774_v19, 1  ;;  %v21698_v60 = vrot.slane %v15706_v32, 7 }
 0x3c8   :  { %v6429_v45 = vadd.f32 %v6365_v43, %v6297_v25  ;;  %v15819_v47 = vsel %vm4808_vm1, %v4834_v7, %v20835_v6  ;;  %v5168_v41 = vmul.f32 %v15355_v15, %v5092_v42  ;;  %v5169_v14 = vmul.f32 %v15355_v15, %v15730_v3  ;;  %v15836_v42 = vpop.f32.mrb[29].mxu0 }
 0x3c9   :  { %v6428_v63 = vadd.f32 %v6364_v4, %v6296_v49  ;;  %v4835_v53 = vsel %vm4808_vm1, %v21698_v60, %v4834_v7  ;;  %v5237_v49 = vmul.f32 %v15360_v21, %v15819_v47  ;;  %v3627_v43 = vmin.f32 %v3563_v55, 6.0  ;;  %21699 = vst [vmem:[#allocation50_spill] sm:$0xff] %v15836_v42 }
 0x3ca   :  { %v15828_v27 = vsel %vm15797_vm13, %v4835_v53, 0.0  ;;  %v5497_v3 = vmul.f32 %v15336_v50, %v15608_v33  ;;  %v5367_v16 = vmul.f32 %v15430_v56, %v15819_v47  ;;  %v5902_v7 = vsel %vm5874_vm2, %v5899_v34, %v5901_v11 }
 0x3cb   :  { %v15824_v18 = vadd.f32 %v6496_v2, %v6428_v63  ;;  %v5236_v4 = vmul.f32 %v15360_v21, %v15828_v27  ;;  %v5366_v25 = vmul.f32 %v15430_v56, %v15828_v27  ;;  %v3562_v63 = vmax.f32 %v3498_v36, 0.0 }
 0x3cc   :  { %v15847_v60 = vadd.f32 %v5237_v49, %v5169_v14  ;;  %v15852_v55 = vsel %vm5874_vm2, %v5901_v11, %v5903_v24  ;;  %v5498_v33 = vmul.f32 %v15336_v50, %v15600_v17  ;;  %v5431_v6 = vadd.f32 %v5367_v16, %v15756_v28 }
 0x3cd   :  { %v15845_v2 = vadd.f32 %v5236_v4, %v5168_v41  ;;  %v5430_v53 = vadd.f32 %v5366_v25, %v5298_v8  ;;  %v15859_v42 = vsel %vm15801_vm14, %v5902_v7, 0.0  ;;  %v5627_v34 = vmul.f32 %v15341_v30, %v15715_v52 }
 0x3ce   :  { %v3691_v41 = vmul.f32 %v13316_v22, %v3627_v43  ;;  %v5628_v8 = vmul.f32 %v15341_v30, %v15706_v32  ;;  %v5560_v14 = vadd.f32 %v5498_v33, %v5431_v6  ;;  %v6497_v11 = vmul.f32 %v15437_v37, %v15859_v42 }
 0x3cf   :  { %v5559_v36 = vadd.f32 %v5497_v3, %v5430_v53  ;;  %v5759_v17 = vmul.f32 %v15423_v9, %v15793_v13  ;;  %v3626_v28 = vmin.f32 %v3562_v63, 6.0  ;;  %v3821_v58 = vadd.s32 128, %v15295_v10 }
 0x3d0   :  { %v5760_v49 = vmul.f32 %v15423_v9, %v15774_v19  ;;  %v5692_v25 = vadd.f32 %v5628_v8, %v5560_v14  ;;  %v15872_v3 = vadd.f32 %v6497_v11, %v6429_v45  ;;  %v13318_v22 = vadd.f32 %v15476_v12, %v15304_v31  ;;  %v15890_v14 = vpop.f32.mrb[30].mxu0 }
 0x3d1   :  { %v5691_v4 = vadd.f32 %v5627_v34, %v5559_v36  ;;  %v6234_v43 = vmul.f32 %v15373_v62, %v15669_v48  ;;  %v15878_v16 = vmul.f32 0.16666667, %v3691_v41  ;;  %v6235_v7 = vmul.f32 %v15373_v62, %v15761_v54 }
 0x3d2   :  { %v5821_v63 = vadd.f32 %v5760_v49, %v5692_v25  ;;  %v3820_v53 = vadd.s32 120, %v15295_v10  ;;  %v6366_v33 = vmul.f32 %v15376_v44, %v15754_v46  ;;  %v3690_v34 = vmul.f32 %v15788_v35, %v3626_v28 }
 0x3d3   :  { %v5820_v6 = vadd.f32 %v5759_v17, %v5691_v4  ;;  %v3993_v36 = vand.u32 15, %v3821_v58  ;;  %v6367_v8 = vmul.f32 %v15376_v44, %v15859_v42  ;;  %v6498_v48 = vmul.f32 %v15437_v37, %v15852_v55 }
 0x3d4   :  { %v6299_v12 = vadd.f32 %v6235_v7, %v5821_v63  ;;  %v3501_v41 = vadd.f32 3.0, %v13318_v22  ;;  %v20836_v11 = vrot.slane %v15878_v16, 7  ;;  %v15893_v4 = vmul.f32 0.16666667, %v3690_v34 }
 0x3d5   :  { %v6298_v45 = vadd.f32 %v6234_v43, %v5820_v6  ;;  %v13319_v17 = vadd.f32 %v15489_v61, %v15304_v31  ;;  %v3986_v28 = vand.u32 15, %v3820_v53  ;;  %vm5024_vm15 = vcmp.ne.s32.totalorder %v3993_v36, 0 }
 0x3d6   :  { %v6431_v35 = vadd.f32 %v6367_v8, %v6299_v12  ;;  %v4838_v49 = vrot.slane %v15893_v4, 7  ;;  %v5905_v25 = vrot.slane %v15893_v4, 1  ;;  %v3565_v6 = vmax.f32 %v3501_v41, 0.0  ;;  %v15920_v12 = vpop.f32.mrb[31].mxu0 }
 0x3d7   :  { %v6430_v54 = vadd.f32 %v6366_v33, %v6298_v45  ;;  %v5907_v43 = vrot.slane %v15878_v16, 1  ;;  %v21700_v7 = vrot.slane %v15774_v19, 7  ;;  %v3500_v53 = vadd.f32 3.0, %v13319_v17  ;;  %21703 = vst [vmem:[#allocation52_spill] sm:$0xff] %v15920_v12 }
 0x3d8   :  { %v15908_v61 = vsel %vm4808_vm1, %v4838_v49, %v20836_v11  ;;  %v5171_v33 = vmul.f32 %v15355_v15, %v15819_v47  ;;  %vm15916_vm3 = vcmp.ne.s32.totalorder %v3986_v28, 15  ;;  %v5499_v8 = vmul.f32 %v15336_v50, %v15715_v52 }
 0x3d9   :  { %v15897_v58 = vadd.f32 %v6498_v48, %v6430_v54  ;;  %v4839_v63 = vsel %vm4808_vm1, %v21700_v7, %v4838_v49  ;;  %v5239_v34 = vmul.f32 %v15360_v21, %v15908_v61  ;;  %v5170_v48 = vmul.f32 %v15355_v15, %v15828_v27 }
 0x3da   :  { %v15912_v45 = vsel %vm5024_vm15, %v4839_v63, 0.0  ;;  %v5369_v28 = vmul.f32 %v15430_v56, %v15908_v61  ;;  %v5906_v49 = vsel %vm5874_vm2, %v5903_v24, %v5905_v25  ;;  %v3629_v7 = vmin.f32 %v3565_v6, 6.0 }
 0x3db   :  { %v5238_v47 = vmul.f32 %v15360_v21, %v15912_v45  ;;  %v5368_v41 = vmul.f32 %v15430_v56, %v15912_v45  ;;  %v15930_v54 = vadd.f32 %v5239_v34, %v5171_v33  ;;  %v15943_v63 = vsel %vm5874_vm2, %v5905_v25, %v5907_v43 }
 0x3dc   :  { %v3564_v11 = vmax.f32 %v3500_v53, 0.0  ;;  %v5500_v33 = vmul.f32 %v15336_v50, %v15706_v32  ;;  %v5433_v34 = vadd.f32 %v5369_v28, %v15847_v60  ;;  %v15950_v12 = vsel %vm15916_vm3, %v5906_v49, 0.0 }
 0x3dd   :  { %v15937_v52 = vadd.f32 %v5238_v47, %v5170_v48  ;;  %v5432_v27 = vadd.f32 %v5368_v41, %v15845_v2  ;;  %v5629_v24 = vmul.f32 %v15341_v30, %v15793_v13  ;;  %v3823_v2 = vadd.s32 144, %v15295_v10 }
 0x3de   :  { %v5630_v25 = vmul.f32 %v15341_v30, %v15774_v19  ;;  %v5562_v48 = vadd.f32 %v5500_v33, %v5433_v34  ;;  %v6499_v53 = vmul.f32 %v15437_v37, %v15950_v12  ;;  %v3693_v32 = vmul.f32 %v13318_v22, %v3629_v7 }
 0x3df   :  { %v5561_v6 = vadd.f32 %v5499_v8, %v5432_v27  ;;  %v5762_v60 = vmul.f32 %v15423_v9, %v15878_v16  ;;  %v5761_v47 = vmul.f32 %v15423_v9, %v15893_v4  ;;  %v3628_v41 = vmin.f32 %v3564_v11, 6.0 }
 0x3e0   :  { %v5694_v28 = vadd.f32 %v5630_v25, %v5562_v48  ;;  %v15963_v8 = vadd.f32 %v6499_v53, %v6431_v35  ;;  %v15965_v49 = vmul.f32 0.16666667, %v3693_v32  ;;  %v13320_v27 = vadd.f32 %v15511_v1, %v15304_v31 }
 0x3e1   :  { %v5693_v36 = vadd.f32 %v5629_v24, %v5561_v6  ;;  %v6236_v22 = vmul.f32 %v15373_v62, %v15754_v46  ;;  %v3692_v7 = vmul.f32 %v13319_v17, %v3628_v41  ;;  %v3822_v34 = vadd.s32 136, %v15295_v10 }
 0x3e2   :  { %v6237_v24 = vmul.f32 %v15373_v62, %v15859_v42  ;;  %v5823_v6 = vadd.f32 %v5762_v60, %v5694_v28  ;;  %v4007_v11 = vand.u32 15, %v3823_v2  ;;  %v6368_v35 = vmul.f32 %v15376_v44, %v15852_v55 }
 0x3e3   :  { %v5822_v33 = vadd.f32 %v5761_v47, %v5693_v36  ;;  %v6369_v48 = vmul.f32 %v15376_v44, %v15950_v12  ;;  %v20838_v53 = vrot.slane %v15965_v49, 7  ;;  %v15979_v32 = vmul.f32 0.16666667, %v3692_v7 }
 0x3e4   :  { %v6301_v1 = vadd.f32 %v6237_v24, %v5823_v6  ;;  %v3503_v46 = vadd.f32 3.0, %v13320_v27  ;;  %v6500_v36 = vmul.f32 %v15437_v37, %v15943_v63  ;;  %v4000_v42 = vand.u32 15, %v3822_v34  ;;  %v15998_v6 = vpop.f32.mrb[32].mxu0 }
 0x3e5   :  { %v6300_v25 = vadd.f32 %v6236_v22, %v5822_v33  ;;  %v4842_v2 = vrot.slane %v15979_v32, 7  ;;  %vm5026_vm4 = vcmp.ne.s32.totalorder %v4007_v11, 0  ;;  %v5909_v41 = vrot.slane %v15979_v32, 1  ;;  %21705 = vst [vmem:[#allocation54_spill] sm:$0xff] %v15998_v6 }
 0x3e6   :  { %v6433_v60 = vadd.f32 %v6369_v48, %v6301_v1  ;;  %v13321_v28 = vadd.f32 %v15518_v38, %v15304_v31  ;;  %v20837_v33 = vrot.slane %v15965_v49, 1  ;;  %v21704_v22 = vrot.slane %v15878_v16, 7 }
 0x3e7   :  { %v6432_v17 = vadd.f32 %v6368_v35, %v6300_v25  ;;  %v15996_v34 = vsel %vm4808_vm1, %v4842_v2, %v20838_v53  ;;  %v3567_v24 = vmax.f32 %v3503_v46, 0.0  ;;  %v5173_v11 = vmul.f32 %v15355_v15, %v15908_v61 }
 0x3e8   :  { %v4843_v7 = vsel %vm4808_vm1, %v21704_v22, %v4842_v2  ;;  %v5241_v38 = vmul.f32 %v15360_v21, %v15996_v34  ;;  %vm6093_vm5 = vcmp.ne.s32.totalorder %v4000_v42, 15  ;;  %v5501_v25 = vmul.f32 %v15336_v50, %v15793_v13 }
 0x3e9   :  { %v15984_v47 = vadd.f32 %v6500_v36, %v6432_v17  ;;  %v16002_v35 = vsel %vm5026_vm4, %v4843_v7, 0.0  ;;  %v5172_v48 = vmul.f32 %v15355_v15, %v15912_v45  ;;  %v5371_v61 = vmul.f32 %v15430_v56, %v15996_v34 }
 0x3ea   :  { %v5240_v1 = vmul.f32 %v15360_v21, %v16002_v35  ;;  %v5370_v46 = vmul.f32 %v15430_v56, %v16002_v35  ;;  %v16014_v17 = vadd.f32 %v5241_v38, %v5173_v11  ;;  %v5910_v36 = vsel %vm5874_vm2, %v5907_v43, %v5909_v41 }
 0x3eb   :  { %v3502_v42 = vadd.f32 3.0, %v13321_v28  ;;  %v16027_v2 = vsel %vm5874_vm2, %v5909_v41, %v20837_v33  ;;  %v3631_v22 = vmin.f32 %v3567_v24, 6.0  ;;  %v5502_v7 = vmul.f32 %v15336_v50, %v15774_v19 }
 0x3ec   :  { %v16021_v13 = vadd.f32 %v5240_v1, %v5172_v48  ;;  %v5434_v45 = vadd.f32 %v5370_v46, %v15937_v52  ;;  %v5435_v11 = vadd.f32 %v5371_v61, %v15930_v54  ;;  %v16032_v38 = vsel %vm6093_vm5, %v5910_v36, 0.0  ;;  %v16040_v46 = vpop.f32.mrb[33].mxu0  ;;  %v14078_v36 = vld [vmem:[%s20530_s1 + $0xe0] sm:$0xff] }
 0x3ed   :  { %v5631_v43 = vmul.f32 %v15341_v30, %v15893_v4  ;;  %v5632_v52 = vmul.f32 %v15341_v30, %v15878_v16  ;;  %v6501_v41 = vmul.f32 %v15437_v37, %v16032_v38  ;;  %21706 = vst [vmem:[#allocation55_spill] sm:$0xff] %v16040_v46  ;;  %v5763_v19 = vmul.f32 %v15423_v9, %v15979_v32 }
 0x3ee   :  { %v5563_v48 = vadd.f32 %v5501_v25, %v5434_v45  ;;  %v5564_v1 = vadd.f32 %v5502_v7, %v5435_v11  ;;  %v3695_v54 = vmul.f32 %v13320_v27, %v3631_v22  ;;  %v3566_v61 = vmax.f32 %v3502_v42, 0.0  ;;  %v16058_v22 = vpop.f32.mrb[34].mxu0 }
 0x3ef   :  { %v21707_v25 = vsub.s32 1, %v15295_v10  ;;  %v5764_v7 = vmul.f32 %v15423_v9, %v15965_v49  ;;  %v16053_v33 = vadd.f32 %v6501_v41, %v6433_v60  ;;  %v3825_v42 = vadd.s32 160, %v15295_v10  ;;  %21708 = vst [vmem:[#allocation58_spill] sm:$0xff] %v16058_v22 }
 0x3f0   :  { %v5695_v24 = vadd.f32 %v5631_v43, %v5563_v48  ;;  %v5696_v11 = vadd.f32 %v5632_v52, %v5564_v1  ;;  %v6238_v48 = vmul.f32 %v15373_v62, %v15852_v55  ;;  %v3630_v27 = vmin.f32 %v3566_v61, 6.0 }
 0x3f1   :  { %v16049_v45 = vrot.slane %v14078_v36, %v21707_v25  ;;  %v16062_v53 = vmul.f32 %v15341_v30, %v15315_v57  ;;  %v16066_v36 = vmul.f32 %v15336_v50, %v15318_v51  ;;  %v6239_v60 = vmul.f32 %v15373_v62, %v15950_v12  ;;  %v16078_v57 = vpop.f32.mrb[35].mxu0 }
 0x3f2   :  { %v5824_v43 = vadd.f32 %v5763_v19, %v5695_v24  ;;  %v5825_v52 = vadd.f32 %v5764_v7, %v5696_v11  ;;  %v16072_v55 = vmul.f32 %v15341_v30, %v15318_v51  ;;  %v6370_v1 = vmul.f32 %v15376_v44, %v15943_v63  ;;  %21712 = vst [vmem:[#allocation66_spill] sm:$0xff] %v16078_v57 }
 0x3f3   :  { %21709 = vst [vmem:[#allocation59_spill] sm:$0xff] %v16062_v53  ;;  %21710 = vst [vmem:[#allocation63_spill] sm:$0xff] %v16066_v36  ;;  %v16076_v24 = vmul.f32 0.16666667, %v3695_v54  ;;  %v16082_v19 = vmul.f32 %v15360_v21, %v15346_v59  ;;  %v6371_v12 = vmul.f32 %v15376_v44, %v16032_v38  ;;  %v3824_v25 = vadd.s32 152, %v15295_v10  ;;  %v21714_v54 = vld [vmem:[#allocation17_spill] sm:$0xff] }
 0x3f4   :  { %21711 = vst [vmem:[#allocation64_spill] sm:$0xff] %v16072_v55  ;;  %v6302_v41 = vadd.f32 %v6238_v48, %v5824_v43  ;;  %v6303_v61 = vadd.f32 %v6239_v60, %v5825_v52  ;;  %v6502_v11 = vmul.f32 %v15437_v37, %v16027_v2  ;;  %v3694_v55 = vmul.f32 %v13321_v28, %v3630_v27  ;;  %v21717_v52 = vld [vmem:[#allocation34_spill] sm:$0xff]  ;;  %v21726_v28 = vld [vmem:[#allocation23_spill] sm:$0xff] }
 0x3f5   :  { %21713 = vst [vmem:[#allocation68_spill] sm:$0xff] %v16082_v19  ;;  %v4021_v43 = vand.u32 15, %v3825_v42  ;;  %v16091_v48 = vmul.f32 %v15373_v62, %v21714_v54  ;;  %v16095_v59 = vmul.f32 %v15376_v44, %v21714_v54  ;;  %v13322_v53 = vadd.f32 %v21717_v52, %v15304_v31  ;;  %v21719_v42 = vld [vmem:[#allocation18_spill] sm:$0xff]  ;;  %v21721_v54 = vld [vmem:[#allocation21_spill] sm:$0xff] }
 0x3f6   :  { %v6434_v7 = vadd.f32 %v6370_v1, %v6302_v41  ;;  %v6435_v60 = vadd.f32 %v6371_v12, %v6303_v61  ;;  %v16101_v1 = vadd.f32 %v16049_v45, %v15606_v26  ;;  %v16106_v27 = vmul.f32 0.16666667, %v3694_v55  ;;  %v21723_v12 = vld [vmem:[#allocation19_spill] sm:$0xff] }
 0x3f7   :  { %21715 = vst [vmem:[#allocation70_spill] sm:$0xff] %v16091_v48  ;;  %21716 = vst [vmem:[#allocation73_spill] sm:$0xff] %v16095_v59  ;;  %v16110_v48 = vmul.f32 %v15423_v9, %v21719_v42  ;;  %v16114_v61 = vmul.f32 %v15430_v56, %v21721_v54  ;;  %v16118_v52 = vmul.f32 %v15341_v30, %v21723_v12  ;;  %vm5028_vm6 = vcmp.ne.s32.totalorder %v4021_v43, 0 }
 0x3f8   :  { %v16103_v41 = vadd.f32 %v6502_v11, %v6434_v7  ;;  %v16122_v26 = vmul.f32 %v15423_v9, %v21723_v12  ;;  %v4014_v7 = vand.u32 15, %v3824_v25  ;;  %v4846_v55 = vrot.slane %v16106_v27, 7 }
 0x3f9   :  { %21720 = vst [vmem:[#allocation76_spill] sm:$0xff] %v16110_v48  ;;  %21722 = vst [vmem:[#allocation78_spill] sm:$0xff] %v16114_v61  ;;  %v3505_v11 = vadd.f32 3.0, %v13322_v53  ;;  %v16127_v42 = vmul.f32 %v15360_v21, %v21726_v28  ;;  %v16131_v54 = vmul.f32 %v15430_v56, %v21726_v28  ;;  %v5913_v59 = vrot.slane %v16106_v27, 1  ;;  %v21729_v48 = vld [vmem:[#allocation35_spill] sm:$0xff] }
 0x3fa   :  { %21718 = vst [vmem:[#allocation74_spill] sm:$0xff] %v16103_v41  ;;  %21724 = vst [vmem:[#allocation80_spill] sm:$0xff] %v16118_v52  ;;  %v13323_v52 = vadd.f32 %v21729_v48, %v15304_v31  ;;  %v6687_v12 = vadd.f32 3.0, %v16101_v1  ;;  %v21730_v43 = vrot.slane %v15965_v49, 7  ;;  %v21731_v36 = vrot.slane %v16076_v24, 7 }
 0x3fb   :  { %21725 = vst [vmem:[#allocation82_spill] sm:$0xff] %v16122_v26  ;;  %21727 = vst [vmem:[#allocation84_spill] sm:$0xff] %v16127_v42  ;;  %v5174_v28 = vmul.f32 %v15355_v15, %v16002_v35  ;;  %vm6095_vm7 = vcmp.ne.s32.totalorder %v4014_v7, 15  ;;  %v5503_v51 = vmul.f32 %v15336_v50, %v15893_v4  ;;  %v21733_v7 = vrot.slane %v16076_v24, 1 }
 0x3fc   :  { %21728 = vst [vmem:[#allocation86_spill] sm:$0xff] %v16131_v54  ;;  %v4847_v26 = vsel %vm4808_vm1, %v21730_v43, %v4846_v55  ;;  %v16144_v61 = vsel %vm4808_vm1, %v4846_v55, %v21731_v36  ;;  %v5175_v54 = vmul.f32 %v15355_v15, %v15996_v34  ;;  %v3569_v36 = vmax.f32 %v3505_v11, 0.0 }
 0x3fd   :  { %v16150_v48 = vsel %vm5028_vm6, %v4847_v26, 0.0  ;;  %v5243_v25 = vmul.f32 %v15360_v21, %v16144_v61  ;;  %v5373_v35 = vmul.f32 %v15430_v56, %v16144_v61  ;;  %v21732_v34 = vrot.slane %v15965_v49, 1 }
 0x3fe   :  { %v5242_v42 = vmul.f32 %v15360_v21, %v16150_v48  ;;  %v5372_v43 = vmul.f32 %v15430_v56, %v16150_v48  ;;  %v3504_v19 = vadd.f32 3.0, %v13323_v52  ;;  %v16173_v11 = vsel %vm5874_vm2, %v5913_v59, %v21733_v7 }
 0x3ff   :  { %v16158_v55 = vadd.f32 %v5243_v25, %v5175_v54  ;;  %v5914_v26 = vsel %vm5874_vm2, %v21732_v34, %v5913_v59  ;;  %v16175_v54 = vpop.f32.mrb[36].mxu0  ;;  %v6751_v25 = vmax.f32 %v6687_v12, 0.0  ;;  %v5504_v46 = vmul.f32 %v15336_v50, %v15878_v16 }
 0x400   :  { %v16167_v57 = vadd.f32 %v5242_v42, %v5174_v28  ;;  %v5436_v22 = vadd.f32 %v5372_v43, %v16021_v13  ;;  %21734 = vst [vmem:[#allocation88_spill] sm:$0xff] %v16175_v54  ;;  %v5437_v34 = vadd.f32 %v5373_v35, %v16014_v17  ;;  %v16180_v6 = vsel %vm6095_vm7, %v5914_v26, 0.0 }
 0x401   :  { %v16184_v4 = vadd.f32 %v16049_v45, %v15659_v20  ;;  %v5634_v13 = vmul.f32 %v15341_v30, %v15965_v49  ;;  %v5633_v59 = vmul.f32 %v15341_v30, %v15979_v32  ;;  %v6503_v12 = vmul.f32 %v15437_v37, %v16180_v6 }
 0x402   :  { %v5565_v42 = vadd.f32 %v5503_v51, %v5436_v22  ;;  %v5566_v28 = vadd.f32 %v5504_v46, %v5437_v34  ;;  %v3633_v16 = vmin.f32 %v3569_v36, 6.0  ;;  %v3568_v43 = vmax.f32 %v3504_v19, 0.0  ;;  %v16199_v46 = vpop.f32.mrb[37].mxu0  ;;  %v21737_v22 = vld [vmem:[#allocation29_spill] sm:$0xff] }
 0x403   :  { %v5766_v17 = vmul.f32 %v15423_v9, %v16076_v24  ;;  %v5765_v20 = vmul.f32 %v15423_v9, %v16106_v27  ;;  %v3827_v26 = vadd.s32 176, %v15295_v10  ;;  %v16197_v54 = vadd.f32 %v6503_v12, %v6435_v60  ;;  %21736 = vst [vmem:[#allocation93_spill] sm:$0xff] %v16199_v46 }
 0x404   :  { %v5697_v35 = vadd.f32 %v5633_v59, %v5565_v42  ;;  %v5698_v7 = vadd.f32 %v5634_v13, %v5566_v28  ;;  %v3697_v41 = vmul.f32 %v13322_v53, %v3633_v16  ;;  %v3632_v51 = vmin.f32 %v3568_v43, 6.0 }
 0x405   :  { %21735 = vst [vmem:[#allocation90_spill] sm:$0xff] %v16197_v54  ;;  %v16203_v36 = vmul.f32 %v15376_v44, %v21737_v22  ;;  %v6688_v19 = vadd.f32 3.0, %v16184_v4  ;;  %v6240_v59 = vmul.f32 %v15373_v62, %v15943_v63  ;;  %v6241_v42 = vmul.f32 %v15373_v62, %v16032_v38 }
 0x406   :  { %v5826_v34 = vadd.f32 %v5765_v20, %v5697_v35  ;;  %v5827_v13 = vadd.f32 %v5766_v17, %v5698_v7  ;;  %v16210_v60 = vmul.f32 0.16666667, %v3697_v41  ;;  %v3696_v53 = vmul.f32 %v13323_v52, %v3632_v51  ;;  %v21740_v7 = vld [vmem:[#allocation37_spill] sm:$0xff] }
 0x407   :  { %21738 = vst [vmem:[#allocation95_spill] sm:$0xff] %v16203_v36  ;;  %v16214_v28 = vmul.f32 %v15376_v44, %v15418_v5  ;;  %v6815_v12 = vmin.f32 %v6751_v25, 6.0  ;;  %v6372_v16 = vmul.f32 %v15376_v44, %v16027_v2  ;;  %v6373_v63 = vmul.f32 %v15376_v44, %v16180_v6 }
 0x408   :  { %v6304_v43 = vadd.f32 %v6240_v59, %v5826_v34  ;;  %v6305_v35 = vadd.f32 %v6241_v42, %v5827_v13  ;;  %v3826_v20 = vadd.s32 168, %v15295_v10  ;;  %v4035_v38 = vand.u32 15, %v3827_v26 }
 0x409   :  { %21739 = vst [vmem:[#allocation96_spill] sm:$0xff] %v16214_v28  ;;  %v6752_v17 = vmax.f32 %v6688_v19, 0.0  ;;  %v6504_v52 = vmul.f32 %v15437_v37, %v16173_v11  ;;  %v13324_v51 = vadd.f32 %v21740_v7, %v15304_v31  ;;  %v20841_v22 = vrot.slane %v16210_v60, 7 }
 0x40a   :  { %v6436_v41 = vadd.f32 %v6372_v16, %v6304_v43  ;;  %v6437_v25 = vadd.f32 %v6373_v63, %v6305_v35  ;;  %v16226_v36 = vmul.f32 0.16666667, %v3696_v53  ;;  %v13325_v34 = vadd.f32 %v15572_v29, %v15304_v31  ;;  %v16248_v16 = vpop.f32.mrb[38].mxu0  ;;  %v21745_v43 = vld [vmem:[#allocation46_spill] sm:$0xff] }
 0x40b   :  { %v16232_v59 = vmul.f32 %v15437_v37, %v15418_v5  ;;  %v16236_v26 = vmul.f32 %v15423_v9, %v15449_v39  ;;  %v16239_v19 = vmul.f32 %v6815_v12, %v16101_v1  ;;  %v16245_v13 = vadd.f32 %v16049_v45, %v15689_v40  ;;  %21744 = vst [vmem:[#allocation106_spill] sm:$0xff] %v16248_v16 }
 0x40c   :  { %v16241_v42 = vadd.f32 %v6504_v52, %v6436_v41  ;;  %v4028_v53 = vand.u32 15, %v3826_v20  ;;  %v4850_v29 = vrot.slane %v16226_v36, 7  ;;  %vm5030_vm8 = vcmp.ne.s32.totalorder %v4035_v38, 0 }
 0x40d   :  { %21741 = vst [vmem:[#allocation99_spill] sm:$0xff] %v16232_v59  ;;  %21742 = vst [vmem:[#allocation101_spill] sm:$0xff] %v16236_v26  ;;  %v6816_v5 = vmin.f32 %v6752_v17, 6.0  ;;  %v16252_v39 = vadd.f32 %v16049_v45, %v21745_v43  ;;  %v5917_v1 = vrot.slane %v16226_v36, 1  ;;  %v3507_v12 = vadd.f32 3.0, %v13324_v51  ;;  %v16264_v17 = vpop.f32.mrb[39].mxu0 }
 0x40e   :  { %21743 = vst [vmem:[#allocation103_spill] sm:$0xff] %v16241_v42  ;;  %v21746_v63 = vrot.slane %v16076_v24, 7  ;;  %v16262_v20 = vsel %vm4808_vm1, %v4850_v29, %v20841_v22  ;;  %v3506_v38 = vadd.f32 3.0, %v13325_v34  ;;  %21747 = vst [vmem:[#allocation110_spill] sm:$0xff] %v16264_v17  ;;  %v5505_v41 = vmul.f32 %v15336_v50, %v15979_v32 }
 0x40f   :  { %v5177_v52 = vmul.f32 %v15355_v15, %v16144_v61  ;;  %v5245_v43 = vmul.f32 %v15360_v21, %v16262_v20  ;;  %vm6097_vm9 = vcmp.ne.s32.totalorder %v4028_v53, 15  ;;  %v5375_v32 = vmul.f32 %v15430_v56, %v16262_v20 }
 0x410   :  { %v4851_v40 = vsel %vm4808_vm1, %v21746_v63, %v4850_v29  ;;  %v5176_v63 = vmul.f32 %v15355_v15, %v16150_v48  ;;  %v21748_v61 = vrot.slane %v16076_v24, 1  ;;  %v3571_v59 = vmax.f32 %v3507_v12, 0.0 }
 0x411   :  { %v16270_v7 = vsel %vm5030_vm8, %v4851_v40, 0.0  ;;  %v16280_v35 = vadd.f32 %v5245_v43, %v5177_v52  ;;  %v21749_v26 = vrot.slane %v16210_v60, 1  ;;  %v3570_v53 = vmax.f32 %v3506_v38, 0.0 }
 0x412   :  { %v5244_v29 = vmul.f32 %v15360_v21, %v16270_v7  ;;  %v5374_v22 = vmul.f32 %v15430_v56, %v16270_v7  ;;  %v5918_v40 = vsel %vm5874_vm2, %v21748_v61, %v5917_v1  ;;  %v6689_v52 = vadd.f32 3.0, %v16245_v13 }
 0x413   :  { %v16293_v17 = vsel %vm5874_vm2, %v5917_v1, %v21749_v26  ;;  %v5506_v43 = vmul.f32 %v15336_v50, %v15965_v49  ;;  %v5439_v16 = vadd.f32 %v5375_v32, %v16158_v55  ;;  %v16299_v46 = vsel %vm6097_vm9, %v5918_v40, 0.0 }
 0x414   :  { %v16287_v28 = vadd.f32 %v5244_v29, %v5176_v63  ;;  %v5438_v48 = vadd.f32 %v5374_v22, %v16167_v57  ;;  %v6690_v12 = vadd.f32 3.0, %v16252_v39  ;;  %v5635_v57 = vmul.f32 %v15341_v30, %v16106_v27 }
 0x415   :  { %v6505_v26 = vmul.f32 %v15437_v37, %v16299_v46  ;;  %v5636_v1 = vmul.f32 %v15341_v30, %v16076_v24  ;;  %v5568_v38 = vadd.f32 %v5506_v43, %v5439_v16  ;;  %v3635_v63 = vmin.f32 %v3571_v59, 6.0 }
 0x416   :  { %v5567_v22 = vadd.f32 %v5505_v41, %v5438_v48  ;;  %v3829_v49 = vadd.s32 192, %v15295_v10  ;;  %v5767_v55 = vmul.f32 %v15423_v9, %v16226_v36  ;;  %v3634_v61 = vmin.f32 %v3570_v53, 6.0 }
 0x417   :  { %v16311_v32 = vadd.f32 %v6505_v26, %v6437_v25  ;;  %v6753_v40 = vmax.f32 %v6689_v52, 0.0  ;;  %v5768_v41 = vmul.f32 %v15423_v9, %v16210_v60  ;;  %v5700_v48 = vadd.f32 %v5636_v1, %v5568_v38 }
 0x418   :  { %v5699_v29 = vadd.f32 %v5635_v57, %v5567_v22  ;;  %v3699_v42 = vmul.f32 %v13324_v51, %v3635_v63  ;;  %v6243_v54 = vmul.f32 %v15373_v62, %v16180_v6  ;;  %v6242_v59 = vmul.f32 %v15373_v62, %v16027_v2  ;;  %v16319_v57 = vpop.f32.mrb[40].mxu0 }
 0x419   :  { %v3698_v43 = vmul.f32 %v13325_v34, %v3634_v61  ;;  %21750 = vst [vmem:[#allocation112_spill] sm:$0xff] %v16319_v57  ;;  %v5829_v22 = vadd.f32 %v5768_v41, %v5700_v48  ;;  %v3828_v53 = vadd.s32 184, %v15295_v10  ;;  %v4049_v52 = vand.u32 15, %v3829_v49 }
 0x41a   :  { %v5828_v16 = vadd.f32 %v5767_v55, %v5699_v29  ;;  %v16321_v25 = vmul.f32 0.16666667, %v3699_v42  ;;  %v6754_v26 = vmax.f32 %v6690_v12, 0.0  ;;  %v6374_v51 = vmul.f32 %v15376_v44, %v16173_v11  ;;  %v16337_v55 = vpop.f32.mrb[41].mxu0 }
 0x41b   :  { %v16326_v38 = vmul.f32 0.16666667, %v3698_v43  ;;  %v16329_v6 = vmul.f32 0.16666667, %v16239_v19  ;;  %v6307_v2 = vadd.f32 %v6243_v54, %v5829_v22  ;;  %v6375_v34 = vmul.f32 %v15376_v44, %v16299_v46  ;;  %21752 = vst [vmem:[#allocation117_spill] sm:$0xff] %v16337_v55 }
 0x41c   :  { %v6306_v1 = vadd.f32 %v6242_v59, %v5828_v16  ;;  %v20842_v42 = vrot.slane %v16321_v25, 7  ;;  %v6880_v63 = vmul.f32 %v6816_v5, %v16184_v4  ;;  %v6817_v29 = vmin.f32 %v6753_v40, 6.0  ;;  %v21754_v59 = vld [vmem:[#allocation40_spill] sm:$0xff] }
 0x41d   :  { %21751 = vst [vmem:[#allocation116_spill] sm:$0xff] %v16329_v6  ;;  %v6506_v12 = vmul.f32 %v15437_v37, %v16293_v17  ;;  %v6439_v61 = vadd.f32 %v6375_v34, %v6307_v2  ;;  %v4042_v41 = vand.u32 15, %v3828_v53  ;;  %v4854_v19 = vrot.slane %v16326_v38, 7 }
 0x41e   :  { %v6438_v49 = vadd.f32 %v6374_v51, %v6306_v1  ;;  %vm5032_vm10 = vcmp.ne.s32.totalorder %v4049_v52, 0  ;;  %v6818_v54 = vmin.f32 %v6754_v26, 6.0  ;;  %v5921_v16 = vrot.slane %v16326_v38, 1 }
 0x41f   :  { %v13326_v4 = vadd.f32 %v21754_v59, %v15304_v31  ;;  %v16347_v5 = vadd.f32 %v16049_v45, %v15778_v0  ;;  %v20843_v40 = vrot.slane %v16321_v25, 1  ;;  %v21755_v43 = vrot.slane %v16210_v60, 7 }
 0x420   :  { %v16340_v48 = vadd.f32 %v6506_v12, %v6438_v49  ;;  %v16356_v53 = vsel %vm4808_vm1, %v4854_v19, %v20842_v42  ;;  %v5507_v52 = vmul.f32 %v15336_v50, %v16106_v27  ;;  %v5178_v26 = vmul.f32 %v15355_v15, %v16270_v7  ;;  %v21757_v12 = vld [vmem:[#allocation42_spill] sm:$0xff] }
 0x421   :  { %v4855_v22 = vsel %vm4808_vm1, %v21755_v43, %v4854_v19  ;;  %v5179_v0 = vmul.f32 %v15355_v15, %v16262_v20  ;;  %v5247_v2 = vmul.f32 %v15360_v21, %v16356_v53  ;;  %vm6099_vm11 = vcmp.ne.s32.totalorder %v4042_v41, 15 }
 0x422   :  { %21753 = vst [vmem:[#allocation118_spill] sm:$0xff] %v16340_v48  ;;  %v16364_v51 = vsel %vm5032_vm10, %v4855_v22, 0.0  ;;  %v5377_v27 = vmul.f32 %v15430_v56, %v16356_v53  ;;  %v21756_v7 = vrot.slane %v16210_v60, 1  ;;  %v3509_v20 = vadd.f32 3.0, %v13326_v4 }
 0x423   :  { %v5246_v1 = vmul.f32 %v15360_v21, %v16364_v51  ;;  %v5376_v34 = vmul.f32 %v15430_v56, %v16364_v51  ;;  %v13327_v19 = vadd.f32 %v21757_v12, %v15304_v31  ;;  %v16381_v43 = vadd.f32 %v5247_v2, %v5179_v0 }
 0x424   :  { %v5922_v49 = vsel %vm5874_vm2, %v21756_v7, %v5921_v16  ;;  %v16387_v41 = vsel %vm5874_vm2, %v5921_v16, %v20843_v40  ;;  %v6691_v42 = vadd.f32 3.0, %v16347_v5  ;;  %v5508_v7 = vmul.f32 %v15336_v50, %v16076_v24 }
 0x425   :  { %v16379_v59 = vadd.f32 %v5246_v1, %v5178_v26  ;;  %v5440_v22 = vadd.f32 %v5376_v34, %v16287_v28  ;;  %v5441_v55 = vadd.f32 %v5377_v27, %v16280_v35  ;;  %v16393_v57 = vsel %vm6099_vm11, %v5922_v49, 0.0 }
 0x426   :  { %v16395_v26 = vmul.f32 0.16666667, %v6880_v63  ;;  %v6881_v0 = vmul.f32 %v6817_v29, %v16245_v13  ;;  %v5637_v28 = vmul.f32 %v15341_v30, %v16226_v36  ;;  %v6882_v16 = vmul.f32 %v6818_v54, %v16252_v39  ;;  %v16407_v13 = vpop.f32.mrb[42].mxu0 }
 0x427   :  { %v5569_v1 = vadd.f32 %v5507_v52, %v5440_v22  ;;  %v5638_v2 = vmul.f32 %v15341_v30, %v16210_v60  ;;  %v5570_v34 = vadd.f32 %v5508_v7, %v5441_v55  ;;  %v6507_v24 = vmul.f32 %v15437_v37, %v16393_v57  ;;  %21759 = vst [vmem:[#allocation129_spill] sm:$0xff] %v16407_v13 }
 0x428   :  { %21758 = vst [vmem:[#allocation123_spill] sm:$0xff] %v16395_v26  ;;  %v5769_v63 = vmul.f32 %v15423_v9, %v16326_v38  ;;  %v3573_v27 = vmax.f32 %v3509_v20, 0.0  ;;  %v3508_v49 = vadd.f32 3.0, %v13327_v19  ;;  %vm7004_vm12 = vcmask 523264  }
 0x429   :  { %v5701_v35 = vadd.f32 %v5637_v28, %v5569_v1  ;;  %v6755_v29 = vmax.f32 %v6691_v42, 0.0  ;;  %v5770_v39 = vmul.f32 %v15423_v9, %v16321_v25  ;;  %v5702_v54 = vadd.f32 %v5638_v2, %v5570_v34 }
 0x42a   :  { %v16411_v52 = vadd.f32 %v6507_v24, %v6439_v61  ;;  %v6244_v12 = vmul.f32 %v15373_v62, %v16173_v11  ;;  %v3637_v22 = vmin.f32 %v3573_v27, 6.0  ;;  %v3572_v7 = vmax.f32 %v3508_v49, 0.0 }
 0x42b   :  { %v5830_v55 = vadd.f32 %v5769_v63, %v5701_v35  ;;  %v16417_v20 = vadd.f32 %v16049_v45, %v15824_v18  ;;  %v6245_v28 = vmul.f32 %v15373_v62, %v16299_v46  ;;  %v5831_v42 = vadd.f32 %v5770_v39, %v5702_v54 }
 0x42c   :  { %21760 = vst [vmem:[#allocation102_spill] sm:$0xff] %v16411_v52  ;;  %v3831_v1 = vadd.s32 208, %v15295_v10  ;;  %v6376_v61 = vmul.f32 %v15376_v44, %v16293_v17  ;;  %v3701_v34 = vmul.f32 %v13326_v4, %v3637_v22  ;;  %v3636_v24 = vmin.f32 %v3572_v7, 6.0 }
 0x42d   :  { %v6308_v2 = vadd.f32 %v6244_v12, %v5830_v55  ;;  %v16424_v35 = vmul.f32 0.16666667, %v6881_v0  ;;  %v6309_v11 = vadd.f32 %v6245_v28, %v5831_v42  ;;  %v6377_v63 = vmul.f32 %v15376_v44, %v16393_v57  ;;  %v21763_v0 = vld [vmem:[#allocation44_spill] sm:$0xff] }
 0x42e   :  { %v6508_v18 = vmul.f32 %v15437_v37, %v16387_v41  ;;  %v16430_v46 = vmul.f32 0.16666667, %v3701_v34  ;;  %v3700_v49 = vmul.f32 %v13327_v19, %v3636_v24  ;;  %v3830_v39 = vadd.s32 200, %v15295_v10  ;;  %v21765_v42 = vld [vmem:[#allocation48_spill] sm:$0xff]  ;;  %v21768_v34 = vld [vmem:[#allocation33_spill] sm:$0xff] }
 0x42f   :  { %21761 = vst [vmem:[#allocation108_spill] sm:$0xff] %v16424_v35  ;;  %v6440_v27 = vadd.f32 %v6376_v61, %v6308_v2  ;;  %v16433_v54 = vmul.f32 0.16666667, %v6882_v16  ;;  %v6441_v55 = vadd.f32 %v6377_v63, %v6309_v11  ;;  %v4063_v4 = vand.u32 15, %v3831_v1  ;;  %v21766_v2 = vld [vmem:[#allocation27_spill] sm:$0xff] }
 0x430   :  { %v13328_v12 = vadd.f32 %v21763_v0, %v15304_v31  ;;  %v6692_v22 = vadd.f32 3.0, %v16417_v20  ;;  %v6819_v7 = vmin.f32 %v6755_v29, 6.0  ;;  %v13329_v61 = vadd.f32 %v21765_v42, %v15304_v31 }
 0x431   :  { %21762 = vst [vmem:[#allocation119_spill] sm:$0xff] %v16433_v54  ;;  %v16438_v28 = vadd.f32 %v6508_v18, %v6440_v27  ;;  %v16444_v19 = vmul.f32 %v15430_v56, %v21766_v2  ;;  %v16448_v16 = vmul.f32 %v15437_v37, %v21768_v34  ;;  %v16451_v24 = vmul.f32 0.16666667, %v3700_v49  ;;  %v16465_v27 = vpop.f32.mrb[43].mxu0 }
 0x432   :  { %v16455_v29 = vsel %vm7004_vm12, %v16329_v6, 0.0  ;;  %v16459_v11 = vsel %vm7004_vm12, %v16395_v26, 0.0  ;;  %v16463_v63 = vsel %vm7004_vm12, %v16424_v35, 0.0  ;;  %v4056_v18 = vand.u32 15, %v3830_v39  ;;  %21773 = vst [vmem:[#allocation9_spill] sm:$0xff] %v16465_v27 }
 0x433   :  { %21764 = vst [vmem:[#allocation122_spill] sm:$0xff] %v16438_v28  ;;  %21767 = vst [vmem:[#allocation127_spill] sm:$0xff] %v16444_v19  ;;  %v16469_v0 = vsel %vm7004_vm12, %v16433_v54, 0.0  ;;  %v4858_v49 = vrot.slane %v16451_v24, 7  ;;  %vm5034_vm13 = vcmp.ne.s32.totalorder %v4063_v4, 0  ;;  %v3511_v42 = vadd.f32 3.0, %v13328_v12 }
 0x434   :  { %21769 = vst [vmem:[#allocation131_spill] sm:$0xff] %v16448_v16  ;;  %21770 = vst [vmem:[#allocation134_spill] sm:$0xff] %v16455_v29  ;;  %v6756_v2 = vmax.f32 %v6692_v22, 0.0  ;;  %v6883_v34 = vmul.f32 %v6819_v7, %v16347_v5  ;;  %v5925_v40 = vrot.slane %v16451_v24, 1  ;;  %v3510_v1 = vadd.f32 3.0, %v13329_v61 }
 0x435   :  { %21771 = vst [vmem:[#allocation135_spill] sm:$0xff] %v16459_v11  ;;  %21772 = vst [vmem:[#allocation8_spill] sm:$0xff] %v16463_v63  ;;  %v5509_v35 = vmul.f32 %v15336_v50, %v16226_v36  ;;  %v21775_v26 = vrot.slane %v16321_v25, 7  ;;  %v21776_v6 = vrot.slane %v16430_v46, 7  ;;  %v5181_v5 = vmul.f32 %v15355_v15, %v16356_v53 }
 0x436   :  { %21774 = vst [vmem:[#allocation13_spill] sm:$0xff] %v16469_v0  ;;  %vm6101_vm14 = vcmp.ne.s32.totalorder %v4056_v18, 15  ;;  %v5180_v36 = vmul.f32 %v15355_v15, %v16364_v51  ;;  %v3574_v18 = vmax.f32 %v3510_v1, 0.0  ;;  %v21778_v11 = vrot.slane %v16430_v46, 1 }
 0x437   :  { %v4859_v54 = vsel %vm4808_vm1, %v21775_v26, %v4858_v49  ;;  %v16483_v4 = vsel %vm4808_vm1, %v4858_v49, %v21776_v6  ;;  %v3575_v6 = vmax.f32 %v3511_v42, 0.0  ;;  %v5510_v16 = vmul.f32 %v15336_v50, %v16210_v60 }
 0x438   :  { %v16487_v22 = vsel %vm5034_vm13, %v4859_v54, 0.0  ;;  %v5249_v7 = vmul.f32 %v15360_v21, %v16483_v4  ;;  %v5379_v53 = vmul.f32 %v15430_v56, %v16483_v4  ;;  %v21777_v54 = vrot.slane %v16321_v25, 1 }
 0x439   :  { %v5248_v26 = vmul.f32 %v15360_v21, %v16487_v22  ;;  %v5378_v39 = vmul.f32 %v15430_v56, %v16487_v22  ;;  %v16510_v29 = vsel %vm5874_vm2, %v5925_v40, %v21778_v11  ;;  %v16521_v1 = vadd.f32 %v16049_v45, %v15872_v3 }
 0x43a   :  { %v16497_v49 = vadd.f32 %v5249_v7, %v5181_v5  ;;  %v5926_v0 = vsel %vm5874_vm2, %v21777_v54, %v5925_v40  ;;  %v6820_v5 = vmin.f32 %v6756_v2, 6.0  ;;  %v16514_v7 = vmul.f32 0.16666667, %v6883_v34 }
 0x43b   :  { %v16504_v63 = vadd.f32 %v5248_v26, %v5180_v36  ;;  %v5442_v51 = vadd.f32 %v5378_v39, %v16379_v59  ;;  %v16512_v42 = vsel %vm6101_vm14, %v5926_v0, 0.0  ;;  %v5443_v54 = vadd.f32 %v5379_v53, %v16381_v43  ;;  %v16534_v26 = vpop.f32.mrb[44].mxu0 }
 0x43c   :  { %21779 = vst [vmem:[#allocation14_spill] sm:$0xff] %v16514_v7  ;;  %v5639_v59 = vmul.f32 %v15341_v30, %v16326_v38  ;;  %v6509_v40 = vmul.f32 %v15437_v37, %v16512_v42  ;;  %v5640_v11 = vmul.f32 %v15341_v30, %v16321_v25  ;;  %v3639_v2 = vmin.f32 %v3575_v6, 6.0  ;;  %21781 = vst [vmem:[#allocation20_spill] sm:$0xff] %v16534_v26 }
 0x43d   :  { %v5571_v39 = vadd.f32 %v5509_v35, %v5442_v51  ;;  %v5572_v0 = vadd.f32 %v5510_v16, %v5443_v54  ;;  %v3638_v34 = vmin.f32 %v3574_v18, 6.0  ;;  %v5771_v43 = vmul.f32 %v15423_v9, %v16451_v24 }
 0x43e   :  { %v16531_v36 = vadd.f32 %v6509_v40, %v6441_v55  ;;  %v3833_v3 = vadd.s32 224, %v15295_v10  ;;  %v5772_v35 = vmul.f32 %v15423_v9, %v16430_v46  ;;  %v3703_v51 = vmul.f32 %v13328_v12, %v3639_v2 }
 0x43f   :  { %v5703_v60 = vadd.f32 %v5639_v59, %v5571_v39  ;;  %v5704_v53 = vadd.f32 %v5640_v11, %v5572_v0  ;;  %v3702_v19 = vmul.f32 %v13329_v61, %v3638_v34  ;;  %v6247_v16 = vmul.f32 %v15373_v62, %v16393_v57 }
 0x440   :  { %21780 = vst [vmem:[#allocation16_spill] sm:$0xff] %v16531_v36  ;;  %v6246_v18 = vmul.f32 %v15373_v62, %v16293_v17  ;;  %v3832_v55 = vadd.s32 216, %v15295_v10  ;;  %v16543_v59 = vmul.f32 0.16666667, %v3703_v51  ;;  %v4077_v40 = vand.u32 15, %v3833_v3  ;;  %v16569_v51 = vpop.f32.mrb[45].mxu0 }
 0x441   :  { %v5832_v6 = vadd.f32 %v5771_v43, %v5703_v60  ;;  %v5833_v54 = vadd.f32 %v5772_v35, %v5704_v53  ;;  %v16545_v39 = vmul.f32 0.16666667, %v3702_v19  ;;  %v16549_v11 = vadd.f32 %v16049_v45, %v15897_v58  ;;  %21783 = vst [vmem:[#allocation24_spill] sm:$0xff] %v16569_v51 }
 0x442   :  { %v16552_v12 = vadd.f32 3.0, %v16521_v1  ;;  %v6378_v57 = vmul.f32 %v15376_v44, %v16387_v41  ;;  %v6379_v0 = vmul.f32 %v15376_v44, %v16512_v42  ;;  %v20848_v2 = vrot.slane %v16543_v59, 7 }
 0x443   :  { %v6310_v61 = vadd.f32 %v6246_v18, %v5832_v6  ;;  %v6311_v17 = vadd.f32 %v6247_v16, %v5833_v54  ;;  %v13330_v19 = vadd.f32 %v15782_v23, %v15304_v31  ;;  %v16563_v58 = vsel %vm7004_vm12, %v16514_v7, 0.0 }
 0x444   :  { %21782 = vst [vmem:[#allocation22_spill] sm:$0xff] %v16563_v58  ;;  %v6510_v60 = vmul.f32 %v15437_v37, %v16510_v29  ;;  %v4070_v43 = vand.u32 15, %v3832_v55  ;;  %v6884_v3 = vmul.f32 %v6820_v5, %v16417_v20  ;;  %v4862_v53 = vrot.slane %v16545_v39, 7 }
 0x445   :  { %v6442_v34 = vadd.f32 %v6378_v57, %v6310_v61  ;;  %v6443_v35 = vadd.f32 %v6379_v0, %v6311_v17  ;;  %vm5036_vm15 = vcmp.ne.s32.totalorder %v4077_v40, 0  ;;  %v6694_v16 = vadd.f32 3.0, %v16549_v11 }
 0x446   :  { %v6757_v23 = vmax.f32 %v16552_v12, 0.0  ;;  %v20850_v18 = vrot.slane %v16545_v39, 1  ;;  %v5512_v54 = vmul.f32 %v15336_v50, %v16321_v25  ;;  %v21785_v55 = vrot.slane %v16430_v46, 7 }
 0x447   :  { %v16573_v6 = vadd.f32 %v6510_v60, %v6442_v34  ;;  %v16584_v5 = vsel %vm4808_vm1, %v4862_v53, %v20848_v2  ;;  %v3513_v40 = vadd.f32 3.0, %v13330_v19  ;;  %v5182_v12 = vmul.f32 %v15355_v15, %v16487_v22 }
 0x448   :  { %v4863_v20 = vsel %vm4808_vm1, %v21785_v55, %v4862_v53  ;;  %v5183_v57 = vmul.f32 %v15355_v15, %v16483_v4  ;;  %vm6103_vm3 = vcmp.ne.s32.totalorder %v4070_v43, 15  ;;  %v5251_v17 = vmul.f32 %v15360_v21, %v16584_v5  ;;  %v21787_v53 = vld [vmem:[#allocation50_spill] sm:$0xff] }
 0x449   :  { %21784 = vst [vmem:[#allocation25_spill] sm:$0xff] %v16573_v6  ;;  %v16590_v61 = vsel %vm5036_vm15, %v4863_v20, 0.0  ;;  %v5381_v34 = vmul.f32 %v15430_v56, %v16584_v5  ;;  %v5511_v22 = vmul.f32 %v15336_v50, %v16326_v38  ;;  %v21786_v4 = vrot.slane %v16430_v46, 1 }
 0x44a   :  { %v5250_v25 = vmul.f32 %v15360_v21, %v16590_v61  ;;  %v5380_v0 = vmul.f32 %v15430_v56, %v16590_v61  ;;  %v3577_v43 = vmax.f32 %v3513_v40, 0.0  ;;  %v13331_v55 = vadd.f32 %v21787_v53, %v15304_v31 }
 0x44b   :  { %v5930_v60 = vsel %vm5874_vm2, %v21786_v4, %v20850_v18  ;;  %v16611_v2 = vadd.f32 %v5251_v17, %v5183_v57  ;;  %v5445_v58 = vadd.f32 %v5381_v34, %v16497_v49  ;;  %v6758_v51 = vmax.f32 %v6694_v16, 0.0 }
 0x44c   :  { %v16609_v20 = vadd.f32 %v5250_v25, %v5182_v12  ;;  %v5444_v7 = vadd.f32 %v5380_v0, %v16504_v63  ;;  %v16617_v38 = vadd.f32 %v16049_v45, %v15963_v8  ;;  %v16619_v26 = vsel %vm6103_vm3, %v5930_v60, 0.0 }
 0x44d   :  { %v3641_v4 = vmin.f32 %v3577_v43, 6.0  ;;  %v5642_v40 = vmul.f32 %v15341_v30, %v16430_v46  ;;  %v5641_v12 = vmul.f32 %v15341_v30, %v16451_v24  ;;  %v5574_v25 = vadd.f32 %v5512_v54, %v5445_v58 }
 0x44e   :  { %v5573_v57 = vadd.f32 %v5511_v22, %v5444_v7  ;;  %v16627_v63 = vadd.f32 %v16049_v45, %v15984_v47  ;;  %v16631_v49 = vadd.f32 %v16049_v45, %v16053_v33  ;;  %v6511_v8 = vmul.f32 %v15437_v37, %v16619_v26  ;;  %v16644_v22 = vpop.f32.mrb[46].mxu0 }
 0x44f   :  { %v3512_v16 = vadd.f32 3.0, %v13331_v55  ;;  %v5774_v17 = vmul.f32 %v15423_v9, %v16543_v59  ;;  %v5706_v34 = vadd.f32 %v5642_v40, %v5574_v25  ;;  %v5773_v7 = vmul.f32 %v15423_v9, %v16545_v39  ;;  %21789 = vst [vmem:[#allocation30_spill] sm:$0xff] %v16644_v22 }
 0x450   :  { %v5705_v0 = vadd.f32 %v5641_v12, %v5573_v57  ;;  %v16640_v58 = vadd.f32 3.0, %v16617_v38  ;;  %v16642_v47 = vadd.f32 %v6511_v8, %v6443_v35  ;;  %v3705_v54 = vmul.f32 %v13330_v19, %v3641_v4 }
 0x451   :  { %v3576_v33 = vmax.f32 %v3512_v16, 0.0  ;;  %v6249_v60 = vmul.f32 %v15373_v62, %v16512_v42  ;;  %v5835_v53 = vadd.f32 %v5774_v17, %v5706_v34  ;;  %v6248_v40 = vmul.f32 %v15373_v62, %v16387_v41 }
 0x452   :  { %21788 = vst [vmem:[#allocation26_spill] sm:$0xff] %v16642_v47  ;;  %v5834_v43 = vadd.f32 %v5773_v7, %v5705_v0  ;;  %v16651_v12 = vadd.f32 3.0, %v16627_v63  ;;  %v16654_v57 = vadd.f32 3.0, %v16631_v49  ;;  %v6380_v19 = vmul.f32 %v15376_v44, %v16510_v29 }
 0x453   :  { %v3835_v35 = vadd.s32 240, %v15295_v10  ;;  %v6313_v25 = vadd.f32 %v6249_v60, %v5835_v53  ;;  %v6381_v42 = vmul.f32 %v15376_v44, %v16619_v26  ;;  %v3834_v8 = vadd.s32 232, %v15295_v10 }
 0x454   :  { %v6312_v4 = vadd.f32 %v6248_v40, %v5834_v43  ;;  %v16662_v16 = vmul.f32 0.16666667, %v6884_v3  ;;  %v5931_v41 = vrot.slane %v16543_v59, 1  ;;  %v16665_v17 = vmul.f32 0.16666667, %v3705_v54 }
 0x455   :  { %v3640_v0 = vmin.f32 %v3576_v33, 6.0  ;;  %v16667_v34 = vmin.f32 %v6757_v23, 6.0  ;;  %v16669_v7 = vmin.f32 %v6758_v51, 6.0  ;;  %v6445_v43 = vadd.f32 %v6381_v42, %v6313_v25  ;;  %v21791_v23 = vld [vmem:[#allocation52_spill] sm:$0xff]  ;;  %v21794_v42 = vld [vmem:[#allocation90_spill] sm:$0xff] }
 0x456   :  { %21790 = vst [vmem:[#allocation31_spill] sm:$0xff] %v16662_v16  ;;  %v16671_v18 = vadd.f32 %v6380_v19, %v6312_v4  ;;  %v4091_v40 = vand.u32 15, %v3835_v35  ;;  %v13332_v3 = vadd.f32 %v15890_v14, %v15304_v31  ;;  %v4084_v47 = vand.u32 15, %v3834_v8  ;;  %v21793_v35 = vld [vmem:[#allocation74_spill] sm:$0xff] }
 0x457   :  { %v3704_v53 = vmul.f32 %v13331_v55, %v3640_v0  ;;  %v13333_v33 = vadd.f32 %v21791_v23, %v15304_v31  ;;  %v21792_v25 = vrot.slane %v16545_v39, 1  ;;  %v16690_v14 = vadd.f32 %v16049_v45, %v21793_v35 }
 0x458   :  { %v3515_v4 = vadd.f32 3.0, %v13332_v3  ;;  %v16694_v8 = vadd.f32 %v16049_v45, %v21794_v42  ;;  %v5514_v0 = vmul.f32 %v15336_v50, %v16430_v46  ;;  %v5513_v54 = vmul.f32 %v15336_v50, %v16451_v24 }
 0x459   :  { %v16681_v19 = vmul.f32 0.16666667, %v3704_v53  ;;  %v16686_v55 = vsel %vm5874_vm2, %v21792_v25, %v5931_v41  ;;  %v3514_v23 = vadd.f32 3.0, %v13333_v33  ;;  %v16698_v53 = vpop.f32.mrb[47].mxu0  ;;  %vm5038_vm4 = vcmp.ne.s32.totalorder %v4091_v40, 0 }
 0x45a   :  { %21795 = vst [vmem:[#allocation32_spill] sm:$0xff] %v16698_v53  ;;  %v16706_v35 = vmul.f32 %v15336_v50, %v16543_v59  ;;  %vm6105_vm5 = vcmp.ne.s32.totalorder %v4084_v47, 15  ;;  %v3579_v60 = vmax.f32 %v3515_v4, 0.0  ;;  %v5644_v46 = vmul.f32 %v15341_v30, %v16543_v59 }
 0x45b   :  { %v4866_v22 = vrot.slane %v16681_v19, 7  ;;  %v5933_v42 = vrot.slane %v16681_v19, 1  ;;  %v16713_v51 = vmul.f32 %v15336_v50, %v16545_v39  ;;  %v21796_v24 = vrot.slane %v16543_v59, 7 }
 0x45c   :  { %v21797_v40 = vrot.slane %v16665_v17, 7  ;;  %v3578_v4 = vmax.f32 %v3514_v23, 0.0  ;;  %v21798_v36 = vrot.slane %v16665_v17, 1  ;;  %v5643_v28 = vmul.f32 %v15341_v30, %v16545_v39 }
 0x45d   :  { %v4867_v25 = vsel %vm4808_vm1, %v21796_v24, %v4866_v22  ;;  %v5934_v47 = vsel %vm5874_vm2, %v5931_v41, %v5933_v42  ;;  %v3643_v24 = vmin.f32 %v3579_v60, 6.0  ;;  %v3837_v41 = vadd.s32 256, %v15295_v10 }
 0x45e   :  { %v4869_v53 = vsel %vm4808_vm1, %v4866_v22, %v21797_v40  ;;  %v5110_v6 = vsel %vm5038_vm4, %v4867_v25, 0.0  ;;  %v16727_v50 = vsel %vm5874_vm2, %v5933_v42, %v21798_v36  ;;  %v16729_v59 = vsel %vm6105_vm5, %v5934_v47, 0.0 }
 0x45f   :  { %v5383_v27 = vmul.f32 %v15430_v56, %v4869_v53  ;;  %v5382_v13 = vmul.f32 %v15430_v56, %v5110_v6  ;;  %v5253_v22 = vmul.f32 %v15360_v21, %v4869_v53  ;;  %v6513_v40 = vmul.f32 %v15437_v37, %v16729_v59 }
 0x460   :  { %v3707_v52 = vmul.f32 %v13332_v3, %v3643_v24  ;;  %v3836_v36 = vadd.s32 248, %v15295_v10  ;;  %v5185_v60 = vmul.f32 %v15355_v15, %v16584_v5  ;;  %v3642_v47 = vmin.f32 %v3578_v4, 6.0 }
 0x461   :  { %v5447_v25 = vadd.f32 %v5383_v27, %v16611_v2  ;;  %v5446_v23 = vadd.f32 %v5382_v13, %v16609_v20  ;;  %v5184_v39 = vmul.f32 %v15355_v15, %v16590_v61  ;;  %v16744_v27 = vadd.f32 %v6513_v40, %v6445_v43  ;;  %v16749_v20 = vpop.f32.mrb[48].mxu0 }
 0x462   :  { %v16746_v2 = vmul.f32 0.16666667, %v3707_v52  ;;  %v5252_v13 = vmul.f32 %v15360_v21, %v5110_v6  ;;  %21800 = vst [vmem:[#allocation38_spill] sm:$0xff] %v16749_v20  ;;  %v3706_v24 = vmul.f32 %v13333_v33, %v3642_v47  ;;  %v4105_v10 = vand.u32 15, %v3837_v41 }
 0x463   :  { %v5576_v42 = vadd.f32 %v5514_v0, %v5447_v25  ;;  %v5575_v48 = vadd.f32 %v5513_v54, %v5446_v23  ;;  %v5317_v16 = vadd.f32 %v5253_v22, %v5185_v60  ;;  %v5776_v5 = vmul.f32 %v15423_v9, %v16665_v17 }
 0x464   :  { %21799 = vst [vmem:[#allocation36_spill] sm:$0xff] %v16746_v2  ;;  %v5775_v61 = vmul.f32 %v15423_v9, %v16681_v19  ;;  %v4098_v54 = vand.u32 15, %v3836_v36  ;;  %v20857_v43 = vrot.slane %v16746_v2, 7  ;;  %v20856_v52 = vrot.slane %v16746_v2, 1 }
 0x465   :  { %v5708_v3 = vadd.f32 %v5644_v46, %v5576_v42  ;;  %v5707_v0 = vadd.f32 %v5643_v28, %v5575_v48  ;;  %v16757_v4 = vmul.f32 0.16666667, %v3706_v24  ;;  %v5316_v25 = vadd.f32 %v5252_v13, %v5184_v39 }
 0x466   :  { %v6251_v33 = vmul.f32 %v15373_v62, %v16619_v26  ;;  %v6250_v22 = vmul.f32 %v15373_v62, %v16510_v29  ;;  %v5646_v48 = vmul.f32 %v15341_v30, %v16665_v17  ;;  %vm5040_vm6 = vcmp.ne.s32.totalorder %v4105_v10, 0 }
 0x467   :  { %21801 = vst [vmem:[#allocation39_spill] sm:$0xff] %v16757_v4  ;;  %v5836_v46 = vadd.f32 %v5775_v61, %v5707_v0  ;;  %v5837_v41 = vadd.f32 %v5776_v5, %v5708_v3  ;;  %v4870_v28 = vrot.slane %v16757_v4, 7  ;;  %v5937_v23 = vrot.slane %v16757_v4, 1 }
 0x468   :  { %v5186_v36 = vmul.f32 %v15355_v15, %v5110_v6  ;;  %vm6107_vm7 = vcmp.ne.s32.totalorder %v4098_v54, 15  ;;  %v21802_v26 = vrot.slane %v16665_v17, 7  ;;  %v21803_v47 = vrot.slane %v16665_v17, 1 }
 0x469   :  { %v6314_v40 = vadd.f32 %v6250_v22, %v5836_v46  ;;  %v6315_v60 = vadd.f32 %v6251_v33, %v5837_v41  ;;  %v4873_v29 = vsel %vm4808_vm1, %v4870_v28, %v20857_v43  ;;  %v16780_v10 = vsel %vm5874_vm2, %v5937_v23, %v20856_v52  ;;  %v16797_v41 = vpop.f32.mrb[49].mxu0 }
 0x46a   :  { %v4871_v42 = vsel %vm4808_vm1, %v21802_v26, %v4870_v28  ;;  %v5938_v39 = vsel %vm5874_vm2, %v21803_v47, %v5937_v23  ;;  %21804 = vst [vmem:[#allocation41_spill] sm:$0xff] %v16780_v10  ;;  %v5187_v13 = vmul.f32 %v15355_v15, %v4869_v53  ;;  %v5255_v3 = vmul.f32 %v15360_v21, %v4873_v29 }
 0x46b   :  { %v5112_v6 = vsel %vm5040_vm6, %v4871_v42, 0.0  ;;  %v5385_v24 = vmul.f32 %v15430_v56, %v4873_v29  ;;  %v16787_v61 = vsel %vm6107_vm7, %v5938_v39, 0.0  ;;  %v6382_v54 = vmul.f32 %v15376_v44, %v16686_v55  ;;  %21807 = vst [vmem:[#allocation47_spill] sm:$0xff] %v16797_v41 }
 0x46c   :  { %v5254_v5 = vmul.f32 %v15360_v21, %v5112_v6  ;;  %v5384_v0 = vmul.f32 %v15430_v56, %v5112_v6  ;;  %21805 = vst [vmem:[#allocation43_spill] sm:$0xff] %v16787_v61  ;;  %v5645_v33 = vmul.f32 %v15341_v30, %v16681_v19  ;;  %v6383_v46 = vmul.f32 %v15376_v44, %v16729_v59 }
 0x46d   :  { %v16795_v53 = vadd.f32 %v5255_v3, %v5187_v13  ;;  %v5449_v22 = vadd.f32 %v5385_v24, %v5317_v16  ;;  %v6514_v28 = vmul.f32 %v15437_v37, %v16727_v50  ;;  %v6446_v42 = vadd.f32 %v6382_v54, %v6314_v40  ;;  %v21811_v24 = vld [vmem:[#allocation55_spill] sm:$0xff] }
 0x46e   :  { %v16801_v23 = vadd.f32 %v5254_v5, %v5186_v36  ;;  %v5448_v26 = vadd.f32 %v5384_v0, %v5316_v25  ;;  %v6447_v47 = vadd.f32 %v6383_v46, %v6315_v60  ;;  %v6512_v39 = vmul.f32 %v15437_v37, %v16686_v55  ;;  %v21810_v36 = vld [vmem:[#allocation54_spill] sm:$0xff] }
 0x46f   :  { %21806 = vst [vmem:[#allocation45_spill] sm:$0xff] %v16795_v53  ;;  %v5578_v29 = vadd.f32 %v16706_v35, %v5449_v22  ;;  %v6515_v6 = vmul.f32 %v15437_v37, %v16787_v61  ;;  %v5778_v16 = vmul.f32 %v15423_v9, %v16746_v2  ;;  %v16811_v3 = vadd.f32 %v6514_v28, %v6446_v42 }
 0x470   :  { %21808 = vst [vmem:[#allocation49_spill] sm:$0xff] %v16801_v23  ;;  %v5577_v13 = vadd.f32 %v16713_v51, %v5448_v26  ;;  %v13334_v25 = vadd.f32 %v21810_v36, %v15304_v31  ;;  %v16816_v35 = vadd.f32 %v6512_v39, %v16671_v18  ;;  %v13335_v5 = vadd.f32 %v21811_v24, %v15304_v31  ;;  %v21812_v51 = vld [vmem:[#allocation58_spill] sm:$0xff]  ;;  %v21813_v24 = vld [vmem:[#allocation103_spill] sm:$0xff] }
 0x471   :  { %21809 = vst [vmem:[#allocation51_spill] sm:$0xff] %v16811_v3  ;;  %v5710_v40 = vadd.f32 %v5646_v48, %v5578_v29  ;;  %v16818_v60 = vadd.f32 %v6515_v6, %v6447_v47  ;;  %v5777_v54 = vmul.f32 %v15423_v9, %v16757_v4  ;;  %v13336_v22 = vadd.f32 %v21812_v51, %v15304_v31 }
 0x472   :  { %v5709_v0 = vadd.f32 %v5645_v33, %v5577_v13  ;;  %v3517_v46 = vadd.f32 3.0, %v13334_v25  ;;  %v6698_v28 = vadd.f32 3.0, %v16690_v14  ;;  %v6253_v48 = vmul.f32 %v15373_v62, %v16729_v59 }
 0x473   :  { %v5839_v18 = vadd.f32 %v5778_v16, %v5710_v40  ;;  %v3516_v26 = vadd.f32 3.0, %v13335_v5  ;;  %v6252_v29 = vmul.f32 %v15373_v62, %v16686_v55  ;;  %v3519_v33 = vadd.f32 3.0, %v13336_v22 }
 0x474   :  { %v5838_v42 = vadd.f32 %v5777_v54, %v5709_v0  ;;  %v3581_v47 = vmax.f32 %v3517_v46, 0.0  ;;  %v6699_v39 = vadd.f32 3.0, %v16694_v8  ;;  %v6385_v13 = vmul.f32 %v15376_v44, %v16787_v61 }
 0x475   :  { %v6317_v6 = vadd.f32 %v6253_v48, %v5839_v18  ;;  %v3580_v36 = vmax.f32 %v3516_v26, 0.0  ;;  %v16836_v51 = vadd.f32 %v16049_v45, %v21813_v24  ;;  %v6384_v16 = vmul.f32 %v15376_v44, %v16727_v50  ;;  %v16846_v48 = vpop.f32.mrb[50].mxu0 }
 0x476   :  { %v6316_v59 = vadd.f32 %v6252_v29, %v5838_v42  ;;  %v3645_v40 = vmin.f32 %v3581_v47, 6.0  ;;  %v16842_v55 = vadd.f32 %v16049_v45, %v16311_v32  ;;  %v3583_v46 = vmax.f32 %v3519_v33, 0.0  ;;  %21815 = vst [vmem:[#allocation56_spill] sm:$0xff] %v16846_v48  ;;  %v21816_v42 = vld [vmem:[#allocation66_spill] sm:$0xff] }
 0x477   :  { %v16844_v0 = vadd.f32 %v6385_v13, %v6317_v6  ;;  %v3644_v54 = vmin.f32 %v3580_v36, 6.0  ;;  %v6516_v26 = vmul.f32 %v15437_v37, %v16780_v10  ;;  %v13337_v29 = vadd.f32 %v21816_v42, %v15304_v31 }
 0x478   :  { %v6448_v18 = vadd.f32 %v6384_v16, %v6316_v59  ;;  %v3709_v24 = vmul.f32 %v13334_v25, %v3645_v40  ;;  %v6885_v47 = vmul.f32 %v16667_v34, %v16521_v1  ;;  %v6886_v32 = vmul.f32 %v16669_v7, %v16549_v11 }
 0x479   :  { %21814 = vst [vmem:[#allocation53_spill] sm:$0xff] %v16844_v0  ;;  %v21817_v6 = vmax.f32 %v16640_v58, 0.0  ;;  %v3708_v33 = vmul.f32 %v13335_v5, %v3644_v54  ;;  %v21818_v36 = vmax.f32 %v16651_v12, 0.0  ;;  %v21819_v16 = vmax.f32 %v16654_v57, 0.0 }
 0x47a   :  { %v16862_v25 = vadd.f32 %v6516_v26, %v6448_v18  ;;  %v16864_v40 = vmul.f32 0.16666667, %v3709_v24  ;;  %v6762_v42 = vmax.f32 %v6698_v28, 0.0  ;;  %v3647_v1 = vmin.f32 %v3583_v46, 6.0 }
 0x47b   :  { %v6823_v13 = vmin.f32 %v21817_v6, 6.0  ;;  %v6824_v59 = vmin.f32 %v21818_v36, 6.0  ;;  %v6825_v52 = vmin.f32 %v21819_v16, 6.0  ;;  %v16866_v43 = vmul.f32 0.16666667, %v3708_v33 }
 0x47c   :  { %21820 = vst [vmem:[#allocation57_spill] sm:$0xff] %v16862_v25  ;;  %21821 = vst [vmem:[#allocation60_spill] sm:$0xff] %v16864_v40  ;;  %v3518_v34 = vadd.f32 3.0, %v13337_v29  ;;  %v6700_v11 = vadd.f32 3.0, %v16836_v51  ;;  %v6763_v58 = vmax.f32 %v6699_v39, 0.0  ;;  %v6701_v7 = vadd.f32 3.0, %v16842_v55 }
 0x47d   :  { %21822 = vst [vmem:[#allocation61_spill] sm:$0xff] %v16866_v43  ;;  %v4877_v12 = vrot.slane %v16864_v40, 7  ;;  %v16871_v5 = vmul.f32 0.16666667, %v6885_v47  ;;  %v16873_v57 = vmul.f32 0.16666667, %v6886_v32  ;;  %v6887_v28 = vmul.f32 %v6823_v13, %v16617_v38 }
 0x47e   :  { %v20860_v54 = vrot.slane %v16864_v40, 1  ;;  %v20859_v18 = vrot.slane %v16866_v43, 7  ;;  %v6888_v46 = vmul.f32 %v6824_v59, %v16627_v63  ;;  %v6889_v26 = vmul.f32 %v6825_v52, %v16631_v49  ;;  %v16893_v63 = vpop.f32.mrb[51].mxu0  ;;  %v21828_v49 = vld [vmem:[#allocation31_spill] sm:$0xff]  ;;  %v21832_v59 = vld [vmem:[#allocation118_spill] sm:$0xff] }
 0x47f   :  { %21823 = vst [vmem:[#allocation62_spill] sm:$0xff] %v16871_v5  ;;  %21824 = vst [vmem:[#allocation65_spill] sm:$0xff] %v16873_v57  ;;  %v20858_v39 = vrot.slane %v16866_v43, 1  ;;  %v6826_v24 = vmin.f32 %v6762_v42, 6.0  ;;  %v3711_v32 = vmul.f32 %v13336_v22, %v3647_v1  ;;  %v3582_v6 = vmax.f32 %v3518_v34, 0.0  ;;  %v21833_v1 = vld [vmem:[#allocation28_spill] sm:$0xff] }
 0x480   :  { %v16884_v47 = vsel %vm4808_vm1, %v20859_v18, %v4877_v12  ;;  %v6764_v33 = vmax.f32 %v6700_v11, 0.0  ;;  %v6827_v36 = vmin.f32 %v6763_v58, 6.0  ;;  %v6765_v16 = vmax.f32 %v6701_v7, 0.0  ;;  %21827 = vst [vmem:[#allocation71_spill] sm:$0xff] %v16893_v63 }
 0x481   :  { %21825 = vst [vmem:[#allocation67_spill] sm:$0xff] %v16884_v47  ;;  %v16891_v38 = vsel %vm5874_vm2, %v20858_v39, %v20860_v54  ;;  %v16897_v52 = vsel %vm7004_vm12, %v21828_v49, 0.0  ;;  %v16901_v22 = vsel %vm7004_vm12, %v16871_v5, 0.0  ;;  %v16905_v13 = vsel %vm7004_vm12, %v16873_v57, 0.0  ;;  %v21839_v5 = vld [vmem:[#allocation88_spill] sm:$0xff] }
 0x482   :  { %21826 = vst [vmem:[#allocation69_spill] sm:$0xff] %v16891_v38  ;;  %21829 = vst [vmem:[#allocation72_spill] sm:$0xff] %v16897_v52  ;;  %v16909_v42 = vadd.f32 %v16049_v45, %v21832_v59  ;;  %v16913_v34 = vmul.f32 %v15437_v37, %v21833_v1  ;;  %v16915_v11 = vmul.f32 0.16666667, %v6887_v28  ;;  %v16917_v58 = vmul.f32 0.16666667, %v6888_v46 }
 0x483   :  { %21830 = vst [vmem:[#allocation75_spill] sm:$0xff] %v16901_v22  ;;  %21831 = vst [vmem:[#allocation77_spill] sm:$0xff] %v16905_v13  ;;  %v16919_v7 = vmul.f32 0.16666667, %v6889_v26  ;;  %v6890_v39 = vmul.f32 %v6826_v24, %v16690_v14  ;;  %v16922_v18 = vmul.f32 0.16666667, %v3711_v32  ;;  %v13338_v49 = vadd.f32 %v21839_v5, %v15304_v31 }
 0x484   :  { %21834 = vst [vmem:[#allocation79_spill] sm:$0xff] %v16913_v34  ;;  %21835 = vst [vmem:[#allocation81_spill] sm:$0xff] %v16915_v11  ;;  %v3646_v54 = vmin.f32 %v3582_v6, 6.0  ;;  %v6828_v59 = vmin.f32 %v6764_v33, 6.0  ;;  %v6891_v57 = vmul.f32 %v6827_v36, %v16694_v8  ;;  %v6829_v13 = vmin.f32 %v6765_v16, 6.0  ;;  %v21840_v1 = vld [vmem:[#allocation93_spill] sm:$0xff] }
 0x485   :  { %21836 = vst [vmem:[#allocation83_spill] sm:$0xff] %v16917_v58  ;;  %21837 = vst [vmem:[#allocation85_spill] sm:$0xff] %v16919_v7  ;;  %v13339_v28 = vadd.f32 %v21840_v1, %v15304_v31  ;;  %v6702_v46 = vadd.f32 3.0, %v16909_v42  ;;  %v3521_v26 = vadd.f32 3.0, %v13338_v49  ;;  %v21841_v52 = vld [vmem:[#allocation106_spill] sm:$0xff]  ;;  %v16936_v24 = vsel %vm7004_vm12, %v16915_v11, 0.0 }
 0x486   :  { %21838 = vst [vmem:[#allocation87_spill] sm:$0xff] %v16922_v18  ;;  %v3710_v22 = vmul.f32 %v13337_v29, %v3646_v54  ;;  %v16932_v14 = vadd.f32 %v21841_v52, %v15304_v31  ;;  %21842 = vst [vmem:[#allocation89_spill] sm:$0xff] %v16936_v24  ;;  %v16940_v5 = vsel %vm7004_vm12, %v16917_v58, 0.0  ;;  %v16944_v8 = vsel %vm7004_vm12, %v16919_v7, 0.0  ;;  %v21848_v11 = vld [vmem:[#allocation102_spill] sm:$0xff] }
 0x487   :  { %21843 = vst [vmem:[#allocation91_spill] sm:$0xff] %v16940_v5  ;;  %21844 = vst [vmem:[#allocation92_spill] sm:$0xff] %v16944_v8  ;;  %v3520_v32 = vadd.f32 3.0, %v13339_v28  ;;  %v16946_v6 = vmul.f32 0.16666667, %v6890_v39  ;;  %v3585_v33 = vmax.f32 %v3521_v26, 0.0  ;;  %v6892_v36 = vmul.f32 %v6828_v59, %v16836_v51 }
 0x488   :  { %v16949_v54 = vmul.f32 0.16666667, %v3710_v22  ;;  %v16952_v16 = vmul.f32 0.16666667, %v6891_v57  ;;  %v6893_v52 = vmul.f32 %v6829_v13, %v16842_v55  ;;  %v6766_v58 = vmax.f32 %v6702_v46, 0.0  ;;  %v21849_v51 = vld [vmem:[#allocation110_spill] sm:$0xff] }
 0x489   :  { %21845 = vst [vmem:[#allocation94_spill] sm:$0xff] %v16946_v6  ;;  %v3584_v1 = vmax.f32 %v3520_v32, 0.0  ;;  %v16957_v7 = vadd.f32 %v16049_v45, %v21848_v11  ;;  %v3523_v8 = vadd.f32 3.0, %v16932_v14  ;;  %v3649_v29 = vmin.f32 %v3585_v33, 6.0  ;;  %v21850_v55 = vld [vmem:[#allocation12_spill] sm:$0xff]  ;;  %v16975_v5 = vpop.f32.mrb[52].mxu0 }
 0x48a   :  { %21846 = vst [vmem:[#allocation97_spill] sm:$0xff] %v16949_v54  ;;  %21847 = vst [vmem:[#allocation98_spill] sm:$0xff] %v16952_v16  ;;  %v4879_v39 = vrot.slane %v16949_v54, 7  ;;  %v5946_v26 = vrot.slane %v16949_v54, 1  ;;  %v16965_v57 = vadd.f32 %v21849_v51, %v15304_v31  ;;  %v3844_v13 = vadd.s32 312, %v21850_v55 }
 0x48b   :  { %v3845_v59 = vadd.s32 320, %v21850_v55  ;;  %v21851_v46 = vrot.slane %v16922_v18, 7  ;;  %21853 = vst [vmem:[#allocation104_spill] sm:$0xff] %v16975_v5  ;;  %v5191_v33 = vmul.f32 %v15355_v15, %v16884_v47  ;;  %v3648_v22 = vmin.f32 %v3584_v1, 6.0 }
 0x48c   :  { %v4880_v11 = vsel %vm4808_vm1, %v4877_v12, %v4879_v39  ;;  %v3847_v24 = vadd.s32 336, %v21850_v55  ;;  %v6830_v0 = vmin.f32 %v6766_v58, 6.0  ;;  %v16983_v53 = vadd.f32 3.0, %v16957_v7 }
 0x48d   :  { %v16973_v32 = vsel %vm4808_vm1, %v4879_v39, %v21851_v46  ;;  %v21854_v12 = vrot.slane %v16864_v40, 1  ;;  %v3587_v46 = vmax.f32 %v3523_v8, 0.0  ;;  %v21855_v34 = vrot.slane %v16922_v18, 1 }
 0x48e   :  { %21852 = vst [vmem:[#allocation100_spill] sm:$0xff] %v16973_v32  ;;  %v5259_v51 = vmul.f32 %v15360_v21, %v16973_v32  ;;  %v3713_v38 = vmul.f32 %v13338_v49, %v3649_v29  ;;  %v3522_v1 = vadd.f32 3.0, %v16965_v57  ;;  %v16996_v58 = vsel %vm7004_vm12, %v16946_v6, 0.0 }
 0x48f   :  { %v5947_v39 = vsel %vm5874_vm2, %v21854_v12, %v5946_v26  ;;  %v16991_v5 = vsel %vm5874_vm2, %v5946_v26, %v21855_v34  ;;  %21857 = vst [vmem:[#allocation107_spill] sm:$0xff] %v16996_v58  ;;  %v17000_v47 = vsel %vm7004_vm12, %v16952_v16, 0.0  ;;  %v4154_v63 = vand.u32 15, %v3844_v13  ;;  %v21861_v58 = vld [vmem:[#allocation122_spill] sm:$0xff] }
 0x490   :  { %v5323_v23 = vadd.f32 %v5259_v51, %v5191_v33  ;;  %21856 = vst [vmem:[#allocation105_spill] sm:$0xff] %v16991_v5  ;;  %21858 = vst [vmem:[#allocation109_spill] sm:$0xff] %v17000_v47  ;;  %v4161_v12 = vand.u32 15, %v3845_v59  ;;  %v17002_v8 = vmul.f32 0.16666667, %v3713_v38  ;;  %v3712_v33 = vmul.f32 %v13339_v28, %v3648_v22  ;;  %v21862_v38 = vld [vmem:[#allocation11_spill] sm:$0xff] }
 0x491   :  { %v3846_v51 = vadd.s32 328, %v21850_v55  ;;  %v4175_v34 = vand.u32 15, %v3847_v24  ;;  %v17005_v26 = vmul.f32 0.16666667, %v6892_v36  ;;  %v17008_v49 = vmul.f32 %v6830_v0, %v16909_v42  ;;  %v21864_v0 = vld [vmem:[#allocation112_spill] sm:$0xff] }
 0x492   :  { %v17010_v29 = vmul.f32 0.16666667, %v6893_v52  ;;  %v3651_v6 = vmin.f32 %v3587_v46, 6.0  ;;  %v17014_v16 = vadd.f32 %v16049_v45, %v21861_v58  ;;  %v6767_v13 = vmax.f32 %v16983_v53, 0.0  ;;  %v17026_v52 = vpop.f32.mrb[53].mxu0 }
 0x493   :  { %21859 = vst [vmem:[#allocation111_spill] sm:$0xff] %v17005_v26  ;;  %v5520_v28 = vmul.f32 %v21862_v38, %v16864_v40  ;;  %v3586_v22 = vmax.f32 %v3522_v1, 0.0  ;;  %vm5048_vm8 = vcmp.ne.s32.totalorder %v4161_v12, 0  ;;  %v17020_v36 = vmul.f32 0.16666667, %v3712_v33  ;;  %21865 = vst [vmem:[#allocation115_spill] sm:$0xff] %v17026_v52 }
 0x494   :  { %21860 = vst [vmem:[#allocation113_spill] sm:$0xff] %v17010_v29  ;;  %v17024_v42 = vadd.f32 %v21864_v0, %v15304_v31  ;;  %v5652_v59 = vmul.f32 %v15341_v30, %v16922_v18  ;;  %vm17030_vm9 = vcmp.ne.s32.totalorder %v4154_v63, 15  ;;  %v4168_v46 = vand.u32 15, %v3846_v51 }
 0x495   :  { %21863 = vst [vmem:[#allocation114_spill] sm:$0xff] %v17020_v36  ;;  %vm5050_vm10 = vcmp.ne.s32.totalorder %v4175_v34, 0  ;;  %v4883_v1 = vrot.slane %v17020_v36, 7  ;;  %v3715_v58 = vmul.f32 %v16932_v14, %v3651_v6  ;;  %v3848_v12 = vadd.s32 344, %v21850_v55 }
 0x496   :  { %v3849_v33 = vadd.s32 352, %v21850_v55  ;;  %v17038_v0 = vsel %vm5048_vm8, %v4880_v11, 0.0  ;;  %v5950_v47 = vrot.slane %v17020_v36, 1  ;;  %v3650_v63 = vmin.f32 %v3586_v22, 6.0  ;;  %v21872_v22 = vld [vmem:[#allocation117_spill] sm:$0xff] }
 0x497   :  { %21868 = vst [vmem:[#allocation120_spill] sm:$0xff] %v17038_v0  ;;  %v5193_v52 = vmul.f32 %v15355_v15, %v16973_v32  ;;  %v21869_v51 = vrot.slane %v16922_v18, 7  ;;  %v21870_v14 = vrot.slane %v17002_v8, 7  ;;  %v3525_v43 = vadd.f32 3.0, %v17024_v42 }
 0x498   :  { %v17057_v61 = vadd.f32 %v21872_v22, %v15304_v31  ;;  %v5192_v32 = vmul.f32 %v15355_v15, %v17038_v0  ;;  %v21874_v4 = vrot.slane %v17002_v8, 1  ;;  %v3714_v22 = vmul.f32 %v16965_v57, %v3650_v63 }
 0x499   :  { %v4884_v34 = vsel %vm4808_vm1, %v21869_v51, %v4883_v1  ;;  %v4886_v6 = vsel %vm4808_vm1, %v4883_v1, %v21870_v14  ;;  %v21873_v1 = vrot.slane %v16922_v18, 1  ;;  %vm17074_vm11 = vcmp.ne.s32.totalorder %v4168_v46, 15 }
 0x49a   :  { %v17051_v11 = vsel %vm5050_vm10, %v4884_v34, 0.0  ;;  %v5261_v24 = vmul.f32 %v15360_v21, %v4886_v6  ;;  %v5391_v40 = vmul.f32 %v15430_v56, %v4886_v6  ;;  %v17066_v34 = vmul.f32 0.16666667, %v3715_v58 }
 0x49b   :  { %21871 = vst [vmem:[#allocation121_spill] sm:$0xff] %v17051_v11  ;;  %v5260_v51 = vmul.f32 %v15360_v21, %v17051_v11  ;;  %v5951_v14 = vsel %vm5874_vm2, %v21873_v1, %v5950_v47  ;;  %v17071_v25 = vsel %vm5874_vm2, %v5950_v47, %v21874_v4  ;;  %v4189_v20 = vand.u32 15, %v3849_v33 }
 0x49c   :  { %v5325_v10 = vadd.f32 %v5261_v24, %v5193_v52  ;;  %v5455_v48 = vadd.f32 %v5391_v40, %v5323_v23  ;;  %v3589_v3 = vmax.f32 %v3525_v43, 0.0  ;;  %v17080_v58 = vsel %vm17030_vm9, %v5947_v39, 0.0  ;;  %v17083_v52 = vpop.f32.mrb[54].mxu0 }
 0x49d   :  { %v5324_v41 = vadd.f32 %v5260_v51, %v5192_v32  ;;  %21877 = vst [vmem:[#allocation124_spill] sm:$0xff] %v17080_v58  ;;  %v4182_v23 = vand.u32 15, %v3848_v12  ;;  %v3524_v40 = vadd.f32 3.0, %v17057_v61  ;;  %21878 = vst [vmem:[#allocation125_spill] sm:$0xff] %v17083_v52  ;;  %v17086_v4 = vadd.f32 3.0, %v17014_v16 }
 0x49e   :  { %v5584_v24 = vadd.f32 %v5520_v28, %v5455_v48  ;;  %v17088_v47 = vmin.f32 %v6767_v13, 6.0  ;;  %v5522_v57 = vmul.f32 %v21862_v38, %v16922_v18  ;;  %v5521_v43 = vmul.f32 %v21862_v38, %v16949_v54 }
 0x49f   :  { %v5783_v32 = vmul.f32 %v15423_v9, %v17002_v8  ;;  %v20881_v39 = vrot.slane %v17066_v34, 7  ;;  %v17097_v28 = vmul.f32 0.16666667, %v3714_v22  ;;  %v6259_v53 = vmul.f32 %v15373_v62, %v17080_v58 }
 0x4a0   :  { %v5716_v48 = vadd.f32 %v5652_v59, %v5584_v24  ;;  %v17103_v13 = vsel %vm17074_vm11, %v5951_v14, 0.0  ;;  %vm5052_vm13 = vcmp.ne.s32.totalorder %v4189_v20, 0  ;;  %v3653_v46 = vmin.f32 %v3589_v3, 6.0 }
 0x4a1   :  { %21879 = vst [vmem:[#allocation126_spill] sm:$0xff] %v17103_v13  ;;  %v4887_v33 = vrot.slane %v17097_v28, 7  ;;  %vm17106_vm14 = vcmp.ne.s32.totalorder %v4182_v23, 15  ;;  %v3588_v59 = vmax.f32 %v3524_v40, 0.0  ;;  %v5194_v51 = vmul.f32 %v15355_v15, %v17051_v11 }
 0x4a2   :  { %v5845_v12 = vadd.f32 %v5783_v32, %v5716_v48  ;;  %v5195_v1 = vmul.f32 %v15355_v15, %v4886_v6  ;;  %v5954_v0 = vrot.slane %v17097_v28, 1  ;;  %v6391_v20 = vmul.f32 %v15376_v44, %v17103_v13 }
 0x4a3   :  { %v21882_v3 = vrot.slane %v17002_v8, 7  ;;  %v4890_v23 = vsel %vm4808_vm1, %v4887_v33, %v20881_v39  ;;  %v3717_v48 = vmul.f32 %v17024_v42, %v3653_v46  ;;  %v3652_v11 = vmin.f32 %v3588_v59, 6.0 }
 0x4a4   :  { %v6323_v14 = vadd.f32 %v6259_v53, %v5845_v12  ;;  %v5263_v32 = vmul.f32 %v15360_v21, %v4890_v23  ;;  %v5393_v6 = vmul.f32 %v15430_v56, %v4890_v23  ;;  %v21883_v58 = vrot.slane %v17002_v8, 1 }
 0x4a5   :  { %v4888_v24 = vsel %vm4808_vm1, %v21882_v3, %v4887_v33  ;;  %v3851_v59 = vadd.s32 368, %v21850_v55 }
 0x4a6   :  { %v5124_v40 = vsel %vm5052_vm13, %v4888_v24, 0.0  ;;  %v6455_v22 = vadd.f32 %v6391_v20, %v6323_v14  ;;  %v17128_v52 = vadd.f32 %v5263_v32, %v5195_v1  ;;  %v5457_v3 = vadd.f32 %v5393_v6, %v5325_v10  ;;  %v21885_v1 = vld [vmem:[#allocation16_spill] sm:$0xff]  ;;  %v17151_v20 = vpop.f32.mrb[55].mxu0 }
 0x4a7   :  { %v5262_v53 = vmul.f32 %v15360_v21, %v5124_v40  ;;  %v5392_v12 = vmul.f32 %v15430_v56, %v5124_v40  ;;  %v5955_v33 = vsel %vm5874_vm2, %v21883_v58, %v5954_v0  ;;  %v21884_v24 = vrot.slane %v17066_v34, 1  ;;  %21886 = vst [vmem:[#allocation128_spill] sm:$0xff] %v17151_v20 }
 0x4a8   :  { %v17140_v46 = vsel %vm17106_vm14, %v5955_v33, 0.0  ;;  %v17145_v10 = vadd.f32 %v16049_v45, %v21885_v1  ;;  %v5654_v58 = vmul.f32 %v15341_v30, %v17002_v8  ;;  %v5586_v14 = vadd.f32 %v5522_v57, %v5457_v3 }
 0x4a9   :  { %v17136_v39 = vsel %vm5874_vm2, %v5954_v0, %v21884_v24  ;;  %v5326_v54 = vadd.f32 %v5262_v53, %v5194_v51  ;;  %v5456_v42 = vadd.f32 %v5392_v12, %v5324_v41  ;;  %v6523_v0 = vmul.f32 %v15437_v37, %v17140_v46 }
 0x4aa   :  { %v5653_v41 = vmul.f32 %v15341_v30, %v17020_v36  ;;  %v17155_v51 = vmul.f32 0.16666667, %v3717_v48  ;;  %v3716_v32 = vmul.f32 %v17057_v61, %v3652_v11  ;;  %v6768_v6 = vmax.f32 %v17086_v4, 0.0 }
 0x4ab   :  { %v5585_v63 = vadd.f32 %v5521_v43, %v5456_v42  ;;  %v5785_v53 = vmul.f32 %v15423_v9, %v17066_v34  ;;  %v5718_v12 = vadd.f32 %v5654_v58, %v5586_v14  ;;  %v17161_v57 = vadd.f32 %v6523_v0, %v6455_v22  ;;  %v21888_v58 = vld [vmem:[#allocation129_spill] sm:$0xff] }
 0x4ac   :  { %v5784_v33 = vmul.f32 %v15423_v9, %v17097_v28  ;;  %v3850_v24 = vadd.s32 360, %v21850_v55  ;;  %v4203_v1 = vand.u32 15, %v3851_v59  ;;  %v17167_v43 = vadd.f32 3.0, %v17145_v10 }
 0x4ad   :  { %21887 = vst [vmem:[#allocation130_spill] sm:$0xff] %v17161_v57  ;;  %v5717_v3 = vadd.f32 %v5653_v41, %v5585_v63  ;;  %v6261_v61 = vmul.f32 %v15373_v62, %v17103_v13  ;;  %v5847_v11 = vadd.f32 %v5785_v53, %v5718_v12  ;;  %v6260_v4 = vmul.f32 %v15373_v62, %v16991_v5  ;;  %v17189_v13 = vpop.f32.mrb[56].mxu0 }
 0x4ae   :  { %v17174_v42 = vmul.f32 0.16666667, %v3716_v32  ;;  %v13344_v14 = vadd.f32 %v21888_v58, %v15304_v31  ;;  %v5523_v59 = vmul.f32 %v21862_v38, %v17020_v36  ;;  %v6392_v0 = vmul.f32 %v15376_v44, %v17071_v25  ;;  %21889 = vst [vmem:[#allocation132_spill] sm:$0xff] %v17189_v13  ;;  %v17257_v18 = vpop.f32.mrb[57].mxu0 }
 0x4af   :  { %v5846_v48 = vadd.f32 %v5784_v33, %v5717_v3  ;;  %v6325_v41 = vadd.f32 %v6261_v61, %v5847_v11  ;;  %v6393_v63 = vmul.f32 %v15376_v44, %v17140_v46  ;;  %v4196_v12 = vand.u32 15, %v3850_v24 }
 0x4b0   :  { %v4891_v3 = vrot.slane %v17174_v42, 7  ;;  %vm5054_vm15 = vcmp.ne.s32.totalorder %v4203_v1, 0  ;;  %v6524_v33 = vmul.f32 %v15437_v37, %v17136_v39  ;;  %v5958_v22 = vrot.slane %v17174_v42, 1 }
 0x4b1   :  { %v6324_v53 = vadd.f32 %v6260_v4, %v5846_v48  ;;  %v6457_v32 = vadd.f32 %v6393_v63, %v6325_v41  ;;  %v21890_v61 = vrot.slane %v17066_v34, 7  ;;  %v21891_v24 = vrot.slane %v17155_v51, 7 }
 0x4b2   :  { %v3527_v1 = vadd.f32 3.0, %v13344_v14  ;;  %v5196_v48 = vmul.f32 %v15355_v15, %v5124_v40  ;;  %v5197_v41 = vmul.f32 %v15355_v15, %v4890_v23  ;;  %vm6121_vm3 = vcmp.ne.s32.totalorder %v4196_v12, 15 }
 0x4b3   :  { %v6456_v36 = vadd.f32 %v6392_v0, %v6324_v53  ;;  %v4892_v11 = vsel %vm4808_vm1, %v21890_v61, %v4891_v3  ;;  %v17197_v4 = vsel %vm4808_vm1, %v4891_v3, %v21891_v24  ;;  %v21893_v23 = vrot.slane %v17066_v34, 1  ;;  %v21894_v24 = vld [vmem:[#allocation9_spill] sm:$0xff] }
 0x4b4   :  { %v17201_v63 = vsel %vm5054_vm15, %v4892_v11, 0.0  ;;  %v5265_v58 = vmul.f32 %v15360_v21, %v17197_v4  ;;  %v5395_v40 = vmul.f32 %v15430_v56, %v17197_v4  ;;  %v21895_v5 = vrot.slane %v17155_v51, 1 }
 0x4b5   :  { %v17205_v0 = vadd.f32 %v6524_v33, %v6456_v36  ;;  %v5264_v53 = vmul.f32 %v15360_v21, %v17201_v63  ;;  %v5394_v61 = vmul.f32 %v15430_v56, %v17201_v63  ;;  %v5959_v11 = vsel %vm5874_vm2, %v21893_v23, %v5958_v22 }
 0x4b6   :  { %v17211_v3 = vadd.f32 %v5265_v58, %v5197_v41  ;;  %v13345_v36 = vadd.f32 %v21894_v24, %v15304_v31  ;;  %v17225_v20 = vsel %vm5874_vm2, %v5958_v22, %v21895_v5  ;;  %v3591_v12 = vmax.f32 %v3527_v1, 0.0  ;;  %v21896_v58 = vld [vmem:[#allocation25_spill] sm:$0xff] }
 0x4b7   :  { %21892 = vst [vmem:[#allocation133_spill] sm:$0xff] %v17205_v0  ;;  %v17220_v33 = vadd.f32 %v5264_v53, %v5196_v48  ;;  %v5458_v13 = vadd.f32 %v5394_v61, %v5326_v54  ;;  %v17229_v41 = vadd.f32 %v16049_v45, %v21896_v58  ;;  %v5524_v0 = vmul.f32 %v21862_v38, %v17002_v8 }
 0x4b8   :  { %v5459_v23 = vadd.f32 %v5395_v40, %v17128_v52  ;;  %v17234_v57 = vsel %vm6121_vm3, %v5959_v11, 0.0  ;;  %v6832_v48 = vmin.f32 %v6768_v6, 6.0  ;;  %v6895_v54 = vmul.f32 %v17088_v47, %v16957_v7 }
 0x4b9   :  { %v5655_v5 = vmul.f32 %v15341_v30, %v17097_v28  ;;  %v5587_v22 = vadd.f32 %v5523_v59, %v5458_v13  ;;  %v6769_v1 = vmax.f32 %v17167_v43, 0.0  ;;  %v5656_v53 = vmul.f32 %v15341_v30, %v17066_v34 }
 0x4ba   :  { %v5588_v61 = vadd.f32 %v5524_v0, %v5459_v23  ;;  %v6525_v8 = vmul.f32 %v15437_v37, %v17234_v57  ;;  %v5786_v6 = vmul.f32 %v15423_v9, %v17174_v42  ;;  %v3655_v40 = vmin.f32 %v3591_v12, 6.0 }
 0x4bb   :  { %v5719_v52 = vadd.f32 %v5655_v5, %v5587_v22  ;;  %v3526_v11 = vadd.f32 3.0, %v13345_v36  ;;  %v6706_v7 = vadd.f32 3.0, %v17229_v41  ;;  %v5787_v47 = vmul.f32 %v15423_v9, %v17155_v51 }
 0x4bc   :  { %v5720_v13 = vadd.f32 %v5656_v53, %v5588_v61  ;;  %v17250_v43 = vadd.f32 %v6525_v8, %v6457_v32  ;;  %v6262_v0 = vmul.f32 %v15373_v62, %v17071_v25  ;;  %v3719_v24 = vmul.f32 %v13344_v14, %v3655_v40 }
 0x4bd   :  { %v5848_v59 = vadd.f32 %v5786_v6, %v5719_v52  ;;  %v3590_v58 = vmax.f32 %v3526_v11, 0.0  ;;  %v6896_v23 = vmul.f32 %v6832_v48, %v17014_v16  ;;  %v6833_v5 = vmin.f32 %v6769_v1, 6.0  ;;  %v21897_v16 = vld [vmem:[#allocation20_spill] sm:$0xff] }
 0x4be   :  { %v6263_v12 = vmul.f32 %v15373_v62, %v17140_v46  ;;  %v5849_v22 = vadd.f32 %v5787_v47, %v5720_v13  ;;  %v6394_v53 = vmul.f32 %v15376_v44, %v17136_v39  ;;  %v3853_v8 = vadd.s32 384, %v21850_v55 }
 0x4bf   :  { %v6326_v32 = vadd.f32 %v6262_v0, %v5848_v59  ;;  %v3654_v61 = vmin.f32 %v3590_v58, 6.0  ;;  %v6770_v52 = vmax.f32 %v6706_v7, 0.0  ;;  %v6395_v14 = vmul.f32 %v15376_v44, %v17234_v57 }
 0x4c0   :  { %v6327_v6 = vadd.f32 %v6263_v12, %v5849_v22  ;;  %v17266_v48 = vadd.f32 %v21897_v16, %v15304_v31  ;;  %v17269_v46 = vmul.f32 0.16666667, %v17008_v49  ;;  %v6526_v40 = vmul.f32 %v15437_v37, %v17225_v20 }
 0x4c1   :  { %v6458_v1 = vadd.f32 %v6394_v53, %v6326_v32  ;;  %v17273_v11 = vmul.f32 0.16666667, %v3719_v24  ;;  %v17275_v47 = vmul.f32 0.16666667, %v6895_v54  ;;  %v17277_v7 = vmul.f32 0.16666667, %v6896_v23 }
 0x4c2   :  { %21898 = vst [vmem:[#allocation17_spill] sm:$0xff] %v17269_v46  ;;  %v17279_v13 = vadd.f32 %v6395_v14, %v6327_v6  ;;  %v3852_v59 = vadd.s32 376, %v21850_v55  ;;  %v17284_v0 = vsel %vm7004_vm12, %v17005_v26, 0.0  ;;  %v3718_v58 = vmul.f32 %v13345_v36, %v3654_v61  ;;  %v21902_v23 = vld [vmem:[#allocation24_spill] sm:$0xff]  ;;  %v21904_v6 = vld [vmem:[#allocation26_spill] sm:$0xff]  ;;  %v17303_v61 = vpop.f32.mrb[58].mxu0 }
 0x4c3   :  { %21899 = vst [vmem:[#allocation34_spill] sm:$0xff] %v17275_v47  ;;  %21900 = vst [vmem:[#allocation18_spill] sm:$0xff] %v17277_v7  ;;  %v17286_v49 = vadd.f32 %v6526_v40, %v6458_v1  ;;  %v4217_v12 = vand.u32 15, %v3853_v8  ;;  %v6834_v22 = vmin.f32 %v6770_v52, 6.0  ;;  %v6897_v24 = vmul.f32 %v6833_v5, %v17145_v10 }
 0x4c4   :  { %21901 = vst [vmem:[#allocation21_spill] sm:$0xff] %v17284_v0  ;;  %v3529_v54 = vadd.f32 3.0, %v17266_v48  ;;  %v13347_v53 = vadd.f32 %v21902_v23, %v15304_v31  ;;  %v17294_v32 = vsel %vm7004_vm12, %v17010_v29, 0.0  ;;  %v17298_v14 = vadd.f32 %v16049_v45, %v21904_v6 }
 0x4c5   :  { %21903 = vst [vmem:[#allocation19_spill] sm:$0xff] %v17294_v32  ;;  %v17301_v36 = vmul.f32 0.16666667, %v3718_v58  ;;  %v17307_v10 = vsel %vm7004_vm12, %v17269_v46, 0.0  ;;  %v17311_v5 = vsel %vm7004_vm12, %v17275_v47, 0.0  ;;  %v17315_v8 = vsel %vm7004_vm12, %v17277_v7, 0.0 }
 0x4c6   :  { %21905 = vst [vmem:[#allocation23_spill] sm:$0xff] %v17307_v10  ;;  %21906 = vst [vmem:[#allocation35_spill] sm:$0xff] %v17311_v5  ;;  %v4210_v52 = vand.u32 15, %v3852_v59  ;;  %vm5056_vm4 = vcmp.ne.s32.totalorder %v4217_v12, 0  ;;  %v3593_v40 = vmax.f32 %v3529_v54, 0.0  ;;  %v3528_v58 = vadd.f32 3.0, %v13347_v53 }
 0x4c7   :  { %21907 = vst [vmem:[#allocation29_spill] sm:$0xff] %v17315_v8  ;;  %v4895_v1 = vrot.slane %v17301_v36, 7  ;;  %v6898_v23 = vmul.f32 %v6834_v22, %v17229_v41  ;;  %v17319_v6 = vmul.f32 0.16666667, %v6897_v24  ;;  %v5962_v46 = vrot.slane %v17301_v36, 1 }
 0x4c8   :  { %v6707_v47 = vadd.f32 3.0, %v17298_v14  ;;  %v5199_v7 = vmul.f32 %v15355_v15, %v17197_v4  ;;  %v21909_v59 = vrot.slane %v17155_v51, 7  ;;  %v21910_v12 = vrot.slane %v17273_v11, 7 }
 0x4c9   :  { %21908 = vst [vmem:[#allocation37_spill] sm:$0xff] %v17319_v6  ;;  %v5198_v41 = vmul.f32 %v15355_v15, %v17201_v63  ;;  %vm6123_vm5 = vcmp.ne.s32.totalorder %v4210_v52, 15  ;;  %v3657_v16 = vmin.f32 %v3593_v40, 6.0  ;;  %v3592_v26 = vmax.f32 %v3528_v58, 0.0 }
 0x4ca   :  { %v4896_v29 = vsel %vm4808_vm1, %v21909_v59, %v4895_v1  ;;  %v17332_v54 = vsel %vm4808_vm1, %v4895_v1, %v21910_v12  ;;  %v21912_v12 = vrot.slane %v17273_v11, 1  ;;  %v5525_v5 = vmul.f32 %v21862_v38, %v17097_v28 }
 0x4cb   :  { %v17336_v22 = vsel %vm5056_vm4, %v4896_v29, 0.0  ;;  %v5267_v24 = vmul.f32 %v15360_v21, %v17332_v54  ;;  %v5397_v1 = vmul.f32 %v15430_v56, %v17332_v54  ;;  %v21911_v29 = vrot.slane %v17155_v51, 1 }
 0x4cc   :  { %v5266_v4 = vmul.f32 %v15360_v21, %v17336_v22  ;;  %v5396_v59 = vmul.f32 %v15430_v56, %v17336_v22  ;;  %v17354_v52 = vsel %vm5874_vm2, %v5962_v46, %v21912_v12  ;;  %v17365_v58 = vsel %vm7004_vm12, %v17319_v6, 0.0  ;;  %v17378_v6 = vpop.f32.mrb[59].mxu0 }
 0x4cd   :  { %v17344_v8 = vadd.f32 %v5267_v24, %v5199_v7  ;;  %v5963_v63 = vsel %vm5874_vm2, %v21911_v29, %v5962_v46  ;;  %21913 = vst [vmem:[#allocation46_spill] sm:$0xff] %v17365_v58  ;;  %v6771_v24 = vmax.f32 %v6707_v47, 0.0  ;;  %v5526_v29 = vmul.f32 %v21862_v38, %v17066_v34 }
 0x4ce   :  { %v17358_v10 = vadd.f32 %v5266_v4, %v5198_v41  ;;  %v5460_v7 = vadd.f32 %v5396_v59, %v17220_v33  ;;  %v17361_v40 = vsel %vm6123_vm5, %v5963_v63, 0.0  ;;  %v5461_v46 = vadd.f32 %v5397_v1, %v17211_v3 }
 0x4cf   :  { %v5658_v12 = vmul.f32 %v15341_v30, %v17155_v51  ;;  %v5657_v28 = vmul.f32 %v15341_v30, %v17174_v42  ;;  %v6527_v33 = vmul.f32 %v15437_v37, %v17361_v40  ;;  %v3721_v59 = vmul.f32 %v17266_v48, %v3657_v16 }
 0x4d0   :  { %v5589_v41 = vadd.f32 %v5525_v5, %v5460_v7  ;;  %v5590_v4 = vadd.f32 %v5526_v29, %v5461_v46  ;;  %v3656_v63 = vmin.f32 %v3592_v26, 6.0  ;;  %v3855_v47 = vadd.s32 400, %v21850_v55 }
 0x4d1   :  { %v17380_v34 = vmul.f32 0.16666667, %v6898_v23  ;;  %v5788_v1 = vmul.f32 %v15423_v9, %v17301_v36  ;;  %v17385_v58 = vadd.f32 %v6527_v33, %v17279_v13  ;;  %v5789_v5 = vmul.f32 %v15423_v9, %v17273_v11 }
 0x4d2   :  { %v5721_v3 = vadd.f32 %v5657_v28, %v5589_v41  ;;  %v5722_v7 = vadd.f32 %v5658_v12, %v5590_v4  ;;  %v17389_v29 = vmul.f32 0.16666667, %v3721_v59  ;;  %v3720_v26 = vmul.f32 %v13347_v53, %v3656_v63 }
 0x4d3   :  { %21914 = vst [vmem:[#allocation40_spill] sm:$0xff] %v17380_v34  ;;  %v6835_v48 = vmin.f32 %v6771_v24, 6.0  ;;  %v17393_v16 = vmul.f32 %v21862_v38, %v16665_v17  ;;  %v6264_v46 = vmul.f32 %v15373_v62, %v17136_v39  ;;  %v6265_v13 = vmul.f32 %v15373_v62, %v17234_v57  ;;  %v21916_v24 = vld [vmem:[#allocation30_spill] sm:$0xff]  ;;  %v21917_v17 = vld [vmem:[#allocation32_spill] sm:$0xff] }
 0x4d4   :  { %v5850_v23 = vadd.f32 %v5788_v1, %v5721_v3  ;;  %v5851_v28 = vadd.f32 %v5789_v5, %v5722_v7  ;;  %v3854_v41 = vadd.s32 392, %v21850_v55  ;;  %v4231_v33 = vand.u32 15, %v3855_v47 }
 0x4d5   :  { %21915 = vst [vmem:[#allocation42_spill] sm:$0xff] %v17393_v16  ;;  %v6396_v12 = vmul.f32 %v15376_v44, %v17225_v20  ;;  %v13348_v4 = vadd.f32 %v21916_v24, %v15304_v31  ;;  %v13349_v59 = vadd.f32 %v21917_v17, %v15304_v31  ;;  %v6397_v39 = vmul.f32 %v15376_v44, %v17361_v40 }
 0x4d6   :  { %v6328_v53 = vadd.f32 %v6264_v46, %v5850_v23  ;;  %v6329_v63 = vadd.f32 %v6265_v13, %v5851_v28  ;;  %v17409_v3 = vmul.f32 0.16666667, %v3720_v26  ;;  %v17413_v47 = vsel %vm7004_vm12, %v17380_v34, 0.0  ;;  %v17420_v23 = vpop.f32.mrb[60].mxu0 }
 0x4d7   :  { %21918 = vst [vmem:[#allocation44_spill] sm:$0xff] %v17413_v47  ;;  %v17416_v1 = vmul.f32 %v6835_v48, %v17298_v14  ;;  %v6528_v7 = vmul.f32 %v15437_v37, %v17354_v52  ;;  %21919 = vst [vmem:[#allocation48_spill] sm:$0xff] %v17420_v23  ;;  %v4224_v13 = vand.u32 15, %v3854_v41  ;;  %vm5058_vm6 = vcmp.ne.s32.totalorder %v4231_v33, 0 }
 0x4d8   :  { %v6460_v5 = vadd.f32 %v6396_v12, %v6328_v53  ;;  %v6461_v46 = vadd.f32 %v6397_v39, %v6329_v63  ;;  %v4899_v28 = vrot.slane %v17409_v3, 7  ;;  %v5966_v24 = vrot.slane %v17409_v3, 1 }
 0x4d9   :  { %v3531_v17 = vadd.f32 3.0, %v13348_v4  ;;  %v3530_v57 = vadd.f32 3.0, %v13349_v59  ;;  %v17428_v14 = vadd.f32 %v16049_v45, %v16744_v27  ;;  %v21920_v12 = vrot.slane %v17273_v11, 7 }
 0x4da   :  { %v17423_v26 = vadd.f32 %v6528_v7, %v6460_v5  ;;  %v21921_v41 = vrot.slane %v17389_v29, 7  ;;  %v5527_v63 = vmul.f32 %v21862_v38, %v17174_v42  ;;  %v5200_v39 = vmul.f32 %v15355_v15, %v17336_v22 }
 0x4db   :  { %v4900_v53 = vsel %vm4808_vm1, %v21920_v12, %v4899_v28  ;;  %v5201_v27 = vmul.f32 %v15355_v15, %v17332_v54  ;;  %vm6125_vm7 = vcmp.ne.s32.totalorder %v4224_v13, 15  ;;  %v21922_v22 = vrot.slane %v17273_v11, 1  ;;  %v17468_v13 = vpop.f32.mrb[61].mxu0 }
 0x4dc   :  { %v17437_v33 = vsel %vm4808_vm1, %v4899_v28, %v21921_v41  ;;  %v17445_v5 = vsel %vm5058_vm6, %v4900_v53, 0.0  ;;  %v3595_v54 = vmax.f32 %v3531_v17, 0.0  ;;  %v3594_v53 = vmax.f32 %v3530_v57, 0.0  ;;  %21924 = vst [vmem:[#allocation27_spill] sm:$0xff] %v17468_v13 }
 0x4dd   :  { %v5268_v7 = vmul.f32 %v15360_v21, %v17445_v5  ;;  %v5269_v12 = vmul.f32 %v15360_v21, %v17437_v33  ;;  %v5398_v28 = vmul.f32 %v15430_v56, %v17445_v5  ;;  %v5399_v42 = vmul.f32 %v15430_v56, %v17437_v33 }
 0x4de   :  { %v5967_v41 = vsel %vm5874_vm2, %v21922_v22, %v5966_v24  ;;  %v21923_v32 = vrot.slane %v17389_v29, 1  ;;  %v17472_v16 = vmul.f32 %v21862_v38, %v16681_v19  ;;  %v5528_v57 = vmul.f32 %v21862_v38, %v17155_v51 }
 0x4df   :  { %v17458_v48 = vadd.f32 %v5268_v7, %v5200_v39  ;;  %v17460_v34 = vadd.f32 %v5269_v12, %v5201_v27  ;;  %v5462_v47 = vadd.f32 %v5398_v28, %v17358_v10  ;;  %v5463_v17 = vadd.f32 %v5399_v42, %v17344_v8 }
 0x4e0   :  { %v17466_v0 = vsel %vm5874_vm2, %v5966_v24, %v21923_v32  ;;  %21925 = vst [vmem:[#allocation33_spill] sm:$0xff] %v17472_v16  ;;  %v17477_v39 = vsel %vm6125_vm7, %v5967_v41, 0.0  ;;  %v17480_v10 = vadd.f32 3.0, %v17428_v14  ;;  %v17484_v32 = vadd.f32 %v16049_v45, %v16816_v35 }
 0x4e1   :  { %v5659_v24 = vmul.f32 %v15341_v30, %v17301_v36  ;;  %v5591_v27 = vadd.f32 %v5527_v63, %v5462_v47  ;;  %v5660_v19 = vmul.f32 %v15341_v30, %v17273_v11  ;;  %v5592_v7 = vadd.f32 %v5528_v57, %v5463_v17 }
 0x4e2   :  { %v6529_v51 = vmul.f32 %v15437_v37, %v17477_v39  ;;  %v3857_v8 = vadd.s32 416, %v21850_v55  ;;  %v5790_v28 = vmul.f32 %v15423_v9, %v17409_v3  ;;  %v3659_v42 = vmin.f32 %v3595_v54, 6.0 }
 0x4e3   :  { %v5723_v12 = vadd.f32 %v5659_v24, %v5591_v27  ;;  %v3658_v35 = vmin.f32 %v3594_v53, 6.0  ;;  %v17497_v22 = vadd.f32 %v16049_v45, %v16818_v60  ;;  %v5791_v47 = vmul.f32 %v15423_v9, %v17389_v29 }
 0x4e4   :  { %v5724_v63 = vadd.f32 %v5660_v19, %v5592_v7  ;;  %v17501_v41 = vadd.f32 %v6529_v51, %v6461_v46  ;;  %v6266_v17 = vmul.f32 %v15373_v62, %v17225_v20  ;;  %v3723_v24 = vmul.f32 %v13348_v4, %v3659_v42  ;;  %v17524_v42 = vpop.f32.mrb[62].mxu0 }
 0x4e5   :  { %v5852_v57 = vadd.f32 %v5790_v28, %v5723_v12  ;;  %v3722_v27 = vmul.f32 %v13349_v59, %v3658_v35  ;;  %v6267_v54 = vmul.f32 %v15373_v62, %v17361_v40  ;;  %v6398_v53 = vmul.f32 %v15376_v44, %v17354_v52  ;;  %21927 = vst [vmem:[#allocation52_spill] sm:$0xff] %v17524_v42 }
 0x4e6   :  { %v5853_v60 = vadd.f32 %v5791_v47, %v5724_v63  ;;  %v3856_v16 = vadd.s32 408, %v21850_v55  ;;  %v17510_v23 = vmul.f32 0.16666667, %v3723_v24  ;;  %v4245_v19 = vand.u32 15, %v3857_v8 }
 0x4e7   :  { %v6330_v13 = vadd.f32 %v6266_v17, %v5852_v57  ;;  %v17512_v46 = vmul.f32 0.16666667, %v3722_v27  ;;  %v17515_v7 = vmul.f32 0.16666667, %v17416_v1  ;;  %v6708_v20 = vadd.f32 3.0, %v17484_v32  ;;  %v21931_v17 = vld [vmem:[#allocation51_spill] sm:$0xff] }
 0x4e8   :  { %v6331_v4 = vadd.f32 %v6267_v54, %v5853_v60  ;;  %v6399_v40 = vmul.f32 %v15376_v44, %v17477_v39  ;;  %v6711_v59 = vadd.f32 3.0, %v17497_v22  ;;  %v6530_v12 = vmul.f32 %v15437_v37, %v17466_v0 }
 0x4e9   :  { %21926 = vst [vmem:[#allocation50_spill] sm:$0xff] %v17515_v7  ;;  %v6462_v51 = vadd.f32 %v6398_v53, %v6330_v13  ;;  %v20896_v28 = vrot.slane %v17510_v23, 7  ;;  %v17528_v1 = vmul.f32 %v15373_v62, %v16727_v50  ;;  %v6773_v8 = vmax.f32 %v17480_v10, 0.0  ;;  %v21933_v10 = vld [vmem:[#allocation38_spill] sm:$0xff] }
 0x4ea   :  { %v17533_v35 = vmul.f32 %v15341_v30, %v16746_v2  ;;  %v6463_v47 = vadd.f32 %v6399_v40, %v6331_v4  ;;  %v4238_v13 = vand.u32 15, %v3856_v16  ;;  %v4903_v57 = vrot.slane %v17512_v46, 7 }
 0x4eb   :  { %21928 = vst [vmem:[#allocation74_spill] sm:$0xff] %v17528_v1  ;;  %v17535_v63 = vadd.f32 %v6530_v12, %v6462_v51  ;;  %vm5060_vm8 = vcmp.ne.s32.totalorder %v4245_v19, 0  ;;  %v17540_v24 = vadd.f32 %v16049_v45, %v21931_v17  ;;  %v6772_v27 = vmax.f32 %v6708_v20, 0.0 }
 0x4ec   :  { %21929 = vst [vmem:[#allocation90_spill] sm:$0xff] %v17533_v35  ;;  %v5970_v50 = vrot.slane %v17512_v46, 1  ;;  %v13350_v54 = vadd.f32 %v21933_v10, %v15304_v31  ;;  %v6775_v53 = vmax.f32 %v6711_v59, 0.0  ;;  %v21934_v4 = vrot.slane %v17389_v29, 7 }
 0x4ed   :  { %21930 = vst [vmem:[#allocation54_spill] sm:$0xff] %v17535_v63  ;;  %21932 = vst [vmem:[#allocation55_spill] sm:$0xff] %v17540_v24  ;;  %v17552_v19 = vsel %vm4808_vm1, %v4903_v57, %v20896_v28  ;;  %v5529_v20 = vmul.f32 %v21862_v38, %v17301_v36  ;;  %v5203_v40 = vmul.f32 %v15355_v15, %v17437_v33  ;;  %vm6127_vm9 = vcmp.ne.s32.totalorder %v4238_v13, 15  ;;  %v17575_v28 = vpop.f32.mrb[63].mxu0  ;;  %v21940_v63 = vld [vmem:[#allocation57_spill] sm:$0xff] }
 0x4ee   :  { %v4904_v16 = vsel %vm4808_vm1, %v21934_v4, %v4903_v57  ;;  %v5271_v59 = vmul.f32 %v15360_v21, %v17552_v19  ;;  %v5202_v12 = vmul.f32 %v15355_v15, %v17445_v5  ;;  %v5401_v36 = vmul.f32 %v15430_v56, %v17552_v19  ;;  %21936 = vst [vmem:[#allocation58_spill] sm:$0xff] %v17575_v28 }
 0x4ef   :  { %v17558_v51 = vsel %vm5060_vm8, %v4904_v16, 0.0  ;;  %v21935_v33 = vrot.slane %v17389_v29, 1  ;;  %v3533_v16 = vadd.f32 3.0, %v13350_v54  ;;  %v21937_v7 = vrot.slane %v17510_v23, 1 }
 0x4f0   :  { %v5270_v17 = vmul.f32 %v15360_v21, %v17558_v51  ;;  %v5400_v57 = vmul.f32 %v15430_v56, %v17558_v51  ;;  %v17568_v10 = vadd.f32 %v5271_v59, %v5203_v40  ;;  %v21938_v40 = vld [vmem:[#allocation47_spill] sm:$0xff]  ;;  %v6837_v1 = vmin.f32 %v6773_v8, 6.0 }
 0x4f1   :  { %v5971_v4 = vsel %vm5874_vm2, %v21935_v33, %v5970_v50  ;;  %v17583_v13 = vsel %vm5874_vm2, %v5970_v50, %v21937_v7  ;;  %v13351_v59 = vadd.f32 %v21938_v40, %v15304_v31  ;;  %v5530_v35 = vmul.f32 %v21862_v38, %v17273_v11 }
 0x4f2   :  { %v17577_v5 = vadd.f32 %v5270_v17, %v5202_v12  ;;  %v5464_v60 = vadd.f32 %v5400_v57, %v17458_v48  ;;  %v5465_v33 = vadd.f32 %v5401_v36, %v17460_v34  ;;  %v17590_v2 = vsel %vm6127_vm9, %v5971_v4, 0.0 }
 0x4f3   :  { %v17593_v12 = vadd.f32 3.0, %v17540_v24  ;;  %v6836_v48 = vmin.f32 %v6772_v27, 6.0  ;;  %v5661_v17 = vmul.f32 %v15341_v30, %v17409_v3  ;;  %v5662_v50 = vmul.f32 %v15341_v30, %v17389_v29 }
 0x4f4   :  { %v5593_v7 = vadd.f32 %v5529_v20, %v5464_v60  ;;  %v5594_v57 = vadd.f32 %v5530_v35, %v5465_v33  ;;  %v6531_v8 = vmul.f32 %v15437_v37, %v17590_v2  ;;  %v3597_v11 = vmax.f32 %v3533_v16, 0.0 }
 0x4f5   :  { %21939 = vst [vmem:[#allocation103_spill] sm:$0xff] %v17593_v12  ;;  %v6839_v40 = vmin.f32 %v6775_v53, 6.0  ;;  %v5792_v36 = vmul.f32 %v15423_v9, %v17512_v46  ;;  %v3532_v4 = vadd.f32 3.0, %v13351_v59  ;;  %v5793_v27 = vmul.f32 %v15423_v9, %v17510_v23 }
 0x4f6   :  { %v5725_v34 = vadd.f32 %v5661_v17, %v5593_v7  ;;  %v5726_v24 = vadd.f32 %v5662_v50, %v5594_v57  ;;  %v17605_v28 = vadd.f32 %v6531_v8, %v6463_v47  ;;  %v3661_v60 = vmin.f32 %v3597_v11, 6.0 }
 0x4f7   :  { %v6900_v20 = vmul.f32 %v6836_v48, %v17484_v32  ;;  %v6268_v33 = vmul.f32 %v15373_v62, %v17354_v52  ;;  %v3596_v16 = vmax.f32 %v3532_v4, 0.0  ;;  %v6269_v53 = vmul.f32 %v15373_v62, %v17477_v39 }
 0x4f8   :  { %v5854_v35 = vadd.f32 %v5792_v36, %v5725_v34  ;;  %v5855_v17 = vadd.f32 %v5793_v27, %v5726_v24  ;;  %v3725_v7 = vmul.f32 %v13350_v54, %v3661_v60  ;;  %v3859_v42 = vadd.s32 432, %v21850_v55  ;;  %v21941_v34 = vld [vmem:[#allocation39_spill] sm:$0xff] }
 0x4f9   :  { %v17615_v50 = vadd.f32 %v16049_v45, %v21940_v63  ;;  %v6400_v47 = vmul.f32 %v15376_v44, %v17466_v0  ;;  %v3660_v48 = vmin.f32 %v3596_v16, 6.0  ;;  %v6903_v57 = vmul.f32 %v6839_v40, %v17497_v22  ;;  %v21943_v22 = vld [vmem:[#allocation56_spill] sm:$0xff] }
 0x4fa   :  { %v6332_v32 = vadd.f32 %v6268_v33, %v5854_v35  ;;  %v6333_v52 = vadd.f32 %v6269_v53, %v5855_v17  ;;  %v6401_v8 = vmul.f32 %v15376_v44, %v17590_v2  ;;  %v17622_v39 = vmul.f32 0.16666667, %v3725_v7  ;;  %v21945_v35 = vld [vmem:[#allocation41_spill] sm:$0xff]  ;;  %v21947_v53 = vld [vmem:[#allocation43_spill] sm:$0xff] }
 0x4fb   :  { %v6532_v54 = vmul.f32 %v15437_v37, %v17583_v13  ;;  %v3724_v11 = vmul.f32 %v13351_v59, %v3660_v48  ;;  %v3858_v63 = vadd.s32 424, %v21850_v55  ;;  %v17629_v36 = vmul.f32 %v15341_v30, %v21941_v34 }
 0x4fc   :  { %v6464_v24 = vadd.f32 %v6400_v47, %v6332_v32  ;;  %v6465_v4 = vadd.f32 %v6401_v8, %v6333_v52  ;;  %v4259_v27 = vand.u32 15, %v3859_v42  ;;  %v13352_v40 = vadd.f32 %v21943_v22, %v15304_v31  ;;  %v21951_v32 = vld [vmem:[#allocation60_spill] sm:$0xff]  ;;  %v21953_v8 = vld [vmem:[#allocation61_spill] sm:$0xff] }
 0x4fd   :  { %21942 = vst [vmem:[#allocation66_spill] sm:$0xff] %v17629_v36  ;;  %v17634_v60 = vmul.f32 %v6837_v1, %v17428_v14  ;;  %v17638_v33 = vmul.f32 %v15376_v44, %v21945_v35  ;;  %v6712_v59 = vadd.f32 3.0, %v17615_v50  ;;  %v17645_v17 = vmul.f32 %v15373_v62, %v21947_v53 }
 0x4fe   :  { %v17641_v16 = vadd.f32 %v6532_v54, %v6464_v24  ;;  %v20902_v7 = vrot.slane %v17622_v39, 7  ;;  %v17649_v47 = vmul.f32 0.16666667, %v3724_v11  ;;  %v17651_v14 = vmul.f32 0.16666667, %v6900_v20  ;;  %v21956_v11 = vld [vmem:[#allocation71_spill] sm:$0xff] }
 0x4ff   :  { %21944 = vst [vmem:[#allocation118_spill] sm:$0xff] %v17634_v60  ;;  %21946 = vst [vmem:[#allocation28_spill] sm:$0xff] %v17638_v33  ;;  %v17653_v1 = vmul.f32 0.16666667, %v6903_v57  ;;  %v17657_v48 = vmul.f32 %v15341_v30, %v21951_v32  ;;  %v4252_v52 = vand.u32 15, %v3858_v63  ;;  %v17661_v24 = vmul.f32 %v21862_v38, %v21953_v8 }
 0x500   :  { %21948 = vst [vmem:[#allocation88_spill] sm:$0xff] %v17645_v17  ;;  %21949 = vst [vmem:[#allocation93_spill] sm:$0xff] %v17651_v14  ;;  %v4907_v54 = vrot.slane %v17649_v47, 7  ;;  %vm5062_vm10 = vcmp.ne.s32.totalorder %v4259_v27, 0  ;;  %v3535_v34 = vadd.f32 3.0, %v13352_v40  ;;  %v6776_v22 = vmax.f32 %v6712_v59, 0.0 }
 0x501   :  { %21950 = vst [vmem:[#allocation106_spill] sm:$0xff] %v17653_v1  ;;  %21952 = vst [vmem:[#allocation102_spill] sm:$0xff] %v17657_v48  ;;  %v17666_v20 = vmul.f32 %v15341_v30, %v21953_v8  ;;  %v5974_v57 = vrot.slane %v17649_v47, 1  ;;  %v13353_v35 = vadd.f32 %v21956_v11, %v15304_v31  ;;  %v5531_v63 = vmul.f32 %v21862_v38, %v17409_v3  ;;  %v21962_v17 = vld [vmem:[#allocation69_spill] sm:$0xff] }
 0x502   :  { %21954 = vst [vmem:[#allocation110_spill] sm:$0xff] %v17661_v24  ;;  %v21957_v32 = vrot.slane %v17510_v23, 7  ;;  %v17680_v59 = vsel %vm4808_vm1, %v4907_v54, %v20902_v7  ;;  %v5205_v42 = vmul.f32 %v15355_v15, %v17552_v19  ;;  %vm6129_vm11 = vcmp.ne.s32.totalorder %v4252_v52, 15 }
 0x503   :  { %21955 = vst [vmem:[#allocation122_spill] sm:$0xff] %v17666_v20  ;;  %v5273_v11 = vmul.f32 %v15360_v21, %v17680_v59  ;;  %v5204_v3 = vmul.f32 %v15355_v15, %v17558_v51  ;;  %v5403_v19 = vmul.f32 %v15430_v56, %v17680_v59  ;;  %v3534_v52 = vadd.f32 3.0, %v13353_v35 }
 0x504   :  { %v4908_v27 = vsel %vm4808_vm1, %v21957_v32, %v4907_v54  ;;  %v3599_v54 = vmax.f32 %v3535_v34, 0.0  ;;  %v21959_v12 = vrot.slane %v17622_v39, 1  ;;  %v17717_v36 = vmul.f32 %v15373_v62, %v21962_v17 }
 0x505   :  { %v17684_v1 = vsel %vm5062_vm10, %v4908_v27, 0.0  ;;  %v17694_v7 = vadd.f32 %v5273_v11, %v5205_v42  ;;  %v21958_v27 = vrot.slane %v17510_v23, 1  ;;  %v21960_v42 = vld [vmem:[#allocation67_spill] sm:$0xff]  ;;  %v3598_v20 = vmax.f32 %v3534_v52, 0.0 }
 0x506   :  { %v5272_v32 = vmul.f32 %v15360_v21, %v17684_v1  ;;  %v5402_v53 = vmul.f32 %v15430_v56, %v17684_v1  ;;  %v17707_v33 = vsel %vm5874_vm2, %v5974_v57, %v21959_v12  ;;  %v17713_v11 = vmul.f32 %v15360_v21, %v21960_v42  ;;  %21963 = vst [vmem:[#allocation112_spill] sm:$0xff] %v17717_v36 }
 0x507   :  { %v5975_v14 = vsel %vm5874_vm2, %v21958_v27, %v5974_v57  ;;  %v5663_v12 = vmul.f32 %v15341_v30, %v17512_v46  ;;  %v3663_v42 = vmin.f32 %v3599_v54, 6.0  ;;  %v5795_v36 = vmul.f32 %v15423_v9, %v17622_v39 }
 0x508   :  { %v17701_v60 = vadd.f32 %v5272_v32, %v5204_v3  ;;  %v5466_v51 = vadd.f32 %v5402_v53, %v17577_v5  ;;  %v17709_v34 = vsel %vm6129_vm11, %v5975_v14, 0.0  ;;  %21961 = vst [vmem:[#allocation11_spill] sm:$0xff] %v17713_v11  ;;  %v5532_v3 = vmul.f32 %v21862_v38, %v17389_v29 }
 0x509   :  { %v5467_v5 = vadd.f32 %v5403_v19, %v17568_v10  ;;  %v6840_v53 = vmin.f32 %v6776_v22, 6.0  ;;  %v6533_v14 = vmul.f32 %v15437_v37, %v17709_v34  ;;  %v5664_v32 = vmul.f32 %v15341_v30, %v17510_v23 }
 0x50a   :  { %v5595_v57 = vadd.f32 %v5531_v63, %v5466_v51  ;;  %v5794_v10 = vmul.f32 %v15423_v9, %v17649_v47  ;;  %v3727_v63 = vmul.f32 %v13352_v40, %v3663_v42  ;;  %v3662_v51 = vmin.f32 %v3598_v20, 6.0  ;;  %v21966_v20 = vld [vmem:[#allocation87_spill] sm:$0xff]  ;;  %v21969_v42 = vld [vmem:[#allocation104_spill] sm:$0xff] }
 0x50b   :  { %v5596_v27 = vadd.f32 %v5532_v3, %v5467_v5  ;;  %v17732_v22 = vadd.f32 %v6533_v14, %v6465_v4  ;;  %v3861_v48 = vadd.s32 448, %v21850_v55  ;;  %v6904_v24 = vmul.f32 %v6840_v53, %v17615_v50  ;;  %v21968_v50 = vld [vmem:[#allocation130_spill] sm:$0xff] }
 0x50c   :  { %v5727_v29 = vadd.f32 %v5663_v12, %v5595_v57  ;;  %v17738_v54 = vmul.f32 %v15376_v44, %v21962_v17  ;;  %v6270_v3 = vmul.f32 %v15373_v62, %v17466_v0  ;;  %v6271_v5 = vmul.f32 %v15373_v62, %v17590_v2 }
 0x50d   :  { %21964 = vst [vmem:[#allocation117_spill] sm:$0xff] %v17732_v22  ;;  %v5728_v19 = vadd.f32 %v5664_v32, %v5596_v27  ;;  %v17744_v12 = vmul.f32 0.16666667, %v3727_v63  ;;  %v3726_v40 = vmul.f32 %v13353_v35, %v3662_v51  ;;  %v17748_v57 = vmul.f32 %v15423_v9, %v21966_v20 }
 0x50e   :  { %21965 = vst [vmem:[#allocation16_spill] sm:$0xff] %v17738_v54  ;;  %v5856_v52 = vadd.f32 %v5794_v10, %v5727_v29  ;;  %v17752_v53 = vadd.f32 %v16049_v45, %v21968_v50  ;;  %v6402_v17 = vmul.f32 %v15376_v44, %v17583_v13  ;;  %v6403_v2 = vmul.f32 %v15376_v44, %v17709_v34  ;;  %v21970_v10 = vld [vmem:[#allocation115_spill] sm:$0xff] }
 0x50f   :  { %v5857_v4 = vadd.f32 %v5795_v36, %v5728_v19  ;;  %21967 = vst [vmem:[#allocation129_spill] sm:$0xff] %v17748_v57  ;;  %v3860_v36 = vadd.s32 440, %v21850_v55  ;;  %v4273_v32 = vand.u32 15, %v3861_v48  ;;  %v6534_v27 = vmul.f32 %v15437_v37, %v17707_v33 }
 0x510   :  { %v6334_v14 = vadd.f32 %v6270_v3, %v5856_v52  ;;  %v13354_v29 = vadd.f32 %v21969_v42, %v15304_v31  ;;  %v13355_v19 = vadd.f32 %v21970_v10, %v15304_v31  ;;  %v17765_v63 = vmul.f32 0.16666667, %v6904_v24  ;;  %v21978_v24 = vld [vmem:[#allocation120_spill] sm:$0xff]  ;;  %v21980_v52 = vld [vmem:[#allocation133_spill] sm:$0xff] }
 0x511   :  { %v6335_v0 = vadd.f32 %v6271_v5, %v5857_v4  ;;  %v17768_v3 = vmul.f32 0.16666667, %v3726_v40  ;;  %v21972_v5 = vld [vmem:[#allocation100_spill] sm:$0xff]  ;;  %v21974_v4 = vld [vmem:[#allocation97_spill] sm:$0xff]  ;;  %v4266_v40 = vand.u32 15, %v3860_v36  ;;  %vm5064_vm13 = vcmp.ne.s32.totalorder %v4273_v32, 0 }
 0x512   :  { %v6466_v35 = vadd.f32 %v6402_v17, %v6334_v14  ;;  %21971 = vst [vmem:[#allocation9_spill] sm:$0xff] %v17765_v63  ;;  %v17772_v48 = vmul.f32 %v15430_v56, %v21972_v5  ;;  %v17776_v20 = vmul.f32 %v15341_v30, %v21974_v4  ;;  %v17780_v50 = vmul.f32 %v15423_v9, %v21974_v4 }
 0x513   :  { %v6467_v51 = vadd.f32 %v6403_v2, %v6335_v0  ;;  %v17786_v14 = vmul.f32 %v15360_v21, %v21978_v24  ;;  %v4911_v0 = vrot.slane %v17768_v3, 7  ;;  %v6719_v2 = vadd.f32 3.0, %v17752_v53 }
 0x514   :  { %21973 = vst [vmem:[#allocation25_spill] sm:$0xff] %v17772_v48  ;;  %21975 = vst [vmem:[#allocation20_spill] sm:$0xff] %v17776_v20  ;;  %v17782_v17 = vadd.f32 %v6534_v27, %v6466_v35  ;;  %v5978_v42 = vrot.slane %v17768_v3, 1  ;;  %v3537_v10 = vadd.f32 3.0, %v13354_v29  ;;  %v3536_v5 = vadd.f32 3.0, %v13355_v19 }
 0x515   :  { %21976 = vst [vmem:[#allocation24_spill] sm:$0xff] %v17780_v50  ;;  %21979 = vst [vmem:[#allocation30_spill] sm:$0xff] %v17786_v14  ;;  %v17793_v4 = vadd.f32 %v16049_v45, %v21980_v52  ;;  %v21981_v27 = vrot.slane %v17622_v39, 7  ;;  %v21982_v36 = vrot.slane %v17744_v12, 7  ;;  %v5533_v54 = vmul.f32 %v21862_v38, %v17512_v46 }
 0x516   :  { %21977 = vst [vmem:[#allocation26_spill] sm:$0xff] %v17782_v17  ;;  %v5206_v50 = vmul.f32 %v15355_v15, %v17684_v1  ;;  %v5207_v52 = vmul.f32 %v15355_v15, %v17680_v59  ;;  %vm6131_vm14 = vcmp.ne.s32.totalorder %v4266_v40, 15  ;;  %v21983_v1 = vrot.slane %v17622_v39, 1 }
 0x517   :  { %v4912_v63 = vsel %vm4808_vm1, %v21981_v27, %v4911_v0  ;;  %v17802_v32 = vsel %vm4808_vm1, %v4911_v0, %v21982_v36  ;;  %v3601_v59 = vmax.f32 %v3537_v10, 0.0  ;;  %v21984_v11 = vrot.slane %v17744_v12, 1 }
 0x518   :  { %v17810_v57 = vsel %vm5064_vm13, %v4912_v63, 0.0  ;;  %v5275_v27 = vmul.f32 %v15360_v21, %v17802_v32  ;;  %v5405_v46 = vmul.f32 %v15430_v56, %v17802_v32  ;;  %v5979_v36 = vsel %vm5874_vm2, %v21983_v1, %v5978_v42 }
 0x519   :  { %v5274_v35 = vmul.f32 %v15360_v21, %v17810_v57  ;;  %v5404_v0 = vmul.f32 %v15430_v56, %v17810_v57  ;;  %v3600_v63 = vmax.f32 %v3536_v5, 0.0  ;;  %v17831_v8 = vsel %vm5874_vm2, %v5978_v42, %v21984_v11 }
 0x51a   :  { %v17825_v48 = vadd.f32 %v5275_v27, %v5207_v52  ;;  %v6720_v40 = vadd.f32 3.0, %v17793_v4  ;;  %v5534_v17 = vmul.f32 %v21862_v38, %v17510_v23  ;;  %v5469_v1 = vadd.f32 %v5405_v46, %v17694_v7 }
 0x51b   :  { %v17823_v20 = vadd.f32 %v5274_v35, %v5206_v50  ;;  %v5468_v14 = vadd.f32 %v5404_v0, %v17701_v60  ;;  %v17837_v10 = vsel %vm6131_vm14, %v5979_v36, 0.0  ;;  %v6783_v50 = vmax.f32 %v6719_v2, 0.0 }
 0x51c   :  { %v5665_v5 = vmul.f32 %v15341_v30, %v17649_v47  ;;  %v6535_v60 = vmul.f32 %v15437_v37, %v17837_v10  ;;  %v5666_v11 = vmul.f32 %v15341_v30, %v17622_v39  ;;  %v5598_v42 = vadd.f32 %v5534_v17, %v5469_v1 }
 0x51d   :  { %v5597_v35 = vadd.f32 %v5533_v54, %v5468_v14  ;;  %v3665_v52 = vmin.f32 %v3601_v59, 6.0  ;;  %v3863_v27 = vadd.s32 464, %v21850_v55  ;;  %v5796_v7 = vmul.f32 %v15423_v9, %v17768_v3 }
 0x51e   :  { %v17848_v0 = vadd.f32 %v6535_v60, %v6467_v51  ;;  %v3664_v2 = vmin.f32 %v3600_v63, 6.0  ;;  %v6784_v46 = vmax.f32 %v6720_v40, 0.0  ;;  %v5797_v54 = vmul.f32 %v15423_v9, %v17744_v12 }
 0x51f   :  { %v5729_v23 = vadd.f32 %v5665_v5, %v5597_v35  ;;  %v5730_v14 = vadd.f32 %v5666_v11, %v5598_v42  ;;  %v3729_v36 = vmul.f32 %v13354_v29, %v3665_v52  ;;  %v6273_v22 = vmul.f32 %v15373_v62, %v17709_v34  ;;  %v21986_v11 = vld [vmem:[#allocation124_spill] sm:$0xff] }
 0x520   :  { %v6272_v59 = vmul.f32 %v15373_v62, %v17583_v13  ;;  %v3728_v1 = vmul.f32 %v13355_v19, %v3664_v2  ;;  %v3862_v51 = vadd.s32 456, %v21850_v55  ;;  %v4287_v63 = vand.u32 15, %v3863_v27 }
 0x521   :  { %v5858_v17 = vadd.f32 %v5796_v7, %v5729_v23  ;;  %v5859_v5 = vadd.f32 %v5797_v54, %v5730_v14  ;;  %v17856_v35 = vmul.f32 0.16666667, %v3729_v36  ;;  %v17861_v40 = vmul.f32 %v15430_v56, %v21978_v24 }
 0x522   :  { %v6404_v29 = vmul.f32 %v15376_v44, %v17707_v33  ;;  %v17865_v34 = vmul.f32 0.16666667, %v3728_v1  ;;  %v17869_v13 = vmul.f32 %v15376_v44, %v21986_v11  ;;  %v6405_v42 = vmul.f32 %v15376_v44, %v17837_v10  ;;  %v21989_v1 = vld [vmem:[#allocation128_spill] sm:$0xff] }
 0x523   :  { %21985 = vst [vmem:[#allocation32_spill] sm:$0xff] %v17861_v40  ;;  %v6336_v60 = vadd.f32 %v6272_v59, %v5858_v17  ;;  %v6337_v19 = vadd.f32 %v6273_v22, %v5859_v5  ;;  %v20907_v52 = vrot.slane %v17856_v35, 7  ;;  %v6847_v27 = vmin.f32 %v6783_v50, 6.0  ;;  %v21988_v17 = vld [vmem:[#allocation125_spill] sm:$0xff] }
 0x524   :  { %21987 = vst [vmem:[#allocation51_spill] sm:$0xff] %v17869_v13  ;;  %v6848_v23 = vmin.f32 %v6784_v46, 6.0  ;;  %v6536_v7 = vmul.f32 %v15437_v37, %v17831_v8  ;;  %v4280_v54 = vand.u32 15, %v3862_v51  ;;  %v4915_v14 = vrot.slane %v17865_v34, 7 }
 0x525   :  { %v6468_v24 = vadd.f32 %v6404_v29, %v6336_v60  ;;  %v6469_v2 = vadd.f32 %v6405_v42, %v6337_v19  ;;  %vm5066_vm15 = vcmp.ne.s32.totalorder %v4287_v63, 0  ;;  %v5982_v22 = vrot.slane %v17865_v34, 1 }
 0x526   :  { %v13356_v59 = vadd.f32 %v21988_v17, %v15304_v31  ;;  %v13357_v50 = vadd.f32 %v21989_v1, %v15304_v31  ;;  %v17886_v46 = vadd.f32 %v16049_v45, %v17250_v43  ;;  %v20908_v5 = vrot.slane %v17856_v35, 1 }
 0x527   :  { %v17877_v36 = vadd.f32 %v6536_v7, %v6468_v24  ;;  %v21990_v51 = vrot.slane %v17744_v12, 7  ;;  %v17895_v29 = vsel %vm4808_vm1, %v4915_v14, %v20907_v52  ;;  %v5535_v60 = vmul.f32 %v21862_v38, %v17649_v47 }
 0x528   :  { %v5208_v11 = vmul.f32 %v15355_v15, %v17810_v57  ;;  %v5209_v43 = vmul.f32 %v15355_v15, %v17802_v32  ;;  %v5277_v24 = vmul.f32 %v15360_v21, %v17895_v29  ;;  %vm6133_vm3 = vcmp.ne.s32.totalorder %v4280_v54, 15 }
 0x529   :  { %v4916_v63 = vsel %vm4808_vm1, %v21990_v51, %v4915_v14  ;;  %v5407_v47 = vmul.f32 %v15430_v56, %v17895_v29  ;;  %v21991_v57 = vrot.slane %v17744_v12, 1  ;;  %v3539_v32 = vadd.f32 3.0, %v13356_v59 }
 0x52a   :  { %v17903_v19 = vsel %vm5066_vm15, %v4916_v63, 0.0  ;;  %v3538_v17 = vadd.f32 3.0, %v13357_v50  ;;  %v17918_v51 = vadd.f32 %v5277_v24, %v5209_v43  ;;  %v17924_v52 = vsel %vm5874_vm2, %v5982_v22, %v20908_v5 }
 0x52b   :  { %v5276_v42 = vmul.f32 %v15360_v21, %v17903_v19  ;;  %v5406_v7 = vmul.f32 %v15430_v56, %v17903_v19  ;;  %v5983_v14 = vsel %vm5874_vm2, %v21991_v57, %v5982_v22  ;;  %v6911_v54 = vmul.f32 %v6847_v27, %v17752_v53 }
 0x52c   :  { %v5536_v13 = vmul.f32 %v21862_v38, %v17622_v39  ;;  %v5471_v57 = vadd.f32 %v5407_v47, %v17825_v48  ;;  %v17930_v40 = vsel %vm6133_vm3, %v5983_v14, 0.0  ;;  %v6721_v43 = vadd.f32 3.0, %v17886_v46 }
 0x52d   :  { %v17916_v1 = vadd.f32 %v5276_v42, %v5208_v11  ;;  %v5470_v63 = vadd.f32 %v5406_v7, %v17823_v20  ;;  %v6912_v11 = vmul.f32 %v6848_v23, %v17793_v4  ;;  %v5667_v20 = vmul.f32 %v15341_v30, %v17768_v3 }
 0x52e   :  { %v17938_v22 = vadd.f32 %v16049_v45, %v17286_v49  ;;  %v5668_v53 = vmul.f32 %v15341_v30, %v17744_v12  ;;  %v5600_v39 = vadd.f32 %v5536_v13, %v5471_v57  ;;  %v6537_v48 = vmul.f32 %v15437_v37, %v17930_v40 }
 0x52f   :  { %v5599_v42 = vadd.f32 %v5535_v60, %v5470_v63  ;;  %v5798_v4 = vmul.f32 %v15423_v9, %v17865_v34  ;;  %v3603_v23 = vmax.f32 %v3539_v32, 0.0  ;;  %v3602_v24 = vmax.f32 %v3538_v17, 0.0 }
 0x530   :  { %v5799_v60 = vmul.f32 %v15423_v9, %v17856_v35  ;;  %v5732_v7 = vadd.f32 %v5668_v53, %v5600_v39  ;;  %v17948_v47 = vadd.f32 %v6537_v48, %v6469_v2  ;;  %v3865_v49 = vadd.s32 480, %v21850_v55 }
 0x531   :  { %v5731_v27 = vadd.f32 %v5667_v20, %v5599_v42  ;;  %v6274_v13 = vmul.f32 %v15373_v62, %v17707_v33  ;;  %v3667_v63 = vmin.f32 %v3603_v23, 6.0  ;;  %v3666_v57 = vmin.f32 %v3602_v24, 6.0 }
 0x532   :  { %v6722_v20 = vadd.f32 3.0, %v17938_v22  ;;  %v6785_v42 = vmax.f32 %v6721_v43, 0.0  ;;  %v6275_v32 = vmul.f32 %v15373_v62, %v17837_v10  ;;  %v5861_v17 = vadd.f32 %v5799_v60, %v5732_v7  ;;  %v21992_v60 = vld [vmem:[#allocation105_spill] sm:$0xff] }
 0x533   :  { %v5860_v14 = vadd.f32 %v5798_v4, %v5731_v27  ;;  %v6406_v53 = vmul.f32 %v15376_v44, %v17831_v8  ;;  %v3731_v39 = vmul.f32 %v13356_v59, %v3667_v63  ;;  %v3730_v48 = vmul.f32 %v13357_v50, %v3666_v57  ;;  %v21995_v50 = vld [vmem:[#allocation114_spill] sm:$0xff] }
 0x534   :  { %v6339_v5 = vadd.f32 %v6275_v32, %v5861_v17  ;;  %v6407_v27 = vmul.f32 %v15376_v44, %v17930_v40  ;;  %v3864_v33 = vadd.s32 472, %v21850_v55  ;;  %v4301_v4 = vand.u32 15, %v3865_v49  ;;  %v21999_v57 = vld [vmem:[#allocation126_spill] sm:$0xff] }
 0x535   :  { %v6338_v2 = vadd.f32 %v6274_v13, %v5860_v14  ;;  %v6538_v43 = vmul.f32 %v15437_v37, %v17924_v52  ;;  %v17963_v24 = vmul.f32 0.16666667, %v3731_v39  ;;  %v17965_v10 = vmul.f32 0.16666667, %v3730_v48  ;;  %v21997_v13 = vld [vmem:[#allocation121_spill] sm:$0xff] }
 0x536   :  { %v17969_v7 = vmul.f32 %v15376_v44, %v21992_v60  ;;  %v17973_v59 = vmul.f32 %v15437_v37, %v21992_v60  ;;  %v17977_v14 = vmul.f32 %v15423_v9, %v21995_v50  ;;  %v6471_v49 = vadd.f32 %v6407_v27, %v6339_v5 }
 0x537   :  { %v6470_v23 = vadd.f32 %v6406_v53, %v6338_v2  ;;  %v17981_v63 = vmul.f32 %v15430_v56, %v21997_v13  ;;  %v17985_v32 = vmul.f32 %v15437_v37, %v21999_v57  ;;  %v20909_v53 = vrot.slane %v17963_v24, 7 }
 0x538   :  { %21993 = vst [vmem:[#allocation38_spill] sm:$0xff] %v17969_v7  ;;  %21994 = vst [vmem:[#allocation47_spill] sm:$0xff] %v17973_v59  ;;  %v17990_v2 = vmul.f32 0.16666667, %v6911_v54  ;;  %v4294_v39 = vand.u32 15, %v3864_v33  ;;  %v4919_v48 = vrot.slane %v17965_v10, 7  ;;  %v17997_v50 = vadd.f32 %v16049_v45, %v17385_v58 }
 0x539   :  { %21996 = vst [vmem:[#allocation57_spill] sm:$0xff] %v17977_v14  ;;  %21998 = vst [vmem:[#allocation39_spill] sm:$0xff] %v17981_v63  ;;  %v17987_v17 = vadd.f32 %v6538_v43, %v6470_v23  ;;  %vm5068_vm4 = vcmp.ne.s32.totalorder %v4301_v4, 0  ;;  %v17993_v60 = vmul.f32 0.16666667, %v6912_v11  ;;  %v6786_v5 = vmax.f32 %v6722_v20, 0.0 }
 0x53a   :  { %22000 = vst [vmem:[#allocation56_spill] sm:$0xff] %v17985_v32  ;;  %22002 = vst [vmem:[#allocation43_spill] sm:$0xff] %v17990_v2  ;;  %v6849_v27 = vmin.f32 %v6785_v42, 6.0  ;;  %v22004_v23 = vrot.slane %v17856_v35, 7  ;;  %v18006_v54 = vsel %vm4808_vm1, %v4919_v48, %v20909_v53  ;;  %v5986_v11 = vrot.slane %v17965_v10, 1  ;;  %v22006_v53 = vld [vmem:[#allocation132_spill] sm:$0xff] }
 0x53b   :  { %22001 = vst [vmem:[#allocation41_spill] sm:$0xff] %v17987_v17  ;;  %22003 = vst [vmem:[#allocation60_spill] sm:$0xff] %v17993_v60  ;;  %v5537_v20 = vmul.f32 %v21862_v38, %v17768_v3  ;;  %v5211_v58 = vmul.f32 %v15355_v15, %v17895_v29  ;;  %v5279_v33 = vmul.f32 %v15360_v21, %v18006_v54  ;;  %vm6135_vm5 = vcmp.ne.s32.totalorder %v4294_v39, 15 }
 0x53c   :  { %v4920_v43 = vsel %vm4808_vm1, %v22004_v23, %v4919_v48  ;;  %v5210_v4 = vmul.f32 %v15355_v15, %v17903_v19  ;;  %v5409_v3 = vmul.f32 %v15430_v56, %v18006_v54  ;;  %v22005_v29 = vrot.slane %v17856_v35, 1 }
 0x53d   :  { %v18013_v42 = vsel %vm5068_vm4, %v4920_v43, 0.0  ;;  %v18023_v23 = vadd.f32 %v5279_v33, %v5211_v58  ;;  %v13358_v13 = vadd.f32 %v22006_v53, %v15304_v31  ;;  %v22007_v32 = vrot.slane %v17963_v24, 1 }
 0x53e   :  { %v5278_v57 = vmul.f32 %v15360_v21, %v18013_v42  ;;  %v5408_v48 = vmul.f32 %v15430_v56, %v18013_v42  ;;  %v5987_v43 = vsel %vm5874_vm2, %v22005_v29, %v5986_v11  ;;  %v13359_v58 = vadd.f32 %v17257_v18, %v15304_v31 }
 0x53f   :  { %v18038_v39 = vsel %vm5874_vm2, %v5986_v11, %v22007_v32  ;;  %v6723_v33 = vadd.f32 3.0, %v17997_v50  ;;  %v5538_v29 = vmul.f32 %v21862_v38, %v17744_v12  ;;  %v5473_v59 = vadd.f32 %v5409_v3, %v17918_v51 }
 0x540   :  { %v18032_v19 = vadd.f32 %v5278_v57, %v5210_v4  ;;  %v5472_v17 = vadd.f32 %v5408_v48, %v17916_v1  ;;  %v18046_v53 = vsel %vm6135_vm5, %v5987_v43, 0.0  ;;  %v6913_v4 = vmul.f32 %v6849_v27, %v17886_v46 }
 0x541   :  { %v5669_v1 = vmul.f32 %v15341_v30, %v17865_v34  ;;  %v6539_v32 = vmul.f32 %v15437_v37, %v18046_v53  ;;  %v6850_v11 = vmin.f32 %v6786_v5, 6.0  ;;  %v5670_v18 = vmul.f32 %v15341_v30, %v17856_v35 }
 0x542   :  { %v5601_v57 = vadd.f32 %v5537_v20, %v5472_v17  ;;  %v5602_v48 = vadd.f32 %v5538_v29, %v5473_v59  ;;  %v3541_v7 = vadd.f32 3.0, %v13358_v13  ;;  %v5800_v51 = vmul.f32 %v15423_v9, %v17965_v10 }
 0x543   :  { %v18057_v3 = vadd.f32 %v6539_v32, %v6471_v49  ;;  %v3540_v46 = vadd.f32 3.0, %v13359_v58  ;;  %v6787_v27 = vmax.f32 %v6723_v33, 0.0  ;;  %v5801_v17 = vmul.f32 %v15423_v9, %v17963_v24 }
 0x544   :  { %v5733_v12 = vadd.f32 %v5669_v1, %v5601_v57  ;;  %v5734_v20 = vadd.f32 %v5670_v18, %v5602_v48  ;;  %v3605_v43 = vmax.f32 %v3541_v7, 0.0  ;;  %v6276_v5 = vmul.f32 %v15373_v62, %v17831_v8 }
 0x545   :  { %v3604_v63 = vmax.f32 %v3540_v46, 0.0  ;;  %v3867_v59 = vadd.s32 496, %v21850_v55  ;;  %v18066_v29 = vadd.f32 %v16049_v45, %v17423_v26  ;;  %v6277_v49 = vmul.f32 %v15373_v62, %v17930_v40 }
 0x546   :  { %v5862_v14 = vadd.f32 %v5800_v51, %v5733_v12  ;;  %v5863_v33 = vadd.f32 %v5801_v17, %v5734_v20  ;;  %v3669_v1 = vmin.f32 %v3605_v43, 6.0  ;;  %v6914_v57 = vmul.f32 %v6850_v11, %v17938_v22 }
 0x547   :  { %v6408_v7 = vmul.f32 %v15376_v44, %v17924_v52  ;;  %v3668_v18 = vmin.f32 %v3604_v63, 6.0  ;;  %v6409_v48 = vmul.f32 %v15376_v44, %v18046_v53  ;;  %v3866_v26 = vadd.s32 488, %v21850_v55 }
 0x548   :  { %v6340_v32 = vadd.f32 %v6276_v5, %v5862_v14  ;;  %v6341_v8 = vadd.f32 %v6277_v49, %v5863_v33  ;;  %v3733_v12 = vmul.f32 %v13358_v13, %v3669_v1  ;;  %v6540_v40 = vmul.f32 %v15437_v37, %v18038_v39 }
 0x549   :  { %v3732_v46 = vmul.f32 %v13359_v58, %v3668_v18  ;;  %v4315_v17 = vand.u32 15, %v3867_v59  ;;  %v6724_v22 = vadd.f32 3.0, %v18066_v29  ;;  %v6851_v11 = vmin.f32 %v6787_v27, 6.0 }
 0x54a   :  { %v6472_v51 = vadd.f32 %v6408_v7, %v6340_v32  ;;  %v6473_v20 = vadd.f32 %v6409_v48, %v6341_v8  ;;  %v18079_v43 = vmul.f32 0.16666667, %v3733_v12  ;;  %v18083_v14 = vmul.f32 %v15437_v37, %v17071_v25 }
 0x54b   :  { %v18087_v63 = vsel %vm7004_vm12, %v17990_v2, 0.0  ;;  %v18091_v5 = vmul.f32 0.16666667, %v3732_v46  ;;  %v18095_v58 = vsel %vm7004_vm12, %v17993_v60, 0.0  ;;  %v18097_v27 = vmul.f32 0.16666667, %v6913_v4 }
 0x54c   :  { %v18089_v13 = vadd.f32 %v6540_v40, %v6472_v51  ;;  %v20911_v59 = vrot.slane %v18079_v43, 7  ;;  %v4308_v49 = vand.u32 15, %v3866_v26  ;;  %v18100_v33 = vmul.f32 0.16666667, %v6914_v57 }
 0x54d   :  { %22009 = vst [vmem:[#allocation67_spill] sm:$0xff] %v18097_v27  ;;  %v4923_v25 = vrot.slane %v18091_v5, 7  ;;  %vm5070_vm6 = vcmp.ne.s32.totalorder %v4315_v17, 0  ;;  %v13360_v1 = vadd.f32 %v17303_v61, %v15304_v31  ;;  %v6788_v7 = vmax.f32 %v6724_v22, 0.0 }
 0x54e   :  { %22008 = vst [vmem:[#allocation71_spill] sm:$0xff] %v18089_v13  ;;  %22010 = vst [vmem:[#allocation69_spill] sm:$0xff] %v18100_v33  ;;  %v6915_v32 = vmul.f32 %v6851_v11, %v17997_v50  ;;  %v5540_v18 = vmul.f32 %v21862_v38, %v17856_v35  ;;  %v5990_v4 = vrot.slane %v18091_v5, 1  ;;  %v5213_v8 = vmul.f32 %v15355_v15, %v18006_v54 }
 0x54f   :  { %v20910_v57 = vrot.slane %v18079_v43, 1  ;;  %v22011_v48 = vrot.slane %v17963_v24, 7  ;;  %v18118_v61 = vsel %vm4808_vm1, %v4923_v25, %v20911_v59  ;;  %vm6137_vm7 = vcmp.ne.s32.totalorder %v4308_v49, 15 }
 0x550   :  { %v5281_v35 = vmul.f32 %v15360_v21, %v18118_v61  ;;  %v5411_v26 = vmul.f32 %v15430_v56, %v18118_v61  ;;  %v5212_v54 = vmul.f32 %v15355_v15, %v18013_v42  ;;  %v3543_v40 = vadd.f32 3.0, %v13360_v1 }
 0x551   :  { %v4924_v12 = vsel %vm4808_vm1, %v22011_v48, %v4923_v25  ;;  %v13361_v46 = vadd.f32 %v17378_v6, %v15304_v31  ;;  %v22012_v25 = vrot.slane %v17963_v24, 1  ;;  %v6852_v48 = vmin.f32 %v6788_v7, 6.0 }
 0x552   :  { %v18120_v50 = vsel %vm5070_vm6, %v4924_v12, 0.0  ;;  %v18132_v17 = vadd.f32 %v5281_v35, %v5213_v8  ;;  %v5475_v11 = vadd.f32 %v5411_v26, %v18023_v23  ;;  %v18145_v12 = vsel %vm5874_vm2, %v5990_v4, %v20910_v57 }
 0x553   :  { %v5280_v51 = vmul.f32 %v15360_v21, %v18120_v50  ;;  %v5410_v22 = vmul.f32 %v15430_v56, %v18120_v50  ;;  %v5991_v49 = vsel %vm5874_vm2, %v22012_v25, %v5990_v4  ;;  %v5539_v8 = vmul.f32 %v21862_v38, %v17865_v34 }
 0x554   :  { %v18147_v6 = vsel %vm6137_vm7, %v5991_v49, 0.0  ;;  %v5672_v23 = vmul.f32 %v15341_v30, %v17963_v24  ;;  %v5604_v26 = vadd.f32 %v5540_v18, %v5475_v11  ;;  %v18156_v7 = vadd.f32 %v16049_v45, %v17501_v41 }
 0x555   :  { %v18140_v42 = vadd.f32 %v5280_v51, %v5212_v54  ;;  %v5474_v35 = vadd.f32 %v5410_v22, %v18032_v19  ;;  %v5671_v54 = vmul.f32 %v15341_v30, %v17965_v10  ;;  %v5803_v4 = vmul.f32 %v15423_v9, %v18079_v43 }
 0x556   :  { %v6541_v51 = vmul.f32 %v15437_v37, %v18147_v6  ;;  %v5736_v25 = vadd.f32 %v5672_v23, %v5604_v26  ;;  %v3607_v49 = vmax.f32 %v3543_v40, 0.0  ;;  %v3542_v57 = vadd.f32 3.0, %v13361_v46 }
 0x557   :  { %v5603_v34 = vadd.f32 %v5539_v8, %v5474_v35  ;;  %v6916_v19 = vmul.f32 %v6852_v48, %v18066_v29  ;;  %v6279_v18 = vmul.f32 %v15373_v62, %v18046_v53  ;;  %v5802_v41 = vmul.f32 %v15423_v9, %v18091_v5 }
 0x558   :  { %v18169_v22 = vadd.f32 %v6541_v51, %v6473_v20  ;;  %v5865_v59 = vadd.f32 %v5803_v4, %v5736_v25  ;;  %v3671_v60 = vmin.f32 %v3607_v49, 6.0  ;;  %v3606_v2 = vmax.f32 %v3542_v57, 0.0 }
 0x559   :  { %v5735_v11 = vadd.f32 %v5671_v54, %v5603_v34  ;;  %v6725_v13 = vadd.f32 3.0, %v18156_v7  ;;  %v6278_v40 = vmul.f32 %v15373_v62, %v17924_v52  ;;  %v6411_v29 = vmul.f32 %v15376_v44, %v18147_v6  ;;  %v22015_v54 = vld [vmem:[#allocation48_spill] sm:$0xff] }
 0x55a   :  { %22013 = vst [vmem:[#allocation87_spill] sm:$0xff] %v18169_v22  ;;  %v3869_v48 = vadd.s32 512, %v21850_v55  ;;  %v6343_v8 = vadd.f32 %v6279_v18, %v5865_v59  ;;  %v3735_v23 = vmul.f32 %v13360_v1, %v3671_v60  ;;  %v3670_v35 = vmin.f32 %v3606_v2, 6.0  ;;  %v22017_v2 = vld [vmem:[#allocation27_spill] sm:$0xff] }
 0x55b   :  { %v5864_v53 = vadd.f32 %v5802_v41, %v5735_v11  ;;  %v18177_v20 = vmul.f32 0.16666667, %v6915_v32  ;;  %v6410_v26 = vmul.f32 %v15376_v44, %v18038_v39  ;;  %v3868_v57 = vadd.s32 504, %v21850_v55  ;;  %v22018_v32 = vld [vmem:[#allocation54_spill] sm:$0xff] }
 0x55c   :  { %v13362_v4 = vadd.f32 %v22015_v54, %v15304_v31  ;;  %v6475_v51 = vadd.f32 %v6411_v29, %v6343_v8  ;;  %v18184_v34 = vmul.f32 0.16666667, %v3735_v23  ;;  %v3734_v25 = vmul.f32 %v13361_v46, %v3670_v35 }
 0x55d   :  { %22014 = vst [vmem:[#allocation130_spill] sm:$0xff] %v18177_v20  ;;  %v6342_v52 = vadd.f32 %v6278_v40, %v5864_v53  ;;  %v18186_v49 = vmul.f32 0.16666667, %v6916_v19  ;;  %v4329_v59 = vand.u32 15, %v3869_v48  ;;  %v18190_v1 = vadd.f32 %v22017_v2, %v15304_v31 }
 0x55e   :  { %v3545_v60 = vadd.f32 3.0, %v13362_v4  ;;  %v18194_v18 = vadd.f32 %v16049_v45, %v22018_v32  ;;  %v6789_v41 = vmax.f32 %v6725_v13, 0.0  ;;  %v6542_v40 = vmul.f32 %v15437_v37, %v18145_v12 }
 0x55f   :  { %22016 = vst [vmem:[#allocation104_spill] sm:$0xff] %v18186_v49  ;;  %v6474_v11 = vadd.f32 %v6410_v26, %v6342_v52  ;;  %v18200_v46 = vsel %vm7004_vm12, %v18097_v27, 0.0  ;;  %v18204_v19 = vsel %vm7004_vm12, %v18100_v33, 0.0  ;;  %v20914_v29 = vrot.slane %v18184_v34, 7 }
 0x560   :  { %22019 = vst [vmem:[#allocation115_spill] sm:$0xff] %v18200_v46  ;;  %22020 = vst [vmem:[#allocation100_spill] sm:$0xff] %v18204_v19  ;;  %v18207_v48 = vmul.f32 0.16666667, %v3734_v25  ;;  %v18211_v53 = vsel %vm7004_vm12, %v18177_v20, 0.0  ;;  %v4322_v8 = vand.u32 15, %v3868_v57  ;;  %v5215_v57 = vmul.f32 %v15355_v15, %v18118_v61 }
 0x561   :  { %22021 = vst [vmem:[#allocation97_spill] sm:$0xff] %v18211_v53  ;;  %v18213_v13 = vadd.f32 %v6542_v40, %v6474_v11  ;;  %v3609_v23 = vmax.f32 %v3545_v60, 0.0  ;;  %v18217_v35 = vsel %vm7004_vm12, %v18186_v49, 0.0  ;;  %vm5072_vm8 = vcmp.ne.s32.totalorder %v4329_v59, 0 }
 0x562   :  { %22023 = vst [vmem:[#allocation133_spill] sm:$0xff] %v18217_v35  ;;  %v4927_v26 = vrot.slane %v18207_v48, 7  ;;  %v3544_v54 = vadd.f32 3.0, %v18190_v1  ;;  %v6726_v52 = vadd.f32 3.0, %v18194_v18  ;;  %v6853_v25 = vmin.f32 %v6789_v41, 6.0 }
 0x563   :  { %22022 = vst [vmem:[#allocation120_spill] sm:$0xff] %v18213_v13  ;;  %v3673_v32 = vmin.f32 %v3609_v23, 6.0  ;;  %v5542_v11 = vmul.f32 %v21862_v38, %v17963_v24  ;;  %v22024_v60 = vrot.slane %v18079_v43, 7  ;;  %v5214_v41 = vmul.f32 %v15355_v15, %v18120_v50  ;;  %v22035_v13 = vld [vmem:[#allocation117_spill] sm:$0xff] }
 0x564   :  { %v18233_v59 = vsel %vm4808_vm1, %v4927_v26, %v20914_v29  ;;  %vm6139_vm9 = vcmp.ne.s32.totalorder %v4322_v8, 15  ;;  %v5541_v29 = vmul.f32 %v21862_v38, %v17965_v10  ;;  %v22026_v49 = vrot.slane %v18079_v43, 1 }
 0x565   :  { %v4928_v40 = vsel %vm4808_vm1, %v22024_v60, %v4927_v26  ;;  %v5283_v24 = vmul.f32 %v15360_v21, %v18233_v59  ;;  %v5413_v60 = vmul.f32 %v15430_v56, %v18233_v59  ;;  %v3608_v26 = vmax.f32 %v3544_v54, 0.0 }
 0x566   :  { %v18237_v2 = vsel %vm5072_vm8, %v4928_v40, 0.0  ;;  %v22025_v40 = vrot.slane %v18207_v48, 1  ;;  %v3737_v20 = vmul.f32 %v13362_v4, %v3673_v32  ;;  %v6917_v54 = vmul.f32 %v6853_v25, %v18156_v7 }
 0x567   :  { %v5282_v61 = vmul.f32 %v15360_v21, %v18237_v2  ;;  %v5412_v23 = vmul.f32 %v15430_v56, %v18237_v2  ;;  %v18249_v50 = vadd.f32 %v5283_v24, %v5215_v57  ;;  %v5477_v35 = vadd.f32 %v5413_v60, %v18132_v17 }
 0x568   :  { %v5995_v8 = vsel %vm5874_vm2, %v22026_v49, %v22025_v40  ;;  %v5674_v10 = vmul.f32 %v15341_v30, %v18079_v43  ;;  %v5673_v57 = vmul.f32 %v15341_v30, %v18091_v5  ;;  %v6790_v24 = vmax.f32 %v6726_v52, 0.0 }
 0x569   :  { %v18256_v33 = vadd.f32 %v5282_v61, %v5214_v41  ;;  %v5476_v27 = vadd.f32 %v5412_v23, %v18140_v42  ;;  %v18260_v53 = vsel %vm6139_vm9, %v5995_v8, 0.0  ;;  %v5606_v32 = vadd.f32 %v5542_v11, %v5477_v35 }
 0x56a   :  { %v6543_v49 = vmul.f32 %v15437_v37, %v18260_v53  ;;  %v3672_v41 = vmin.f32 %v3608_v26, 6.0  ;;  %v3871_v42 = vadd.s32 528, %v21850_v55  ;;  %v5805_v17 = vmul.f32 %v15423_v9, %v18184_v34 }
 0x56b   :  { %v5605_v4 = vadd.f32 %v5541_v29, %v5476_v27  ;;  %v3870_v7 = vadd.s32 520, %v21850_v55  ;;  %v5738_v23 = vadd.f32 %v5674_v10, %v5606_v32  ;;  %v5804_v60 = vmul.f32 %v15423_v9, %v18207_v48  ;;  %v22030_v32 = vld [vmem:[#allocation52_spill] sm:$0xff] }
 0x56c   :  { %v18272_v61 = vadd.f32 %v6543_v49, %v6475_v51  ;;  %v18277_v40 = vmul.f32 0.16666667, %v3737_v20  ;;  %v18279_v27 = vmul.f32 0.16666667, %v6917_v54  ;;  %v18283_v29 = vadd.f32 %v16049_v45, %v17605_v28 }
 0x56d   :  { %v5737_v25 = vadd.f32 %v5673_v57, %v5605_v4  ;;  %v6281_v35 = vmul.f32 %v15373_v62, %v18147_v6  ;;  %v6280_v51 = vmul.f32 %v15373_v62, %v18038_v39  ;;  %v5867_v11 = vadd.f32 %v5805_v17, %v5738_v23 }
 0x56e   :  { %22027 = vst [vmem:[#allocation124_spill] sm:$0xff] %v18272_v61  ;;  %22028 = vst [vmem:[#allocation125_spill] sm:$0xff] %v18279_v27  ;;  %v3736_v26 = vmul.f32 %v18190_v1, %v3672_v41  ;;  %v4343_v8 = vand.u32 15, %v3871_v42  ;;  %v6854_v10 = vmin.f32 %v6790_v24, 6.0  ;;  %v6412_v20 = vmul.f32 %v15376_v44, %v18145_v12  ;;  %v22031_v42 = vld [vmem:[#allocation58_spill] sm:$0xff] }
 0x56f   :  { %22029 = vst [vmem:[#allocation128_spill] sm:$0xff] %v18283_v29  ;;  %v5866_v52 = vadd.f32 %v5804_v60, %v5737_v25  ;;  %v6413_v54 = vmul.f32 %v15376_v44, %v18260_v53  ;;  %v4336_v28 = vand.u32 15, %v3870_v7  ;;  %v6345_v49 = vadd.f32 %v6281_v35, %v5867_v11 }
 0x570   :  { %v20920_v6 = vrot.slane %v18277_v40, 7  ;;  %v18295_v4 = vmul.f32 0.16666667, %v3736_v26  ;;  %v18298_v39 = vadd.f32 3.0, %v18283_v29  ;;  %v20919_v1 = vrot.slane %v18277_v40, 1 }
 0x571   :  { %v6344_v57 = vadd.f32 %v6280_v51, %v5866_v52  ;;  %v13364_v41 = vadd.f32 %v22030_v32, %v15304_v31  ;;  %v13365_v24 = vadd.f32 %v22031_v42, %v15304_v31  ;;  %v6477_v7 = vadd.f32 %v6413_v54, %v6345_v49 }
 0x572   :  { %v4931_v25 = vrot.slane %v18295_v4, 7  ;;  %vm5074_vm10 = vcmp.ne.s32.totalorder %v4343_v8, 0  ;;  %v18309_v23 = vmul.f32 %v6854_v10, %v18194_v18  ;;  %v18313_v60 = vadd.f32 %v16049_v45, %v17641_v16 }
 0x573   :  { %v18305_v17 = vadd.f32 %v6412_v20, %v6344_v57  ;;  %v5996_v35 = vrot.slane %v18184_v34, 1  ;;  %v5998_v51 = vrot.slane %v18295_v4, 1  ;;  %v22033_v52 = vrot.slane %v18184_v34, 7 }
 0x574   :  { %22032 = vst [vmem:[#allocation105_spill] sm:$0xff] %v18313_v60  ;;  %v18323_v11 = vsel %vm4808_vm1, %v4931_v25, %v20920_v6  ;;  %vm6141_vm11 = vcmp.ne.s32.totalorder %v4336_v28, 15  ;;  %v3547_v18 = vadd.f32 3.0, %v13364_v41  ;;  %v3546_v10 = vadd.f32 3.0, %v13365_v24 }
 0x575   :  { %v4932_v31 = vsel %vm4808_vm1, %v22033_v52, %v4931_v25  ;;  %v5415_v16 = vmul.f32 %v15430_v56, %v18323_v11  ;;  %v5999_v54 = vsel %vm5874_vm2, %v5996_v35, %v5998_v51  ;;  %v18333_v57 = vsel %vm5874_vm2, %v5998_v51, %v20919_v1 }
 0x576   :  { %v5146_v8 = vsel %vm5074_vm10, %v4932_v31, 0.0  ;;  %v3611_v49 = vmax.f32 %v3547_v18, 0.0  ;;  %v18336_v28 = vadd.f32 3.0, %v18313_v60  ;;  %v5544_v32 = vmul.f32 %v21862_v38, %v18079_v43 }
 0x577   :  { %v5414_v20 = vmul.f32 %v15430_v56, %v5146_v8  ;;  %v5479_v42 = vadd.f32 %v5415_v16, %v18249_v50  ;;  %v18341_v25 = vsel %vm6141_vm11, %v5999_v54, 0.0  ;;  %v5543_v52 = vmul.f32 %v21862_v38, %v18091_v5 }
 0x578   :  { %v5676_v31 = vmul.f32 %v15341_v30, %v18184_v34  ;;  %v6545_v18 = vmul.f32 %v15437_v37, %v18341_v25  ;;  %v5675_v26 = vmul.f32 %v15341_v30, %v18207_v48  ;;  %v3675_v43 = vmin.f32 %v3611_v49, 6.0 }
 0x579   :  { %v5478_v51 = vadd.f32 %v5414_v20, %v18256_v33  ;;  %v5608_v1 = vadd.f32 %v5544_v32, %v5479_v42  ;;  %v3610_v6 = vmax.f32 %v3546_v10, 0.0  ;;  %v5285_v50 = vmul.f32 %v15360_v21, %v18323_v11 }
 0x57a   :  { %v18354_v54 = vadd.f32 %v6545_v18, %v6477_v7  ;;  %v3873_v5 = vadd.s32 544, %v21850_v55  ;;  %v3739_v19 = vmul.f32 %v13364_v41, %v3675_v43  ;;  %v3872_v20 = vadd.s32 536, %v21850_v55 }
 0x57b   :  { %v5607_v16 = vadd.f32 %v5543_v52, %v5478_v51  ;;  %v5740_v61 = vadd.f32 %v5676_v31, %v5608_v1  ;;  %v3674_v33 = vmin.f32 %v3610_v6, 6.0  ;;  %v18360_v60 = vadd.f32 %v16049_v45, %v22035_v13  ;;  %v22037_v51 = vld [vmem:[#allocation26_spill] sm:$0xff] }
 0x57c   :  { %22034 = vst [vmem:[#allocation114_spill] sm:$0xff] %v18354_v54  ;;  %v5217_v10 = vmul.f32 %v15355_v15, %v18233_v59  ;;  %v5806_v32 = vmul.f32 %v15423_v9, %v18295_v4  ;;  %v6282_v7 = vmul.f32 %v15373_v62, %v18145_v12  ;;  %v18368_v42 = vmul.f32 0.16666667, %v3739_v19 }
 0x57d   :  { %22036 = vst [vmem:[#allocation121_spill] sm:$0xff] %v18360_v60  ;;  %v5739_v49 = vadd.f32 %v5675_v26, %v5607_v16  ;;  %v3738_v1 = vmul.f32 %v13365_v24, %v3674_v33  ;;  %v5284_v6 = vmul.f32 %v15360_v21, %v5146_v8  ;;  %v4357_v52 = vand.u32 15, %v3873_v5 }
 0x57e   :  { %v5216_v13 = vmul.f32 %v15355_v15, %v18237_v2  ;;  %v5349_v31 = vadd.f32 %v5285_v50, %v5217_v10  ;;  %v18375_v59 = vadd.f32 %v16049_v45, %v22037_v51  ;;  %v5546_v26 = vmul.f32 %v21862_v38, %v18184_v34 }
 0x57f   :  { %v5868_v41 = vadd.f32 %v5806_v32, %v5739_v49  ;;  %v5807_v12 = vmul.f32 %v15423_v9, %v18277_v40  ;;  %v4350_v19 = vand.u32 15, %v3872_v20  ;;  %v20923_v18 = vrot.slane %v18368_v42, 7 }
 0x580   :  { %22038 = vst [vmem:[#allocation126_spill] sm:$0xff] %v18375_v59  ;;  %v18382_v43 = vmul.f32 0.16666667, %v3738_v1  ;;  %v5348_v16 = vadd.f32 %v5284_v6, %v5216_v13  ;;  %v5545_v2 = vmul.f32 %v21862_v38, %v18207_v48  ;;  %v6283_v50 = vmul.f32 %v15373_v62, %v18260_v53 }
 0x581   :  { %v6346_v24 = vadd.f32 %v6282_v7, %v5868_v41  ;;  %v5869_v5 = vadd.f32 %v5807_v12, %v5740_v61  ;;  %v22039_v33 = vrot.slane %v18207_v48, 1  ;;  %v5678_v20 = vmul.f32 %v15341_v30, %v18277_v40 }
 0x582   :  { %v20922_v10 = vrot.slane %v18368_v42, 1  ;;  %v4935_v49 = vrot.slane %v18382_v43, 7  ;;  %vm5076_vm13 = vcmp.ne.s32.totalorder %v4357_v52, 0  ;;  %v5218_v32 = vmul.f32 %v15355_v15, %v5146_v8 }
 0x583   :  { %v5997_v34 = vsel %vm5874_vm2, %v22039_v33, %v5996_v35  ;;  %v6002_v7 = vrot.slane %v18382_v43, 1  ;;  %vm6143_vm14 = vcmp.ne.s32.totalorder %v4350_v19, 15  ;;  %v6347_v1 = vadd.f32 %v6283_v50, %v5869_v5 }
 0x584   :  { %v22040_v53 = vrot.slane %v18277_v40, 7  ;;  %v4938_v61 = vsel %vm4808_vm1, %v4935_v49, %v20923_v18  ;;  %v5219_v35 = vmul.f32 %v15355_v15, %v18323_v11  ;;  %v6414_v6 = vmul.f32 %v15376_v44, %v5997_v34 }
 0x585   :  { %v5287_v8 = vmul.f32 %v15360_v21, %v4938_v61  ;;  %v5417_v52 = vmul.f32 %v15430_v56, %v4938_v61  ;;  %v22041_v13 = vrot.slane %v18277_v40, 1  ;;  %v18416_v50 = vsel %vm5874_vm2, %v6002_v7, %v20922_v10 }
 0x586   :  { %v4936_v48 = vsel %vm4808_vm1, %v22040_v53, %v4935_v49  ;;  %v6415_v5 = vmul.f32 %v15376_v44, %v18341_v25  ;;  %v6546_v33 = vmul.f32 %v15437_v37, %v18333_v57  ;;  %v5677_v10 = vmul.f32 %v15341_v30, %v18295_v4 }
 0x587   :  { %v5148_v41 = vsel %vm5076_vm13, %v4936_v48, 0.0  ;;  %v6003_v51 = vsel %vm5874_vm2, %v22041_v13, %v6002_v7  ;;  %v18424_v49 = vadd.f32 %v5287_v8, %v5219_v35  ;;  %v5481_v53 = vadd.f32 %v5417_v52, %v5349_v31  ;;  %v30_v7 = vld [vmem:[%s20530_s1 + $0x20] sm:$0xff]  ;;  %v33_v52 = vld [vmem:[%s20530_s1 + $0x38] sm:$0xff] }
 0x588   :  { %v5286_v12 = vmul.f32 %v15360_v21, %v5148_v41  ;;  %v5416_v19 = vmul.f32 %v15430_v56, %v5148_v41  ;;  %v18418_v11 = vsel %vm6143_vm14, %v6003_v51, 0.0  ;;  %v6478_v41 = vadd.f32 %v6414_v6, %v6346_v24  ;;  %v31_v51 = vld [vmem:[%s20530_s1 + $0x28] sm:$0xff]  ;;  %v32_v6 = vld [vmem:[%s20530_s1 + $0x30] sm:$0xff] }
 0x589   :  { %v6544_v13 = vmul.f32 %v15437_v37, %v5997_v34  ;;  %v5610_v35 = vadd.f32 %v5546_v26, %v5481_v53  ;;  %v6479_v8 = vadd.f32 %v6415_v5, %v6347_v1  ;;  %v6547_v31 = vmul.f32 %v15437_v37, %v18418_v11 }
 0x58a   :  { %v18426_v48 = vadd.f32 %v5286_v12, %v5218_v32  ;;  %v5480_v61 = vadd.f32 %v5416_v19, %v5348_v16  ;;  %v18442_v32 = vadd.f32 %v6546_v33, %v6478_v41  ;;  %v5809_v26 = vmul.f32 %v15423_v9, %v18368_v42 }
 0x58b   :  { %v18440_v24 = vadd.f32 %v6544_v13, %v18305_v17  ;;  %v5742_v1 = vadd.f32 %v5678_v20, %v5610_v35  ;;  %v18452_v12 = vadd.f32 %v6547_v31, %v6479_v8  ;;  %v13175_v17 = vpack.c.bf16 %v31_v51, %v30_v7  ;;  %v35_v8 = vld [vmem:[%s20530_s1 + $0x48] sm:$0xff] }
 0x58c   :  { %v5609_v16 = vadd.f32 %v5545_v2, %v5480_v61  ;;  %22043 = vst [vmem:[#allocation48_spill] sm:$0xff] %v18442_v32  ;;  %v20926_v2 = vmov 0.0|0.0   ;;  %v22045_v5 = vmax.f32 %v18298_v39, 0.0  ;;  %v5808_v61 = vmul.f32 %v15423_v9, %v18382_v43 }
 0x58d   :  { %22042 = vst [vmem:[#allocation132_spill] sm:$0xff] %v18440_v24  ;;  %22044 = vst [vmem:[#allocation27_spill] sm:$0xff] %v18452_v12  ;;  %13174 = vmatprep.subr.bf16.mxu1 %v20926_v2  ;;  %v18463_v41 = vadd.f32 3.0, %v18360_v60  ;;  %v6285_v20 = vmul.f32 %v15373_v62, %v18341_v25  ;;  %v5871_v13 = vadd.f32 %v5809_v26, %v5742_v1  ;;  %v18468_v7 = vadd.f32 3.0, %v18375_v59  ;;  %v22063_v12 = vld [vmem:[#allocation11_spill] sm:$0xff]  ;;  %v22064_v59 = vld [vmem:[#allocation30_spill] sm:$0xff] }
 0x58e   :  { %v18458_v33 = vmin.f32 %v22045_v5, 6.0  ;;  %v5741_v53 = vadd.f32 %v5677_v10, %v5609_v16  ;;  %13176 = vmatpush3.bf16.msra.mxu1 %v13175_v17  ;;  %v13178_v35 = vpack.c.bf16 %v33_v52, %v32_v6  ;;  %v6284_v39 = vmul.f32 %v15373_v62, %v5997_v34  ;;  %v34_v10 = vld [vmem:[%s20530_s1 + $0x40] sm:$0xff] }
 0x58f   :  { %13177 = vmatprep.subr.bf16.mxu1 %v20926_v2  ;;  %v3807_v25 = vadd.s32 16, %v21850_v55  ;;  %v18481_v31 = vadd.f32 %v16049_v45, %v17848_v0  ;;  %v6349_v16 = vadd.f32 %v6285_v20, %v5871_v13  ;;  %v6417_v34 = vmul.f32 %v15376_v44, %v18418_v11 }
 0x590   :  { %22046 = vst [vmem:[#allocation54_spill] sm:$0xff] %v18458_v33  ;;  %v5870_v51 = vadd.f32 %v5808_v61, %v5741_v53  ;;  %v3841_v6 = vadd.s32 288, %v21850_v55  ;;  %v18488_v52 = vadd.f32 %v16049_v45, %v17877_v36  ;;  %v6416_v1 = vmul.f32 %v15376_v44, %v18333_v57  ;;  %v36_v36 = vld [vmem:[%s20530_s1 + $0x50] sm:$0xff] }
 0x591   :  { %22047 = vst [vmem:[#allocation52_spill] sm:$0xff] %v18481_v31  ;;  %v3843_v17 = vadd.s32 304, %v21850_v55  ;;  %v18494_v0 = vadd.f32 %v6417_v34, %v6349_v16  ;;  %v13181_v53 = vpack.c.bf16 %v35_v8, %v34_v10  ;;  %v3881_v61 = vand.u32 15, %v21850_v55 }
 0x592   :  { %22048 = vst [vmem:[#allocation58_spill] sm:$0xff] %v18488_v52  ;;  %v6348_v26 = vadd.f32 %v6284_v39, %v5870_v51  ;;  %13179 = vmatpush3.bf16.msra.mxu1 %v13178_v35  ;;  %v6548_v13 = vmul.f32 %v15437_v37, %v18416_v50  ;;  %v37_v51 = vld [vmem:[%s20530_s1 + $0x58] sm:$0xff]  ;;  %v3895_v39 = vand.u32 15, %v3807_v25  ;;  %v4133_v16 = vand.u32 15, %v3841_v6 }
 0x593   :  { %13180 = vmatprep.subr.bf16.mxu1 %v20926_v2  ;;  %v18508_v10 = vadd.f32 3.0, %v18481_v31  ;;  %v4147_v8 = vand.u32 15, %v3843_v17  ;;  %v18511_v34 = vadd.f32 3.0, %v18488_v52  ;;  %vm18518_vm15 = vcmp.ne.s32.totalorder %v3881_v61, 0 }
 0x594   :  { %v6480_v20 = vadd.f32 %v6416_v1, %v6348_v26  ;;  %v20924_v1 = vmov 0.0   ;;  %v13184_v25 = vpack.c.bf16 %v37_v51, %v36_v36  ;;  %vm5010_vm3 = vcmp.ne.s32.totalorder %v3895_v39, 0 }
 0x595   :  { %22049 = vst [vmem:[#allocation117_spill] sm:$0xff] %v18508_v10  ;;  %22050 = vst [vmem:[#allocation26_spill] sm:$0xff] %v18511_v34  ;;  %v18516_v5 = vrot.slane %v20924_v1, 7  ;;  %vm18522_vm4 = vcmp.ne.s32.totalorder %v4133_v16, 0  ;;  %vm5046_vm5 = vcmp.ne.s32.totalorder %v4147_v8, 0  ;;  %v18528_v17 = vadd.f32 %v16049_v45, %v17948_v47 }
 0x596   :  { %v18513_v26 = vadd.f32 %v6548_v13, %v6480_v20  ;;  %13182 = vmatpush3.bf16.msra.mxu1 %v13181_v53  ;;  %v18532_v20 = vmul.f32 %v21862_v38, %v18277_v40  ;;  %v18536_v61 = vmul.f32 %v21862_v38, %v18295_v4  ;;  %v22056_v53 = vld [vmem:[#allocation10_spill] sm:$0xff]  ;;  %v18545_v51 = vmul.f32 %v15341_v30, %v18368_v42  ;;  %v22058_v40 = vld [vmem:[#allocation61_spill] sm:$0xff] }
 0x597   :  { %13183 = vmatprep.subr.bf16.mxu1 %v20926_v2  ;;  %v22057_v13 = vrot.slane %v22056_v53, 7  ;;  %v18549_v47 = vmul.f32 %v15341_v30, %v18382_v43  ;;  %v22059_v39 = vrot.slane %v22058_v40, 7  ;;  %v5080_v16 = vsel %vm18518_vm15, %v18516_v5, 0.0 }
 0x598   :  { %22051 = vst [vmem:[#allocation136_spill] sm:$0xff] %v18513_v26  ;;  %v3806_v8 = vadd.s32 8, %v21850_v55  ;;  %v5116_v35 = vsel %vm18522_vm4, %v18516_v5, 0.0  ;;  %v5156_v30 = vmul.f32 %v15355_v15, %v5080_v16  ;;  %v5157_v43 = vmul.f32 %v15355_v15, %v18516_v5  ;;  %v22062_v16 = vld [vmem:[#allocation84_spill] sm:$0xff] }
 0x599   :  { %v4811_v36 = vsel %vm4808_vm1, %v18516_v5, %v22057_v13  ;;  %v4876_v4 = vsel %vm4808_vm1, %v18516_v5, %v22059_v39  ;;  %v5188_v1 = vmul.f32 %v15355_v15, %v5116_v35  ;;  %v3842_v19 = vadd.s32 296, %v21850_v55 }
 0x59a   :  { %v5082_v13 = vsel %vm5010_vm3, %v4811_v36, 0.0  ;;  %v5118_v18 = vsel %vm5046_vm5, %v4876_v4, 0.0  ;;  %13185 = vmatpush3.bf16.msra.mxu1 %v13184_v25  ;;  %v22060_v26 = vmov 0.0|0.0   ;;  %v22061_v25 = vld [vmem:[#allocation68_spill] sm:$0xff]  ;;  %v5321_v24 = vadd.f32 %v22063_v12, %v5157_v43 }
 0x59b   :  { %v5158_v39 = vmul.f32 %v15355_v15, %v5082_v13  ;;  %v5190_v2 = vmul.f32 %v15355_v15, %v5118_v18  ;;  %v5224_v36 = vmul.f32 %v15360_v21, %v5082_v13  ;;  %v5256_v6 = vmul.f32 %v15360_v21, %v5118_v18  ;;  %13186 = vmatprep.subr.bf16.mxu1 %v22060_v26  ;;  %v22065_v15 = vld [vmem:[#allocation78_spill] sm:$0xff]  ;;  %v22066_v13 = vld [vmem:[#allocation127_spill] sm:$0xff]  ;;  %v22067_v21 = vld [vmem:[#allocation25_spill] sm:$0xff] }
 0x59c   :  { %v5289_v4 = vadd.f32 %v22061_v25, %v5157_v43  ;;  %v5488_v54 = vmul.f32 0.0, %v21862_v38  ;;  %v3888_v52 = vand.u32 15, %v3806_v8  ;;  %v5453_v18 = vadd.f32 %v22067_v21, %v5321_v24  ;;  %v22070_v12 = vld [vmem:[#allocation32_spill] sm:$0xff]  ;;  %v22071_v38 = vld [vmem:[#allocation39_spill] sm:$0xff] }
 0x59d   :  { %v5290_v32 = vadd.f32 %v22062_v16, %v5158_v39  ;;  %v5288_v35 = vadd.f32 %v5224_v36, %v5156_v30  ;;  %v5320_v31 = vadd.f32 %v5256_v6, %v5188_v1  ;;  %v5322_v60 = vadd.f32 %v22064_v59, %v5190_v2  ;;  %v22069_v39 = vld [vmem:[#allocation86_spill] sm:$0xff]  ;;  %v22072_v1 = vld [vmem:[#allocation36_spill] sm:$0xff] }
 0x59e   :  { %v5421_v27 = vadd.f32 %v22065_v15, %v5289_v4  ;;  %v22068_v26 = vmov 0.0   ;;  %v4140_v25 = vand.u32 15, %v3842_v19  ;;  %v22073_v30 = vrot.slane %v22072_v1, 7  ;;  %v22075_v15 = vld [vmem:[#allocation110_spill] sm:$0xff]  ;;  %v22078_v21 = vld [vmem:[#allocation80_spill] sm:$0xff] }
 0x59f   :  { %v5422_v46 = vadd.f32 %v22066_v13, %v5290_v32  ;;  %v18581_v22 = vrot.slane %v22068_v26, 1  ;;  %v5420_v16 = vadd.f32 %v22069_v39, %v5288_v35  ;;  %v5452_v43 = vadd.f32 %v22070_v12, %v5320_v31  ;;  %v22074_v32 = vld [vmem:[#allocation63_spill] sm:$0xff]  ;;  %v22079_v12 = vld [vmem:[#allocation102_spill] sm:$0xff] }
 0x5a0   :  { %v5454_v8 = vadd.f32 %v22071_v38, %v5322_v60  ;;  %v18590_v59 = vsel %vm4808_vm1, %v22073_v30, %v18516_v5  ;;  %v5550_v2 = vadd.f32 %v5488_v54, %v5421_v27  ;;  %v5582_v24 = vadd.f32 %v5488_v54, %v5453_v18  ;;  %v22077_v60 = vld [vmem:[#allocation59_spill] sm:$0xff]  ;;  %v22081_v18 = vld [vmem:[#allocation64_spill] sm:$0xff] }
 0x5a1   :  { %v5551_v36 = vadd.f32 %v22074_v32, %v5422_v46  ;;  %v5549_v6 = vadd.f32 %v5488_v54, %v5420_v16  ;;  %v5581_v4 = vadd.f32 %v5488_v54, %v5452_v43  ;;  %v22076_v35 = vrot.slane %v22056_v53, 1  ;;  %v22082_v16 = vld [vmem:[#allocation122_spill] sm:$0xff]  ;;  %v22084_v30 = vld [vmem:[#allocation76_spill] sm:$0xff] }
 0x5a2   :  { %v5583_v19 = vadd.f32 %v22075_v15, %v5454_v8  ;;  %v5682_v13 = vadd.f32 %v22077_v60, %v5550_v2  ;;  %v5714_v38 = vadd.f32 %v22079_v12, %v5582_v24  ;;  %v22080_v27 = vrot.slane %v22058_v40, 1  ;;  %v22083_v8 = vld [vmem:[#allocation20_spill] sm:$0xff]  ;;  %v22085_v15 = vld [vmem:[#allocation101_spill] sm:$0xff]  ;;  %v22087_v24 = vld [vmem:[#allocation82_spill] sm:$0xff] }
 0x5a3   :  { %v5878_v31 = vsel %vm5874_vm2, %v18581_v22, %v22076_v35  ;;  %v5683_v39 = vadd.f32 %v22078_v21, %v5551_v36  ;;  %v5681_v54 = vadd.f32 %v22081_v18, %v5549_v6  ;;  %v5713_v43 = vadd.f32 %v22082_v16, %v5581_v4  ;;  %v22086_v35 = vld [vmem:[#allocation129_spill] sm:$0xff]  ;;  %v22088_v40 = vld [vmem:[#allocation24_spill] sm:$0xff] }
 0x5a4   :  { %v5943_v46 = vsel %vm5874_vm2, %v18581_v22, %v22080_v27  ;;  %v5715_v53 = vadd.f32 %v22083_v8, %v5583_v19  ;;  %vm6077_vm6 = vcmp.ne.s32.totalorder %v3888_v52, 15  ;;  %v5811_v32 = vadd.f32 %v22084_v30, %v5682_v13  ;;  %v22089_v12 = vld [vmem:[#allocation57_spill] sm:$0xff]  ;;  %v22090_v19 = vld [vmem:[#allocation70_spill] sm:$0xff]  ;;  %v22092_v18 = vld [vmem:[#allocation112_spill] sm:$0xff] }
 0x5a5   :  { %v5812_v2 = vadd.f32 %v22085_v15, %v5683_v39  ;;  %v5843_v36 = vadd.f32 %v22086_v35, %v5714_v38  ;;  %vm6113_vm7 = vcmp.ne.s32.totalorder %v4140_v25, 15  ;;  %v5810_v60 = vadd.f32 %v22087_v24, %v5681_v54  ;;  %v22095_v35 = vld [vmem:[#allocation73_spill] sm:$0xff] }
 0x5a6   :  { %v5842_v21 = vadd.f32 %v22088_v40, %v5713_v43  ;;  %v5844_v27 = vadd.f32 %v22089_v12, %v5715_v53  ;;  %v6149_v34 = vsel %vm6077_vm6, %v5878_v31, 0.0  ;;  %v6185_v6 = vsel %vm6113_vm7, %v5943_v46, 0.0  ;;  %v22093_v43 = vld [vmem:[#allocation96_spill] sm:$0xff]  ;;  %v22094_v53 = vld [vmem:[#allocation38_spill] sm:$0xff]  ;;  %v22096_v40 = vld [vmem:[#allocation95_spill] sm:$0xff] }
 0x5a7   :  { %v6224_v4 = vmul.f32 %v15373_v62, %v18581_v22  ;;  %v6225_v52 = vmul.f32 %v15373_v62, %v6149_v34  ;;  %v6290_v13 = vadd.f32 %v22090_v19, %v5812_v2  ;;  %v22091_v39 = vrot.slane %v18368_v42, 7  ;;  %v22098_v12 = vld [vmem:[#allocation79_spill] sm:$0xff] }
 0x5a8   :  { %v6257_v38 = vmul.f32 %v15373_v62, %v6185_v6  ;;  %v6322_v54 = vadd.f32 %v22092_v18, %v5844_v27  ;;  %vm14198_vm8 = vmmov 0   ;;  %v18631_v15 = vadd.s32 264, %v21850_v55  ;;  %v22099_v6 = vld [vmem:[#allocation51_spill] sm:$0xff] }
 0x5a9   :  { %v18622_v25 = vsel %vm4808_vm1, %v22091_v39, %v18516_v5  ;;  %v6288_v16 = vadd.f32 %v6224_v4, %v5810_v60  ;;  %v6289_v31 = vadd.f32 %v6225_v52, %v5811_v32  ;;  %v6320_v46 = vadd.f32 %v6224_v4, %v5842_v21  ;;  %12456 = vmatprep.mubr.msk.f32.mxu1 %vm14198_vm8, %v22068_v26  ;;  %v22097_v32 = vld [vmem:[#allocation16_spill] sm:$0xff] }
 0x5aa   :  { %v6422_v8 = vadd.f32 %v22093_v43, %v6290_v13  ;;  %v6321_v34 = vadd.f32 %v6257_v38, %v5843_v36  ;;  %v6454_v30 = vadd.f32 %v22094_v53, %v6322_v54  ;;  %v3839_v2 = vadd.s32 272, %v21850_v55  ;;  %v22100_v13 = vld [vmem:[#allocation99_spill] sm:$0xff] }
 0x5ab   :  { %v6420_v24 = vadd.f32 %v22095_v35, %v6288_v16  ;;  %v6421_v60 = vadd.f32 %v22096_v40, %v6289_v31  ;;  %v6452_v21 = vadd.f32 %v22097_v32, %v6320_v46  ;;  %v18641_v36 = vadd.s32 280, %v21850_v55  ;;  %v22101_v38 = vld [vmem:[#allocation131_spill] sm:$0xff]  ;;  %v22103_v46 = vld [vmem:[#allocation56_spill] sm:$0xff] }
 0x5ac   :  { %v6554_v27 = vadd.f32 %v22098_v12, %v6422_v8  ;;  %v6453_v4 = vadd.f32 %v22099_v6, %v6321_v34  ;;  %v6586_v52 = vadd.f32 %v18083_v14, %v6454_v30  ;;  %v18644_v19 = vadd.s32 552, %v21850_v55  ;;  %v22102_v54 = vld [vmem:[#allocation47_spill] sm:$0xff] }
 0x5ad   :  { %v6552_v39 = vadd.f32 %v22100_v13, %v6420_v24  ;;  %v6553_v18 = vadd.f32 %v22101_v38, %v6421_v60  ;;  %v6584_v16 = vadd.f32 %v22102_v54, %v6452_v21  ;;  %v3875_v14 = vadd.s32 560, %v21850_v55 }
 0x5ae   :  { %v6622_v31 = vadd.f32 %v16049_v45, %v6554_v27  ;;  %v6585_v43 = vadd.f32 %v22103_v46, %v6453_v4  ;;  %v6654_v8 = vadd.f32 %v16049_v45, %v6586_v52  ;;  %v18654_v34 = vadd.s32 568, %v21850_v55 }
 0x5af   :  { %v6620_v53 = vadd.f32 %v16049_v45, %v6552_v39  ;;  %v6621_v30 = vadd.f32 %v16049_v45, %v6553_v18  ;;  %v6652_v35 = vadd.f32 %v16049_v45, %v6584_v16  ;;  %v4119_v21 = vand.u32 15, %v3839_v2 }
 0x5b0   :  { %v6686_v24 = vadd.f32 3.0, %v6622_v31  ;;  %v6653_v40 = vadd.f32 %v16049_v45, %v6585_v43  ;;  %v6718_v60 = vadd.f32 3.0, %v6654_v8  ;;  %v4126_v38 = vand.u32 15, %v18641_v36 }
 0x5b1   :  { %v6684_v12 = vadd.f32 3.0, %v6620_v53  ;;  %v6685_v27 = vadd.f32 3.0, %v6621_v30  ;;  %v6716_v6 = vadd.f32 3.0, %v6652_v35  ;;  %v4371_v39 = vand.u32 15, %v3875_v14 }
 0x5b2   :  { %v6750_v4 = vmax.f32 %v6686_v24, 0.0  ;;  %v6717_v52 = vadd.f32 3.0, %v6653_v40  ;;  %v6782_v13 = vmax.f32 %v6718_v60, 0.0  ;;  %v4364_v43 = vand.u32 15, %v18644_v19 }
 0x5b3   :  { %v6748_v54 = vmax.f32 %v6684_v12, 0.0  ;;  %v6749_v18 = vmax.f32 %v6685_v27, 0.0  ;;  %v6780_v46 = vmax.f32 %v6716_v6, 0.0  ;;  %vm18663_vm1 = vcmp.ne.s32.totalorder %v4119_v21, 0 }
 0x5b4   :  { %v6814_v16 = vmin.f32 %v6750_v4, 6.0  ;;  %v6781_v55 = vmax.f32 %v6717_v52, 0.0  ;;  %v6846_v26 = vmin.f32 %v6782_v13, 6.0  ;;  %vm18667_vm9 = vcmp.ne.s32.totalorder %v4371_v39, 0 }
 0x5b5   :  { %v6812_v2 = vmin.f32 %v6748_v54, 6.0  ;;  %v6813_v10 = vmin.f32 %v6749_v18, 6.0  ;;  %v6844_v24 = vmin.f32 %v6780_v46, 6.0  ;;  %v5114_v12 = vsel %vm18663_vm1, %v18590_v59, 0.0  ;;  %v22109_v54 = vld [vmem:[#allocation45_spill] sm:$0xff] }
 0x5b6   :  { %v6878_v33 = vmul.f32 %v6814_v16, %v6622_v31  ;;  %v6845_v60 = vmin.f32 %v6781_v55, 6.0  ;;  %v6910_v29 = vmul.f32 %v6846_v26, %v6654_v8  ;;  %v5150_v55 = vsel %vm18667_vm9, %v18622_v25, 0.0 }
 0x5b7   :  { %v6876_v27 = vmul.f32 %v6812_v2, %v6620_v53  ;;  %v6877_v19 = vmul.f32 %v6813_v10, %v6621_v30  ;;  %v6908_v21 = vmul.f32 %v6844_v24, %v6652_v35  ;;  %v5386_v26 = vmul.f32 %v15430_v56, %v5114_v12  ;;  %v22110_v2 = vld [vmem:[#allocation33_spill] sm:$0xff] }
 0x5b8   :  { %v18674_v6 = vmul.f32 0.16666667, %v6878_v33  ;;  %v6909_v4 = vmul.f32 %v6845_v60, %v6653_v40  ;;  %v18676_v52 = vmul.f32 0.16666667, %v6910_v29  ;;  %v5387_v10 = vmul.f32 %v15430_v56, %v18516_v5  ;;  %v22108_v5 = vld [vmem:[#allocation49_spill] sm:$0xff] }
 0x5b9   :  { %v18682_v31 = vmul.f32 0.16666667, %v6876_v27  ;;  %v18684_v8 = vmul.f32 0.16666667, %v6877_v19  ;;  %v18686_v32 = vmul.f32 0.16666667, %v6908_v21  ;;  %v5418_v25 = vmul.f32 %v15430_v56, %v5150_v55 }
 0x5ba   :  { %v18690_v33 = vmul.f32 0.16666667, %v6909_v4  ;;  %v7008_v29 = vsel %vm7004_vm12, %v18674_v6, 0.0  ;;  %v7077_v59 = vsel %vm7004_vm12, %v18676_v52, 0.0  ;;  %v5450_v40 = vadd.f32 %v5386_v26, %v22108_v5  ;;  %v22111_v27 = vld [vmem:[#allocation42_spill] sm:$0xff] }
 0x5bb   :  { %v7005_v53 = vsel %vm7004_vm12, %v18682_v31, 0.0  ;;  %v7006_v30 = vsel %vm7004_vm12, %v18684_v8, 0.0  ;;  %v7074_v35 = vsel %vm7004_vm12, %v18686_v32, 0.0  ;;  %v5451_v18 = vadd.f32 %v5387_v10, %v22109_v54  ;;  %v22112_v26 = vld [vmem:[#allocation66_spill] sm:$0xff] }
 0x5bc   :  { %v7007_v13 = vadd.f32 %v7006_v30, %v7005_v53  ;;  %v7075_v39 = vsel %vm7004_vm12, %v18690_v33, 0.0  ;;  %v5482_v46 = vadd.f32 %v5418_v25, %v18426_v48  ;;  %v5483_v16 = vadd.f32 %v5387_v10, %v18424_v49  ;;  %v22114_v10 = vld [vmem:[#allocation134_spill] sm:$0xff] }
 0x5bd   :  { %v7076_v56 = vadd.f32 %v7075_v39, %v7074_v35  ;;  %v5579_v24 = vadd.f32 %v22110_v2, %v5450_v40  ;;  %v5779_v60 = vmul.f32 0.0, %v15423_v9  ;;  %v4378_v12 = vand.u32 15, %v18654_v34  ;;  %v22115_v9 = vld [vmem:[#allocation90_spill] sm:$0xff]  ;;  %v22122_v39 = vld [vmem:[#allocation135_spill] sm:$0xff] }
 0x5be   :  { %v7009_v14 = vadd.f32 %v7008_v29, %v7007_v13  ;;  %v5580_v19 = vadd.f32 %v22111_v27, %v5451_v18  ;;  %v5611_v21 = vadd.f32 %v18536_v61, %v5482_v46  ;;  %v5612_v55 = vadd.f32 %v18532_v20, %v5483_v16  ;;  %v22123_v18 = vld [vmem:[#allocation74_spill] sm:$0xff] }
 0x5bf   :  { %v7078_v4 = vadd.f32 %v7077_v59, %v7076_v56  ;;  %v5711_v53 = vadd.f32 %v22112_v26, %v5579_v24  ;;  %v22113_v48 = vrot.slane %v22072_v1, 1  ;;  %v22116_v30 = vand.u32 15, %v18631_v15 }
 0x5c0   :  { %v7011_v25 = vadd.f32 %v22114_v10, %v7009_v14  ;;  %v5712_v29 = vadd.f32 %v22115_v9, %v5580_v19  ;;  %v5743_v34 = vadd.f32 %v18549_v47, %v5611_v21  ;;  %v6286_v61 = vmul.f32 %v15373_v62, %v18333_v57  ;;  %v22126_v14 = vld [vmem:[#allocation28_spill] sm:$0xff]  ;;  %v22128_v10 = vld [vmem:[#allocation53_spill] sm:$0xff]  ;;  %v22132_v47 = vld [vmem:[#allocation71_spill] sm:$0xff] }
 0x5c1   :  { %v5941_v49 = vsel %vm5874_vm2, %v22113_v48, %v18581_v22  ;;  %vm6109_vm10 = vcmp.ne.s32.totalorder %v22116_v30, 15  ;;  %v5744_v20 = vadd.f32 %v18545_v51, %v5612_v55  ;;  %v5840_v59 = vadd.f32 %v5779_v60, %v5711_v53  ;;  %v22127_v53 = vld [vmem:[#allocation8_spill] sm:$0xff]  ;;  %v22135_v51 = vld [vmem:[#allocation117_spill] sm:$0xff] }
 0x5c2   :  { %v22117_v1 = vrot.slane %v18368_v42, 1  ;;  %v5841_v5 = vadd.f32 %v5779_v60, %v5712_v29  ;;  %v5872_v40 = vadd.f32 %v5779_v60, %v5743_v34  ;;  %vm18734_vm11 = vcmp.ne.s32.totalorder %v4126_v38, 15 }
 0x5c3   :  { %vm6145_vm13 = vcmp.ne.s32.totalorder %v4364_v43, 15  ;;  %v6287_v57 = vmul.f32 %v15373_v62, %v18418_v11  ;;  %v5873_v15 = vadd.f32 %v5779_v60, %v5744_v20  ;;  %vm18740_vm14 = vcmp.ne.s32.totalorder %v4378_v12, 15  ;;  %v22124_v11 = vld [vmem:[#allocation88_spill] sm:$0xff] }
 0x5c4   :  { %v6006_v35 = vsel %vm5874_vm2, %v22117_v1, %v18581_v22  ;;  %v6181_v42 = vsel %vm6109_vm10, %v5941_v49, 0.0  ;;  %v6418_v13 = vmul.f32 %v15376_v44, %v18416_v50  ;;  %v7013_v54 = vadd.f32 %v22122_v39, %v7011_v25 }
 0x5c5   :  { %v7080_v36 = vadd.f32 %v18087_v63, %v7078_v4  ;;  %v6217_v38 = vsel %vm6145_vm13, %v6006_v35, 0.0  ;;  %v6183_v43 = vsel %vm18734_vm11, %v18581_v22, 0.0  ;;  %v6318_v62 = vadd.f32 %v22123_v18, %v5840_v59  ;;  %v22125_v63 = vld [vmem:[#allocation41_spill] sm:$0xff] }
 0x5c6   :  { %v6319_v46 = vadd.f32 %v22124_v11, %v5841_v5  ;;  %v6350_v56 = vadd.f32 %v6286_v61, %v5872_v40  ;;  %v6219_v16 = vsel %vm18740_vm14, %v18581_v22, 0.0  ;;  %v6351_v2 = vadd.f32 %v6287_v57, %v5873_v15  ;;  %v22134_v15 = vld [vmem:[#allocation54_spill] sm:$0xff]  ;;  %v22141_v11 = vld [vmem:[#allocation105_spill] sm:$0xff] }
 0x5c7   :  { %v6387_v50 = vmul.f32 %v15376_v44, %v6181_v42  ;;  %v6419_v24 = vmul.f32 %v15376_v44, %v6217_v38  ;;  %v18760_v60 = vadd.f32 %v16049_v45, %v22125_v63  ;;  %v6450_v12 = vadd.f32 %v22126_v14, %v6318_v62  ;;  %v22140_v62 = vld [vmem:[#allocation125_spill] sm:$0xff]  ;;  %v22144_v63 = vld [vmem:[#allocation126_spill] sm:$0xff] }
 0x5c8   :  { %v6482_v27 = vadd.f32 %v6418_v13, %v6350_v56  ;;  %v6517_v19 = vmul.f32 %v15437_v37, %v6181_v42  ;;  %v6518_v55 = vmul.f32 %v15437_v37, %v18581_v22  ;;  %v6519_v26 = vmul.f32 %v15437_v37, %v6183_v43  ;;  %v22136_v13 = vld [vmem:[#allocation13_spill] sm:$0xff]  ;;  %v22139_v43 = vld [vmem:[#allocation115_spill] sm:$0xff] }
 0x5c9   :  { %v6451_v21 = vadd.f32 %v6387_v50, %v6319_v46  ;;  %v6483_v4 = vadd.f32 %v6419_v24, %v6351_v2  ;;  %v7015_v48 = vadd.f32 %v22127_v53, %v7013_v54  ;;  %v6549_v44 = vmul.f32 %v15437_v37, %v6217_v38  ;;  %v22143_v50 = vld [vmem:[#allocation121_spill] sm:$0xff] }
 0x5ca   :  { %v6551_v49 = vmul.f32 %v15437_v37, %v6219_v16  ;;  %v18771_v25 = vadd.f32 %v6517_v19, %v22128_v10  ;;  %v7082_v9 = vadd.f32 %v18095_v58, %v7080_v36  ;;  %v18774_v29 = vadd.f32 %v6518_v55, %v6450_v12  ;;  %v22138_v36 = vld [vmem:[#allocation87_spill] sm:$0xff]  ;;  %v22142_v16 = vld [vmem:[#allocation120_spill] sm:$0xff] }
 0x5cb   :  { %v18776_v34 = vadd.f32 %v6519_v26, %v6451_v21  ;;  %v18778_v30 = vadd.f32 %v6518_v55, %v6482_v27  ;;  %v22129_v22 = vmax.f32 %v18336_v28, 0.0  ;;  %v18784_v20 = vadd.f32 %v16049_v45, %v18057_v3  ;;  %v22133_v3 = vld [vmem:[#allocation128_spill] sm:$0xff]  ;;  %v22145_v55 = vld [vmem:[#allocation22_spill] sm:$0xff] }
 0x5cc   :  { %v18787_v37 = vadd.f32 %v6549_v44, %v18494_v0  ;;  %v18789_v59 = vadd.f32 %v6551_v49, %v6483_v4  ;;  %v22130_v58 = vmax.f32 %v18463_v41, 0.0  ;;  %v22131_v35 = vmax.f32 %v18468_v7, 0.0  ;;  %v22137_v41 = vld [vmem:[#allocation26_spill] sm:$0xff]  ;;  %v22146_v49 = vld [vmem:[#allocation100_spill] sm:$0xff] }
 0x5cd   :  { %v6856_v61 = vmin.f32 %v22129_v22, 6.0  ;;  %v6733_v40 = vadd.f32 3.0, %v18528_v17  ;;  %v6672_v28 = vadd.f32 %v16049_v45, %v22132_v47  ;;  %v18799_v57 = vmul.f32 0.16666667, %v18309_v23 }
 0x5ce   :  { %v6857_v1 = vmin.f32 %v22130_v58, 6.0  ;;  %v6858_v5 = vmin.f32 %v22131_v35, 6.0  ;;  %v6919_v0 = vmul.f32 %v22134_v15, %v22133_v3  ;;  %v6795_v42 = vmax.f32 %v22135_v51, 0.0  ;;  %v22147_v58 = vld [vmem:[#allocation72_spill] sm:$0xff] }
 0x5cf   :  { %v7017_v39 = vadd.f32 %v22136_v13, %v7015_v48  ;;  %v6796_v54 = vmax.f32 %v22137_v41, 0.0  ;;  %v6734_v7 = vadd.f32 3.0, %v18760_v60  ;;  %v18809_v38 = vadd.f32 %v16049_v45, %v22138_v36  ;;  %v22148_v15 = vld [vmem:[#allocation52_spill] sm:$0xff]  ;;  %v22150_v13 = vld [vmem:[#allocation75_spill] sm:$0xff]  ;;  %v22151_v41 = vld [vmem:[#allocation58_spill] sm:$0xff] }
 0x5d0   :  { %v7084_v18 = vadd.f32 %v22139_v43, %v7082_v9  ;;  %v7091_v23 = vsel %vm7004_vm12, %v22140_v62, 0.0  ;;  %v6920_v46 = vmul.f32 %v6856_v61, %v22141_v11  ;;  %v6735_v56 = vadd.f32 3.0, %v18784_v20  ;;  %v22149_v51 = vld [vmem:[#allocation124_spill] sm:$0xff]  ;;  %v22152_v43 = vld [vmem:[#allocation97_spill] sm:$0xff] }
 0x5d1   :  { %v6674_v2 = vadd.f32 %v16049_v45, %v22142_v16  ;;  %v6921_v24 = vmul.f32 %v6857_v1, %v22143_v50  ;;  %v6922_v14 = vmul.f32 %v6858_v5, %v22144_v63  ;;  %v6797_v12 = vmax.f32 %v6733_v40, 0.0  ;;  %v22153_v16 = vld [vmem:[#allocation77_spill] sm:$0xff] }
 0x5d2   :  { %v6736_v27 = vadd.f32 3.0, %v6672_v28  ;;  %v7093_v19 = vsel %vm7004_vm12, %v18799_v57, 0.0  ;;  %v18822_v21 = vmul.f32 0.16666667, %v6919_v0  ;;  %v6859_v4 = vmin.f32 %v6795_v42, 6.0 }
 0x5d3   :  { %v7019_v26 = vadd.f32 %v22145_v55, %v7017_v39  ;;  %v6860_v53 = vmin.f32 %v6796_v54, 6.0  ;;  %v6798_v48 = vmax.f32 %v6734_v7, 0.0  ;;  %v6737_v44 = vadd.f32 3.0, %v18809_v38  ;;  %v22154_v55 = vld [vmem:[#allocation89_spill] sm:$0xff] }
 0x5d4   :  { %v7086_v10 = vadd.f32 %v22146_v49, %v7084_v18  ;;  %v18827_v9 = vmul.f32 0.16666667, %v6920_v46  ;;  %v6799_v22 = vmax.f32 %v6735_v56, 0.0  ;;  %v6738_v61 = vadd.f32 3.0, %v6674_v2 }
 0x5d5   :  { %v7021_v1 = vadd.f32 %v22147_v58, %v7019_v26  ;;  %v18830_v35 = vmul.f32 0.16666667, %v6921_v24  ;;  %v18832_v5 = vmul.f32 0.16666667, %v6922_v14  ;;  %v6861_v40 = vmin.f32 %v6797_v12, 6.0 }
 0x5d6   :  { %v6800_v47 = vmax.f32 %v6736_v27, 0.0  ;;  %v7095_v3 = vsel %vm7004_vm12, %v18822_v21, 0.0  ;;  %v6923_v0 = vmul.f32 %v6859_v4, %v22148_v15  ;;  %v6675_v42 = vadd.f32 %v16049_v45, %v22149_v51  ;;  %v22158_v51 = vld [vmem:[#allocation132_spill] sm:$0xff] }
 0x5d7   :  { %v7023_v39 = vadd.f32 %v22150_v13, %v7021_v1  ;;  %v6924_v54 = vmul.f32 %v6860_v53, %v22151_v41  ;;  %v6862_v7 = vmin.f32 %v6798_v48, 6.0  ;;  %v6801_v36 = vmax.f32 %v6737_v44, 0.0  ;;  %v22155_v53 = vld [vmem:[#allocation133_spill] sm:$0xff] }
 0x5d8   :  { %v7088_v18 = vadd.f32 %v22152_v43, %v7086_v10  ;;  %v7097_v11 = vsel %vm7004_vm12, %v18827_v9, 0.0  ;;  %v6863_v46 = vmin.f32 %v6799_v22, 6.0  ;;  %v6802_v56 = vmax.f32 %v6738_v61, 0.0  ;;  %v22156_v22 = vld [vmem:[#allocation114_spill] sm:$0xff] }
 0x5d9   :  { %v7025_v50 = vadd.f32 %v22153_v16, %v7023_v39  ;;  %v7099_v24 = vsel %vm7004_vm12, %v18830_v35, 0.0  ;;  %v7101_v63 = vsel %vm7004_vm12, %v18832_v5, 0.0  ;;  %v6925_v14 = vmul.f32 %v6861_v40, %v18528_v17  ;;  %v22157_v17 = vld [vmem:[#allocation91_spill] sm:$0xff] }
 0x5da   :  { %v6864_v12 = vmin.f32 %v6800_v47, 6.0  ;;  %v18850_v27 = vmul.f32 0.16666667, %v6923_v0  ;;  %v6739_v4 = vadd.f32 3.0, %v6675_v42  ;;  %v7090_v48 = vadd.f32 %v22155_v53, %v7088_v18  ;;  %v22159_v39 = vld [vmem:[#allocation27_spill] sm:$0xff]  ;;  %v22163_v53 = vld [vmem:[#allocation48_spill] sm:$0xff] }
 0x5db   :  { %v7027_v26 = vadd.f32 %v22154_v55, %v7025_v50  ;;  %v18854_v44 = vmul.f32 0.16666667, %v6924_v54  ;;  %v6926_v49 = vmul.f32 %v6862_v7, %v18760_v60  ;;  %v6865_v10 = vmin.f32 %v6801_v36, 6.0  ;;  %v22160_v7 = vld [vmem:[#allocation92_spill] sm:$0xff]  ;;  %v22161_v16 = vld [vmem:[#allocation107_spill] sm:$0xff] }
 0x5dc   :  { %v6677_v61 = vadd.f32 %v16049_v45, %v22156_v22  ;;  %v6927_v58 = vmul.f32 %v6863_v46, %v18784_v20  ;;  %v6866_v1 = vmin.f32 %v6802_v56, 6.0  ;;  %v7092_v47 = vadd.f32 %v7091_v23, %v7090_v48 }
 0x5dd   :  { %v7029_v40 = vadd.f32 %v22157_v17, %v7027_v26  ;;  %v18861_v15 = vmul.f32 0.16666667, %v6925_v14  ;;  %v6928_v0 = vmul.f32 %v6864_v12, %v6672_v28  ;;  %v6676_v13 = vadd.f32 %v16049_v45, %v22158_v51 }
 0x5de   :  { %v6679_v41 = vadd.f32 %v16049_v45, %v22159_v39  ;;  %v7103_v60 = vsel %vm7004_vm12, %v18850_v27, 0.0  ;;  %v6803_v54 = vmax.f32 %v6739_v4, 0.0  ;;  %v7094_v20 = vadd.f32 %v7093_v19, %v7092_v47  ;;  %v22168_v47 = vld [vmem:[#allocation21_spill] sm:$0xff] }
 0x5df   :  { %v7031_v36 = vadd.f32 %v22160_v7, %v7029_v40  ;;  %v7105_v43 = vsel %vm7004_vm12, %v18854_v44, 0.0  ;;  %v18872_v23 = vmul.f32 0.16666667, %v6926_v49  ;;  %v6929_v28 = vmul.f32 %v6865_v10, %v18809_v38  ;;  %v22164_v38 = vld [vmem:[#allocation109_spill] sm:$0xff] }
 0x5e0   :  { %v6741_v18 = vadd.f32 3.0, %v6677_v61  ;;  %v18875_v46 = vmul.f32 0.16666667, %v6927_v58  ;;  %v6930_v56 = vmul.f32 %v6866_v1, %v6674_v2  ;;  %v7096_v14 = vadd.f32 %v7095_v3, %v7094_v20  ;;  %v22166_v58 = vld [vmem:[#allocation136_spill] sm:$0xff] }
 0x5e1   :  { %v7033_v50 = vadd.f32 %v22161_v16, %v7031_v36  ;;  %v7107_v12 = vsel %vm7004_vm12, %v18861_v15, 0.0  ;;  %v18880_v4 = vmul.f32 0.16666667, %v6928_v0  ;;  %v6740_v19 = vadd.f32 3.0, %v6676_v13 }
 0x5e2   :  { %v6743_v55 = vadd.f32 3.0, %v6679_v41  ;;  %v6867_v26 = vmin.f32 %v6803_v54, 6.0  ;;  %v18884_v48 = vadd.f32 %v16049_v45, %v22163_v53  ;;  %v7098_v10 = vadd.f32 %v7097_v11, %v7096_v14 }
 0x5e3   :  { %22162 = vst [vmem:[#allocation10_spill] sm:$0xff] %v18880_v4  ;;  %v7035_v49 = vadd.f32 %v22164_v38, %v7033_v50  ;;  %v7109_v2 = vsel %vm7004_vm12, %v18872_v23, 0.0  ;;  %v18889_v22 = vmul.f32 0.16666667, %v6929_v28  ;;  %v6805_v3 = vmax.f32 %v6741_v18, 0.0  ;;  %v22169_v28 = vld [vmem:[#allocation19_spill] sm:$0xff] }
 0x5e4   :  { %v6680_v1 = vadd.f32 %v16049_v45, %v22166_v58  ;;  %v7111_v17 = vsel %vm7004_vm12, %v18875_v46, 0.0  ;;  %v18895_v40 = vmul.f32 0.16666667, %v6930_v56  ;;  %v7100_v51 = vadd.f32 %v7099_v24, %v7098_v10 }
 0x5e5   :  { %22165 = vst [vmem:[#allocation61_spill] sm:$0xff] %v18889_v22  ;;  %v7037_v0 = vadd.f32 %v22168_v47, %v7035_v49  ;;  %v7113_v11 = vsel %vm7004_vm12, %v18880_v4, 0.0  ;;  %v6804_v39 = vmax.f32 %v6740_v19, 0.0  ;;  %v6807_v54 = vmax.f32 %v6743_v55, 0.0  ;;  %v22170_v55 = vld [vmem:[#allocation103_spill] sm:$0xff] }
 0x5e6   :  { %22167 = vst [vmem:[#allocation68_spill] sm:$0xff] %v18895_v40  ;;  %v6649_v7 = vadd.f32 %v16049_v45, %v18771_v25  ;;  %v6931_v36 = vmul.f32 %v6867_v26, %v6675_v42  ;;  %v6742_v20 = vadd.f32 3.0, %v18884_v48  ;;  %v7102_v16 = vadd.f32 %v7101_v63, %v7100_v51  ;;  %v22172_v42 = vld [vmem:[#allocation23_spill] sm:$0xff] }
 0x5e7   :  { %v7039_v18 = vadd.f32 %v22169_v28, %v7037_v0  ;;  %v7115_v56 = vsel %vm7004_vm12, %v18889_v22, 0.0  ;;  %v6869_v50 = vmin.f32 %v6805_v3, 6.0  ;;  %v6744_v14 = vadd.f32 3.0, %v6680_v1  ;;  %v22173_v0 = vld [vmem:[#allocation35_spill] sm:$0xff]  ;;  %v22177_v22 = vld [vmem:[#allocation118_spill] sm:$0xff] }
 0x5e8   :  { %v6650_v24 = vadd.f32 %v16049_v45, %v18774_v29  ;;  %v7117_v19 = vsel %vm7004_vm12, %v18895_v40, 0.0  ;;  %v22171_v53 = vmax.f32 %v22170_v55, 0.0  ;;  %v7104_v38 = vadd.f32 %v7103_v60, %v7102_v16 }
 0x5e9   :  { %v7041_v26 = vadd.f32 %v22172_v42, %v7039_v18  ;;  %v6868_v49 = vmin.f32 %v6804_v39, 6.0  ;;  %v6871_v10 = vmin.f32 %v6807_v54, 6.0  ;;  %v6651_v63 = vadd.f32 %v16049_v45, %v18776_v34  ;;  %v22174_v39 = vld [vmem:[#allocation55_spill] sm:$0xff]  ;;  %v22175_v34 = vld [vmem:[#allocation29_spill] sm:$0xff] }
 0x5ea   :  { %v6838_v25 = vmin.f32 %v22171_v53, 6.0  ;;  %v6713_v58 = vadd.f32 3.0, %v6649_v7  ;;  %v18915_v3 = vmul.f32 0.16666667, %v6931_v36  ;;  %v6806_v47 = vmax.f32 %v6742_v20, 0.0 }
 0x5eb   :  { %v7043_v29 = vadd.f32 %v22173_v0, %v7041_v26  ;;  %v7106_v51 = vadd.f32 %v7105_v43, %v7104_v38  ;;  %v6933_v28 = vmul.f32 %v6869_v50, %v6677_v61  ;;  %v6808_v40 = vmax.f32 %v6744_v14, 0.0  ;;  %v22176_v50 = vld [vmem:[#allocation46_spill] sm:$0xff] }
 0x5ec   :  { %v6681_v55 = vadd.f32 %v16049_v45, %v18787_v37  ;;  %v6714_v53 = vadd.f32 3.0, %v6650_v24  ;;  %v18922_v60 = vadd.f32 %v16049_v45, %v18778_v30  ;;  %v6902_v54 = vmul.f32 %v6838_v25, %v22174_v39 }
 0x5ed   :  { %v7045_v18 = vadd.f32 %v22175_v34, %v7043_v29  ;;  %v7108_v36 = vadd.f32 %v7107_v12, %v7106_v51  ;;  %v6932_v16 = vmul.f32 %v6868_v49, %v6676_v13  ;;  %v6935_v20 = vmul.f32 %v6871_v10, %v6679_v41  ;;  %v22178_v13 = vld [vmem:[#allocation44_spill] sm:$0xff] }
 0x5ee   :  { %v6715_v42 = vadd.f32 3.0, %v6651_v63  ;;  %v6777_v26 = vmax.f32 %v6713_v58, 0.0  ;;  %v6683_v61 = vadd.f32 %v16049_v45, %v18789_v59  ;;  %v6870_v43 = vmin.f32 %v6806_v47, 6.0  ;;  %v22179_v45 = vld [vmem:[#allocation50_spill] sm:$0xff]  ;;  %v22180_v47 = vld [vmem:[#allocation93_spill] sm:$0xff] }
 0x5ef   :  { %v7047_v37 = vadd.f32 %v22176_v50, %v7045_v18  ;;  %v7110_v14 = vadd.f32 %v7109_v2, %v7108_v36  ;;  %v6872_v38 = vmin.f32 %v6808_v40, 6.0  ;;  %v6745_v0 = vadd.f32 3.0, %v6681_v55 }
 0x5f0   :  { %v6778_v30 = vmax.f32 %v6714_v53, 0.0  ;;  %v18930_v4 = vmul.f32 0.16666667, %v22177_v22  ;;  %v6746_v25 = vadd.f32 3.0, %v18922_v60  ;;  %v18933_v12 = vmul.f32 0.16666667, %v6902_v54 }
 0x5f1   :  { %v7049_v41 = vadd.f32 %v22178_v13, %v7047_v37  ;;  %v7112_v49 = vadd.f32 %v7111_v17, %v7110_v14  ;;  %v6779_v10 = vmax.f32 %v6715_v42, 0.0  ;;  %v6841_v58 = vmin.f32 %v6777_v26, 6.0 }
 0x5f2   :  { %v7050_v59 = vsel %vm7004_vm12, %v22179_v45, 0.0  ;;  %v7052_v2 = vsel %vm7004_vm12, %v22180_v47, 0.0  ;;  %v6747_v40 = vadd.f32 3.0, %v6683_v61  ;;  %v6934_v29 = vmul.f32 %v6870_v43, %v18884_v48 }
 0x5f3   :  { %v7051_v22 = vadd.f32 %v7050_v59, %v7049_v41  ;;  %v7114_v51 = vadd.f32 %v7113_v11, %v7112_v49  ;;  %v6936_v53 = vmul.f32 %v6872_v38, %v6680_v1  ;;  %v18941_v39 = vmul.f32 0.16666667, %v6932_v16  ;;  %v22181_v49 = vld [vmem:[#allocation106_spill] sm:$0xff] }
 0x5f4   :  { %v6809_v54 = vmax.f32 %v6745_v0, 0.0  ;;  %v6842_v34 = vmin.f32 %v6778_v30, 6.0  ;;  %v6810_v18 = vmax.f32 %v6746_v25, 0.0  ;;  %v18943_v17 = vmul.f32 0.16666667, %v6933_v28 }
 0x5f5   :  { %v7053_v36 = vadd.f32 %v7052_v2, %v7051_v22  ;;  %v7116_v42 = vadd.f32 %v7115_v56, %v7114_v51  ;;  %v6843_v26 = vmin.f32 %v6779_v10, 6.0  ;;  %v6905_v50 = vmul.f32 %v6841_v58, %v6649_v7 }
 0x5f6   :  { %v7054_v37 = vsel %vm7004_vm12, %v18930_v4, 0.0  ;;  %v7056_v48 = vsel %vm7004_vm12, %v18933_v12, 0.0  ;;  %v6811_v43 = vmax.f32 %v6747_v40, 0.0  ;;  %v18949_v11 = vmul.f32 0.16666667, %v6934_v29 }
 0x5f7   :  { %v7055_v1 = vadd.f32 %v7054_v37, %v7053_v36  ;;  %v7118_v16 = vadd.f32 %v7117_v19, %v7116_v42  ;;  %v6873_v14 = vmin.f32 %v6809_v54, 6.0  ;;  %v6906_v38 = vmul.f32 %v6842_v34, %v6650_v24  ;;  %v22182_v19 = vld [vmem:[#allocation9_spill] sm:$0xff] }
 0x5f8   :  { %v7119_v28 = vsel %vm7004_vm12, %v18915_v3, 0.0  ;;  %v7121_v56 = vsel %vm7004_vm12, %v18941_v39, 0.0  ;;  %v18955_v7 = vmul.f32 0.16666667, %v6935_v20  ;;  %v6874_v0 = vmin.f32 %v6810_v18, 6.0 }
 0x5f9   :  { %v7057_v30 = vadd.f32 %v7056_v48, %v7055_v1  ;;  %v7120_v25 = vadd.f32 %v7119_v28, %v7118_v16  ;;  %v6907_v13 = vmul.f32 %v6843_v26, %v6651_v63  ;;  %v18957_v41 = vmul.f32 0.16666667, %v6905_v50 }
 0x5fa   :  { %v7058_v10 = vsel %vm7004_vm12, %v22181_v49, 0.0  ;;  %v7060_v24 = vsel %vm7004_vm12, %v22182_v19, 0.0  ;;  %v18963_v58 = vmul.f32 0.16666667, %v6936_v53  ;;  %v6875_v59 = vmin.f32 %v6811_v43, 6.0 }
 0x5fb   :  { %v7059_v2 = vadd.f32 %v7058_v10, %v7057_v30  ;;  %v7122_v40 = vadd.f32 %v7121_v56, %v7120_v25  ;;  %v6937_v29 = vmul.f32 %v6873_v14, %v6681_v55  ;;  %v18965_v20 = vmul.f32 0.16666667, %v6906_v38 }
 0x5fc   :  { %v7123_v22 = vsel %vm7004_vm12, %v18943_v17, 0.0  ;;  %v7125_v63 = vsel %vm7004_vm12, %v18949_v11, 0.0  ;;  %v6938_v34 = vmul.f32 %v6874_v0, %v18922_v60  ;;  %v18972_v18 = vmul.f32 0.16666667, %v6907_v13 }
 0x5fd   :  { %v7061_v51 = vadd.f32 %v7060_v24, %v7059_v2  ;;  %v7124_v54 = vadd.f32 %v7123_v22, %v7122_v40  ;;  %v7062_v53 = vsel %vm7004_vm12, %v18957_v41, 0.0  ;;  %v6939_v36 = vmul.f32 %v6875_v59, %v6683_v61 }
 0x5fe   :  { %v18976_v26 = vmul.f32 0.16666667, %v6937_v29  ;;  %v7064_v50 = vsel %vm7004_vm12, %v18965_v20, 0.0  ;;  %v7127_v37 = vsel %vm7004_vm12, %v18955_v7, 0.0  ;;  %v7129_v48 = vsel %vm7004_vm12, %v18963_v58, 0.0 }
 0x5ff   :  { %v7063_v42 = vadd.f32 %v7062_v53, %v7061_v51  ;;  %v7126_v55 = vadd.f32 %v7125_v63, %v7124_v54  ;;  %v18984_v1 = vmul.f32 0.16666667, %v6938_v34  ;;  %v7066_v61 = vsel %vm7004_vm12, %v18972_v18, 0.0  ;;  %v38_v53 = vld [vmem:[%s20530_s1 + $0x60] sm:$0xff] }
 0x600   :  { %v18988_v38 = vmul.f32 0.16666667, %v6939_v36  ;;  %v7131_v28 = vsel %vm7004_vm12, %v18976_v26, 0.0  ;;  %v39_v36 = vld [vmem:[%s20530_s1 + $0x68] sm:$0xff]  ;;  %vm7152_vm2 = vcmask 1041409  }
 0x601   :  { %v7065_v60 = vadd.f32 %v7064_v50, %v7063_v42  ;;  %v7128_v43 = vadd.f32 %v7127_v37, %v7126_v55  ;;  %v7133_v30 = vsel %vm7004_vm12, %v18984_v1, 0.0  ;;  %v13187_v37 = vpack.c.bf16 %v39_v36, %v38_v53 }
 0x602   :  { %22183 = vst [vmem:[#allocation84_spill] sm:$0xff] %v18988_v38  ;;  %v7135_v10 = vsel %vm7004_vm12, %v18988_v38, 0.0 }
 0x603   :  { %v7067_v16 = vadd.f32 %v7066_v61, %v7065_v60  ;;  %v7130_v14 = vadd.f32 %v7129_v48, %v7128_v43  ;;  %v40_v48 = vld [vmem:[%s20530_s1 + $0x70] sm:$0xff]  ;;  %v41_v60 = vld [vmem:[%s20530_s1 + $0x78] sm:$0xff] }
 0x604   :  { %v13190_v61 = vpack.c.bf16 %v41_v60, %v40_v48 }
 0x605   :  { %v7068_v56 = vrot.slane %v7067_v16, 4  ;;  %v7132_v0 = vadd.f32 %v7131_v28, %v7130_v14  ;;  %v22185_v14 = vmov 0.0|0.0   ;;  %v42_v28 = vld [vmem:[%s20530_s1 + $0x80] sm:$0xff] }
 0x607   :  { %v7069_v25 = vadd.f32 %v7068_v56, %v7067_v16  ;;  %v7134_v13 = vadd.f32 %v7133_v30, %v7132_v0  ;;  %v22184_v16 = vmov 0.0   ;;  %v43_v56 = vld [vmem:[%s20530_s1 + $0x88] sm:$0xff]  ;;  %v44_v30 = vld [vmem:[%s20530_s1 + $0x90] sm:$0xff] }
 0x608   :  { %v13193_v0 = vpack.c.bf16 %v43_v56, %v42_v28  ;;  %v53_v28 = vld [vmem:[%s20530_s1 + $0xd8] sm:$0xff] }
 0x609   :  { %v7070_v24 = vrot.slane %v7069_v25, 2  ;;  %v7136_v59 = vadd.f32 %v7135_v10, %v7134_v13  ;;  %v14079_v10 = vld [vmem:[%s20530_s1 + $0xe0] sm:$0xff] }
 0x60b   :  { %v7071_v2 = vadd.f32 %v7070_v24, %v7069_v25  ;;  %v7137_v40 = vrot.slane %v7136_v59, 4  ;;  %v45_v25 = vld [vmem:[%s20530_s1 + $0x98] sm:$0xff]  ;;  %v22186_v24 = vld [vmem:[#allocation12_spill] sm:$0xff] }
 0x60c   :  { %v13196_v13 = vpack.c.bf16 %v45_v25, %v44_v30  ;;  %v7623_v30 = vand.u32 4294901760, %v53_v28 }
 0x60d   :  { %v7138_v29 = vadd.f32 %v7137_v40, %v7136_v59  ;;  %v7072_v22 = vrot.slane %v7071_v2, 1  ;;  %v22187_v59 = vsub.s32 2, %v22186_v24 }
 0x60f   :  { %v7139_v63 = vrot.slane %v7138_v29, 2  ;;  %v7073_v54 = vadd.f32 %v7072_v22, %v7071_v2  ;;  %v7149_v2 = vrot.slane %v14079_v10, %v22187_v59 }
 0x611   :  { %v7140_v51 = vadd.f32 %v7139_v63, %v7138_v29  ;;  %v7144_v55 = vmul.f32 0.00390625, %v7073_v54  ;;  %v47_v54 = vld [vmem:[%s20530_s1 + $0xa8] sm:$0xff] }
 0x612   :  { %v7605_v36 = vand.u32 4294901760, %v47_v54 }
 0x613   :  { %v7141_v34 = vrot.slane %v7140_v51, 1 }
 0x614   :  { %v19078_v59 = vsub.f32 %v47_v54, %v7605_v36 }
 0x615   :  { %v7142_v42 = vadd.f32 %v7141_v34, %v7140_v51  ;;  %v46_v51 = vld [vmem:[%s20530_s1 + $0xa0] sm:$0xff]  ;;  %v48_v34 = vld [vmem:[%s20530_s1 + $0xb0] sm:$0xff] }
 0x616   :  { %v7602_v53 = vand.u32 4294901760, %v46_v51 }
 0x617   :  { %v7145_v50 = vmul.f32 0.00390625, %v7142_v42  ;;  %v49_v42 = vld [vmem:[%s20530_s1 + $0xb8] sm:$0xff] }
 0x618   :  { %v7611_v48 = vand.u32 4294901760, %v49_v42  ;;  %v19050_v60 = vpack.c.bf16 %v7605_v36, %v7602_v53 }
 0x619   :  { %v7153_v43 = vsel %vm7152_vm2, %v7145_v50, %v7144_v55  ;;  %v7608_v55 = vand.u32 4294901760, %v48_v34  ;;  %v50_v50 = vld [vmem:[%s20530_s1 + $0xc0] sm:$0xff] }
 0x61a   :  { %12457 = vmatmul.mubr.msk.f32.vlgmr.msra.gmra.mrb[0].mxu1 %vm7004_vm12, %v7153_v43  ;;  %22188 = vst [vmem:[#allocation11_spill] sm:$0xff] %v19050_v60  ;;  %v7614_v43 = vand.u32 4294901760, %v50_v50  ;;  %13199 = vmatprep.subr.bf16.mxu0 %v19050_v60  ;;  %v19097_v36 = vsub.f32 %v49_v42, %v7611_v48 }
 0x61b   :  { %13188 = vmatpush3.bf16.msra.mxu1 %v13187_v37  ;;  %12475 = vmatprep.mubr.msk.f32.mxu1 %vm14198_vm8, %v22184_v16  ;;  %v51_v37 = vld [vmem:[%s20530_s1 + $0xc8] sm:$0xff]  ;;  %v19052_v16 = vpack.c.bf16 %v7611_v48, %v7608_v55 }
 0x61c   :  { %13189 = vmatprep.subr.bf16.mxu1 %v22185_v14  ;;  %13201 = vmatpush3.bf16.msra.mxu0 %v19050_v60  ;;  %v20951_v48 = vand.u32 4294901760, %v19097_v36 }
 0x61d   :  { %22189 = vst [vmem:[#allocation30_spill] sm:$0xff] %v19052_v16  ;;  %13203 = vmatprep.subr.bf16.mxu0 %v19052_v16 }
 0x61f   :  { %13191 = vmatpush3.bf16.msra.mxu1 %v13190_v61  ;;  %v7617_v61 = vand.u32 4294901760, %v51_v37 }
 0x620   :  { %13192 = vmatprep.subr.bf16.mxu1 %v22185_v14  ;;  %13205 = vmatpush3.bf16.msra.mxu0 %v19052_v16 }
 0x621   :  { %v19066_v56 = vpack.c.bf16 %v7617_v61, %v7614_v43  ;;  %v19103_v38 = vsub.f32 %v51_v37, %v7617_v61 }
 0x623   :  { %13194 = vmatpush3.bf16.msra.mxu1 %v13193_v0  ;;  %22190 = vst [vmem:[#allocation78_spill] sm:$0xff] %v19066_v56  ;;  %13207 = vmatprep.subr.bf16.mxu0 %v19066_v56  ;;  %22195 = vst [vmem:[#allocation32_spill] sm:$0xff] %v19103_v38 }
 0x624   :  { %13195 = vmatprep.subr.bf16.mxu1 %v22185_v14  ;;  %v52_v14 = vld [vmem:[%s20530_s1 + $0xd0] sm:$0xff]  ;;  %13209 = vmatpush3.bf16.msra.mxu0 %v19066_v56 }
 0x625   :  { %v7620_v0 = vand.u32 4294901760, %v52_v14 }
 0x627   :  { %13197 = vmatpush3.bf16.msra.mxu1 %v13196_v13  ;;  %v19072_v25 = vpack.c.bf16 %v7623_v30, %v7620_v0  ;;  %v19076_v13 = vsub.f32 %v46_v51, %v7602_v53  ;;  %v19095_v53 = vsub.f32 %v48_v34, %v7608_v55 }
 0x628   :  { %13294 = vmatprep.subr.bf16.mxu1 %v19050_v60 }
 0x629   :  { %22191 = vst [vmem:[#allocation127_spill] sm:$0xff] %v19072_v25  ;;  %22192 = vst [vmem:[#allocation25_spill] sm:$0xff] %v19076_v13  ;;  %13211 = vmatprep.subr.bf16.mxu0 %v19072_v25  ;;  %v20953_v42 = vand.u32 4294901760, %v19095_v53 }
 0x62a   :  { %13213 = vmatpush3.bf16.msra.mxu0 %v19072_v25 }
 0x6ed   :  { %v7222_v40 = vpop.f32.mrb[0].mxu1 }
 0x6ee   :  { %v7223_v29 = vadd.f32 %v7222_v40, %v7149_v2  ;;  %v12458_v22 = vpop.f32.mrb[1].mxu1  ;;  %v20947_v2 = vand.u32 4294901760, %v19076_v13  ;;  %v20954_v40 = vand.u32 4294901760, %v19078_v59 }
 0x6f0   :  { %v7226_v63 = vmax.f32 %v7223_v29, 0.0  ;;  %v8318_v29 = vsub.f32 %v19076_v13, %v20947_v2  ;;  %v8325_v22 = vsub.f32 %v19078_v59, %v20954_v40  ;;  %v19101_v13 = vsub.f32 %v50_v50, %v7614_v43 }
 0x6f2   :  { %12476 = vmatmul.mubr.msk.f32.vlgmr.msra.gmra.mrb[2].mxu1 %vm7004_vm12, %v7226_v63  ;;  %v8319_v63 = vand.u32 4294901760, %v8318_v29  ;;  %v8326_v51 = vand.u32 4294901760, %v8325_v22  ;;  %22194 = vst [vmem:[#allocation86_spill] sm:$0xff] %v19101_v13  ;;  %v19105_v29 = vsub.f32 %v52_v14, %v7620_v0  ;;  %v19107_v22 = vsub.f32 %v53_v28, %v7623_v30 }
 0x6f3   :  { %13298 = vmatpush3.bf16.msra.mxu1 %v19050_v60  ;;  %v8339_v28 = vsub.f32 %v19097_v36, %v20951_v48 }
 0x6f4   :  { %13295 = vmatprep.subr.bf16.mxu1 %v19052_v16  ;;  %v19092_v54 = vpack.c.bf16 %v8326_v51, %v8319_v63  ;;  %22196 = vst [vmem:[#allocation39_spill] sm:$0xff] %v19105_v29  ;;  %22197 = vst [vmem:[#allocation36_spill] sm:$0xff] %v19107_v22  ;;  %v20961_v50 = vand.u32 4294901760, %v19105_v29  ;;  %v20964_v37 = vand.u32 4294901760, %v19107_v22 }
 0x6f6   :  { %v8360_v30 = vsub.f32 %v19105_v29, %v20961_v50 }
 0x6f7   :  { %13299 = vmatpush3.bf16.msra.mxu1 %v19052_v16  ;;  %v14199_v16 = vmov 1966171168  }
 0x6f8   :  { %13296 = vmatprep.subr.bf16.mxu1 %v19066_v56  ;;  %v7310_v60 = vunpack.c.l.s4 %v14199_v16  ;;  %v20956_v16 = vand.u32 4294901760, %v19103_v38  ;;  %v8361_v48 = vand.u32 4294901760, %v8360_v30 }
 0x6fa   :  { %v7311_v55 = vunpack.c.0.s8 %v7310_v60  ;;  %v8332_v60 = vsub.f32 %v19095_v53, %v20953_v42  ;;  %v8353_v0 = vsub.f32 %v19103_v38, %v20956_v16  ;;  %v22198_v16 = vld [vmem:[#allocation15_spill] sm:$0xff] }
 0x6fb   :  { %13300 = vmatpush3.bf16.msra.mxu1 %v19066_v56 }
 0x6fc   :  { %13297 = vmatprep.subr.bf16.mxu1 %v19072_v25  ;;  %v7314_v14 = vsub.s32 %v7311_v55, %v22186_v24 }
 0x6ff   :  { %13301 = vmatpush3.bf16.msra.mxu1 %v19072_v25  ;;  %v22193_v25 = vsub.s32 3, %v22186_v24 }
 0x700   :  { %13215 = vmatprep.subr.bf16.mxu1 %v19092_v54 }
 0x701   :  { %v7230_v56 = vrot.slane %v14079_v10, %v22193_v25  ;;  %v20952_v10 = vand.u32 4294901760, %v19101_v13  ;;  %v8367_v25 = vsub.f32 %v19107_v22, %v20964_v37 }
 0x7c5   :  { %v7300_v2 = vpop.f32.mrb[2].mxu1 }
 0x7c6   :  { %v7301_v63 = vadd.f32 %v7300_v2, %v7230_v56  ;;  %v12477_v51 = vpop.f32.mrb[3].mxu1  ;;  %v8346_v56 = vsub.f32 %v19101_v13, %v20952_v10  ;;  %v8368_v10 = vand.u32 4294901760, %v8367_v25 }
 0x7c7   :  { %v8333_v51 = vand.u32 4294901760, %v8332_v60 }
 0x7c8   :  { %v7304_v34 = vadd.f32 3.0, %v7301_v63  ;;  %v8347_v55 = vand.u32 4294901760, %v8346_v56  ;;  %v19141_v29 = vpack.c.bf16 %v8368_v10, %v8361_v48  ;;  %v22201_v48 = vld [vmem:[#allocation83_spill] sm:$0xff] }
 0x7ca   :  { %v7305_v43 = vmax.f32 %v7304_v34, 0.0  ;;  %v8340_v34 = vand.u32 4294901760, %v8339_v28  ;;  %v22199_v28 = vld [vmem:[#allocation65_spill] sm:$0xff] }
 0x7cc   :  { %v7306_v61 = vmin.f32 %v7305_v43, 6.0  ;;  %v8354_v43 = vand.u32 4294901760, %v8353_v0  ;;  %v19137_v13 = vpack.c.bf16 %v8340_v34, %v8333_v51 }
 0x7ce   :  { %v7307_v2 = vmul.f32 0.16666667, %v7306_v61  ;;  %v19139_v50 = vpack.c.bf16 %v8354_v43, %v8347_v55 }
 0x7d0   :  { %v7315_v63 = vrot.slane %v7307_v2, %v7314_v14  ;;  %v22203_v2 = vld [vmem:[#allocation85_spill] sm:$0xff] }
 0x7d2   :  { %v7316_v42 = vcombine.high %v7315_v63, %v7315_v63  ;;  %v7323_v40 = vrot.slane %v7315_v63, %v7314_v14 }
 0x7d4   :  { %v7330_v24 = vrot.slane %v7316_v42, %v7314_v14  ;;  %v19135_v38 = vrot.slane %v7323_v40, %v22198_v16  ;;  %v22200_v40 = vld [vmem:[#allocation81_spill] sm:$0xff] }
 0x7d6   :  { %v19144_v61 = vrot.slane %v7330_v24, %v22198_v16  ;;  %v7341_v60 = vmul.f32 %v19135_v38, %v18682_v31  ;;  %v7351_v56 = vmul.f32 %v19135_v38, %v22199_v28  ;;  %v7342_v42 = vmul.f32 %v19135_v38, %v18684_v8  ;;  %v22202_v24 = vld [vmem:[#allocation116_spill] sm:$0xff] }
 0x7d7   :  { %v7352_v14 = vmul.f32 %v19135_v38, %v22200_v40  ;;  %v7343_v0 = vmul.f32 %v19135_v38, %v18674_v6  ;;  %v7353_v10 = vmul.f32 %v19135_v38, %v22201_v48  ;;  %v7344_v16 = vmul.f32 %v19135_v38, %v22202_v24 }
 0x7d8   :  { %v7410_v31 = vsel %vm7004_vm12, %v7341_v60, 0  ;;  %v7440_v30 = vsel %vm7004_vm12, %v7351_v56, 0  ;;  %v7413_v25 = vsel %vm7004_vm12, %v7342_v42, 0  ;;  %v7354_v8 = vmul.f32 %v19135_v38, %v22203_v2 }
 0x7d9   :  { %v19165_v63 = vand.u32 4294901760, %v7410_v31  ;;  %v19167_v51 = vand.u32 4294901760, %v7440_v30  ;;  %v19169_v6 = vand.u32 4294901760, %v7413_v25  ;;  %v7443_v34 = vsel %vm7004_vm12, %v7352_v14, 0 }
 0x7da   :  { %v19172_v55 = vand.u32 4294901760, %v7443_v34  ;;  %v7416_v43 = vsel %vm7004_vm12, %v7343_v0, 0  ;;  %v7446_v60 = vsel %vm7004_vm12, %v7353_v10, 0  ;;  %v7419_v28 = vsel %vm7004_vm12, %v7344_v16, 0 }
 0x7db   :  { %22204 = vst [vmem:[#allocation63_spill] sm:$0xff] %v19165_v63  ;;  %22205 = vst [vmem:[#allocation110_spill] sm:$0xff] %v19167_v51  ;;  %v19178_v56 = vsub.f32 %v7410_v31, %v19165_v63  ;;  %v19181_v42 = vsub.f32 %v7440_v30, %v19167_v51  ;;  %v19184_v40 = vsub.f32 %v7413_v25, %v19169_v6  ;;  %v19186_v48 = vand.u32 4294901760, %v7416_v43 }
 0x7dc   :  { %22206 = vst [vmem:[#allocation59_spill] sm:$0xff] %v19169_v6  ;;  %22207 = vst [vmem:[#allocation80_spill] sm:$0xff] %v19172_v55  ;;  %v19189_v14 = vsub.f32 %v7443_v34, %v19172_v55  ;;  %v19191_v24 = vand.u32 4294901760, %v7446_v60  ;;  %v19193_v0 = vand.u32 4294901760, %v7419_v28  ;;  %v7449_v10 = vsel %vm7004_vm12, %v7354_v8, 0 }
 0x7dd   :  { %22208 = vst [vmem:[#allocation102_spill] sm:$0xff] %v19178_v56  ;;  %22209 = vst [vmem:[#allocation64_spill] sm:$0xff] %v19181_v42  ;;  %v20973_v16 = vand.u32 4294901760, %v19178_v56  ;;  %v20978_v31 = vand.u32 4294901760, %v19181_v42  ;;  %v19200_v25 = vsub.f32 %v7416_v43, %v19186_v48  ;;  %v19209_v55 = vand.u32 4294901760, %v7449_v10 }
 0x7de   :  { %22210 = vst [vmem:[#allocation122_spill] sm:$0xff] %v19184_v40  ;;  %22211 = vst [vmem:[#allocation20_spill] sm:$0xff] %v19186_v48  ;;  %v19204_v34 = vsub.f32 %v7446_v60, %v19191_v24  ;;  %v19207_v37 = vsub.f32 %v7419_v28, %v19193_v0  ;;  %v22219_v43 = vand.u32 4294901760, %v19184_v40 }
 0x7df   :  { %22212 = vst [vmem:[#allocation76_spill] sm:$0xff] %v19189_v14  ;;  %22213 = vst [vmem:[#allocation101_spill] sm:$0xff] %v19191_v24  ;;  %v7677_v8 = vsub.f32 %v19178_v56, %v20973_v16  ;;  %v7777_v30 = vsub.f32 %v19181_v42, %v20978_v31  ;;  %v20985_v60 = vand.u32 4294901760, %v19200_v25  ;;  %v22220_v24 = vand.u32 4294901760, %v19189_v14 }
 0x7e0   :  { %22214 = vst [vmem:[#allocation129_spill] sm:$0xff] %v19193_v0  ;;  %22215 = vst [vmem:[#allocation82_spill] sm:$0xff] %v19200_v25  ;;  %v7687_v2 = vsub.f32 %v19184_v40, %v22219_v43  ;;  %v20988_v51 = vand.u32 4294901760, %v19204_v34  ;;  %v20991_v22 = vand.u32 4294901760, %v19207_v37  ;;  %v19227_v16 = vsub.f32 %v7449_v10, %v19209_v55 }
 0x7e1   :  { %22216 = vst [vmem:[#allocation24_spill] sm:$0xff] %v19204_v34  ;;  %22217 = vst [vmem:[#allocation57_spill] sm:$0xff] %v19207_v37  ;;  %v7787_v28 = vsub.f32 %v19189_v14, %v22220_v24  ;;  %v7678_v56 = vand.u32 4294901760, %v7677_v8  ;;  %v7778_v0 = vand.u32 4294901760, %v7777_v30  ;;  %v7697_v43 = vsub.f32 %v19200_v25, %v20985_v60  ;;  %v22222_v30 = vld [vmem:[#allocation123_spill] sm:$0xff]  ;;  %v22223_v8 = vld [vmem:[#allocation94_spill] sm:$0xff] }
 0x7e2   :  { %22218 = vst [vmem:[#allocation70_spill] sm:$0xff] %v19209_v55  ;;  %22221 = vst [vmem:[#allocation112_spill] sm:$0xff] %v19227_v16  ;;  %v7688_v31 = vand.u32 4294901760, %v7687_v2  ;;  %v7797_v40 = vsub.f32 %v19204_v34, %v20988_v51  ;;  %v7707_v24 = vsub.f32 %v19207_v37, %v20991_v22  ;;  %v20992_v14 = vand.u32 4294901760, %v19227_v16 }
 0x7e3   :  { %v7788_v42 = vand.u32 4294901760, %v7787_v28  ;;  %12494 = vmatprep.mubr.f32.mxu0 %v7678_v56  ;;  %12509 = vmatprep.mubr.f32.mxu1 %v7778_v0  ;;  %v7698_v10 = vand.u32 4294901760, %v7697_v43  ;;  %v7345_v2 = vmul.f32 %v19135_v38, %v22222_v30  ;;  %v7355_v60 = vmul.f32 %v19135_v38, %v22223_v8  ;;  %v22224_v28 = vld [vmem:[#allocation108_spill] sm:$0xff]  ;;  %v22225_v56 = vld [vmem:[#allocation98_spill] sm:$0xff] }
 0x7e4   :  { %v7346_v25 = vmul.f32 %v19135_v38, %v22224_v28  ;;  %12495 = vmatmul.mubr.f32.vlgmr.msra.gmra.mrb[64].mxu0 %v7688_v31  ;;  %v7798_v51 = vand.u32 4294901760, %v7797_v40  ;;  %v7708_v34 = vand.u32 4294901760, %v7707_v24  ;;  %v7807_v22 = vsub.f32 %v19227_v16, %v20992_v14  ;;  %v22226_v31 = vld [vmem:[#allocation119_spill] sm:$0xff] }
 0x7e5   :  { %12510 = vmatmul.mubr.f32.vlgmr.msra.gmra.mrb[4].mxu1 %v7788_v42  ;;  %v7356_v0 = vmul.f32 %v19135_v38, %v22225_v56  ;;  %12497 = vmatprep.mubr.f32.mxu0 %v7698_v10  ;;  %v7422_v43 = vsel %vm7004_vm12, %v7345_v2, 0  ;;  %v7452_v30 = vsel %vm7004_vm12, %v7355_v60, 0  ;;  %v7347_v42 = vmul.f32 %v19135_v38, %v22226_v31  ;;  %v22230_v60 = vld [vmem:[#allocation111_spill] sm:$0xff]  ;;  %v22231_v2 = vld [vmem:[#allocation14_spill] sm:$0xff] }
 0x7e6   :  { %13217 = vmatpush3.bf16.msra.mxu1 %v19092_v54  ;;  %v7425_v8 = vsel %vm7004_vm12, %v7346_v25, 0  ;;  %12512 = vmatprep.mubr.f32.mxu1 %v7798_v51  ;;  %v7808_v40 = vand.u32 4294901760, %v7807_v22  ;;  %v19256_v24 = vand.u32 4294901760, %v7422_v43  ;;  %v19258_v28 = vand.u32 4294901760, %v7452_v30 }
 0x7e7   :  { %v19260_v14 = vand.u32 4294901760, %v7425_v8  ;;  %13219 = vmatprep.subr.bf16.mxu1 %v19137_v13  ;;  %v7455_v54 = vsel %vm7004_vm12, %v7356_v0, 0  ;;  %v7428_v10 = vsel %vm7004_vm12, %v7347_v42, 0  ;;  %v7357_v25 = vmul.f32 %v19135_v38, %v22230_v60 }
 0x7e8   :  { %22227 = vst [vmem:[#allocation96_spill] sm:$0xff] %v19256_v24  ;;  %22228 = vst [vmem:[#allocation38_spill] sm:$0xff] %v19258_v28  ;;  %v7348_v56 = vmul.f32 %v19135_v38, %v22231_v2  ;;  %12498 = vmatmul.mubr.f32.gmra.mrb[66].mxu0 %v7708_v34  ;;  %v19270_v22 = vsub.f32 %v7422_v43, %v19256_v24  ;;  %v19273_v51 = vsub.f32 %v7452_v30, %v19258_v28  ;;  %v22237_v2 = vld [vmem:[#allocation113_spill] sm:$0xff] }
 0x7e9   :  { %22229 = vst [vmem:[#allocation73_spill] sm:$0xff] %v19260_v14  ;;  %12513 = vmatmul.mubr.f32.gmra.mrb[6].mxu1 %v7808_v40  ;;  %v19276_v31 = vsub.f32 %v7425_v8, %v19260_v14  ;;  %v19278_v0 = vand.u32 4294901760, %v7455_v54  ;;  %v19280_v42 = vand.u32 4294901760, %v7428_v10  ;;  %v7458_v60 = vsel %vm7004_vm12, %v7357_v25, 0 }
 0x7ea   :  { %22232 = vst [vmem:[#allocation95_spill] sm:$0xff] %v19270_v22  ;;  %22233 = vst [vmem:[#allocation16_spill] sm:$0xff] %v19273_v51  ;;  %v7431_v16 = vsel %vm7004_vm12, %v7348_v56, 0  ;;  %v7358_v34 = vmul.f32 %v19135_v38, %v22237_v2  ;;  %13221 = vmatpush3.bf16.msra.mxu1 %v19137_v13  ;;  %v21005_v43 = vand.u32 4294901760, %v19270_v22  ;;  %v21006_v30 = vand.u32 4294901760, %v19273_v51 }
 0x7eb   :  { %22234 = vst [vmem:[#allocation79_spill] sm:$0xff] %v19276_v31  ;;  %22235 = vst [vmem:[#allocation51_spill] sm:$0xff] %v19278_v0  ;;  %v21009_v8 = vand.u32 4294901760, %v19276_v31  ;;  %v19291_v40 = vsub.f32 %v7455_v54, %v19278_v0  ;;  %13223 = vmatprep.subr.bf16.mxu1 %v19139_v50  ;;  %v19295_v25 = vsub.f32 %v7428_v10, %v19280_v42  ;;  %v19297_v56 = vand.u32 4294901760, %v7458_v60 }
 0x7ec   :  { %22236 = vst [vmem:[#allocation99_spill] sm:$0xff] %v19280_v42  ;;  %v19299_v37 = vand.u32 4294901760, %v7431_v16  ;;  %v7461_v13 = vsel %vm7004_vm12, %v7358_v34, 0  ;;  %v7717_v2 = vsub.f32 %v19270_v22, %v21005_v43  ;;  %v7817_v54 = vsub.f32 %v19273_v51, %v21006_v30 }
 0x7ed   :  { %22238 = vst [vmem:[#allocation131_spill] sm:$0xff] %v19291_v40  ;;  %22239 = vst [vmem:[#allocation47_spill] sm:$0xff] %v19295_v25  ;;  %v7727_v0 = vsub.f32 %v19276_v31, %v21009_v8  ;;  %v21014_v10 = vand.u32 4294901760, %v19291_v40  ;;  %v21019_v28 = vand.u32 4294901760, %v19295_v25  ;;  %v19314_v55 = vsub.f32 %v7458_v60, %v19297_v56 }
 0x7ee   :  { %22240 = vst [vmem:[#allocation56_spill] sm:$0xff] %v19297_v56  ;;  %22241 = vst [vmem:[#allocation49_spill] sm:$0xff] %v19299_v37  ;;  %v19317_v34 = vsub.f32 %v7431_v16, %v19299_v37  ;;  %v19319_v42 = vand.u32 4294901760, %v7461_v13  ;;  %13225 = vmatpush3.bf16.msra.mxu1 %v19139_v50  ;;  %v7718_v43 = vand.u32 4294901760, %v7717_v2  ;;  %v7818_v30 = vand.u32 4294901760, %v7817_v54  ;;  %v22247_v54 = vld [vmem:[#allocation17_spill] sm:$0xff] }
 0x7ef   :  { %22242 = vst [vmem:[#allocation45_spill] sm:$0xff] %v19314_v55  ;;  %v7728_v51 = vand.u32 4294901760, %v7727_v0  ;;  %v7827_v8 = vsub.f32 %v19291_v40, %v21014_v10  ;;  %13227 = vmatprep.subr.bf16.mxu1 %v19141_v29  ;;  %v7737_v60 = vsub.f32 %v19295_v25, %v21019_v28  ;;  %v21020_v16 = vand.u32 4294901760, %v19314_v55  ;;  %v22246_v0 = vld [vmem:[#allocation31_spill] sm:$0xff]  ;;  %v22248_v40 = vld [vmem:[#allocation62_spill] sm:$0xff] }
 0x7f0   :  { %22243 = vst [vmem:[#allocation33_spill] sm:$0xff] %v19317_v34  ;;  %22244 = vst [vmem:[#allocation42_spill] sm:$0xff] %v19319_v42  ;;  %v19332_v22 = vsub.f32 %v7461_v13, %v19319_v42  ;;  %12500 = vmatprep.mubr.f32.mxu0 %v7718_v43  ;;  %12515 = vmatprep.mubr.f32.mxu1 %v7818_v30  ;;  %v7349_v2 = vmul.f32 %v19135_v38, %v22246_v0  ;;  %v22249_v13 = vand.u32 4294901760, %v19317_v34 }
 0x7f1   :  { %v7828_v50 = vand.u32 4294901760, %v7827_v8  ;;  %v7359_v10 = vmul.f32 %v19135_v38, %v22247_v54  ;;  %v7350_v56 = vmul.f32 %v19135_v38, %v22248_v40  ;;  %12501 = vmatmul.mubr.f32.gmra.mrb[68].mxu0 %v7728_v51  ;;  %v7738_v28 = vand.u32 4294901760, %v7737_v60  ;;  %v22250_v40 = vld [vmem:[#allocation34_spill] sm:$0xff] }
 0x7f2   :  { %22245 = vst [vmem:[#allocation66_spill] sm:$0xff] %v19332_v22  ;;  %v7837_v31 = vsub.f32 %v19314_v55, %v21020_v16  ;;  %v7747_v43 = vsub.f32 %v19317_v34, %v22249_v13  ;;  %v21023_v30 = vand.u32 4294901760, %v19332_v22  ;;  %13229 = vmatpush3.bf16.msra.mxu1 %v19141_v29  ;;  %v7434_v8 = vsel %vm7004_vm12, %v7349_v2, 0  ;;  %v22254_v2 = vld [vmem:[#allocation18_spill] sm:$0xff] }
 0x7f3   :  { %12516 = vmatmul.mubr.f32.gmra.mrb[8].mxu1 %v7828_v50  ;;  %v7464_v0 = vsel %vm7004_vm12, %v7359_v10, 0  ;;  %v7437_v51 = vsel %vm7004_vm12, %v7350_v56, 0  ;;  %v7360_v60 = vmul.f32 %v19135_v38, %v22250_v40  ;;  %12503 = vmatprep.mubr.f32.mxu0 %v7738_v28  ;;  %v19356_v55 = vand.u32 4294901760, %v7434_v8  ;;  %v22257_v40 = vld [vmem:[#allocation37_spill] sm:$0xff] }
 0x7f4   :  { %v7838_v54 = vand.u32 4294901760, %v7837_v31  ;;  %v7748_v16 = vand.u32 4294901760, %v7747_v43  ;;  %v7847_v13 = vsub.f32 %v19332_v22, %v21023_v30  ;;  %v19358_v29 = vand.u32 4294901760, %v7464_v0 }
 0x7f5   :  { %22251 = vst [vmem:[#allocation134_spill] sm:$0xff] %v19356_v55  ;;  %v19360_v50 = vand.u32 4294901760, %v7437_v51  ;;  %v7467_v10 = vsel %vm7004_vm12, %v7360_v60, 0  ;;  %v7361_v56 = vmul.f32 %v19135_v38, %v22254_v2  ;;  %v19366_v31 = vsub.f32 %v7434_v8, %v19356_v55  ;;  %v22260_v2 = vld [vmem:[#allocation40_spill] sm:$0xff] }
 0x7f6   :  { %22252 = vst [vmem:[#allocation90_spill] sm:$0xff] %v19358_v29  ;;  %12518 = vmatprep.mubr.f32.mxu1 %v7838_v54  ;;  %12504 = vmatmul.mubr.f32.gmra.mrb[70].mxu0 %v7748_v16  ;;  %v7848_v28 = vand.u32 4294901760, %v7847_v13  ;;  %v19368_v43 = vand.u32 4294901760, %v7467_v10  ;;  %v7362_v30 = vmul.f32 %v19135_v38, %v22257_v40  ;;  %v19373_v22 = vsub.f32 %v7464_v0, %v19358_v29 }
 0x7f7   :  { %22253 = vst [vmem:[#allocation135_spill] sm:$0xff] %v19360_v50  ;;  %22255 = vst [vmem:[#allocation74_spill] sm:$0xff] %v19366_v31  ;;  %v19376_v34 = vsub.f32 %v7437_v51, %v19360_v50  ;;  %v7470_v60 = vsel %vm7004_vm12, %v7361_v56, 0  ;;  %v7363_v16 = vmul.f32 %v19135_v38, %v22260_v2  ;;  %v21034_v8 = vand.u32 4294901760, %v19366_v31 }
 0x7f8   :  { %22256 = vst [vmem:[#allocation88_spill] sm:$0xff] %v19368_v43  ;;  %22258 = vst [vmem:[#allocation41_spill] sm:$0xff] %v19373_v22  ;;  %12519 = vmatmul.mubr.f32.gmra.mrb[10].mxu1 %v7848_v28  ;;  %v19383_v54 = vsub.f32 %v7467_v10, %v19368_v43  ;;  %v19385_v13 = vand.u32 4294901760, %v7470_v60  ;;  %v7473_v40 = vsel %vm7004_vm12, %v7362_v30, 0  ;;  %v21041_v0 = vand.u32 4294901760, %v19373_v22 }
 0x7f9   :  { %22259 = vst [vmem:[#allocation28_spill] sm:$0xff] %v19376_v34  ;;  %v21044_v51 = vand.u32 4294901760, %v19376_v34  ;;  %v19390_v25 = vand.u32 4294901760, %v7473_v40  ;;  %v7476_v56 = vsel %vm7004_vm12, %v7363_v16, 0  ;;  %v7757_v28 = vsub.f32 %v19366_v31, %v21034_v8 }
 0x7fa   :  { %22261 = vst [vmem:[#allocation8_spill] sm:$0xff] %v19383_v54  ;;  %22262 = vst [vmem:[#allocation53_spill] sm:$0xff] %v19385_v13  ;;  %v19398_v10 = vsub.f32 %v7470_v60, %v19385_v13  ;;  %v19400_v43 = vand.u32 4294901760, %v7476_v56  ;;  %v7857_v30 = vsub.f32 %v19373_v22, %v21041_v0  ;;  %v7364_v8 = vmul.f32 %v19135_v38, %v22179_v45 }
 0x7fb   :  { %22263 = vst [vmem:[#allocation71_spill] sm:$0xff] %v19390_v25  ;;  %v7767_v29 = vsub.f32 %v19376_v34, %v21044_v51  ;;  %v19409_v16 = vsub.f32 %v7473_v40, %v19390_v25  ;;  %v7758_v2 = vand.u32 4294901760, %v7757_v28  ;;  %v22267_v60 = vand.u32 4294901760, %v19383_v54 }
 0x7fc   :  { %22264 = vst [vmem:[#allocation128_spill] sm:$0xff] %v19398_v10  ;;  %22265 = vst [vmem:[#allocation54_spill] sm:$0xff] %v19400_v43  ;;  %v21048_v13 = vand.u32 4294901760, %v19398_v10  ;;  %v19418_v42 = vsub.f32 %v7476_v56, %v19400_v43  ;;  %v7858_v0 = vand.u32 4294901760, %v7857_v30  ;;  %v7479_v40 = vsel %vm7004_vm12, %v7364_v8, 0 }
 0x7fd   :  { %22266 = vst [vmem:[#allocation117_spill] sm:$0xff] %v19409_v16  ;;  %v7867_v31 = vsub.f32 %v19383_v54, %v22267_v60  ;;  %v7768_v22 = vand.u32 4294901760, %v7767_v29  ;;  %v21047_v51 = vand.u32 4294901760, %v19409_v16  ;;  %12506 = vmatprep.mubr.f32.mxu0 %v7758_v2  ;;  %v19426_v60 = vand.u32 4294901760, %v7479_v40 }
 0x7fe   :  { %22268 = vst [vmem:[#allocation13_spill] sm:$0xff] %v19418_v42  ;;  %v7877_v45 = vsub.f32 %v19398_v10, %v21048_v13  ;;  %v21049_v28 = vand.u32 4294901760, %v19418_v42  ;;  %12521 = vmatprep.mubr.f32.mxu1 %v7858_v0  ;;  %v7365_v56 = vmul.f32 %v19135_v38, %v22180_v47 }
 0x7ff   :  { %v7868_v34 = vand.u32 4294901760, %v7867_v31  ;;  %22269 = vst [vmem:[#allocation26_spill] sm:$0xff] %v19426_v60  ;;  %12507 = vmatmul.mubr.f32.gmra.mrb[72].mxu0 %v7768_v22  ;;  %v7887_v29 = vsub.f32 %v19409_v16, %v21047_v51  ;;  %v7366_v31 = vmul.f32 %v19135_v38, %v18930_v4  ;;  %v19439_v30 = vsub.f32 %v7479_v40, %v19426_v60 }
 0x800   :  { %v7878_v8 = vand.u32 4294901760, %v7877_v45  ;;  %v7897_v2 = vsub.f32 %v19418_v42, %v21049_v28  ;;  %v7367_v22 = vmul.f32 %v19135_v38, %v18933_v12  ;;  %v7482_v51 = vsel %vm7004_vm12, %v7365_v56, 0 }
 0x801   :  { %12522 = vmatmul.mubr.f32.gmra.mrb[12].mxu1 %v7868_v34  ;;  %22270 = vst [vmem:[#allocation87_spill] sm:$0xff] %v19439_v30  ;;  %v7888_v0 = vand.u32 4294901760, %v7887_v29  ;;  %v7485_v47 = vsel %vm7004_vm12, %v7366_v31, 0  ;;  %v7368_v4 = vmul.f32 %v19135_v38, %v22181_v49  ;;  %v21050_v45 = vand.u32 4294901760, %v19439_v30 }
 0x802   :  { %12524 = vmatprep.mubr.f32.mxu1 %v7878_v8  ;;  %v7898_v34 = vand.u32 4294901760, %v7897_v2  ;;  %v19448_v13 = vand.u32 4294901760, %v7482_v51  ;;  %v19450_v28 = vand.u32 4294901760, %v7485_v47  ;;  %v7488_v40 = vsel %vm7004_vm12, %v7367_v22, 0 }
 0x803   :  { %v7491_v12 = vsel %vm7004_vm12, %v7368_v4, 0  ;;  %v7369_v29 = vmul.f32 %v19135_v38, %v22182_v19  ;;  %v7370_v56 = vmul.f32 %v19135_v38, %v18957_v41  ;;  %v7907_v49 = vsub.f32 %v19439_v30, %v21050_v45 }
 0x804   :  { %22271 = vst [vmem:[#allocation115_spill] sm:$0xff] %v19448_v13  ;;  %22272 = vst [vmem:[#allocation125_spill] sm:$0xff] %v19450_v28  ;;  %v19462_v31 = vsub.f32 %v7482_v51, %v19448_v13  ;;  %v19465_v8 = vsub.f32 %v7485_v47, %v19450_v28  ;;  %v19467_v2 = vand.u32 4294901760, %v7488_v40  ;;  %v19469_v22 = vand.u32 4294901760, %v7491_v12 }
 0x805   :  { %12525 = vmatmul.mubr.f32.gmra.mrb[14].mxu1 %v7888_v0  ;;  %v7494_v19 = vsel %vm7004_vm12, %v7369_v29, 0  ;;  %v7497_v41 = vsel %vm7004_vm12, %v7370_v56, 0  ;;  %v7371_v0 = vmul.f32 %v19135_v38, %v18965_v20  ;;  %v7908_v4 = vand.u32 4294901760, %v7907_v49 }
 0x806   :  { %22273 = vst [vmem:[#allocation105_spill] sm:$0xff] %v19462_v31  ;;  %22274 = vst [vmem:[#allocation120_spill] sm:$0xff] %v19465_v8  ;;  %12527 = vmatprep.mubr.f32.mxu1 %v7898_v34  ;;  %v21057_v45 = vand.u32 4294901760, %v19462_v31  ;;  %v21060_v51 = vand.u32 4294901760, %v19465_v8  ;;  %v19478_v47 = vsub.f32 %v7488_v40, %v19467_v2  ;;  %v19481_v30 = vsub.f32 %v7491_v12, %v19469_v22 }
 0x807   :  { %22275 = vst [vmem:[#allocation121_spill] sm:$0xff] %v19467_v2  ;;  %22276 = vst [vmem:[#allocation126_spill] sm:$0xff] %v19469_v22  ;;  %v19483_v34 = vand.u32 4294901760, %v7494_v19  ;;  %v19485_v42 = vand.u32 4294901760, %v7497_v41  ;;  %v7500_v29 = vsel %vm7004_vm12, %v7371_v0, 0 }
 0x808   :  { %22277 = vst [vmem:[#allocation22_spill] sm:$0xff] %v19478_v47  ;;  %22278 = vst [vmem:[#allocation100_spill] sm:$0xff] %v19481_v30  ;;  %v7917_v20 = vsub.f32 %v19462_v31, %v21057_v45  ;;  %v7927_v56 = vsub.f32 %v19465_v8, %v21060_v51  ;;  %v21068_v40 = vand.u32 4294901760, %v19478_v47  ;;  %v19495_v49 = vand.u32 4294901760, %v7500_v29 }
 0x809   :  { %22279 = vst [vmem:[#allocation72_spill] sm:$0xff] %v19483_v34  ;;  %22280 = vst [vmem:[#allocation52_spill] sm:$0xff] %v19485_v42  ;;  %12528 = vmatmul.mubr.f32.gmra.mrb[16].mxu1 %v7908_v4  ;;  %v21067_v12 = vand.u32 4294901760, %v19481_v30  ;;  %v19499_v16 = vsub.f32 %v7494_v19, %v19483_v34  ;;  %v19502_v0 = vsub.f32 %v7497_v41, %v19485_v42 }
 0x80a   :  { %22281 = vst [vmem:[#allocation124_spill] sm:$0xff] %v19495_v49  ;;  %v7372_v4 = vmul.f32 %v19135_v38, %v18972_v18  ;;  %v7918_v45 = vand.u32 4294901760, %v7917_v20  ;;  %v7928_v31 = vand.u32 4294901760, %v7927_v56  ;;  %v7937_v51 = vsub.f32 %v19478_v47, %v21068_v40 }
 0x80b   :  { %22282 = vst [vmem:[#allocation75_spill] sm:$0xff] %v19499_v16  ;;  %22283 = vst [vmem:[#allocation58_spill] sm:$0xff] %v19502_v0  ;;  %v19510_v8 = vsub.f32 %v7500_v29, %v19495_v49  ;;  %v7947_v19 = vsub.f32 %v19481_v30, %v21067_v12  ;;  %v21069_v10 = vand.u32 4294901760, %v19499_v16  ;;  %v21072_v41 = vand.u32 4294901760, %v19502_v0 }
 0x80c   :  { %v7503_v54 = vsel %vm7004_vm12, %v7372_v4, 0  ;;  %12530 = vmatprep.mubr.f32.mxu1 %v7918_v45  ;;  %v7938_v18 = vand.u32 4294901760, %v7937_v51  ;;  %v7373_v29 = vmul.f32 %v19144_v61, %v18686_v32  ;;  %v7374_v45 = vmul.f32 %v19144_v61, %v18690_v33 }
 0x80d   :  { %22284 = vst [vmem:[#allocation97_spill] sm:$0xff] %v19510_v8  ;;  %v21073_v38 = vand.u32 4294901760, %v19510_v8  ;;  %v19519_v20 = vand.u32 4294901760, %v7503_v54  ;;  %12531 = vmatmul.mubr.f32.gmra.mrb[18].mxu1 %v7928_v31  ;;  %v7957_v56 = vsub.f32 %v19499_v16, %v21069_v10  ;;  %v7967_v12 = vsub.f32 %v19502_v0, %v21072_v41 }
 0x80e   :  { %12533 = vmatprep.mubr.f32.mxu1 %v7938_v18  ;;  %v7948_v51 = vand.u32 4294901760, %v7947_v19  ;;  %v7506_v40 = vsel %vm7004_vm12, %v7373_v29, 0  ;;  %v7375_v32 = vmul.f32 %v19144_v61, %v18676_v52  ;;  %v7509_v41 = vsel %vm7004_vm12, %v7374_v45, 0 }
 0x80f   :  { %22285 = vst [vmem:[#allocation77_spill] sm:$0xff] %v19519_v20  ;;  %v19532_v4 = vsub.f32 %v7503_v54, %v19519_v20  ;;  %v7958_v31 = vand.u32 4294901760, %v7957_v56  ;;  %v7977_v10 = vsub.f32 %v19510_v8, %v21073_v38  ;;  %v19540_v16 = vand.u32 4294901760, %v7506_v40  ;;  %v22291_v56 = vld [vmem:[#allocation43_spill] sm:$0xff]  ;;  %v22292_v8 = vld [vmem:[#allocation60_spill] sm:$0xff] }
 0x810   :  { %v7968_v33 = vand.u32 4294901760, %v7967_v12  ;;  %v19544_v18 = vand.u32 4294901760, %v7509_v41  ;;  %v7512_v54 = vsel %vm7004_vm12, %v7375_v32, 0  ;;  %v7376_v38 = vmul.f32 %v19144_v61, %v22291_v56  ;;  %v22295_v32 = vld [vmem:[#allocation69_spill] sm:$0xff] }
 0x811   :  { %22286 = vst [vmem:[#allocation89_spill] sm:$0xff] %v19532_v4  ;;  %22287 = vst [vmem:[#allocation133_spill] sm:$0xff] %v19540_v16  ;;  %v21084_v19 = vand.u32 4294901760, %v19532_v4  ;;  %12534 = vmatmul.mubr.f32.gmra.mrb[20].mxu1 %v7948_v51  ;;  %v19548_v29 = vsub.f32 %v7506_v40, %v19540_v16  ;;  %v19550_v52 = vand.u32 4294901760, %v7512_v54  ;;  %v7377_v0 = vmul.f32 %v19144_v61, %v22292_v8  ;;  %v22294_v51 = vld [vmem:[#allocation67_spill] sm:$0xff] }
 0x812   :  { %22288 = vst [vmem:[#allocation114_spill] sm:$0xff] %v19544_v18  ;;  %12536 = vmatprep.mubr.f32.mxu1 %v7958_v31  ;;  %v19560_v45 = vsub.f32 %v7509_v41, %v19544_v18  ;;  %v7378_v40 = vmul.f32 %v19144_v61, %v22294_v51  ;;  %v7379_v30 = vmul.f32 %v19144_v61, %v22295_v32  ;;  %v7515_v8 = vsel %vm7004_vm12, %v7376_v38, 0 }
 0x813   :  { %22289 = vst [vmem:[#allocation91_spill] sm:$0xff] %v19548_v29  ;;  %22290 = vst [vmem:[#allocation132_spill] sm:$0xff] %v19550_v52  ;;  %v7987_v12 = vsub.f32 %v19532_v4, %v21084_v19  ;;  %v21089_v47 = vand.u32 4294901760, %v19548_v29  ;;  %v19568_v56 = vsub.f32 %v7512_v54, %v19550_v52  ;;  %v7518_v31 = vsel %vm7004_vm12, %v7377_v0, 0 }
 0x814   :  { %22293 = vst [vmem:[#allocation27_spill] sm:$0xff] %v19560_v45  ;;  %v7978_v16 = vand.u32 4294901760, %v7977_v10  ;;  %v21094_v19 = vand.u32 4294901760, %v19560_v45  ;;  %v19573_v41 = vand.u32 4294901760, %v7515_v8  ;;  %v19575_v4 = vand.u32 4294901760, %v7518_v31 }
 0x815   :  { %22296 = vst [vmem:[#allocation92_spill] sm:$0xff] %v19568_v56  ;;  %12537 = vmatmul.mubr.f32.gmra.mrb[22].mxu1 %v7968_v33  ;;  %v7997_v51 = vsub.f32 %v19548_v29, %v21089_v47  ;;  %v7521_v54 = vsel %vm7004_vm12, %v7378_v40, 0  ;;  %v7524_v38 = vsel %vm7004_vm12, %v7379_v30, 0  ;;  %v7988_v47 = vand.u32 4294901760, %v7987_v12  ;;  %v22303_v40 = vld [vmem:[#allocation130_spill] sm:$0xff] }
 0x816   :  { %22297 = vst [vmem:[#allocation107_spill] sm:$0xff] %v19573_v41  ;;  %22298 = vst [vmem:[#allocation48_spill] sm:$0xff] %v19575_v4  ;;  %12539 = vmatprep.mubr.f32.mxu1 %v7978_v16  ;;  %v8007_v10 = vsub.f32 %v19560_v45, %v21094_v19  ;;  %v19587_v0 = vsub.f32 %v7515_v8, %v19573_v41  ;;  %v19590_v33 = vsub.f32 %v7518_v31, %v19575_v4  ;;  %v22307_v4 = vld [vmem:[#allocation104_spill] sm:$0xff] }
 0x817   :  { %v19592_v52 = vand.u32 4294901760, %v7521_v54  ;;  %v7998_v29 = vand.u32 4294901760, %v7997_v51  ;;  %v19594_v32 = vand.u32 4294901760, %v7524_v38  ;;  %v7380_v30 = vmul.f32 %v19144_v61, %v22303_v40 }
 0x818   :  { %22299 = vst [vmem:[#allocation109_spill] sm:$0xff] %v19587_v0  ;;  %22300 = vst [vmem:[#allocation136_spill] sm:$0xff] %v19590_v33  ;;  %v22304_v16 = vand.u32 4294901760, %v19568_v56  ;;  %v21101_v19 = vand.u32 4294901760, %v19587_v0  ;;  %v21104_v8 = vand.u32 4294901760, %v19590_v33  ;;  %v8008_v45 = vand.u32 4294901760, %v8007_v10 }
 0x819   :  { %22301 = vst [vmem:[#allocation21_spill] sm:$0xff] %v19592_v52  ;;  %22302 = vst [vmem:[#allocation19_spill] sm:$0xff] %v19594_v32  ;;  %v19604_v31 = vsub.f32 %v7521_v54, %v19592_v52  ;;  %12540 = vmatmul.mubr.f32.gmra.mrb[24].mxu1 %v7988_v47  ;;  %v19607_v12 = vsub.f32 %v7524_v38, %v19594_v32  ;;  %v7527_v51 = vsel %vm7004_vm12, %v7380_v30, 0 }
 0x81a   :  { %v8017_v18 = vsub.f32 %v19568_v56, %v22304_v16  ;;  %v7381_v40 = vmul.f32 %v19144_v61, %v22307_v4  ;;  %12542 = vmatprep.mubr.f32.mxu1 %v7998_v29  ;;  %v8027_v16 = vsub.f32 %v19587_v0, %v21101_v19  ;;  %v8037_v54 = vsub.f32 %v19590_v33, %v21104_v8 }
 0x81b   :  { %22305 = vst [vmem:[#allocation103_spill] sm:$0xff] %v19604_v31  ;;  %22306 = vst [vmem:[#allocation23_spill] sm:$0xff] %v19607_v12  ;;  %v19619_v10 = vand.u32 4294901760, %v7527_v51  ;;  %v7382_v4 = vmul.f32 %v19144_v61, %v22140_v62  ;;  %v7383_v29 = vmul.f32 %v19144_v61, %v18799_v57 }
 0x81c   :  { %v7530_v30 = vsel %vm7004_vm12, %v7381_v40, 0  ;;  %v8018_v56 = vand.u32 4294901760, %v8017_v18  ;;  %v8028_v19 = vand.u32 4294901760, %v8027_v16  ;;  %v8038_v8 = vand.u32 4294901760, %v8037_v54 }
 0x81d   :  { %22308 = vst [vmem:[#allocation35_spill] sm:$0xff] %v19619_v10  ;;  %v19628_v0 = vsub.f32 %v7527_v51, %v19619_v10  ;;  %12543 = vmatmul.mubr.f32.gmra.mrb[26].mxu1 %v8008_v45  ;;  %v19630_v47 = vand.u32 4294901760, %v7530_v30  ;;  %v7533_v33 = vsel %vm7004_vm12, %v7382_v4, 0  ;;  %v7536_v38 = vsel %vm7004_vm12, %v7383_v29, 0 }
 0x81e   :  { %12545 = vmatprep.mubr.f32.mxu1 %v8018_v56  ;;  %v22311_v40 = vand.u32 4294901760, %v19604_v31  ;;  %v19638_v18 = vand.u32 4294901760, %v7533_v33  ;;  %v19640_v16 = vand.u32 4294901760, %v7536_v38  ;;  %v22314_v45 = vand.u32 4294901760, %v19607_v12 }
 0x81f   :  { %22309 = vst [vmem:[#allocation55_spill] sm:$0xff] %v19628_v0  ;;  %22310 = vst [vmem:[#allocation29_spill] sm:$0xff] %v19630_v47  ;;  %v21111_v57 = vand.u32 4294901760, %v19628_v0  ;;  %v19646_v54 = vsub.f32 %v7530_v30, %v19630_v47  ;;  %v7384_v56 = vmul.f32 %v19144_v61, %v18822_v21  ;;  %v7385_v4 = vmul.f32 %v19144_v61, %v18827_v9 }
 0x820   :  { %v8047_v62 = vsub.f32 %v19604_v31, %v22311_v40  ;;  %22312 = vst [vmem:[#allocation46_spill] sm:$0xff] %v19638_v18  ;;  %22313 = vst [vmem:[#allocation118_spill] sm:$0xff] %v19640_v16  ;;  %v8057_v51 = vsub.f32 %v19607_v12, %v22314_v45  ;;  %v19656_v40 = vsub.f32 %v7533_v33, %v19638_v18 }
 0x821   :  { %22315 = vst [vmem:[#allocation44_spill] sm:$0xff] %v19646_v54  ;;  %v8067_v29 = vsub.f32 %v19628_v0, %v21111_v57  ;;  %v19659_v31 = vsub.f32 %v7536_v38, %v19640_v16  ;;  %v7386_v30 = vmul.f32 %v19144_v61, %v18830_v35  ;;  %12546 = vmatmul.mubr.f32.gmra.mrb[28].mxu1 %v8028_v19  ;;  %v21116_v45 = vand.u32 4294901760, %v19646_v54 }
 0x822   :  { %22316 = vst [vmem:[#allocation50_spill] sm:$0xff] %v19656_v40  ;;  %v7539_v21 = vsel %vm7004_vm12, %v7384_v56, 0  ;;  %v7542_v9 = vsel %vm7004_vm12, %v7385_v4, 0  ;;  %v7387_v12 = vmul.f32 %v19144_v61, %v18832_v5  ;;  %12548 = vmatprep.mubr.f32.mxu1 %v8038_v8  ;;  %v8048_v57 = vand.u32 4294901760, %v8047_v62 }
 0x823   :  { %22317 = vst [vmem:[#allocation93_spill] sm:$0xff] %v19659_v31  ;;  %v19670_v0 = vand.u32 4294901760, %v7539_v21  ;;  %v8077_v35 = vsub.f32 %v19646_v54, %v21116_v45  ;;  %v19675_v19 = vand.u32 4294901760, %v7542_v9  ;;  %v7545_v56 = vsel %vm7004_vm12, %v7386_v30, 0 }
 0x824   :  { %v7548_v4 = vsel %vm7004_vm12, %v7387_v12, 0  ;;  %v8058_v16 = vand.u32 4294901760, %v8057_v51  ;;  %v19682_v8 = vand.u32 4294901760, %v7545_v56  ;;  %v8068_v62 = vand.u32 4294901760, %v8067_v29 }
 0x825   :  { %22318 = vst [vmem:[#allocation106_spill] sm:$0xff] %v19670_v0  ;;  %22319 = vst [vmem:[#allocation9_spill] sm:$0xff] %v19675_v19  ;;  %v19680_v5 = vsub.f32 %v7539_v21, %v19670_v0  ;;  %12549 = vmatmul.mubr.f32.gmra.mrb[30].mxu1 %v8048_v57  ;;  %v19685_v38 = vsub.f32 %v7542_v9, %v19675_v19  ;;  %v19687_v33 = vand.u32 4294901760, %v7548_v4  ;;  %v22324_v30 = vand.u32 4294901760, %v19656_v40 }
 0x826   :  { %22321 = vst [vmem:[#allocation65_spill] sm:$0xff] %v19682_v8  ;;  %v7388_v45 = vmul.f32 %v19144_v61, %v18850_v27  ;;  %12551 = vmatprep.mubr.f32.mxu1 %v8058_v16  ;;  %v22325_v51 = vand.u32 4294901760, %v19659_v31  ;;  %v19699_v29 = vsub.f32 %v7545_v56, %v19682_v8  ;;  %v8078_v9 = vand.u32 4294901760, %v8077_v35 }
 0x827   :  { %22320 = vst [vmem:[#allocation15_spill] sm:$0xff] %v19680_v5  ;;  %22322 = vst [vmem:[#allocation81_spill] sm:$0xff] %v19685_v38  ;;  %v8087_v12 = vsub.f32 %v19656_v40, %v22324_v30  ;;  %v21121_v57 = vand.u32 4294901760, %v19680_v5  ;;  %v21128_v54 = vand.u32 4294901760, %v19685_v38  ;;  %v7389_v27 = vmul.f32 %v19144_v61, %v18854_v44 }
 0x828   :  { %22323 = vst [vmem:[#allocation83_spill] sm:$0xff] %v19687_v33  ;;  %v8097_v21 = vsub.f32 %v19659_v31, %v22325_v51  ;;  %22326 = vst [vmem:[#allocation116_spill] sm:$0xff] %v19699_v29  ;;  %v7551_v19 = vsel %vm7004_vm12, %v7388_v45, 0  ;;  %v19709_v30 = vsub.f32 %v7548_v4, %v19687_v33  ;;  %v7390_v56 = vmul.f32 %v19144_v61, %v18861_v15 }
 0x829   :  { %v8107_v16 = vsub.f32 %v19680_v5, %v21121_v57  ;;  %v19711_v51 = vand.u32 4294901760, %v7551_v19  ;;  %12552 = vmatmul.mubr.f32.gmra.mrb[32].mxu1 %v8068_v62  ;;  %v7554_v45 = vsel %vm7004_vm12, %v7389_v27, 0  ;;  %v7391_v44 = vmul.f32 %v19144_v61, %v18872_v23 }
 0x82a   :  { %22327 = vst [vmem:[#allocation85_spill] sm:$0xff] %v19709_v30  ;;  %12554 = vmatprep.mubr.f32.mxu1 %v8078_v9  ;;  %v8117_v57 = vsub.f32 %v19685_v38, %v21128_v54  ;;  %v19725_v5 = vand.u32 4294901760, %v7554_v45  ;;  %v8088_v31 = vand.u32 4294901760, %v8087_v12  ;;  %v8098_v15 = vand.u32 4294901760, %v8097_v21  ;;  %v22335_v21 = vld [vmem:[#allocation10_spill] sm:$0xff] }
 0x82b   :  { %22328 = vst [vmem:[#allocation123_spill] sm:$0xff] %v19711_v51  ;;  %v19723_v4 = vsub.f32 %v7551_v19, %v19711_v51  ;;  %v7557_v62 = vsel %vm7004_vm12, %v7390_v56, 0  ;;  %v7560_v35 = vsel %vm7004_vm12, %v7391_v44, 0  ;;  %v8108_v27 = vand.u32 4294901760, %v8107_v16 }
 0x82c   :  { %22330 = vst [vmem:[#allocation108_spill] sm:$0xff] %v19725_v5  ;;  %v19731_v23 = vsub.f32 %v7554_v45, %v19725_v5  ;;  %v19733_v9 = vand.u32 4294901760, %v7557_v62  ;;  %v22333_v19 = vand.u32 4294901760, %v19699_v29  ;;  %v19738_v38 = vand.u32 4294901760, %v7560_v35  ;;  %v22339_v5 = vld [vmem:[#allocation68_spill] sm:$0xff] }
 0x82d   :  { %22329 = vst [vmem:[#allocation94_spill] sm:$0xff] %v19723_v4  ;;  %12555 = vmatmul.mubr.f32.gmra.mrb[34].mxu1 %v8088_v31  ;;  %v7392_v12 = vmul.f32 %v19144_v61, %v18875_v46  ;;  %v7393_v16 = vmul.f32 %v19144_v61, %v22335_v21  ;;  %v8118_v56 = vand.u32 4294901760, %v8117_v57  ;;  %v22337_v31 = vld [vmem:[#allocation61_spill] sm:$0xff]  ;;  %v7395_v21 = vmul.f32 %v19144_v61, %v22339_v5 }
 0x82e   :  { %22331 = vst [vmem:[#allocation98_spill] sm:$0xff] %v19731_v23  ;;  %22332 = vst [vmem:[#allocation119_spill] sm:$0xff] %v19733_v9  ;;  %v8127_v54 = vsub.f32 %v19699_v29, %v22333_v19  ;;  %12557 = vmatprep.mubr.f32.mxu1 %v8098_v15  ;;  %v19746_v44 = vsub.f32 %v7557_v62, %v19733_v9  ;;  %v7394_v40 = vmul.f32 %v19144_v61, %v22337_v31 }
 0x82f   :  { %22334 = vst [vmem:[#allocation111_spill] sm:$0xff] %v19738_v38  ;;  %v19751_v19 = vsub.f32 %v7560_v35, %v19738_v38  ;;  %v7563_v29 = vsel %vm7004_vm12, %v7392_v12, 0  ;;  %v7566_v46 = vsel %vm7004_vm12, %v7393_v16, 0  ;;  %v22340_v57 = vand.u32 4294901760, %v19709_v30 }
 0x830   :  { %22336 = vst [vmem:[#allocation14_spill] sm:$0xff] %v19746_v44  ;;  %v19762_v9 = vand.u32 4294901760, %v7563_v29  ;;  %v19765_v31 = vand.u32 4294901760, %v7566_v46  ;;  %v7569_v12 = vsel %vm7004_vm12, %v7394_v40, 0  ;;  %v7572_v16 = vsel %vm7004_vm12, %v7395_v21, 0 }
 0x831   :  { %22338 = vst [vmem:[#allocation113_spill] sm:$0xff] %v19751_v19  ;;  %v8137_v15 = vsub.f32 %v19709_v30, %v22340_v57  ;;  %12558 = vmatmul.mubr.f32.gmra.mrb[36].mxu1 %v8108_v27  ;;  %v8128_v5 = vand.u32 4294901760, %v8127_v54  ;;  %v19769_v38 = vand.u32 4294901760, %v7569_v12  ;;  %v22344_v57 = vand.u32 4294901760, %v19723_v4 }
 0x832   :  { %22341 = vst [vmem:[#allocation31_spill] sm:$0xff] %v19762_v9  ;;  %22342 = vst [vmem:[#allocation17_spill] sm:$0xff] %v19765_v31  ;;  %12560 = vmatprep.mubr.f32.mxu1 %v8118_v56  ;;  %v19775_v45 = vsub.f32 %v7563_v29, %v19762_v9  ;;  %v19777_v27 = vand.u32 4294901760, %v7572_v16  ;;  %v7396_v35 = vmul.f32 %v19144_v61, %v18915_v3  ;;  %v22347_v40 = vand.u32 4294901760, %v19731_v23 }
 0x833   :  { %22343 = vst [vmem:[#allocation62_spill] sm:$0xff] %v19769_v38  ;;  %v8147_v62 = vsub.f32 %v19723_v4, %v22344_v57  ;;  %v8138_v30 = vand.u32 4294901760, %v8137_v15  ;;  %v19785_v54 = vsub.f32 %v7566_v46, %v19765_v31  ;;  %v7397_v21 = vmul.f32 %v19144_v61, %v18941_v39 }
 0x834   :  { %22345 = vst [vmem:[#allocation34_spill] sm:$0xff] %v19775_v45  ;;  %22346 = vst [vmem:[#allocation18_spill] sm:$0xff] %v19777_v27  ;;  %v8157_v56 = vsub.f32 %v19731_v23, %v22347_v40  ;;  %v22349_v29 = vand.u32 4294901760, %v19746_v44  ;;  %v22350_v4 = vand.u32 4294901760, %v19751_v19  ;;  %v7575_v15 = vsel %vm7004_vm12, %v7396_v35, 0 }
 0x835   :  { %22348 = vst [vmem:[#allocation37_spill] sm:$0xff] %v19785_v54  ;;  %12561 = vmatmul.mubr.f32.gmra.mrb[38].mxu1 %v8128_v5  ;;  %v19797_v40 = vsub.f32 %v7569_v12, %v19769_v38  ;;  %v19800_v46 = vsub.f32 %v7572_v16, %v19777_v27  ;;  %v19802_v23 = vand.u32 4294901760, %v7575_v15  ;;  %v7578_v39 = vsel %vm7004_vm12, %v7397_v21, 0 }
 0x836   :  { %v8167_v57 = vsub.f32 %v19746_v44, %v22349_v29  ;;  %v8177_v3 = vsub.f32 %v19751_v19, %v22350_v4  ;;  %12563 = vmatprep.mubr.f32.mxu1 %v8138_v30  ;;  %v8148_v5 = vand.u32 4294901760, %v8147_v62  ;;  %v19806_v44 = vand.u32 4294901760, %v7578_v39 }
 0x837   :  { %22351 = vst [vmem:[#allocation40_spill] sm:$0xff] %v19797_v40  ;;  %22352 = vst [vmem:[#allocation43_spill] sm:$0xff] %v19800_v46  ;;  %v7398_v4 = vmul.f32 %v19144_v61, %v18943_v17  ;;  %v8158_v35 = vand.u32 4294901760, %v8157_v56  ;;  %v7399_v12 = vmul.f32 %v19144_v61, %v18949_v11  ;;  %v21155_v62 = vand.u32 4294901760, %v19797_v40 }
 0x838   :  { %22353 = vst [vmem:[#allocation60_spill] sm:$0xff] %v19802_v23  ;;  %22354 = vst [vmem:[#allocation67_spill] sm:$0xff] %v19806_v44  ;;  %v8168_v16 = vand.u32 4294901760, %v8167_v57  ;;  %v8178_v19 = vand.u32 4294901760, %v8177_v3  ;;  %v21156_v21 = vand.u32 4294901760, %v19800_v46  ;;  %v19817_v29 = vsub.f32 %v7575_v15, %v19802_v23 }
 0x839   :  { %12564 = vmatmul.mubr.f32.gmra.mrb[40].mxu1 %v8148_v5  ;;  %v7581_v27 = vsel %vm7004_vm12, %v7398_v4, 0  ;;  %v7584_v17 = vsel %vm7004_vm12, %v7399_v12, 0  ;;  %v22356_v56 = vand.u32 4294901760, %v19775_v45  ;;  %v19824_v11 = vsub.f32 %v7578_v39, %v19806_v44 }
 0x83a   :  { %12566 = vmatprep.mubr.f32.mxu1 %v8158_v35  ;;  %22355 = vst [vmem:[#allocation69_spill] sm:$0xff] %v19817_v29  ;;  %v19826_v57 = vand.u32 4294901760, %v7581_v27  ;;  %v7400_v3 = vmul.f32 %v19144_v61, %v18955_v7  ;;  %v22359_v5 = vand.u32 4294901760, %v19785_v54  ;;  %v19833_v15 = vand.u32 4294901760, %v7584_v17 }
 0x83b   :  { %v8187_v30 = vsub.f32 %v19775_v45, %v22356_v56  ;;  %22357 = vst [vmem:[#allocation130_spill] sm:$0xff] %v19824_v11  ;;  %v7401_v35 = vmul.f32 %v19144_v61, %v18963_v58  ;;  %v7402_v12 = vmul.f32 %v19144_v61, %v18976_v26  ;;  %v7403_v56 = vmul.f32 %v19144_v61, %v18984_v1 }
 0x83c   :  { %22358 = vst [vmem:[#allocation104_spill] sm:$0xff] %v19826_v57  ;;  %v8197_v4 = vsub.f32 %v19785_v54, %v22359_v5  ;;  %22360 = vst [vmem:[#allocation10_spill] sm:$0xff] %v19833_v15  ;;  %v7587_v39 = vsel %vm7004_vm12, %v7400_v3, 0  ;;  %v8207_v7 = vsub.f32 %v19797_v40, %v21155_v62  ;;  %v8217_v5 = vsub.f32 %v19800_v46, %v21156_v21  ;;  %v22367_v40 = vld [vmem:[#allocation25_spill] sm:$0xff] }
 0x83d   :  { %12567 = vmatmul.mubr.f32.gmra.mrb[42].mxu1 %v8168_v16  ;;  %v7590_v54 = vsel %vm7004_vm12, %v7401_v35, 0  ;;  %v8188_v26 = vand.u32 4294901760, %v8187_v30  ;;  %v19852_v3 = vsub.f32 %v7581_v27, %v19826_v57  ;;  %v19854_v1 = vand.u32 4294901760, %v7587_v39  ;;  %v22365_v35 = vld [vmem:[#allocation84_spill] sm:$0xff] }
 0x83e   :  { %12569 = vmatprep.mubr.f32.mxu1 %v8178_v19  ;;  %v8198_v19 = vand.u32 4294901760, %v8197_v4  ;;  %v19857_v45 = vsub.f32 %v7584_v17, %v19833_v15  ;;  %v19859_v62 = vand.u32 4294901760, %v7590_v54  ;;  %v7593_v21 = vsel %vm7004_vm12, %v7402_v12, 0 }
 0x83f   :  { %22361 = vst [vmem:[#allocation61_spill] sm:$0xff] %v19852_v3  ;;  %22362 = vst [vmem:[#allocation68_spill] sm:$0xff] %v19854_v1  ;;  %v7596_v58 = vsel %vm7004_vm12, %v7403_v56, 0  ;;  %v7404_v30 = vmul.f32 %v19144_v61, %v22365_v35  ;;  %v8208_v16 = vand.u32 4294901760, %v8207_v7  ;;  %v8218_v27 = vand.u32 4294901760, %v8217_v5 }
 0x840   :  { %22363 = vst [vmem:[#allocation137_spill] sm:$0xff] %v19857_v45  ;;  %22364 = vst [vmem:[#allocation138_spill] sm:$0xff] %v19859_v62  ;;  %v22366_v46 = vand.u32 4294901760, %v19817_v29  ;;  %v13230_v17 = vpack.c.bf16 %v19078_v59, %v22367_v40  ;;  %v22368_v15 = vand.u32 4294901760, %v19824_v11  ;;  %v19875_v56 = vsub.f32 %v7587_v39, %v19854_v1 }
 0x841   :  { %12570 = vmatmul.mubr.f32.gmra.mrb[44].mxu1 %v8188_v26  ;;  %v21167_v26 = vand.u32 4294901760, %v19852_v3  ;;  %v19877_v61 = vand.u32 4294901760, %v7593_v21  ;;  %v19881_v5 = vsub.f32 %v7590_v54, %v19859_v62 }
 0x842   :  { %12572 = vmatprep.mubr.f32.mxu1 %v8198_v19  ;;  %v8227_v4 = vsub.f32 %v19817_v29, %v22366_v46  ;;  %v8237_v12 = vsub.f32 %v19824_v11, %v22368_v15  ;;  %22369 = vst [vmem:[#allocation84_spill] sm:$0xff] %v19875_v56  ;;  %v19883_v46 = vand.u32 4294901760, %v7596_v58  ;;  %v7599_v19 = vsel %vm7004_vm12, %v7404_v30, 0  ;;  %13231 = vmatprep.subr.bf16.mxu1 %v13230_v17 }
 0x843   :  { %22370 = vst [vmem:[#allocation25_spill] sm:$0xff] %v19877_v61  ;;  %v8247_v39 = vsub.f32 %v19852_v3, %v21167_v26  ;;  %v21170_v35 = vand.u32 4294901760, %v19875_v56  ;;  %v19891_v11 = vsub.f32 %v7593_v21, %v19877_v61  ;;  %v19893_v7 = vand.u32 4294901760, %v7599_v19 }
 0x844   :  { %22371 = vst [vmem:[#allocation139_spill] sm:$0xff] %v19883_v46  ;;  %v8228_v15 = vand.u32 4294901760, %v8227_v4  ;;  %v8238_v54 = vand.u32 4294901760, %v8237_v12  ;;  %v22373_v29 = vand.u32 4294901760, %v19857_v45 }
 0x845   :  { %12573 = vmatmul.mubr.f32.gmra.mrb[46].mxu1 %v8208_v16  ;;  %22372 = vst [vmem:[#allocation140_spill] sm:$0xff] %v19893_v7  ;;  %v21174_v16 = vand.u32 4294901760, %v19881_v5  ;;  %v8248_v4 = vand.u32 4294901760, %v8247_v39  ;;  %v8267_v21 = vsub.f32 %v19875_v56, %v21170_v35  ;;  %v21173_v26 = vand.u32 4294901760, %v19891_v11 }
 0x846   :  { %12575 = vmatprep.mubr.f32.mxu1 %v8218_v27  ;;  %v8257_v30 = vsub.f32 %v19857_v45, %v22373_v29  ;;  %v19900_v27 = vsub.f32 %v7596_v58, %v19883_v46  ;;  %v19907_v12 = vsub.f32 %v7599_v19, %v19893_v7 }
 0x847   :  { %v8277_v29 = vsub.f32 %v19881_v5, %v21174_v16  ;;  %v8287_v39 = vsub.f32 %v19891_v11, %v21173_v26  ;;  %v22386_v26 = vld [vmem:[#allocation70_spill] sm:$0xff] }
 0x848   :  { %22374 = vst [vmem:[#allocation141_spill] sm:$0xff] %v19900_v27  ;;  %22375 = vst [vmem:[#allocation142_spill] sm:$0xff] %v19907_v12  ;;  %v8258_v3 = vand.u32 4294901760, %v8257_v30  ;;  %v21172_v58 = vand.u32 4294901760, %v19900_v27  ;;  %v22387_v16 = vld [vmem:[#allocation38_spill] sm:$0xff] }
 0x849   :  { %12576 = vmatmul.mubr.f32.gmra.mrb[48].mxu1 %v8228_v15  ;;  %v8268_v15 = vand.u32 4294901760, %v8267_v21  ;;  %v8278_v35 = vand.u32 4294901760, %v8277_v29  ;;  %v8288_v30 = vand.u32 4294901760, %v8287_v39  ;;  %v13234_v29 = vpack.c.bf16 %v19097_v36, %v19095_v53 }
 0x84a   :  { %12578 = vmatprep.mubr.f32.mxu1 %v8238_v54  ;;  %v21171_v54 = vand.u32 4294901760, %v19907_v12  ;;  %v8297_v19 = vsub.f32 %v19900_v27, %v21172_v58  ;;  %v22385_v58 = vld [vmem:[#allocation101_spill] sm:$0xff] }
 0x84d   :  { %12579 = vmatmul.mubr.f32.gmra.mrb[50].mxu1 %v8248_v4  ;;  %v8307_v4 = vsub.f32 %v19907_v12, %v21171_v54  ;;  %v22378_v54 = vld [vmem:[#allocation129_spill] sm:$0xff] }
 0x84e   :  { %12581 = vmatprep.mubr.f32.mxu1 %v8258_v3  ;;  %v8298_v3 = vand.u32 4294901760, %v8297_v19  ;;  %v22379_v19 = vld [vmem:[#allocation39_spill] sm:$0xff] }
 0x84f   :  { %v8308_v21 = vand.u32 4294901760, %v8307_v4 }
 0x851   :  { %12582 = vmatmul.mubr.f32.gmra.mrb[52].mxu1 %v8268_v15  ;;  %v22377_v15 = vld [vmem:[#allocation32_spill] sm:$0xff] }
 0x852   :  { %12584 = vmatprep.mubr.f32.mxu1 %v8278_v35  ;;  %v22376_v35 = vld [vmem:[#allocation86_spill] sm:$0xff] }
 0x853   :  { %v13238_v39 = vpack.c.bf16 %v22377_v15, %v22376_v35 }
 0x855   :  { %12585 = vmatmul.mubr.f32.gmra.mrb[54].mxu1 %v8288_v30  ;;  %v22380_v30 = vld [vmem:[#allocation36_spill] sm:$0xff] }
 0x856   :  { %12587 = vmatprep.mubr.f32.mxu1 %v8298_v3  ;;  %v13242_v4 = vpack.c.bf16 %v22380_v30, %v22379_v19  ;;  %v22381_v3 = vld [vmem:[#allocation99_spill] sm:$0xff] }
 0x859   :  { %12588 = vmatmul.mubr.f32.gmra.mrb[56].mxu1 %v8308_v21  ;;  %v22383_v21 = vld [vmem:[#allocation110_spill] sm:$0xff] }
 0x85a   :  { %12606 = vmatprep.mubr.f32.mxu1 %v19165_v63  ;;  %v22469_v63 = vld [vmem:[#allocation14_spill] sm:$0xff] }
 0x85d   :  { %12607 = vmatmul.mubr.f32.vlgmr.msra.gmra.mrb[58].mxu1 %v19169_v6  ;;  %v22468_v6 = vld [vmem:[#allocation98_spill] sm:$0xff] }
 0x85e   :  { %12609 = vmatprep.mubr.f32.mxu1 %v19186_v48  ;;  %13233 = vmatpush3.bf16.msra.mxu1 %v13230_v17  ;;  %v22382_v17 = vld [vmem:[#allocation11_spill] sm:$0xff]  ;;  %v22467_v48 = vld [vmem:[#allocation94_spill] sm:$0xff] }
 0x85f   :  { %13235 = vmatprep.subr.bf16.mxu1 %v13234_v29 }
 0x861   :  { %12610 = vmatmul.mubr.f32.gmra.mrb[60].mxu1 %v22378_v54  ;;  %v22465_v54 = vld [vmem:[#allocation116_spill] sm:$0xff] }
 0x862   :  { %12612 = vmatprep.mubr.f32.mxu1 %v19256_v24  ;;  %13237 = vmatpush3.bf16.msra.mxu1 %v13234_v29  ;;  %v22384_v29 = vld [vmem:[#allocation80_spill] sm:$0xff]  ;;  %v22464_v24 = vld [vmem:[#allocation81_spill] sm:$0xff] }
 0x863   :  { %13239 = vmatprep.subr.bf16.mxu1 %v13238_v39 }
 0x865   :  { %12613 = vmatmul.mubr.f32.gmra.mrb[62].mxu1 %v19260_v14  ;;  %v22462_v14 = vld [vmem:[#allocation93_spill] sm:$0xff] }
 0x866   :  { %12615 = vmatprep.mubr.f32.mxu1 %v22381_v3  ;;  %13241 = vmatpush3.bf16.msra.mxu1 %v13238_v39  ;;  %v22388_v39 = vld [vmem:[#allocation51_spill] sm:$0xff]  ;;  %v22392_v3 = vld [vmem:[#allocation88_spill] sm:$0xff] }
 0x867   :  { %13243 = vmatprep.subr.bf16.mxu1 %v13242_v4 }
 0x869   :  { %12616 = vmatmul.mubr.f32.gmra.mrb[64].mxu1 %v19299_v37  ;;  %v22389_v37 = vld [vmem:[#allocation56_spill] sm:$0xff] }
 0x86a   :  { %12618 = vmatprep.mubr.f32.mxu1 %v19356_v55  ;;  %13245 = vmatpush3.bf16.msra.mxu1 %v13242_v4  ;;  %v22390_v55 = vld [vmem:[#allocation42_spill] sm:$0xff] }
 0x86b   :  { %13247 = vmatprep.subr.bf16.mxu1 %v22382_v17  ;;  %v22391_v4 = vld [vmem:[#allocation90_spill] sm:$0xff] }
 0x86d   :  { %12619 = vmatmul.mubr.f32.gmra.mrb[66].mxu1 %v19360_v50  ;;  %v22393_v50 = vld [vmem:[#allocation53_spill] sm:$0xff] }
 0x86e   :  { %12621 = vmatprep.mubr.f32.mxu1 %v22383_v21  ;;  %v22460_v21 = vld [vmem:[#allocation44_spill] sm:$0xff] }
 0x871   :  { %12622 = vmatmul.mubr.f32.gmra.mrb[4].mxu1 %v22384_v29  ;;  %v22459_v29 = vld [vmem:[#allocation55_spill] sm:$0xff] }
 0x872   :  { %12624 = vmatprep.mubr.f32.mxu1 %v22385_v58  ;;  %v22458_v58 = vld [vmem:[#allocation23_spill] sm:$0xff] }
 0x875   :  { %12625 = vmatmul.mubr.f32.gmra.mrb[6].mxu1 %v22386_v26  ;;  %v22457_v26 = vld [vmem:[#allocation103_spill] sm:$0xff] }
 0x876   :  { %12627 = vmatprep.mubr.f32.mxu1 %v22387_v16  ;;  %v22456_v16 = vld [vmem:[#allocation136_spill] sm:$0xff] }
 0x879   :  { %12628 = vmatmul.mubr.f32.gmra.mrb[8].mxu1 %v22388_v39  ;;  %v22455_v39 = vld [vmem:[#allocation109_spill] sm:$0xff] }
 0x87a   :  { %12630 = vmatprep.mubr.f32.mxu1 %v22389_v37  ;;  %v22454_v37 = vld [vmem:[#allocation92_spill] sm:$0xff] }
 0x87d   :  { %12631 = vmatmul.mubr.f32.gmra.mrb[10].mxu1 %v22390_v55  ;;  %v22453_v55 = vld [vmem:[#allocation27_spill] sm:$0xff] }
 0x87e   :  { %12633 = vmatprep.mubr.f32.mxu1 %v22391_v4  ;;  %v22452_v4 = vld [vmem:[#allocation91_spill] sm:$0xff] }
 0x881   :  { %12634 = vmatmul.mubr.f32.gmra.mrb[12].mxu1 %v22392_v3  ;;  %v22451_v3 = vld [vmem:[#allocation89_spill] sm:$0xff] }
 0x882   :  { %12636 = vmatprep.mubr.f32.mxu1 %v22393_v50  ;;  %v22450_v50 = vld [vmem:[#allocation97_spill] sm:$0xff] }
 0x885   :  { %12637 = vmatmul.mubr.f32.gmra.mrb[14].mxu1 %v19390_v25  ;;  %v22394_v25 = vld [vmem:[#allocation133_spill] sm:$0xff] }
 0x886   :  { %12639 = vmatprep.mubr.f32.mxu1 %v19400_v43  ;;  %v22395_v43 = vld [vmem:[#allocation114_spill] sm:$0xff] }
 0x889   :  { %12640 = vmatmul.mubr.f32.gmra.mrb[16].mxu1 %v19426_v60  ;;  %v22396_v60 = vld [vmem:[#allocation132_spill] sm:$0xff] }
 0x88a   :  { %12642 = vmatprep.mubr.f32.mxu1 %v19448_v13  ;;  %v22449_v13 = vld [vmem:[#allocation58_spill] sm:$0xff] }
 0x88d   :  { %12643 = vmatmul.mubr.f32.gmra.mrb[18].mxu1 %v19450_v28  ;;  %v22397_v28 = vld [vmem:[#allocation48_spill] sm:$0xff] }
 0x88e   :  { %12645 = vmatprep.mubr.f32.mxu1 %v19467_v2  ;;  %v22448_v2 = vld [vmem:[#allocation75_spill] sm:$0xff] }
 0x891   :  { %12646 = vmatmul.mubr.f32.gmra.mrb[20].mxu1 %v19469_v22  ;;  %v22447_v22 = vld [vmem:[#allocation100_spill] sm:$0xff] }
 0x892   :  { %12648 = vmatprep.mubr.f32.mxu1 %v19483_v34  ;;  %v22446_v34 = vld [vmem:[#allocation22_spill] sm:$0xff] }
 0x895   :  { %12649 = vmatmul.mubr.f32.gmra.mrb[22].mxu1 %v19485_v42  ;;  %v22445_v42 = vld [vmem:[#allocation120_spill] sm:$0xff] }
 0x896   :  { %12651 = vmatprep.mubr.f32.mxu1 %v19495_v49  ;;  %v22444_v49 = vld [vmem:[#allocation105_spill] sm:$0xff] }
 0x899   :  { %12652 = vmatmul.mubr.f32.gmra.mrb[24].mxu1 %v19519_v20  ;;  %v22398_v20 = vld [vmem:[#allocation118_spill] sm:$0xff] }
 0x89a   :  { %12654 = vmatprep.mubr.f32.mxu1 %v22394_v25  ;;  %v22443_v25 = vld [vmem:[#allocation87_spill] sm:$0xff] }
 0x89d   :  { %12655 = vmatmul.mubr.f32.gmra.mrb[26].mxu1 %v22395_v43  ;;  %v22399_v43 = vld [vmem:[#allocation9_spill] sm:$0xff] }
 0x89e   :  { %12657 = vmatprep.mubr.f32.mxu1 %v22396_v60  ;;  %v22442_v60 = vld [vmem:[#allocation13_spill] sm:$0xff] }
 0x8a1   :  { %12658 = vmatmul.mubr.f32.gmra.mrb[28].mxu1 %v19573_v41  ;;  %v22441_v41 = vld [vmem:[#allocation117_spill] sm:$0xff] }
 0x8a2   :  { %12660 = vmatprep.mubr.f32.mxu1 %v22397_v28 }
 0x8a5   :  { %12661 = vmatmul.mubr.f32.gmra.mrb[30].mxu1 %v19592_v52  ;;  %v22440_v52 = vld [vmem:[#allocation128_spill] sm:$0xff] }
 0x8a6   :  { %12663 = vmatprep.mubr.f32.mxu1 %v19594_v32 }
 0x8a9   :  { %12664 = vmatmul.mubr.f32.gmra.mrb[32].mxu1 %v19619_v10  ;;  %v22402_v10 = vld [vmem:[#allocation108_spill] sm:$0xff] }
 0x8aa   :  { %12666 = vmatprep.mubr.f32.mxu1 %v19630_v47 }
 0x8ad   :  { %12667 = vmatmul.mubr.f32.gmra.mrb[34].mxu1 %v19638_v18  ;;  %v22404_v18 = vld [vmem:[#allocation119_spill] sm:$0xff] }
 0x8ae   :  { %12669 = vmatprep.mubr.f32.mxu1 %v22398_v20 }
 0x8b1   :  { %12670 = vmatmul.mubr.f32.gmra.mrb[36].mxu1 %v19670_v0  ;;  %v22406_v0 = vld [vmem:[#allocation111_spill] sm:$0xff] }
 0x8b2   :  { %12672 = vmatprep.mubr.f32.mxu1 %v22399_v43  ;;  %v22439_v43 = vld [vmem:[#allocation8_spill] sm:$0xff] }
 0x8b5   :  { %12673 = vmatmul.mubr.f32.gmra.mrb[38].mxu1 %v19682_v8  ;;  %v22438_v8 = vld [vmem:[#allocation41_spill] sm:$0xff] }
 0x8b6   :  { %12675 = vmatprep.mubr.f32.mxu1 %v19687_v33  ;;  %v22437_v33 = vld [vmem:[#allocation66_spill] sm:$0xff] }
 0x8b7   :  { %v19977_v28 = vpop.f32.mrb[64].mxu0 }
 0x8b8   :  { %22400 = vst [vmem:[#allocation86_spill] sm:$0xff] %v19977_v28  ;;  %v19980_v32 = vpop.f32.mrb[65].mxu0 }
 0x8b9   :  { %12676 = vmatmul.mubr.f32.gmra.mrb[40].mxu1 %v19711_v51  ;;  %22401 = vst [vmem:[#allocation32_spill] sm:$0xff] %v19980_v32  ;;  %v22408_v51 = vld [vmem:[#allocation18_spill] sm:$0xff] }
 0x8ba   :  { %12678 = vmatprep.mubr.f32.mxu1 %v22402_v10  ;;  %v22432_v10 = vld [vmem:[#allocation24_spill] sm:$0xff] }
 0x8bb   :  { %v19983_v47 = vpop.f32.mrb[66].mxu0 }
 0x8bc   :  { %22403 = vst [vmem:[#allocation39_spill] sm:$0xff] %v19983_v47  ;;  %v19986_v20 = vpop.f32.mrb[67].mxu0 }
 0x8bd   :  { %12679 = vmatmul.mubr.f32.gmra.mrb[42].mxu1 %v22404_v18  ;;  %22405 = vst [vmem:[#allocation36_spill] sm:$0xff] %v19986_v20  ;;  %v22431_v18 = vld [vmem:[#allocation76_spill] sm:$0xff] }
 0x8be   :  { %12681 = vmatprep.mubr.f32.mxu1 %v22406_v0  ;;  %v22430_v0 = vld [vmem:[#allocation64_spill] sm:$0xff] }
 0x8c1   :  { %12682 = vmatmul.mubr.f32.gmra.mrb[44].mxu1 %v19762_v9  ;;  %v22412_v9 = vld [vmem:[#allocation10_spill] sm:$0xff] }
 0x8c2   :  { %12684 = vmatprep.mubr.f32.mxu1 %v19765_v31  ;;  %v22429_v31 = vld [vmem:[#allocation28_spill] sm:$0xff] }
 0x8c4   :  { %v19992_v28 = vpop.f32.mrb[68].mxu0 }
 0x8c5   :  { %12685 = vmatmul.mubr.f32.gmra.mrb[46].mxu1 %v19769_v38  ;;  %22407 = vst [vmem:[#allocation11_spill] sm:$0xff] %v19992_v28  ;;  %v19995_v32 = vpop.f32.mrb[69].mxu0  ;;  %v22428_v38 = vld [vmem:[#allocation74_spill] sm:$0xff] }
 0x8c6   :  { %12687 = vmatprep.mubr.f32.mxu1 %v22408_v51  ;;  %22409 = vst [vmem:[#allocation143_spill] sm:$0xff] %v19995_v32  ;;  %v22417_v32 = vld [vmem:[#allocation82_spill] sm:$0xff] }
 0x8c9   :  { %12688 = vmatmul.mubr.f32.gmra.mrb[48].mxu1 %v19802_v23  ;;  %v19998_v47 = vpop.f32.mrb[70].mxu0  ;;  %v22427_v23 = vld [vmem:[#allocation33_spill] sm:$0xff] }
 0x8ca   :  { %22410 = vst [vmem:[#allocation144_spill] sm:$0xff] %v19998_v47  ;;  %12690 = vmatprep.mubr.f32.mxu1 %v19806_v44  ;;  %v20001_v20 = vpop.f32.mrb[71].mxu0  ;;  %v22415_v47 = vld [vmem:[#allocation102_spill] sm:$0xff] }
 0x8cb   :  { %22411 = vst [vmem:[#allocation145_spill] sm:$0xff] %v20001_v20  ;;  %v22416_v20 = vld [vmem:[#allocation122_spill] sm:$0xff] }
 0x8cd   :  { %12691 = vmatmul.mubr.f32.gmra.mrb[50].mxu1 %v19826_v57  ;;  %v22426_v57 = vand.u32 4294901760, %v19078_v59  ;;  %v22434_v59 = vld [vmem:[#allocation16_spill] sm:$0xff] }
 0x8ce   :  { %12693 = vmatprep.mubr.f32.mxu1 %v22412_v9  ;;  %v22425_v9 = vand.u32 4294901760, %v22367_v40  ;;  %v22433_v40 = vld [vmem:[#allocation112_spill] sm:$0xff] }
 0x8d0   :  { %v20031_v44 = vpack.c.bf16 %v22426_v57, %v22425_v9  ;;  %v22435_v9 = vld [vmem:[#allocation131_spill] sm:$0xff]  ;;  %v22436_v57 = vld [vmem:[#allocation45_spill] sm:$0xff] }
 0x8d1   :  { %12694 = vmatmul.mubr.f32.gmra.mrb[52].mxu1 %v19854_v1  ;;  %v22418_v1 = vld [vmem:[#allocation30_spill] sm:$0xff] }
 0x8d2   :  { %12696 = vmatprep.mubr.f32.mxu1 %v19859_v62  ;;  %v20007_v28 = vpop.f32.mrb[72].mxu0  ;;  %v22419_v62 = vld [vmem:[#allocation57_spill] sm:$0xff] }
 0x8d3   :  { %22413 = vst [vmem:[#allocation146_spill] sm:$0xff] %v20007_v28  ;;  %v20009_v51 = vpop.f32.mrb[73].mxu0  ;;  %v22420_v28 = vld [vmem:[#allocation95_spill] sm:$0xff] }
 0x8d4   :  { %22414 = vst [vmem:[#allocation147_spill] sm:$0xff] %v20009_v51  ;;  %v22421_v51 = vld [vmem:[#allocation78_spill] sm:$0xff] }
 0x8d5   :  { %12697 = vmatmul.mubr.f32.gmra.mrb[54].mxu1 %v19877_v61  ;;  %v22424_v61 = vld [vmem:[#allocation127_spill] sm:$0xff] }
 0x8d6   :  { %12699 = vmatprep.mubr.f32.mxu1 %v19883_v46  ;;  %v22422_v46 = vld [vmem:[#allocation79_spill] sm:$0xff] }
 0x8d9   :  { %12700 = vmatmul.mubr.f32.gmra.mrb[56].mxu1 %v19893_v7  ;;  %v22423_v7 = vld [vmem:[#allocation47_spill] sm:$0xff] }
 0x8da   :  { %12718 = vmatprep.mubr.f32.mxu1 %v22415_v47 }
 0x8dd   :  { %12719 = vmatmul.mubr.f32.vlgmr.msra.gmra.mrb[58].mxu1 %v22416_v20 }
 0x8de   :  { %12721 = vmatprep.mubr.f32.mxu1 %v22417_v32  ;;  %13249 = vmatpush3.bf16.msra.mxu1 %v22382_v17 }
 0x8df   :  { %13251 = vmatprep.subr.bf16.mxu1 %v22418_v1 }
 0x8e1   :  { %12722 = vmatmul.mubr.f32.gmra.mrb[60].mxu1 %v22419_v62 }
 0x8e2   :  { %12724 = vmatprep.mubr.f32.mxu1 %v22420_v28  ;;  %13253 = vmatpush3.bf16.msra.mxu1 %v22418_v1  ;;  %v22466_v1 = vld [vmem:[#allocation85_spill] sm:$0xff] }
 0x8e3   :  { %13255 = vmatprep.subr.bf16.mxu1 %v22421_v51 }
 0x8e5   :  { %12725 = vmatmul.mubr.f32.gmra.mrb[62].mxu1 %v22422_v46 }
 0x8e6   :  { %12727 = vmatprep.mubr.f32.mxu1 %v22423_v7  ;;  %13257 = vmatpush3.bf16.msra.mxu1 %v22421_v51  ;;  %v22463_v51 = vld [vmem:[#allocation15_spill] sm:$0xff] }
 0x8e7   :  { %13259 = vmatprep.subr.bf16.mxu1 %v22424_v61 }
 0x8e9   :  { %12728 = vmatmul.mubr.f32.gmra.mrb[64].mxu1 %v22427_v23 }
 0x8ea   :  { %12730 = vmatprep.mubr.f32.mxu1 %v22428_v38  ;;  %13261 = vmatpush3.bf16.msra.mxu1 %v22424_v61  ;;  %v22461_v61 = vld [vmem:[#allocation50_spill] sm:$0xff] }
 0x8eb   :  { %13263 = vmatprep.subr.bf16.mxu1 %v20031_v44 }
 0x8ed   :  { %12731 = vmatmul.mubr.f32.gmra.mrb[66].mxu1 %v22429_v31 }
 0x8ee   :  { %12733 = vmatprep.mubr.f32.mxu1 %v22430_v0 }
 0x8f1   :  { %12734 = vmatmul.mubr.f32.gmra.mrb[4].mxu1 %v22431_v18 }
 0x8f2   :  { %12736 = vmatprep.mubr.f32.mxu1 %v22432_v10 }
 0x8f5   :  { %12737 = vmatmul.mubr.f32.gmra.mrb[6].mxu1 %v22433_v40 }
 0x8f6   :  { %12739 = vmatprep.mubr.f32.mxu1 %v22434_v59 }
 0x8f9   :  { %12740 = vmatmul.mubr.f32.gmra.mrb[8].mxu1 %v22435_v9 }
 0x8fa   :  { %12742 = vmatprep.mubr.f32.mxu1 %v22436_v57 }
 0x8fd   :  { %12743 = vmatmul.mubr.f32.gmra.mrb[10].mxu1 %v22437_v33 }
 0x8fe   :  { %12745 = vmatprep.mubr.f32.mxu1 %v22438_v8 }
 0x901   :  { %12746 = vmatmul.mubr.f32.gmra.mrb[12].mxu1 %v22439_v43 }
 0x902   :  { %12748 = vmatprep.mubr.f32.mxu1 %v22440_v52 }
 0x905   :  { %12749 = vmatmul.mubr.f32.gmra.mrb[14].mxu1 %v22441_v41 }
 0x906   :  { %12751 = vmatprep.mubr.f32.mxu1 %v22442_v60 }
 0x909   :  { %12752 = vmatmul.mubr.f32.gmra.mrb[16].mxu1 %v22443_v25 }
 0x90a   :  { %12754 = vmatprep.mubr.f32.mxu1 %v22444_v49 }
 0x90d   :  { %12755 = vmatmul.mubr.f32.gmra.mrb[18].mxu1 %v22445_v42 }
 0x90e   :  { %12757 = vmatprep.mubr.f32.mxu1 %v22446_v34 }
 0x911   :  { %12758 = vmatmul.mubr.f32.gmra.mrb[20].mxu1 %v22447_v22 }
 0x912   :  { %12760 = vmatprep.mubr.f32.mxu1 %v22448_v2 }
 0x915   :  { %12761 = vmatmul.mubr.f32.gmra.mrb[22].mxu1 %v22449_v13 }
 0x916   :  { %12763 = vmatprep.mubr.f32.mxu1 %v22450_v50 }
 0x919   :  { %12764 = vmatmul.mubr.f32.gmra.mrb[24].mxu1 %v22451_v3 }
 0x91a   :  { %12766 = vmatprep.mubr.f32.mxu1 %v22452_v4 }
 0x91d   :  { %12767 = vmatmul.mubr.f32.gmra.mrb[26].mxu1 %v22453_v55 }
 0x91e   :  { %12769 = vmatprep.mubr.f32.mxu1 %v22454_v37 }
 0x921   :  { %12770 = vmatmul.mubr.f32.gmra.mrb[28].mxu1 %v22455_v39 }
 0x922   :  { %12772 = vmatprep.mubr.f32.mxu1 %v22456_v16 }
 0x925   :  { %12773 = vmatmul.mubr.f32.gmra.mrb[30].mxu1 %v22457_v26 }
 0x926   :  { %12775 = vmatprep.mubr.f32.mxu1 %v22458_v58 }
 0x929   :  { %12776 = vmatmul.mubr.f32.gmra.mrb[32].mxu1 %v22459_v29  ;;  %v22470_v29 = vld [vmem:[#allocation113_spill] sm:$0xff] }
 0x92a   :  { %12778 = vmatprep.mubr.f32.mxu1 %v22460_v21  ;;  %v22471_v21 = vld [vmem:[#allocation34_spill] sm:$0xff] }
 0x92d   :  { %12779 = vmatmul.mubr.f32.gmra.mrb[34].mxu1 %v22461_v61  ;;  %v22472_v61 = vld [vmem:[#allocation37_spill] sm:$0xff] }
 0x92e   :  { %12781 = vmatprep.mubr.f32.mxu1 %v22462_v14  ;;  %v22473_v14 = vld [vmem:[#allocation40_spill] sm:$0xff] }
 0x931   :  { %12782 = vmatmul.mubr.f32.gmra.mrb[36].mxu1 %v22463_v51  ;;  %v22474_v51 = vld [vmem:[#allocation43_spill] sm:$0xff] }
 0x932   :  { %12784 = vmatprep.mubr.f32.mxu1 %v22464_v24  ;;  %v22475_v24 = vld [vmem:[#allocation69_spill] sm:$0xff] }
 0x935   :  { %12785 = vmatmul.mubr.f32.gmra.mrb[38].mxu1 %v22465_v54  ;;  %v22476_v54 = vld [vmem:[#allocation130_spill] sm:$0xff] }
 0x936   :  { %12787 = vmatprep.mubr.f32.mxu1 %v22466_v1  ;;  %v22477_v1 = vld [vmem:[#allocation61_spill] sm:$0xff] }
 0x939   :  { %12788 = vmatmul.mubr.f32.gmra.mrb[40].mxu1 %v22467_v48 }
 0x93a   :  { %12790 = vmatprep.mubr.f32.mxu1 %v22468_v6 }
 0x93d   :  { %12791 = vmatmul.mubr.f32.gmra.mrb[42].mxu1 %v22469_v63 }
 0x93e   :  { %12793 = vmatprep.mubr.f32.mxu1 %v22470_v29 }
 0x941   :  { %12794 = vmatmul.mubr.f32.gmra.mrb[44].mxu1 %v22471_v21 }
 0x942   :  { %12796 = vmatprep.mubr.f32.mxu1 %v22472_v61 }
 0x945   :  { %12797 = vmatmul.mubr.f32.gmra.mrb[46].mxu1 %v22473_v14 }
 0x946   :  { %12799 = vmatprep.mubr.f32.mxu1 %v22474_v51  ;;  %v22478_v51 = vand.u32 4294901760, %v22415_v47 }
 0x949   :  { %12800 = vmatmul.mubr.f32.gmra.mrb[48].mxu1 %v22475_v24  ;;  %v22479_v24 = vand.u32 4294901760, %v19095_v53  ;;  %v22486_v53 = vand.u32 4294901760, %v22420_v28  ;;  %v22492_v28 = vand.u32 4294901760, %v22428_v38  ;;  %v22498_v38 = vand.u32 4294901760, %v22434_v59 }
 0x94a   :  { %12802 = vmatprep.mubr.f32.mxu1 %v22476_v54  ;;  %v22480_v54 = vand.u32 4294901760, %v19097_v36  ;;  %v22487_v36 = vand.u32 4294901760, %v22379_v19  ;;  %v22523_v19 = vld [vmem:[#allocation55_spill] sm:$0xff] }
 0x94d   :  { %12803 = vmatmul.mubr.f32.gmra.mrb[50].mxu1 %v22477_v1  ;;  %v13266_v1 = vpack.c.bf16 %v22480_v54, %v22479_v24  ;;  %v22488_v24 = vand.u32 4294901760, %v22380_v30  ;;  %v22506_v54 = vand.u32 4294901760, %v22442_v60  ;;  %v22513_v60 = vand.u32 4294901760, %v22449_v13 }
 0x94e   :  { %12805 = vmatprep.mubr.f32.mxu1 %v19857_v45  ;;  %v22481_v45 = vand.u32 4294901760, %v22416_v20  ;;  %v22520_v13 = vand.u32 4294901760, %v22456_v16  ;;  %v22524_v30 = vand.u32 4294901760, %v22523_v19  ;;  %v22531_v16 = vld [vmem:[#allocation15_spill] sm:$0xff]  ;;  %v22587_v19 = vld [vmem:[#allocation53_spill] sm:$0xff] }
 0x94f   :  { %v13274_v20 = vpack.c.bf16 %v22488_v24, %v22487_v36  ;;  %v22532_v59 = vand.u32 4294901760, %v22531_v16  ;;  %v22540_v36 = vand.u32 4294901760, %v22468_v6  ;;  %v22541_v24 = vand.u32 4294901760, %v22469_v63  ;;  %v22548_v6 = vld [vmem:[#allocation69_spill] sm:$0xff]  ;;  %v22550_v63 = vld [vmem:[#allocation130_spill] sm:$0xff]  ;;  %v22595_v16 = vld [vmem:[#allocation72_spill] sm:$0xff] }
 0x951   :  { %12806 = vmatmul.mubr.f32.gmra.mrb[52].mxu1 %v19875_v56  ;;  %v22482_v56 = vand.u32 4294901760, %v22417_v32  ;;  %v22489_v32 = vand.u32 4294901760, %v22422_v46  ;;  %v22499_v46 = vand.u32 4294901760, %v22435_v9 }
 0x952   :  { %12808 = vmatprep.mubr.f32.mxu1 %v19881_v5 }
 0x955   :  { %12809 = vmatmul.mubr.f32.gmra.mrb[54].mxu1 %v19891_v11 }
 0x956   :  { %12811 = vmatprep.mubr.f32.mxu1 %v19900_v27  ;;  %v22483_v27 = vand.u32 4294901760, %v22376_v35  ;;  %v22507_v35 = vand.u32 4294901760, %v22443_v25  ;;  %v22514_v25 = vand.u32 4294901760, %v22450_v50  ;;  %v22521_v50 = vand.u32 4294901760, %v22457_v26  ;;  %v22533_v26 = vld [vmem:[#allocation81_spill] sm:$0xff] }
 0x957   :  { %v22534_v9 = vand.u32 4294901760, %v22533_v26  ;;  %v22597_v26 = vld [vmem:[#allocation124_spill] sm:$0xff] }
 0x959   :  { %12812 = vmatmul.mubr.f32.gmra.mrb[56].mxu1 %v19907_v12  ;;  %v22484_v12 = vand.u32 4294901760, %v22377_v15  ;;  %v22522_v15 = vand.u32 4294901760, %v22458_v58  ;;  %v22535_v58 = vld [vmem:[#allocation116_spill] sm:$0xff] }
 0x95a   :  { %12830 = vmatprep.mubr.f32.mxu1 %v22478_v51  ;;  %v22485_v51 = vand.u32 4294901760, %v22419_v62  ;;  %v22493_v62 = vand.u32 4294901760, %v22429_v31  ;;  %v22500_v31 = vand.u32 4294901760, %v22436_v57  ;;  %v22536_v57 = vand.u32 4294901760, %v22535_v58  ;;  %v22599_v58 = vld [vmem:[#allocation133_spill] sm:$0xff] }
 0x95b   :  { %v13270_v47 = vpack.c.bf16 %v22484_v12, %v22483_v27  ;;  %v22504_v27 = vand.u32 4294901760, %v22440_v52  ;;  %v22505_v12 = vand.u32 4294901760, %v22441_v41  ;;  %v22511_v52 = vand.u32 4294901760, %v22447_v22 }
 0x95c   :  { %v22512_v41 = vand.u32 4294901760, %v22448_v2  ;;  %v22518_v22 = vand.u32 4294901760, %v22454_v37  ;;  %v22519_v2 = vand.u32 4294901760, %v22455_v39  ;;  %v22527_v37 = vld [vmem:[#allocation50_spill] sm:$0xff]  ;;  %v22529_v39 = vld [vmem:[#allocation93_spill] sm:$0xff] }
 0x95d   :  { %12831 = vmatmul.mubr.f32.vlgmr.msra.gmra.mrb[58].mxu1 %v22481_v45  ;;  %v22490_v45 = vand.u32 4294901760, %v22423_v7  ;;  %v22496_v7 = vand.u32 4294901760, %v22432_v10  ;;  %v22503_v10 = vand.u32 4294901760, %v22439_v43  ;;  %v22510_v43 = vand.u32 4294901760, %v22446_v34 }
 0x95e   :  { %12833 = vmatprep.mubr.f32.mxu1 %v22482_v56  ;;  %13265 = vmatpush3.bf16.msra.mxu1 %v20031_v44  ;;  %v22491_v44 = vand.u32 4294901760, %v22427_v23  ;;  %v22495_v56 = vand.u32 4294901760, %v22431_v18  ;;  %v22497_v23 = vand.u32 4294901760, %v22433_v40  ;;  %v22502_v18 = vand.u32 4294901760, %v22438_v8 }
 0x95f   :  { %13267 = vmatprep.subr.bf16.mxu1 %v13266_v1  ;;  %v22509_v8 = vand.u32 4294901760, %v22445_v42  ;;  %v22516_v42 = vand.u32 4294901760, %v22452_v4  ;;  %v22517_v34 = vand.u32 4294901760, %v22453_v55  ;;  %v22525_v55 = vld [vmem:[#allocation44_spill] sm:$0xff]  ;;  %v22528_v4 = vand.u32 4294901760, %v22527_v37  ;;  %v22591_v37 = vld [vmem:[#allocation115_spill] sm:$0xff] }
 0x960   :  { %v22530_v40 = vand.u32 4294901760, %v22529_v39  ;;  %v22593_v39 = vld [vmem:[#allocation121_spill] sm:$0xff] }
 0x961   :  { %12834 = vmatmul.mubr.f32.gmra.mrb[60].mxu1 %v22485_v51 }
 0x962   :  { %12836 = vmatprep.mubr.f32.mxu1 %v22486_v53  ;;  %13269 = vmatpush3.bf16.msra.mxu1 %v13266_v1  ;;  %v22494_v1 = vand.u32 4294901760, %v22430_v0  ;;  %v22501_v0 = vand.u32 4294901760, %v22437_v33  ;;  %v22508_v33 = vand.u32 4294901760, %v22444_v49  ;;  %v22515_v49 = vand.u32 4294901760, %v22451_v3 }
 0x963   :  { %13271 = vmatprep.subr.bf16.mxu1 %v13270_v47  ;;  %v22526_v3 = vand.u32 4294901760, %v22525_v55  ;;  %v22539_v53 = vand.u32 4294901760, %v22467_v48  ;;  %v22546_v48 = vld [vmem:[#allocation43_spill] sm:$0xff]  ;;  %v22589_v55 = vld [vmem:[#allocation54_spill] sm:$0xff] }
 0x965   :  { %12837 = vmatmul.mubr.f32.gmra.mrb[62].mxu1 %v22489_v32  ;;  %v22543_v32 = vand.u32 4294901760, %v22471_v21  ;;  %v22554_v21 = vld [vmem:[#allocation137_spill] sm:$0xff] }
 0x966   :  { %12839 = vmatprep.mubr.f32.mxu1 %v22490_v45  ;;  %13273 = vmatpush3.bf16.msra.mxu1 %v13270_v47  ;;  %v22537_v47 = vld [vmem:[#allocation85_spill] sm:$0xff]  ;;  %v22544_v45 = vand.u32 4294901760, %v22472_v61  ;;  %v22556_v61 = vld [vmem:[#allocation84_spill] sm:$0xff] }
 0x967   :  { %13275 = vmatprep.subr.bf16.mxu1 %v13274_v20  ;;  %v22538_v51 = vand.u32 4294901760, %v22537_v47  ;;  %v22601_v47 = vld [vmem:[#allocation132_spill] sm:$0xff] }
 0x969   :  { %12840 = vmatmul.mubr.f32.gmra.mrb[64].mxu1 %v22491_v44  ;;  %v22545_v44 = vand.u32 4294901760, %v22473_v14  ;;  %v22558_v14 = vand.u32 4294901760, %v19881_v5  ;;  %v22568_v5 = vld [vmem:[#allocation129_spill] sm:$0xff] }
 0x96a   :  { %12842 = vmatprep.mubr.f32.mxu1 %v22492_v28  ;;  %13277 = vmatpush3.bf16.msra.mxu1 %v13274_v20  ;;  %v22542_v20 = vand.u32 4294901760, %v22470_v29  ;;  %v22547_v28 = vand.u32 4294901760, %v22546_v48  ;;  %v22552_v29 = vld [vmem:[#allocation61_spill] sm:$0xff]  ;;  %v22610_v48 = vld [vmem:[#allocation106_spill] sm:$0xff] }
 0x96b   :  { %13279 = vmatprep.subr.bf16.mxu1 %v22382_v17 }
 0x96d   :  { %12843 = vmatmul.mubr.f32.gmra.mrb[66].mxu1 %v22493_v62  ;;  %v22549_v62 = vand.u32 4294901760, %v22548_v6  ;;  %v22612_v6 = vld [vmem:[#allocation65_spill] sm:$0xff] }
 0x96e   :  { %12845 = vmatprep.mubr.f32.mxu1 %v22494_v1  ;;  %v22551_v1 = vand.u32 4294901760, %v22550_v63  ;;  %v22614_v63 = vld [vmem:[#allocation123_spill] sm:$0xff] }
 0x971   :  { %12846 = vmatmul.mubr.f32.gmra.mrb[4].mxu1 %v22495_v56  ;;  %v22553_v56 = vand.u32 4294901760, %v22552_v29  ;;  %v22616_v29 = vld [vmem:[#allocation119_spill] sm:$0xff] }
 0x972   :  { %12848 = vmatprep.mubr.f32.mxu1 %v22496_v7  ;;  %v22555_v7 = vand.u32 4294901760, %v22554_v21  ;;  %v22618_v21 = vld [vmem:[#allocation31_spill] sm:$0xff] }
 0x975   :  { %12849 = vmatmul.mubr.f32.gmra.mrb[6].mxu1 %v22497_v23  ;;  %v22557_v23 = vand.u32 4294901760, %v22556_v61  ;;  %v22620_v61 = vld [vmem:[#allocation62_spill] sm:$0xff] }
 0x976   :  { %12851 = vmatprep.mubr.f32.mxu1 %v22498_v38  ;;  %v22559_v38 = vand.u32 4294901760, %v19891_v11  ;;  %v22569_v11 = vld [vmem:[#allocation96_spill] sm:$0xff] }
 0x979   :  { %12852 = vmatmul.mubr.f32.gmra.mrb[8].mxu1 %v22499_v46  ;;  %v22560_v46 = vld [vmem:[#allocation141_spill] sm:$0xff] }
 0x97a   :  { %12854 = vmatprep.mubr.f32.mxu1 %v22500_v31  ;;  %v22561_v31 = vand.u32 4294901760, %v22560_v46  ;;  %v22624_v46 = vld [vmem:[#allocation104_spill] sm:$0xff] }
 0x97d   :  { %12855 = vmatmul.mubr.f32.gmra.mrb[10].mxu1 %v22501_v0  ;;  %v22562_v0 = vld [vmem:[#allocation142_spill] sm:$0xff] }
 0x97e   :  { %12857 = vmatprep.mubr.f32.mxu1 %v22502_v18  ;;  %v22563_v18 = vand.u32 4294901760, %v22562_v0  ;;  %v22626_v0 = vld [vmem:[#allocation68_spill] sm:$0xff] }
 0x981   :  { %12858 = vmatmul.mubr.f32.gmra.mrb[12].mxu1 %v22503_v10  ;;  %v22564_v10 = vld [vmem:[#allocation63_spill] sm:$0xff] }
 0x982   :  { %12860 = vmatprep.mubr.f32.mxu1 %v22504_v27  ;;  %v22565_v27 = vld [vmem:[#allocation59_spill] sm:$0xff] }
 0x985   :  { %12861 = vmatmul.mubr.f32.gmra.mrb[14].mxu1 %v22505_v12  ;;  %v22566_v12 = vld [vmem:[#allocation20_spill] sm:$0xff] }
 0x986   :  { %12863 = vmatprep.mubr.f32.mxu1 %v22506_v54  ;;  %v22567_v54 = vld [vmem:[#allocation30_spill] sm:$0xff] }
 0x989   :  { %12864 = vmatmul.mubr.f32.gmra.mrb[16].mxu1 %v22507_v35  ;;  %v22570_v35 = vld [vmem:[#allocation78_spill] sm:$0xff] }
 0x98a   :  { %12866 = vmatprep.mubr.f32.mxu1 %v22508_v33  ;;  %v22571_v33 = vld [vmem:[#allocation73_spill] sm:$0xff] }
 0x98d   :  { %12867 = vmatmul.mubr.f32.gmra.mrb[18].mxu1 %v22509_v8  ;;  %v22572_v8 = vld [vmem:[#allocation99_spill] sm:$0xff] }
 0x98e   :  { %12869 = vmatprep.mubr.f32.mxu1 %v22510_v43  ;;  %v22573_v43 = vld [vmem:[#allocation127_spill] sm:$0xff] }
 0x991   :  { %12870 = vmatmul.mubr.f32.gmra.mrb[20].mxu1 %v22511_v52  ;;  %v22574_v52 = vld [vmem:[#allocation49_spill] sm:$0xff] }
 0x992   :  { %12872 = vmatprep.mubr.f32.mxu1 %v22512_v41  ;;  %v22576_v41 = vld [vmem:[#allocation135_spill] sm:$0xff] }
 0x995   :  { %12873 = vmatmul.mubr.f32.gmra.mrb[22].mxu1 %v22513_v60  ;;  %v22577_v60 = vld [vmem:[#allocation110_spill] sm:$0xff] }
 0x996   :  { %12875 = vmatprep.mubr.f32.mxu1 %v22514_v25  ;;  %v22578_v25 = vld [vmem:[#allocation80_spill] sm:$0xff] }
 0x999   :  { %12876 = vmatmul.mubr.f32.gmra.mrb[24].mxu1 %v22515_v49  ;;  %v22579_v49 = vld [vmem:[#allocation101_spill] sm:$0xff] }
 0x99a   :  { %12878 = vmatprep.mubr.f32.mxu1 %v22516_v42  ;;  %v22580_v42 = vld [vmem:[#allocation70_spill] sm:$0xff] }
 0x99d   :  { %12879 = vmatmul.mubr.f32.gmra.mrb[26].mxu1 %v22517_v34  ;;  %v22581_v34 = vld [vmem:[#allocation38_spill] sm:$0xff] }
 0x99e   :  { %12881 = vmatprep.mubr.f32.mxu1 %v22518_v22  ;;  %v22582_v22 = vld [vmem:[#allocation51_spill] sm:$0xff] }
 0x9a1   :  { %12882 = vmatmul.mubr.f32.gmra.mrb[28].mxu1 %v22519_v2  ;;  %v22583_v2 = vld [vmem:[#allocation56_spill] sm:$0xff] }
 0x9a2   :  { %12884 = vmatprep.mubr.f32.mxu1 %v22520_v13  ;;  %v22584_v13 = vld [vmem:[#allocation42_spill] sm:$0xff] }
 0x9a5   :  { %12885 = vmatmul.mubr.f32.gmra.mrb[30].mxu1 %v22521_v50  ;;  %v22585_v50 = vld [vmem:[#allocation90_spill] sm:$0xff] }
 0x9a6   :  { %12887 = vmatprep.mubr.f32.mxu1 %v22522_v15  ;;  %v22586_v15 = vld [vmem:[#allocation88_spill] sm:$0xff] }
 0x9a9   :  { %12888 = vmatmul.mubr.f32.gmra.mrb[32].mxu1 %v22524_v30  ;;  %v22588_v30 = vld [vmem:[#allocation71_spill] sm:$0xff] }
 0x9aa   :  { %12890 = vmatprep.mubr.f32.mxu1 %v22526_v3  ;;  %v22590_v3 = vld [vmem:[#allocation26_spill] sm:$0xff] }
 0x9ad   :  { %12891 = vmatmul.mubr.f32.gmra.mrb[34].mxu1 %v22528_v4  ;;  %v22592_v4 = vld [vmem:[#allocation125_spill] sm:$0xff] }
 0x9ae   :  { %12893 = vmatprep.mubr.f32.mxu1 %v22530_v40  ;;  %v22594_v40 = vld [vmem:[#allocation126_spill] sm:$0xff] }
 0x9b1   :  { %12894 = vmatmul.mubr.f32.gmra.mrb[36].mxu1 %v22532_v59  ;;  %v22596_v59 = vld [vmem:[#allocation52_spill] sm:$0xff] }
 0x9b2   :  { %12896 = vmatprep.mubr.f32.mxu1 %v22534_v9  ;;  %v22598_v9 = vld [vmem:[#allocation77_spill] sm:$0xff] }
 0x9b5   :  { %12897 = vmatmul.mubr.f32.gmra.mrb[38].mxu1 %v22536_v57  ;;  %v22600_v57 = vld [vmem:[#allocation114_spill] sm:$0xff] }
 0x9b6   :  { %12899 = vmatprep.mubr.f32.mxu1 %v22538_v51  ;;  %v22602_v51 = vld [vmem:[#allocation107_spill] sm:$0xff] }
 0x9b9   :  { %12900 = vmatmul.mubr.f32.gmra.mrb[40].mxu1 %v22539_v53  ;;  %v22603_v53 = vld [vmem:[#allocation48_spill] sm:$0xff] }
 0x9ba   :  { %12902 = vmatprep.mubr.f32.mxu1 %v22540_v36  ;;  %v22604_v36 = vld [vmem:[#allocation21_spill] sm:$0xff] }
 0x9bd   :  { %12903 = vmatmul.mubr.f32.gmra.mrb[42].mxu1 %v22541_v24  ;;  %v22605_v24 = vld [vmem:[#allocation19_spill] sm:$0xff] }
 0x9be   :  { %12905 = vmatprep.mubr.f32.mxu1 %v22542_v20  ;;  %v22606_v20 = vld [vmem:[#allocation35_spill] sm:$0xff] }
 0x9c1   :  { %12906 = vmatmul.mubr.f32.gmra.mrb[44].mxu1 %v22543_v32  ;;  %v22607_v32 = vld [vmem:[#allocation29_spill] sm:$0xff] }
 0x9c2   :  { %12908 = vmatprep.mubr.f32.mxu1 %v22544_v45  ;;  %v22608_v45 = vld [vmem:[#allocation46_spill] sm:$0xff] }
 0x9c5   :  { %12909 = vmatmul.mubr.f32.gmra.mrb[46].mxu1 %v22545_v44  ;;  %v22609_v44 = vld [vmem:[#allocation118_spill] sm:$0xff] }
 0x9c6   :  { %12911 = vmatprep.mubr.f32.mxu1 %v22547_v28  ;;  %v22611_v28 = vld [vmem:[#allocation9_spill] sm:$0xff] }
 0x9c9   :  { %12912 = vmatmul.mubr.f32.gmra.mrb[48].mxu1 %v22549_v62  ;;  %v22613_v62 = vld [vmem:[#allocation83_spill] sm:$0xff] }
 0x9ca   :  { %12914 = vmatprep.mubr.f32.mxu1 %v22551_v1  ;;  %v22615_v1 = vld [vmem:[#allocation108_spill] sm:$0xff] }
 0x9cd   :  { %12915 = vmatmul.mubr.f32.gmra.mrb[50].mxu1 %v22553_v56  ;;  %v22617_v56 = vld [vmem:[#allocation111_spill] sm:$0xff] }
 0x9ce   :  { %12917 = vmatprep.mubr.f32.mxu1 %v22555_v7  ;;  %v22619_v7 = vld [vmem:[#allocation17_spill] sm:$0xff] }
 0x9d1   :  { %12918 = vmatmul.mubr.f32.gmra.mrb[52].mxu1 %v22557_v23  ;;  %v22621_v23 = vld [vmem:[#allocation18_spill] sm:$0xff] }
 0x9d2   :  { %12920 = vmatprep.mubr.f32.mxu1 %v22558_v14  ;;  %v22622_v14 = vld [vmem:[#allocation60_spill] sm:$0xff] }
 0x9d5   :  { %12921 = vmatmul.mubr.f32.gmra.mrb[54].mxu1 %v22559_v38  ;;  %v22623_v38 = vld [vmem:[#allocation67_spill] sm:$0xff] }
 0x9d6   :  { %12923 = vmatprep.mubr.f32.mxu1 %v22561_v31  ;;  %v22625_v31 = vld [vmem:[#allocation10_spill] sm:$0xff] }
 0x9d9   :  { %12924 = vmatmul.mubr.f32.gmra.mrb[56].mxu1 %v22563_v18  ;;  %v22627_v18 = vld [vmem:[#allocation138_spill] sm:$0xff] }
 0x9da   :  { %12942 = vmatprep.mubr.f32.mxu1 %v22564_v10 }
 0x9dd   :  { %12943 = vmatmul.mubr.f32.vlgmr.msra.gmra.mrb[58].mxu1 %v22565_v27 }
 0x9de   :  { %12945 = vmatprep.mubr.f32.mxu1 %v22566_v12  ;;  %13281 = vmatpush3.bf16.msra.mxu1 %v22382_v17  ;;  %v22575_v17 = vld [vmem:[#allocation134_spill] sm:$0xff] }
 0x9df   :  { %13283 = vmatprep.subr.bf16.mxu1 %v22567_v54 }
 0x9e1   :  { %12946 = vmatmul.mubr.f32.gmra.mrb[60].mxu1 %v22568_v5 }
 0x9e2   :  { %12948 = vmatprep.mubr.f32.mxu1 %v22569_v11  ;;  %13285 = vmatpush3.bf16.msra.mxu1 %v22567_v54  ;;  %v22628_v54 = vld [vmem:[#allocation25_spill] sm:$0xff] }
 0x9e3   :  { %13287 = vmatprep.subr.bf16.mxu1 %v22570_v35 }
 0x9e5   :  { %12949 = vmatmul.mubr.f32.gmra.mrb[62].mxu1 %v22571_v33 }
 0x9e6   :  { %12951 = vmatprep.mubr.f32.mxu1 %v22572_v8  ;;  %13289 = vmatpush3.bf16.msra.mxu1 %v22570_v35  ;;  %v22629_v35 = vld [vmem:[#allocation139_spill] sm:$0xff] }
 0x9e7   :  { %13291 = vmatprep.subr.bf16.mxu1 %v22573_v43 }
 0x9e9   :  { %12952 = vmatmul.mubr.f32.gmra.mrb[64].mxu1 %v22574_v52 }
 0x9ea   :  { %12954 = vmatprep.mubr.f32.mxu1 %v22575_v17  ;;  %13293 = vmatpush3.bf16.msra.mxu1 %v22573_v43  ;;  %v22630_v43 = vld [vmem:[#allocation140_spill] sm:$0xff] }
 0x9ed   :  { %12955 = vmatmul.mubr.f32.gmra.mrb[66].mxu1 %v22576_v41 }
 0x9ee   :  { %12957 = vmatprep.mubr.f32.mxu1 %v22577_v60 }
 0x9f1   :  { %12958 = vmatmul.mubr.f32.gmra.mrb[4].mxu1 %v22578_v25 }
 0x9f2   :  { %12960 = vmatprep.mubr.f32.mxu1 %v22579_v49 }
 0x9f5   :  { %12961 = vmatmul.mubr.f32.gmra.mrb[6].mxu1 %v22580_v42 }
 0x9f6   :  { %12963 = vmatprep.mubr.f32.mxu1 %v22581_v34 }
 0x9f9   :  { %12964 = vmatmul.mubr.f32.gmra.mrb[8].mxu1 %v22582_v22 }
 0x9fa   :  { %12966 = vmatprep.mubr.f32.mxu1 %v22583_v2 }
 0x9fd   :  { %12967 = vmatmul.mubr.f32.gmra.mrb[10].mxu1 %v22584_v13 }
 0x9fe   :  { %12969 = vmatprep.mubr.f32.mxu1 %v22585_v50 }
 0xa01   :  { %12970 = vmatmul.mubr.f32.gmra.mrb[12].mxu1 %v22586_v15 }
 0xa02   :  { %12972 = vmatprep.mubr.f32.mxu1 %v22587_v19 }
 0xa05   :  { %12973 = vmatmul.mubr.f32.gmra.mrb[14].mxu1 %v22588_v30 }
 0xa06   :  { %12975 = vmatprep.mubr.f32.mxu1 %v22589_v55 }
 0xa09   :  { %12976 = vmatmul.mubr.f32.gmra.mrb[16].mxu1 %v22590_v3 }
 0xa0a   :  { %12978 = vmatprep.mubr.f32.mxu1 %v22591_v37 }
 0xa0d   :  { %12979 = vmatmul.mubr.f32.gmra.mrb[18].mxu1 %v22592_v4 }
 0xa0e   :  { %12981 = vmatprep.mubr.f32.mxu1 %v22593_v39 }
 0xa11   :  { %12982 = vmatmul.mubr.f32.gmra.mrb[20].mxu1 %v22594_v40 }
 0xa12   :  { %12984 = vmatprep.mubr.f32.mxu1 %v22595_v16 }
 0xa15   :  { %12985 = vmatmul.mubr.f32.gmra.mrb[22].mxu1 %v22596_v59 }
 0xa16   :  { %12987 = vmatprep.mubr.f32.mxu1 %v22597_v26 }
 0xa19   :  { %12988 = vmatmul.mubr.f32.gmra.mrb[24].mxu1 %v22598_v9 }
 0xa1a   :  { %12990 = vmatprep.mubr.f32.mxu1 %v22599_v58 }
 0xa1d   :  { %12991 = vmatmul.mubr.f32.gmra.mrb[26].mxu1 %v22600_v57 }
 0xa1e   :  { %12993 = vmatprep.mubr.f32.mxu1 %v22601_v47 }
 0xa21   :  { %12994 = vmatmul.mubr.f32.gmra.mrb[28].mxu1 %v22602_v51 }
 0xa22   :  { %12996 = vmatprep.mubr.f32.mxu1 %v22603_v53 }
 0xa25   :  { %12997 = vmatmul.mubr.f32.gmra.mrb[30].mxu1 %v22604_v36 }
 0xa26   :  { %12999 = vmatprep.mubr.f32.mxu1 %v22605_v24 }
 0xa29   :  { %13000 = vmatmul.mubr.f32.gmra.mrb[32].mxu1 %v22606_v20 }
 0xa2a   :  { %13002 = vmatprep.mubr.f32.mxu1 %v22607_v32 }
 0xa2d   :  { %13003 = vmatmul.mubr.f32.gmra.mrb[34].mxu1 %v22608_v45 }
 0xa2e   :  { %13005 = vmatprep.mubr.f32.mxu1 %v22609_v44 }
 0xa31   :  { %13006 = vmatmul.mubr.f32.gmra.mrb[36].mxu1 %v22610_v48 }
 0xa32   :  { %13008 = vmatprep.mubr.f32.mxu1 %v22611_v28 }
 0xa35   :  { %13009 = vmatmul.mubr.f32.gmra.mrb[38].mxu1 %v22612_v6 }
 0xa36   :  { %13011 = vmatprep.mubr.f32.mxu1 %v22613_v62 }
 0xa39   :  { %13012 = vmatmul.mubr.f32.gmra.mrb[40].mxu1 %v22614_v63 }
 0xa3a   :  { %13014 = vmatprep.mubr.f32.mxu1 %v22615_v1 }
 0xa3d   :  { %13015 = vmatmul.mubr.f32.gmra.mrb[42].mxu1 %v22616_v29 }
 0xa3e   :  { %13017 = vmatprep.mubr.f32.mxu1 %v22617_v56 }
 0xa41   :  { %13018 = vmatmul.mubr.f32.gmra.mrb[44].mxu1 %v22618_v21 }
 0xa42   :  { %13020 = vmatprep.mubr.f32.mxu1 %v22619_v7 }
 0xa45   :  { %13021 = vmatmul.mubr.f32.gmra.mrb[46].mxu1 %v22620_v61 }
 0xa46   :  { %13023 = vmatprep.mubr.f32.mxu1 %v22621_v23 }
 0xa49   :  { %13024 = vmatmul.mubr.f32.gmra.mrb[48].mxu1 %v22622_v14 }
 0xa4a   :  { %13026 = vmatprep.mubr.f32.mxu1 %v22623_v38 }
 0xa4d   :  { %13027 = vmatmul.mubr.f32.gmra.mrb[50].mxu1 %v22624_v46 }
 0xa4e   :  { %13029 = vmatprep.mubr.f32.mxu1 %v22625_v31 }
 0xa51   :  { %13030 = vmatmul.mubr.f32.gmra.mrb[52].mxu1 %v22626_v0 }
 0xa52   :  { %13032 = vmatprep.mubr.f32.mxu1 %v22627_v18 }
 0xa55   :  { %13033 = vmatmul.mubr.f32.gmra.mrb[54].mxu1 %v22628_v54 }
 0xa56   :  { %13035 = vmatprep.mubr.f32.mxu1 %v22629_v35 }
 0xa59   :  { %13036 = vmatmul.mubr.f32.gmra.mrb[56].mxu1 %v22630_v43 }
 0xa5a   :  { %13054 = vmatprep.mubr.f32.mxu1 %v22564_v10  ;;  %v14080_v10 = vld [vmem:[%s20530_s1 + $0xe0] sm:$0xff]  ;;  %s14200_s1 = smov [#allocation5]  }
 0xa5b   :  { %s10980_s4 = sshll.u32 %s14200_s1, 4  ;;  %s10981_s4 = int_to_ptr.vmem [resolvable:$true] %s10980_s4 }
 0xa5c   :  { %s14167_s5 = scalar_lea.vmem %s10981_s4, 8192  ;;  %p14172_p9 = scmp.lt.s32.totalorder %s10981_s4, %s10981_s4 }
 0xa5d   :  { %13055 = vmatmul.mubr.f32.vlgmr.msra.gmra.mrb[58].mxu1 %v22565_v27  ;;  %v22631_v27 = vld [vmem:[#allocation12_spill] sm:$0xff]  ;;  %p14168_p8 = scmp.ne.s32.totalorder %s10981_s4, %s14167_s5  ;;  %p14173_p10 = scmp.lt.s32.totalorder %s14167_s5, %s14167_s5 }
 0xa5e   :  { %13057 = vmatprep.mubr.f32.mxu1 %v22566_v12  ;;  %v22632_v12 = vsub.s32 4, %v22631_v27 }
 0xa5f   :  { %p14174_p11 = por %p14173_p10, %p14172_p9 }
 0xa61   :  { %13058 = vmatmul.mubr.f32.gmra.mrb[60].mxu1 %v22568_v5  ;;  %v20374_v5 = vrot.slane %v14080_v10, %v22632_v12  ;;  %p14175_p12 = pnand %p14174_p11, %p14168_p8 }
 0xa62   :  { %13060 = vmatprep.mubr.f32.mxu1 %v22569_v11  ;;  %v22633_v11 = vld [vmem:[#allocation86_spill] sm:$0xff] }
 0xa65   :  { %13061 = vmatmul.mubr.f32.gmra.mrb[62].mxu1 %v22571_v33  ;;  %v7691_v33 = vadd.f32 %v22633_v11, %v20374_v5 }
 0xa66   :  { %13063 = vmatprep.mubr.f32.mxu1 %v22572_v8  ;;  %v22634_v8 = vld [vmem:[#allocation32_spill] sm:$0xff] }
 0xa69   :  { %13064 = vmatmul.mubr.f32.gmra.mrb[64].mxu1 %v22574_v52  ;;  %v7681_v52 = vadd.f32 %v22634_v8, %v20374_v5 }
 0xa6a   :  { %13066 = vmatprep.mubr.f32.mxu1 %v22575_v17 }
 0xa6d   :  { %13067 = vmatmul.mubr.f32.gmra.mrb[66].mxu1 %v22576_v41 }
 0xa6e   :  { %13069 = vmatprep.mubr.f32.mxu1 %v22577_v60 }
 0xa71   :  { %13070 = vmatmul.mubr.f32.gmra.mrb[4].mxu1 %v22578_v25 }
 0xa72   :  { %13072 = vmatprep.mubr.f32.mxu1 %v22579_v49  ;;  %v22635_v49 = vld [vmem:[#allocation39_spill] sm:$0xff] }
 0xa75   :  { %13073 = vmatmul.mubr.f32.gmra.mrb[6].mxu1 %v22580_v42  ;;  %v7711_v42 = vadd.f32 %v22635_v49, %v20374_v5 }
 0xa76   :  { %13075 = vmatprep.mubr.f32.mxu1 %v22581_v34  ;;  %v14081_v34 = vld [vmem:[#allocation2 + $0x8] sm:$0xff] }
 0xa79   :  { %13076 = vmatmul.mubr.f32.gmra.mrb[8].mxu1 %v22582_v22 }
 0xa7a   :  { %13078 = vmatprep.mubr.f32.mxu1 %v22583_v2  ;;  %v22636_v2 = vld [vmem:[#allocation36_spill] sm:$0xff] }
 0xa7d   :  { %13079 = vmatmul.mubr.f32.gmra.mrb[10].mxu1 %v22584_v13  ;;  %v7701_v13 = vadd.f32 %v22636_v2, %v20374_v5 }
 0xa7e   :  { %13081 = vmatprep.mubr.f32.mxu1 %v22585_v50  ;;  %v14082_v50 = vld [vmem:[#allocation2] sm:$0xff] }
 0xa81   :  { %13082 = vmatmul.mubr.f32.gmra.mrb[12].mxu1 %v22586_v15 }
 0xa82   :  { %13084 = vmatprep.mubr.f32.mxu1 %v22587_v19 }
 0xa85   :  { %13085 = vmatmul.mubr.f32.gmra.mrb[14].mxu1 %v22588_v30 }
 0xa86   :  { %13087 = vmatprep.mubr.f32.mxu1 %v22589_v55 }
 0xa89   :  { %13088 = vmatmul.mubr.f32.gmra.mrb[16].mxu1 %v22590_v3 }
 0xa8a   :  { %13090 = vmatprep.mubr.f32.mxu1 %v22591_v37  ;;  %v22637_v37 = vld [vmem:[#allocation11_spill] sm:$0xff] }
 0xa8d   :  { %13091 = vmatmul.mubr.f32.gmra.mrb[18].mxu1 %v22592_v4  ;;  %v7731_v4 = vadd.f32 %v22637_v37, %v20374_v5 }
 0xa8e   :  { %13093 = vmatprep.mubr.f32.mxu1 %v22593_v39  ;;  %v14083_v39 = vld [vmem:[#allocation2 + $0x18] sm:$0xff] }
 0xa91   :  { %13094 = vmatmul.mubr.f32.gmra.mrb[20].mxu1 %v22594_v40 }
 0xa92   :  { %13096 = vmatprep.mubr.f32.mxu1 %v22595_v16  ;;  %v22638_v16 = vld [vmem:[#allocation143_spill] sm:$0xff] }
 0xa95   :  { %13097 = vmatmul.mubr.f32.gmra.mrb[22].mxu1 %v22596_v59  ;;  %v7721_v59 = vadd.f32 %v22638_v16, %v20374_v5 }
 0xa96   :  { %13099 = vmatprep.mubr.f32.mxu1 %v22597_v26  ;;  %v14084_v26 = vld [vmem:[#allocation2 + $0x10] sm:$0xff] }
 0xa99   :  { %13100 = vmatmul.mubr.f32.gmra.mrb[24].mxu1 %v22598_v9 }
 0xa9a   :  { %13102 = vmatprep.mubr.f32.mxu1 %v22599_v58 }
 0xa9d   :  { %13103 = vmatmul.mubr.f32.gmra.mrb[26].mxu1 %v22600_v57 }
 0xa9e   :  { %13105 = vmatprep.mubr.f32.mxu1 %v22601_v47 }
 0xaa1   :  { %13106 = vmatmul.mubr.f32.gmra.mrb[28].mxu1 %v22602_v51 }
 0xaa2   :  { %13108 = vmatprep.mubr.f32.mxu1 %v22603_v53  ;;  %v22639_v53 = vld [vmem:[#allocation144_spill] sm:$0xff] }
 0xaa5   :  { %13109 = vmatmul.mubr.f32.gmra.mrb[30].mxu1 %v22604_v36  ;;  %v7751_v36 = vadd.f32 %v22639_v53, %v20374_v5 }
 0xaa6   :  { %13111 = vmatprep.mubr.f32.mxu1 %v22605_v24  ;;  %v14085_v24 = vld [vmem:[#allocation2 + $0x28] sm:$0xff] }
 0xaa9   :  { %13112 = vmatmul.mubr.f32.gmra.mrb[32].mxu1 %v22606_v20 }
 0xaaa   :  { %13114 = vmatprep.mubr.f32.mxu1 %v22607_v32  ;;  %v22640_v32 = vld [vmem:[#allocation145_spill] sm:$0xff] }
 0xaad   :  { %13115 = vmatmul.mubr.f32.gmra.mrb[34].mxu1 %v22608_v45  ;;  %v7741_v45 = vadd.f32 %v22640_v32, %v20374_v5 }
 0xaae   :  { %13117 = vmatprep.mubr.f32.mxu1 %v22609_v44  ;;  %v14086_v44 = vld [vmem:[#allocation2 + $0x20] sm:$0xff] }
 0xab1   :  { %13118 = vmatmul.mubr.f32.gmra.mrb[36].mxu1 %v22610_v48 }
 0xab2   :  { %13120 = vmatprep.mubr.f32.mxu1 %v22611_v28 }
 0xab5   :  { %13121 = vmatmul.mubr.f32.gmra.mrb[38].mxu1 %v22612_v6 }
 0xab6   :  { %13123 = vmatprep.mubr.f32.mxu1 %v22613_v62 }
 0xab9   :  { %13124 = vmatmul.mubr.f32.gmra.mrb[40].mxu1 %v22614_v63 }
 0xaba   :  { %13126 = vmatprep.mubr.f32.mxu1 %v22615_v1  ;;  %v22641_v1 = vld [vmem:[#allocation146_spill] sm:$0xff] }
 0xabd   :  { %13127 = vmatmul.mubr.f32.gmra.mrb[42].mxu1 %v22616_v29  ;;  %v7771_v29 = vadd.f32 %v22641_v1, %v20374_v5 }
 0xabe   :  { %13129 = vmatprep.mubr.f32.mxu1 %v22617_v56  ;;  %v14087_v56 = vld [vmem:[#allocation2 + $0x38] sm:$0xff] }
 0xac1   :  { %13130 = vmatmul.mubr.f32.gmra.mrb[44].mxu1 %v22618_v21 }
 0xac2   :  { %13132 = vmatprep.mubr.f32.mxu1 %v22619_v7  ;;  %v22642_v7 = vld [vmem:[#allocation147_spill] sm:$0xff] }
 0xac5   :  { %13133 = vmatmul.mubr.f32.gmra.mrb[46].mxu1 %v22620_v61  ;;  %v7761_v61 = vadd.f32 %v22642_v7, %v20374_v5 }
 0xac6   :  { %13135 = vmatprep.mubr.f32.mxu1 %v22621_v23  ;;  %v14088_v23 = vld [vmem:[#allocation2 + $0x30] sm:$0xff] }
 0xac9   :  { %13136 = vmatmul.mubr.f32.gmra.mrb[48].mxu1 %v22622_v14 }
 0xaca   :  { %13138 = vmatprep.mubr.f32.mxu1 %v22623_v38 }
 0xacd   :  { %13139 = vmatmul.mubr.f32.gmra.mrb[50].mxu1 %v22624_v46 }
 0xace   :  { %13141 = vmatprep.mubr.f32.mxu1 %v22625_v31 }
 0xad1   :  { %13142 = vmatmul.mubr.f32.gmra.mrb[52].mxu1 %v22626_v0 }
 0xad2   :  { %13144 = vmatprep.mubr.f32.mxu1 %v22627_v18  ;;  %v14089_v18 = vld [vmem:[#allocation2 + $0x48] sm:$0xff] }
 0xad5   :  { %13145 = vmatmul.mubr.f32.gmra.mrb[54].mxu1 %v22628_v54 }
 0xad6   :  { %13147 = vmatprep.mubr.f32.mxu1 %v22629_v35  ;;  %v14090_v35 = vld [vmem:[#allocation2 + $0x40] sm:$0xff] }
 0xad9   :  { %13148 = vmatmul.mubr.f32.gmra.mrb[56].mxu1 %v22630_v43 }
 0xb30   :  { %v13056_v17 = vpop.f32.mrb[58].mxu1 }
 0xb31   :  { %v13367_v41 = vadd.f32 %v13056_v17, %v7691_v33  ;;  %v10465_v60 = vpop.f32.mrb[59].mxu1  ;;  %v14091_v33 = vld [vmem:[#allocation2 + $0x58] sm:$0xff] }
 0xb32   :  { %v13369_v25 = vadd.f32 %v10465_v60, %v7681_v52  ;;  %v14092_v52 = vld [vmem:[#allocation2 + $0x50] sm:$0xff] }
 0xb33   :  { %v10848_v22 = vadd.f32 %v14081_v34, %v13367_v41 }
 0xb34   :  { %v10847_v15 = vadd.f32 %v14082_v50, %v13369_v25  ;;  %v13059_v19 = vpop.f32.mrb[60].mxu1 }
 0xb35   :  { %10912 = vst.msk [vmem:[#allocation5 + $0x8] sm:$0xff] %vm123_vm0, %v10848_v22  ;;  %v13371_v30 = vadd.f32 %v13059_v19, %v7711_v42  ;;  %v10477_v55 = vpop.f32.mrb[61].mxu1  ;;  %v14093_v42 = vld [vmem:[#allocation2 + $0x68] sm:$0xff]  ;;  %v14094_v22 = vld [vmem:[#allocation2 + $0x60] sm:$0xff] }
 0xb36   :  { %10911 = vst.msk [vmem:[#allocation5] sm:$0xff] %vm123_vm0, %v10847_v15  ;;  %v13373_v3 = vadd.f32 %v10477_v55, %v7701_v13 }
 0xb37   :  { %v10850_v40 = vadd.f32 %v14083_v39, %v13371_v30  ;;  %v14095_v30 = vld [vmem:[#allocation2 + $0x78] sm:$0xff] }
 0xb38   :  { %v10849_v9 = vadd.f32 %v14084_v26, %v13373_v3  ;;  %v13062_v58 = vpop.f32.mrb[62].mxu1  ;;  %v14096_v3 = vld [vmem:[#allocation2 + $0x70] sm:$0xff] }
 0xb39   :  { %10914 = vst.msk [vmem:[#allocation5 + $0x18] sm:$0xff] %vm123_vm0, %v10850_v40  ;;  %v13375_v57 = vadd.f32 %v13062_v58, %v7731_v4  ;;  %v10489_v47 = vpop.f32.mrb[63].mxu1 }
 0xb3a   :  { %10913 = vst.msk [vmem:[#allocation5 + $0x10] sm:$0xff] %vm123_vm0, %v10849_v9  ;;  %v13377_v51 = vadd.f32 %v10489_v47, %v7721_v59  ;;  %v14097_v59 = vld [vmem:[#allocation2 + $0x88] sm:$0xff]  ;;  %v14098_v9 = vld [vmem:[#allocation2 + $0x80] sm:$0xff] }
 0xb3b   :  { %v10852_v20 = vadd.f32 %v14085_v24, %v13375_v57 }
 0xb3c   :  { %v10851_v48 = vadd.f32 %v14086_v44, %v13377_v51  ;;  %v13065_v28 = vpop.f32.mrb[64].mxu1 }
 0xb3d   :  { %10916 = vst.msk [vmem:[#allocation5 + $0x28] sm:$0xff] %vm123_vm0, %v10852_v20  ;;  %v13379_v6 = vadd.f32 %v13065_v28, %v7751_v36  ;;  %v10501_v62 = vpop.f32.mrb[65].mxu1  ;;  %v14099_v36 = vld [vmem:[#allocation2 + $0x98] sm:$0xff]  ;;  %v14100_v20 = vld [vmem:[#allocation2 + $0x90] sm:$0xff] }
 0xb3e   :  { %10915 = vst.msk [vmem:[#allocation5 + $0x20] sm:$0xff] %vm123_vm0, %v10851_v48  ;;  %v13381_v63 = vadd.f32 %v10501_v62, %v7741_v45 }
 0xb3f   :  { %v10854_v21 = vadd.f32 %v14087_v56, %v13379_v6  ;;  %v14101_v6 = vld [vmem:[#allocation2 + $0xa8] sm:$0xff] }
 0xb40   :  { %v10853_v14 = vadd.f32 %v14088_v23, %v13381_v63  ;;  %v13068_v38 = vpop.f32.mrb[66].mxu1  ;;  %v14102_v63 = vld [vmem:[#allocation2 + $0xa0] sm:$0xff] }
 0xb41   :  { %10918 = vst.msk [vmem:[#allocation5 + $0x38] sm:$0xff] %vm123_vm0, %v10854_v21  ;;  %v13383_v46 = vadd.f32 %v13068_v38, %v7771_v29  ;;  %v10513_v31 = vpop.f32.mrb[67].mxu1 }
 0xb42   :  { %10917 = vst.msk [vmem:[#allocation5 + $0x30] sm:$0xff] %vm123_vm0, %v10853_v14  ;;  %v13385_v0 = vadd.f32 %v10513_v31, %v7761_v61  ;;  %v14103_v61 = vld [vmem:[#allocation2 + $0xb8] sm:$0xff]  ;;  %v14104_v14 = vld [vmem:[#allocation2 + $0xb0] sm:$0xff] }
 0xb43   :  { %v10856_v54 = vadd.f32 %v14089_v18, %v13383_v46 }
 0xb44   :  { %v10855_v43 = vadd.f32 %v14090_v35, %v13385_v0  ;;  %v13071_v10 = vpop.f32.mrb[4].mxu1 }
 0xb45   :  { %10920 = vst.msk [vmem:[#allocation5 + $0x48] sm:$0xff] %vm123_vm0, %v10856_v54  ;;  %v13386_v27 = vadd.f32 %v13071_v10, %v20374_v5  ;;  %v10525_v12 = vpop.f32.mrb[5].mxu1  ;;  %v14105_v54 = vld [vmem:[#allocation2 + $0xc8] sm:$0xff] }
 0xb46   :  { %10919 = vst.msk [vmem:[#allocation5 + $0x40] sm:$0xff] %vm123_vm0, %v10855_v43  ;;  %v13387_v11 = vadd.f32 %v10525_v12, %v20374_v5  ;;  %v14106_v43 = vld [vmem:[#allocation2 + $0xc0] sm:$0xff] }
 0xb47   :  { %v10858_v8 = vadd.f32 %v14091_v33, %v13386_v27 }
 0xb48   :  { %v10857_v17 = vadd.f32 %v14092_v52, %v13387_v11  ;;  %v13074_v41 = vpop.f32.mrb[6].mxu1 }
 0xb49   :  { %10922 = vst.msk [vmem:[#allocation5 + $0x58] sm:$0xff] %vm123_vm0, %v10858_v8  ;;  %v13388_v60 = vadd.f32 %v13074_v41, %v20374_v5  ;;  %v10537_v25 = vpop.f32.mrb[7].mxu1  ;;  %v14107_v8 = vld [vmem:[#allocation2 + $0xd8] sm:$0xff] }
 0xb4a   :  { %10921 = vst.msk [vmem:[#allocation5 + $0x50] sm:$0xff] %vm123_vm0, %v10857_v17  ;;  %v13389_v49 = vadd.f32 %v10537_v25, %v20374_v5  ;;  %v14108_v17 = vld [vmem:[#allocation2 + $0xd0] sm:$0xff] }
 0xb4b   :  { %v10860_v34 = vadd.f32 %v14093_v42, %v13388_v60 }
 0xb4c   :  { %v10859_v2 = vadd.f32 %v14094_v22, %v13389_v49  ;;  %v13077_v13 = vpop.f32.mrb[8].mxu1 }
 0xb4d   :  { %10924 = vst.msk [vmem:[#allocation5 + $0x68] sm:$0xff] %vm123_vm0, %v10860_v34  ;;  %v13390_v50 = vadd.f32 %v13077_v13, %v20374_v5  ;;  %v10549_v15 = vpop.f32.mrb[9].mxu1  ;;  %v14109_v34 = vld [vmem:[#allocation2 + $0xe8] sm:$0xff] }
 0xb4e   :  { %10923 = vst.msk [vmem:[#allocation5 + $0x60] sm:$0xff] %vm123_vm0, %v10859_v2  ;;  %v13391_v19 = vadd.f32 %v10549_v15, %v20374_v5  ;;  %v14110_v2 = vld [vmem:[#allocation2 + $0xe0] sm:$0xff] }
 0xb4f   :  { %v10862_v55 = vadd.f32 %v14095_v30, %v13390_v50 }
 0xb50   :  { %v10861_v37 = vadd.f32 %v14096_v3, %v13391_v19  ;;  %v13080_v4 = vpop.f32.mrb[10].mxu1 }
 0xb51   :  { %10926 = vst.msk [vmem:[#allocation5 + $0x78] sm:$0xff] %vm123_vm0, %v10862_v55  ;;  %v13392_v39 = vadd.f32 %v13080_v4, %v20374_v5  ;;  %v10561_v40 = vpop.f32.mrb[11].mxu1  ;;  %v14111_v55 = vld [vmem:[#allocation2 + $0xf8] sm:$0xff] }
 0xb52   :  { %10925 = vst.msk [vmem:[#allocation5 + $0x70] sm:$0xff] %vm123_vm0, %v10861_v37  ;;  %v13393_v16 = vadd.f32 %v10561_v40, %v20374_v5  ;;  %v14112_v37 = vld [vmem:[#allocation2 + $0xf0] sm:$0xff] }
 0xb53   :  { %v10864_v26 = vadd.f32 %v14097_v59, %v13392_v39 }
 0xb54   :  { %v10863_v58 = vadd.f32 %v14098_v9, %v13393_v16  ;;  %v13083_v57 = vpop.f32.mrb[12].mxu1 }
 0xb55   :  { %10928 = vst.msk [vmem:[#allocation5 + $0x88] sm:$0xff] %vm123_vm0, %v10864_v26  ;;  %v13394_v47 = vadd.f32 %v13083_v57, %v20374_v5  ;;  %v10573_v51 = vpop.f32.mrb[13].mxu1  ;;  %v14113_v26 = vld [vmem:[#allocation2 + $0x108] sm:$0xff] }
 0xb56   :  { %10927 = vst.msk [vmem:[#allocation5 + $0x80] sm:$0xff] %vm123_vm0, %v10863_v58  ;;  %v13395_v53 = vadd.f32 %v10573_v51, %v20374_v5  ;;  %v14114_v58 = vld [vmem:[#allocation2 + $0x100] sm:$0xff] }
 0xb57   :  { %v10866_v24 = vadd.f32 %v14099_v36, %v13394_v47 }
 0xb58   :  { %v10865_v32 = vadd.f32 %v14100_v20, %v13395_v53  ;;  %v13086_v45 = vpop.f32.mrb[14].mxu1 }
 0xb59   :  { %10930 = vst.msk [vmem:[#allocation5 + $0x98] sm:$0xff] %vm123_vm0, %v10866_v24  ;;  %v13396_v44 = vadd.f32 %v13086_v45, %v20374_v5  ;;  %v10585_v48 = vpop.f32.mrb[15].mxu1  ;;  %v14115_v24 = vld [vmem:[#allocation2 + $0x118] sm:$0xff] }
 0xb5a   :  { %10929 = vst.msk [vmem:[#allocation5 + $0x90] sm:$0xff] %vm123_vm0, %v10865_v32  ;;  %v13397_v28 = vadd.f32 %v10585_v48, %v20374_v5  ;;  %v14116_v32 = vld [vmem:[#allocation2 + $0x110] sm:$0xff] }
 0xb5b   :  { %v10868_v62 = vadd.f32 %v14101_v6, %v13396_v44 }
 0xb5c   :  { %v10867_v1 = vadd.f32 %v14102_v63, %v13397_v28  ;;  %v13089_v29 = vpop.f32.mrb[16].mxu1 }
 0xb5d   :  { %10932 = vst.msk [vmem:[#allocation5 + $0xa8] sm:$0xff] %vm123_vm0, %v10868_v62  ;;  %v13398_v56 = vadd.f32 %v13089_v29, %v20374_v5  ;;  %v10597_v21 = vpop.f32.mrb[17].mxu1  ;;  %v14117_v62 = vld [vmem:[#allocation2 + $0x128] sm:$0xff] }
 0xb5e   :  { %10931 = vst.msk [vmem:[#allocation5 + $0xa0] sm:$0xff] %vm123_vm0, %v10867_v1  ;;  %v13399_v7 = vadd.f32 %v10597_v21, %v20374_v5  ;;  %v14118_v1 = vld [vmem:[#allocation2 + $0x120] sm:$0xff] }
 0xb5f   :  { %v10870_v23 = vadd.f32 %v14103_v61, %v13398_v56 }
 0xb60   :  { %v10869_v38 = vadd.f32 %v14104_v14, %v13399_v7  ;;  %v13092_v46 = vpop.f32.mrb[18].mxu1 }
 0xb61   :  { %10934 = vst.msk [vmem:[#allocation5 + $0xb8] sm:$0xff] %vm123_vm0, %v10870_v23  ;;  %v13400_v31 = vadd.f32 %v13092_v46, %v20374_v5  ;;  %v10609_v0 = vpop.f32.mrb[19].mxu1  ;;  %v14119_v23 = vld [vmem:[#allocation2 + $0x138] sm:$0xff] }
 0xb62   :  { %10933 = vst.msk [vmem:[#allocation5 + $0xb0] sm:$0xff] %vm123_vm0, %v10869_v38  ;;  %v13401_v18 = vadd.f32 %v10609_v0, %v20374_v5  ;;  %v14120_v38 = vld [vmem:[#allocation2 + $0x130] sm:$0xff] }
 0xb63   :  { %v10872_v35 = vadd.f32 %v14105_v54, %v13400_v31 }
 0xb64   :  { %v10871_v10 = vadd.f32 %v14106_v43, %v13401_v18  ;;  %v13095_v27 = vpop.f32.mrb[20].mxu1 }
 0xb65   :  { %10936 = vst.msk [vmem:[#allocation5 + $0xc8] sm:$0xff] %vm123_vm0, %v10872_v35  ;;  %v13402_v12 = vadd.f32 %v13095_v27, %v20374_v5  ;;  %v10621_v11 = vpop.f32.mrb[21].mxu1  ;;  %v14121_v35 = vld [vmem:[#allocation2 + $0x148] sm:$0xff] }
 0xb66   :  { %10935 = vst.msk [vmem:[#allocation5 + $0xc0] sm:$0xff] %vm123_vm0, %v10871_v10  ;;  %v13403_v33 = vadd.f32 %v10621_v11, %v20374_v5  ;;  %v14122_v10 = vld [vmem:[#allocation2 + $0x140] sm:$0xff] }
 0xb67   :  { %v10874_v52 = vadd.f32 %v14107_v8, %v13402_v12 }
 0xb68   :  { %v10873_v41 = vadd.f32 %v14108_v17, %v13403_v33  ;;  %v13098_v60 = vpop.f32.mrb[22].mxu1 }
 0xb69   :  { %10938 = vst.msk [vmem:[#allocation5 + $0xd8] sm:$0xff] %vm123_vm0, %v10874_v52  ;;  %v13404_v25 = vadd.f32 %v13098_v60, %v20374_v5  ;;  %v10633_v49 = vpop.f32.mrb[23].mxu1  ;;  %v14123_v52 = vld [vmem:[#allocation2 + $0x158] sm:$0xff] }
 0xb6a   :  { %10937 = vst.msk [vmem:[#allocation5 + $0xd0] sm:$0xff] %vm123_vm0, %v10873_v41  ;;  %v13405_v42 = vadd.f32 %v10633_v49, %v20374_v5  ;;  %v14124_v41 = vld [vmem:[#allocation2 + $0x150] sm:$0xff] }
 0xb6b   :  { %v10876_v22 = vadd.f32 %v14109_v34, %v13404_v25 }
 0xb6c   :  { %v10875_v13 = vadd.f32 %v14110_v2, %v13405_v42  ;;  %v13101_v50 = vpop.f32.mrb[24].mxu1 }
 0xb6d   :  { %10940 = vst.msk [vmem:[#allocation5 + $0xe8] sm:$0xff] %vm123_vm0, %v10876_v22  ;;  %v13406_v15 = vadd.f32 %v13101_v50, %v20374_v5  ;;  %v10645_v19 = vpop.f32.mrb[25].mxu1  ;;  %v14125_v22 = vld [vmem:[#allocation2 + $0x168] sm:$0xff] }
 0xb6e   :  { %10939 = vst.msk [vmem:[#allocation5 + $0xe0] sm:$0xff] %vm123_vm0, %v10875_v13  ;;  %v13407_v30 = vadd.f32 %v10645_v19, %v20374_v5  ;;  %v14126_v13 = vld [vmem:[#allocation2 + $0x160] sm:$0xff] }
 0xb6f   :  { %v10878_v3 = vadd.f32 %v14111_v55, %v13406_v15 }
 0xb70   :  { %v10877_v4 = vadd.f32 %v14112_v37, %v13407_v30  ;;  %v13104_v39 = vpop.f32.mrb[26].mxu1 }
 0xb71   :  { %10942 = vst.msk [vmem:[#allocation5 + $0xf8] sm:$0xff] %vm123_vm0, %v10878_v3  ;;  %v13408_v40 = vadd.f32 %v13104_v39, %v20374_v5  ;;  %v10657_v16 = vpop.f32.mrb[27].mxu1  ;;  %v14127_v3 = vld [vmem:[#allocation2 + $0x178] sm:$0xff] }
 0xb72   :  { %10941 = vst.msk [vmem:[#allocation5 + $0xf0] sm:$0xff] %vm123_vm0, %v10877_v4  ;;  %v13409_v59 = vadd.f32 %v10657_v16, %v20374_v5  ;;  %v14128_v4 = vld [vmem:[#allocation2 + $0x170] sm:$0xff] }
 0xb73   :  { %v10880_v9 = vadd.f32 %v14113_v26, %v13408_v40 }
 0xb74   :  { %v10879_v57 = vadd.f32 %v14114_v58, %v13409_v59  ;;  %v13107_v47 = vpop.f32.mrb[28].mxu1 }
 0xb75   :  { %10944 = vst.msk [vmem:[#allocation5 + $0x108] sm:$0xff] %vm123_vm0, %v10880_v9  ;;  %v13410_v51 = vadd.f32 %v13107_v47, %v20374_v5  ;;  %v10669_v53 = vpop.f32.mrb[29].mxu1  ;;  %v14129_v9 = vld [vmem:[#allocation2 + $0x188] sm:$0xff] }
 0xb76   :  { %10943 = vst.msk [vmem:[#allocation5 + $0x100] sm:$0xff] %vm123_vm0, %v10879_v57  ;;  %v13411_v36 = vadd.f32 %v10669_v53, %v20374_v5  ;;  %v14130_v57 = vld [vmem:[#allocation2 + $0x180] sm:$0xff] }
 0xb77   :  { %v10882_v20 = vadd.f32 %v14115_v24, %v13410_v51 }
 0xb78   :  { %v10881_v45 = vadd.f32 %v14116_v32, %v13411_v36  ;;  %v13110_v44 = vpop.f32.mrb[30].mxu1 }
 0xb79   :  { %10946 = vst.msk [vmem:[#allocation5 + $0x118] sm:$0xff] %vm123_vm0, %v10882_v20  ;;  %v13412_v48 = vadd.f32 %v13110_v44, %v20374_v5  ;;  %v10681_v28 = vpop.f32.mrb[31].mxu1  ;;  %v14131_v20 = vld [vmem:[#allocation2 + $0x198] sm:$0xff] }
 0xb7a   :  { %10945 = vst.msk [vmem:[#allocation5 + $0x110] sm:$0xff] %vm123_vm0, %v10881_v45  ;;  %v13413_v6 = vadd.f32 %v10681_v28, %v20374_v5  ;;  %v14132_v45 = vld [vmem:[#allocation2 + $0x190] sm:$0xff] }
 0xb7b   :  { %v10884_v63 = vadd.f32 %v14117_v62, %v13412_v48 }
 0xb7c   :  { %v10883_v29 = vadd.f32 %v14118_v1, %v13413_v6  ;;  %v13113_v56 = vpop.f32.mrb[32].mxu1 }
 0xb7d   :  { %10948 = vst.msk [vmem:[#allocation5 + $0x128] sm:$0xff] %vm123_vm0, %v10884_v63  ;;  %v13414_v21 = vadd.f32 %v13113_v56, %v20374_v5  ;;  %v10693_v7 = vpop.f32.mrb[33].mxu1  ;;  %v14133_v63 = vld [vmem:[#allocation2 + $0x1a8] sm:$0xff] }
 0xb7e   :  { %10947 = vst.msk [vmem:[#allocation5 + $0x120] sm:$0xff] %vm123_vm0, %v10883_v29  ;;  %v13415_v61 = vadd.f32 %v10693_v7, %v20374_v5  ;;  %v14134_v29 = vld [vmem:[#allocation2 + $0x1a0] sm:$0xff] }
 0xb7f   :  { %v10886_v14 = vadd.f32 %v14119_v23, %v13414_v21 }
 0xb80   :  { %v10885_v46 = vadd.f32 %v14120_v38, %v13415_v61  ;;  %v13116_v31 = vpop.f32.mrb[34].mxu1 }
 0xb81   :  { %10950 = vst.msk [vmem:[#allocation5 + $0x138] sm:$0xff] %vm123_vm0, %v10886_v14  ;;  %v13416_v0 = vadd.f32 %v13116_v31, %v20374_v5  ;;  %v10705_v18 = vpop.f32.mrb[35].mxu1  ;;  %v14135_v14 = vld [vmem:[#allocation2 + $0x1b8] sm:$0xff] }
 0xb82   :  { %10949 = vst.msk [vmem:[#allocation5 + $0x130] sm:$0xff] %vm123_vm0, %v10885_v46  ;;  %v13417_v54 = vadd.f32 %v10705_v18, %v20374_v5  ;;  %v14136_v46 = vld [vmem:[#allocation2 + $0x1b0] sm:$0xff] }
 0xb83   :  { %v10888_v43 = vadd.f32 %v14121_v35, %v13416_v0 }
 0xb84   :  { %v10887_v27 = vadd.f32 %v14122_v10, %v13417_v54  ;;  %v13119_v12 = vpop.f32.mrb[36].mxu1 }
 0xb85   :  { %10952 = vst.msk [vmem:[#allocation5 + $0x148] sm:$0xff] %vm123_vm0, %v10888_v43  ;;  %v13418_v11 = vadd.f32 %v13119_v12, %v20374_v5  ;;  %v10717_v33 = vpop.f32.mrb[37].mxu1  ;;  %v14137_v43 = vld [vmem:[#allocation2 + $0x1c8] sm:$0xff] }
 0xb86   :  { %10951 = vst.msk [vmem:[#allocation5 + $0x140] sm:$0xff] %vm123_vm0, %v10887_v27  ;;  %v13419_v8 = vadd.f32 %v10717_v33, %v20374_v5  ;;  %v14138_v27 = vld [vmem:[#allocation2 + $0x1c0] sm:$0xff] }
 0xb87   :  { %v10890_v17 = vadd.f32 %v14123_v52, %v13418_v11 }
 0xb88   :  { %v10889_v60 = vadd.f32 %v14124_v41, %v13419_v8  ;;  %v13122_v25 = vpop.f32.mrb[38].mxu1 }
 0xb89   :  { %10954 = vst.msk [vmem:[#allocation5 + $0x158] sm:$0xff] %vm123_vm0, %v10890_v17  ;;  %v13420_v49 = vadd.f32 %v13122_v25, %v20374_v5  ;;  %v10729_v42 = vpop.f32.mrb[39].mxu1  ;;  %v14139_v17 = vld [vmem:[#allocation2 + $0x1d8] sm:$0xff] }
 0xb8a   :  { %10953 = vst.msk [vmem:[#allocation5 + $0x150] sm:$0xff] %vm123_vm0, %v10889_v60  ;;  %v13421_v34 = vadd.f32 %v10729_v42, %v20374_v5  ;;  %v14140_v60 = vld [vmem:[#allocation2 + $0x1d0] sm:$0xff] }
 0xb8b   :  { %v10892_v2 = vadd.f32 %v14125_v22, %v13420_v49 }
 0xb8c   :  { %v10891_v50 = vadd.f32 %v14126_v13, %v13421_v34  ;;  %v13125_v15 = vpop.f32.mrb[40].mxu1 }
 0xb8d   :  { %10956 = vst.msk [vmem:[#allocation5 + $0x168] sm:$0xff] %vm123_vm0, %v10892_v2  ;;  %v13422_v19 = vadd.f32 %v13125_v15, %v20374_v5  ;;  %v10741_v30 = vpop.f32.mrb[41].mxu1  ;;  %v14141_v2 = vld [vmem:[#allocation2 + $0x1e8] sm:$0xff] }
 0xb8e   :  { %10955 = vst.msk [vmem:[#allocation5 + $0x160] sm:$0xff] %vm123_vm0, %v10891_v50  ;;  %v13423_v55 = vadd.f32 %v10741_v30, %v20374_v5  ;;  %v14142_v50 = vld [vmem:[#allocation2 + $0x1e0] sm:$0xff] }
 0xb8f   :  { %v10894_v37 = vadd.f32 %v14127_v3, %v13422_v19 }
 0xb90   :  { %v10893_v39 = vadd.f32 %v14128_v4, %v13423_v55  ;;  %v13128_v40 = vpop.f32.mrb[42].mxu1 }
 0xb91   :  { %10958 = vst.msk [vmem:[#allocation5 + $0x178] sm:$0xff] %vm123_vm0, %v10894_v37  ;;  %v13424_v16 = vadd.f32 %v13128_v40, %v20374_v5  ;;  %v10753_v59 = vpop.f32.mrb[43].mxu1  ;;  %v14143_v37 = vld [vmem:[#allocation2 + $0x1f8] sm:$0xff] }
 0xb92   :  { %10957 = vst.msk [vmem:[#allocation5 + $0x170] sm:$0xff] %vm123_vm0, %v10893_v39  ;;  %v13425_v26 = vadd.f32 %v10753_v59, %v20374_v5  ;;  %v14144_v39 = vld [vmem:[#allocation2 + $0x1f0] sm:$0xff] }
 0xb93   :  { %v10896_v58 = vadd.f32 %v14129_v9, %v13424_v16 }
 0xb94   :  { %v10895_v47 = vadd.f32 %v14130_v57, %v13425_v26  ;;  %v13131_v51 = vpop.f32.mrb[44].mxu1 }
 0xb95   :  { %10960 = vst.msk [vmem:[#allocation5 + $0x188] sm:$0xff] %vm123_vm0, %v10896_v58  ;;  %v13426_v53 = vadd.f32 %v13131_v51, %v20374_v5  ;;  %v10765_v36 = vpop.f32.mrb[45].mxu1 }
 0xb96   :  { %10959 = vst.msk [vmem:[#allocation5 + $0x180] sm:$0xff] %vm123_vm0, %v10895_v47  ;;  %v13427_v24 = vadd.f32 %v10765_v36, %v20374_v5 }
 0xb97   :  { %v10898_v32 = vadd.f32 %v14131_v20, %v13426_v53 }
 0xb98   :  { %v10897_v44 = vadd.f32 %v14132_v45, %v13427_v24  ;;  %v13134_v48 = vpop.f32.mrb[46].mxu1 }
 0xb99   :  { %10962 = vst.msk [vmem:[#allocation5 + $0x198] sm:$0xff] %vm123_vm0, %v10898_v32  ;;  %v13428_v28 = vadd.f32 %v13134_v48, %v20374_v5  ;;  %v10777_v6 = vpop.f32.mrb[47].mxu1 }
 0xb9a   :  { %10961 = vst.msk [vmem:[#allocation5 + $0x190] sm:$0xff] %vm123_vm0, %v10897_v44  ;;  %v13429_v62 = vadd.f32 %v10777_v6, %v20374_v5 }
 0xb9b   :  { %v10900_v1 = vadd.f32 %v14133_v63, %v13428_v28 }
 0xb9c   :  { %v10899_v56 = vadd.f32 %v14134_v29, %v13429_v62  ;;  %v13137_v21 = vpop.f32.mrb[48].mxu1 }
 0xb9d   :  { %10964 = vst.msk [vmem:[#allocation5 + $0x1a8] sm:$0xff] %vm123_vm0, %v10900_v1  ;;  %v13430_v7 = vadd.f32 %v13137_v21, %v20374_v5  ;;  %v10789_v61 = vpop.f32.mrb[49].mxu1 }
 0xb9e   :  { %10963 = vst.msk [vmem:[#allocation5 + $0x1a0] sm:$0xff] %vm123_vm0, %v10899_v56  ;;  %v13431_v23 = vadd.f32 %v10789_v61, %v20374_v5 }
 0xb9f   :  { %v10902_v38 = vadd.f32 %v14135_v14, %v13430_v7 }
 0xba0   :  { %v10901_v31 = vadd.f32 %v14136_v46, %v13431_v23  ;;  %v13140_v0 = vpop.f32.mrb[50].mxu1 }
 0xba1   :  { %10966 = vst.msk [vmem:[#allocation5 + $0x1b8] sm:$0xff] %vm123_vm0, %v10902_v38  ;;  %v13432_v18 = vadd.f32 %v13140_v0, %v20374_v5  ;;  %v10801_v54 = vpop.f32.mrb[51].mxu1 }
 0xba2   :  { %10965 = vst.msk [vmem:[#allocation5 + $0x1b0] sm:$0xff] %vm123_vm0, %v10901_v31  ;;  %v13433_v35 = vadd.f32 %v10801_v54, %v20374_v5 }
 0xba3   :  { %v10904_v10 = vadd.f32 %v14137_v43, %v13432_v18 }
 0xba4   :  { %v10903_v12 = vadd.f32 %v14138_v27, %v13433_v35  ;;  %v13143_v11 = vpop.f32.mrb[52].mxu1 }
 0xba5   :  { %10968 = vst.msk [vmem:[#allocation5 + $0x1c8] sm:$0xff] %vm123_vm0, %v10904_v10  ;;  %v13434_v33 = vadd.f32 %v13143_v11, %v20374_v5  ;;  %v10813_v8 = vpop.f32.mrb[53].mxu1 }
 0xba6   :  { %10967 = vst.msk [vmem:[#allocation5 + $0x1c0] sm:$0xff] %vm123_vm0, %v10903_v12  ;;  %v13435_v52 = vadd.f32 %v10813_v8, %v20374_v5 }
 0xba7   :  { %v10906_v41 = vadd.f32 %v14139_v17, %v13434_v33 }
 0xba8   :  { %v10905_v25 = vadd.f32 %v14140_v60, %v13435_v52  ;;  %v13146_v49 = vpop.f32.mrb[54].mxu1 }
 0xba9   :  { %10970 = vst.msk [vmem:[#allocation5 + $0x1d8] sm:$0xff] %vm123_vm0, %v10906_v41  ;;  %v13436_v42 = vadd.f32 %v13146_v49, %v20374_v5  ;;  %v10825_v34 = vpop.f32.mrb[55].mxu1 }
 0xbaa   :  { %10969 = vst.msk [vmem:[#allocation5 + $0x1d0] sm:$0xff] %vm123_vm0, %v10905_v25  ;;  %v13437_v22 = vadd.f32 %v10825_v34, %v20374_v5 }
 0xbab   :  { %v10908_v13 = vadd.f32 %v14141_v2, %v13436_v42 }
 0xbac   :  { %v10907_v15 = vadd.f32 %v14142_v50, %v13437_v22  ;;  %v13149_v19 = vpop.f32.mrb[56].mxu1 }
 0xbad   :  { %10972 = vst.msk [vmem:[#allocation5 + $0x1e8] sm:$0xff] %vm123_vm0, %v10908_v13  ;;  %v13438_v30 = vadd.f32 %v13149_v19, %v20374_v5  ;;  %v10837_v55 = vpop.f32.mrb[57].mxu1 }
 0xbae   :  { %10971 = vst.msk [vmem:[#allocation5 + $0x1e0] sm:$0xff] %vm123_vm0, %v10907_v15  ;;  %v13439_v3 = vadd.f32 %v10837_v55, %v20374_v5 }
 0xbaf   :  { %v10910_v4 = vadd.f32 %v14143_v37, %v13438_v30 }
 0xbb0   :  { %v10909_v40 = vadd.f32 %v14144_v39, %v13439_v3 }
 0xbb1   :  { %10974 = vst.msk [vmem:[#allocation5 + $0x1f8] sm:$0xff] %vm123_vm0, %v10910_v4 }
 0xbb2   :  { %10973 = vst.msk [vmem:[#allocation5 + $0x1f0] sm:$0xff] %vm123_vm0, %v10909_v40 }
 0xbb3   :  { %14178 = shalt.err (!%p14175_p12)
}
 0xbb4   :  { %s14179_s8 = scalar_lea.hbm %s20531_s2, 8192 }
 0xbb5   :  { %p14180_p13 = scmp.ne.s32.totalorder %s20531_s2, %s14179_s8  ;;  %p14183_p0 = scmp.lt.u32.totalorder %s14179_s8, %s20531_s2 }
 0xbb7   :  { %p14185_p1 = pnand %p14183_p0, %p14180_p13 }
 0xbb9   :  { %14188 = shalt.err (!%p14185_p1)
}
 0xbba   :  { %10986 = dma.vmem_to_hbm [thread:$0]  %s10981_s4, 8192, %s20531_s2, [#allocation4], %s14194_s19, %s14194_s19, %s14195_s20  }
 0xbbb   :  { %14191 = dma.done.wait [#allocation4], 8192  }
 0xbbc   :  { %14192 = vsyncadd [#allocation4], 4294959104 }
 0xbbd   :  { %10990 = vsyncpa [#allocation3], 1 }
 0xbbe   :  { %10991 = vsyncpa [#allocation4], 1 }

</bundles_post_ra>
